<compile_context>
chip_gen: v7x
topology: tpu7x:2x2x1
jax: 0.10.0
libtpu: 0.0.40
codegen_flags: <defaults>
</compile_context>

<pallas_src>
import functools

import jax
import jax.numpy as jnp
from jax.experimental import pallas as pl
from jax.experimental.pallas import tpu as pltpu


# Per-grid-step activation budget (im2col input + pooled output, one buffer).
# Kept small enough that the double-buffered working set plus the kernel's f32
# temporaries stays far inside v7x's 64 MiB VMEM (and v5e/v6e defaults).
_VMEM_STEP_BUDGET = 3 * 1024 * 1024 // 2      # 1.5 MiB
_VMEM_LIMIT_BYTES = 32 * 1024 * 1024


def _round_up(x, m):
    return (x + m - 1) // m * m


def _pick_frames_per_step(nf, per_frame_bytes, budget=_VMEM_STEP_BUDGET):
    """Largest divisor of nf whose per-step footprint fits the budget."""
    best = 1
    for f in range(1, nf + 1):
        if nf % f == 0 and f * per_frame_bytes <= budget:
            best = f
    return best


def _conv_relu_pool_kernel(x_ref, w_ref, b_ref, out_ref, stat_ref, *,
                           n_frames, h2, w2, cout):
    """Fused Conv(3x3, pad 1) + bias + ReLU + 2x2/2 max-pool for `n_frames`
    frames, plus per-channel sum / sum-of-squares partials for BatchNorm.

    x_ref   : (n_frames, 4, w2*h2, 9*cin) bf16  im2col; axis 1 = the 4 pool
              phases, rows ordered (w-index outer, h-index inner)
    w_ref   : (9*cin, cout) bf16                conv taps, (kh*3+kw, cin)-major
    b_ref   : (1, cout) f32
    out_ref : (n_frames, h2, w2*cout) f32       lane-dense pooled activations
    stat_ref: (2, cout) f32                     per-step [sum; sum_of_squares]
    """
    hw = h2 * w2
    k = x_ref.shape[-1]

    # One big MXU matmul: all 9 taps (K = 9*cin), all 4 pool phases and all
    # frames of this step stacked along M.  f32 accumulation.
    x = x_ref[...].reshape(n_frames * 4 * hw, k)
    acc = jnp.dot(x, w_ref[...], preferred_element_type=jnp.float32)
    acc = jnp.maximum(acc + b_ref[...], 0.0)                 # bias + ReLU (f32)

    # 2x2/2 max-pool == max over the 4 stacked phases (cheap VPU maxima).
    acc = acc.reshape(n_frames, 4, w2, h2, cout)
    pooled = jnp.maximum(jnp.maximum(acc[:, 0], acc[:, 1]),
                         jnp.maximum(acc[:, 2], acc[:, 3]))  # (F, w2, h2, cout)

    # Lane-dense packing: fold the W axis into the lane dimension so the
    # output block is (F, h2, w2*cout) (>=128 lanes -> unmasked stores, dense
    # HBM writeback).  pooled[:, j] only slices a leading ("page") dim.
    for j in range(w2):
        out_ref[:, :, j * cout:(j + 1) * cout] = pooled[:, j]

    # Per-step partial BatchNorm statistics; reduced outside the kernel so the
    # grid axis can stay "parallel" (v7x dual-core friendly).
    flat = pooled.reshape(n_frames * w2 * h2, cout)
    stat_ref[0:1, :] = jnp.sum(flat, axis=0, keepdims=True)
    stat_ref[1:2, :] = jnp.sum(flat * flat, axis=0, keepdims=True)


def _im2col_pool_phases(frames):
    """(NF, H, W, Cin) -> (NF, 4, (W/2)*(H/2), 9*Cin) im2col (XLA glue).

    Axis 1 stacks the four 2x2 max-pool phases, the last axis stacks the nine
    3x3 conv taps (conv becomes a single K = 9*Cin contraction) and rows are
    ordered (w outer, h inner) so the kernel repacks to a lane-dense output
    using leading-dim slices only.
    """
    nf, h, w, cin = frames.shape
    h2, w2 = h // 2, w // 2
    xp = jnp.pad(frames, ((0, 0), (1, 1), (1, 1), (0, 0)))   # spatial zero pad
    phases = []
    for ph in range(2):
        for pw in range(2):
            taps = []
            for dh in range(3):
                for dw in range(3):
                    r0, c0 = ph + dh, pw + dw
                    patch = xp[:, r0:r0 + 2 * h2 - 1:2, c0:c0 + 2 * w2 - 1:2, :]
                    patch = jnp.transpose(patch, (0, 2, 1, 3))  # (NF, W2, H2, Cin)
                    taps.append(patch.reshape(nf, w2 * h2, cin))
            phases.append(jnp.concatenate(taps, axis=-1))       # (NF, W2*H2, 9*Cin)
    return jnp.stack(phases, axis=1)


def conv_block(frames, weight, bias):
    """One Conv3D_Block minus its BatchNorm affine.

    frames : (NF, H, W, Cin) f32  per-frame channels-last input (temporal pad
             frames already included; previous layer's BN already applied)
    weight : (Cout, Cin, 1, 3, 3), bias: (Cout,)
    Returns pooled activations (NF, H//2, (W//2)*Cout) f32 and per-channel
    (sum, sum_of_squares) over all NF * H/2 * W/2 pooled positions.
    """
    nf, h, w_sp, cin = frames.shape
    assert h % 2 == 0 and w_sp % 2 == 0, "spatial dims must be even"
    cout = weight.shape[0]
    h2, w2 = h // 2, w_sp // 2
    hw = h2 * w2
    k = 9 * cin

    # Glue: im2col (pool phases + conv taps) and bf16 cast for the MXU.
    # TODO(synk): for production sizes the im2col could be built in-kernel to
    # avoid the 9x HBM read expansion; at these shapes glue is the simpler win.
    cols = _im2col_pool_phases(frames).astype(jnp.bfloat16)     # (NF, 4, hw, k)
    wk = jnp.transpose(weight[:, :, 0], (2, 3, 1, 0)).reshape(k, cout)
    wk = wk.astype(jnp.bfloat16)
    bk = bias.reshape(1, cout).astype(jnp.float32)

    per_frame_bytes = (4 * hw * _round_up(k, 128) * 2            # bf16 im2col
                       + h2 * _round_up(w2 * cout, 128) * 4)     # f32 output
    f = _pick_frames_per_step(nf, per_frame_bytes)
    steps = nf // f

    kernel = functools.partial(_conv_relu_pool_kernel,
                               n_frames=f, h2=h2, w2=w2, cout=cout)
    pooled, stats = pl.pallas_call(
        kernel,
        out_shape=(jax.ShapeDtypeStruct((nf, h2, w2 * cout), jnp.float32),
                   jax.ShapeDtypeStruct((steps, 2, cout), jnp.float32)),
        grid_spec=pltpu.PrefetchScalarGridSpec(
            num_scalar_prefetch=0,
            grid=(steps,),
            in_specs=[
                pl.BlockSpec((f, 4, hw, k), lambda s: (s, 0, 0, 0)),
                pl.BlockSpec((k, cout), lambda s: (0, 0)),
                pl.BlockSpec((1, cout), lambda s: (0, 0)),
            ],
            out_specs=[
                pl.BlockSpec((f, h2, w2 * cout), lambda s: (s, 0, 0)),
                pl.BlockSpec((None, 2, cout), lambda s: (s, 0, 0)),
            ],
        ),
        compiler_params=pltpu.CompilerParams(
            dimension_semantics=("parallel",),
            vmem_limit_bytes=_VMEM_LIMIT_BYTES,
        ),
    )(cols, wk, bk)

    csum = jnp.sum(stats[:, 0, :], axis=0)
    cssq = jnp.sum(stats[:, 1, :], axis=0)
    return pooled, csum, cssq


def primary_conv3d(x, params, eps=1e-5):
    """Primary_conv3D.forward.

    x      : (B, Cin, T, H, W) f32 (PyTorch NCTHW)
    params : list of (w, b, gamma, beta) per Conv3D_Block
    returns (B, T_out, C_out, H_out, W_out)  == torch.transpose(out, 2, 1)
    """
    y = jnp.transpose(x, (0, 2, 3, 4, 1))            # (B, T, H, W, C)
    for (weight, bias, gamma, beta) in params:
        b_, t_, h_, w_, _ = y.shape
        # Conv3d temporal kernel 1 with temporal padding 1: two extra all-zero
        # frames (zeros in this layer's *input* space, i.e. after the previous
        # layer's BatchNorm affine, which is already folded into `y`).
        y = jnp.pad(y, ((0, 0), (1, 1), (0, 0), (0, 0), (0, 0)))
        t_ += 2
        frames = y.reshape(b_ * t_, h_, w_, y.shape[-1])
        pooled, csum, cssq = conv_block(frames, weight, bias)
        cout = weight.shape[0]
        h2, w2 = h_ // 2, w_ // 2
        # BatchNorm3d, training mode: biased batch statistics over (B,T,H,W).
        n = float(b_ * t_ * h2 * w2)
        mean = csum / n
        var = jnp.maximum(cssq / n - mean * mean, 0.0)
        scale = gamma * jax.lax.rsqrt(var + eps)
        shift = beta - mean * scale
        # BN affine applied lazily; XLA fuses it into the next layer's im2col
        # (or the final transpose), so there is no dedicated HBM pass.
        y = pooled.reshape(b_, t_, h2, w2, cout) * scale + shift
    # Blocks produce (B, C, T, H, W); module then does transpose(2, 1)
    # -> (B, T, C, H, W).  `y` is channels-last, so permute directly.
    return jnp.transpose(y, (0, 1, 4, 2, 3))


def init_params(key, conv_n_feats=(3, 32, 64)):
    """Deterministic parameter init mirroring the module's __init__ shapes."""
    params = []
    for i in range(len(conv_n_feats) - 1):
        cin, cout = conv_n_feats[i], conv_n_feats[i + 1]
        key, kw, kb = jax.random.split(key, 3)
        fan_in = cin * 3 * 3
        bound = 1.0 / (fan_in ** 0.5)
        w = jax.random.uniform(kw, (cout, cin, 1, 3, 3), jnp.float32, -bound, bound)
        b = jax.random.uniform(kb, (cout,), jnp.float32, -bound, bound)
        gamma = jnp.ones((cout,), jnp.float32)    # PyTorch BatchNorm defaults
        beta = jnp.zeros((cout,), jnp.float32)
        params.append((w, b, gamma, beta))
    return params


def _reference_forward(x, params, eps=1e-5):
    """Pure-XLA f32 reference (used only for the self-check in __main__)."""
    y = x
    for (weight, bias, gamma, beta) in params:
        b_, c_, t_, h_, w_ = y.shape
        y = jnp.pad(y, ((0, 0), (0, 0), (1, 1), (0, 0), (0, 0)))
        t_ += 2
        imgs = jnp.transpose(y, (0, 2, 3, 4, 1)).reshape(b_ * t_, h_, w_, c_)
        ker = jnp.transpose(weight[:, :, 0], (2, 3, 1, 0))      # (3,3,Cin,Cout)
        conv = jax.lax.conv_general_dilated(
            imgs, ker, window_strides=(1, 1), padding=((1, 1), (1, 1)),
            dimension_numbers=("NHWC", "HWIO", "NHWC"))
        conv = jax.nn.relu(conv + bias)
        cout = weight.shape[0]
        h2, w2 = h_ // 2, w_ // 2
        pooled = conv.reshape(b_ * t_, h2, 2, w2, 2, cout).max(axis=(2, 4))
        mean = pooled.mean(axis=(0, 1, 2))
        var = ((pooled - mean) ** 2).mean(axis=(0, 1, 2))
        normed = (pooled - mean) * jax.lax.rsqrt(var + eps) * gamma + beta
        y = jnp.transpose(normed.reshape(b_, t_, h2, w2, cout), (0, 4, 1, 2, 3))
    return jnp.transpose(y, (0, 2, 1, 3, 4))


if __name__ == "__main__":
    key = jax.random.PRNGKey(0)
    kx, kp = jax.random.split(key)
    # (B, C=3, T, H, W) — PyTorch NCTHW, conv_n_feats=[3, 32, 64]
    x = jax.random.normal(kx, (2, 3, 4, 32, 32), jnp.float32)
    params = init_params(kp)

    out = jax.jit(primary_conv3d)(x, params)
    out = jax.block_until_ready(out)

    # T=4 -> +2 per block -> 8; H,W: 32 -> /2 /2 -> 8; C -> 64; then (B,T,C,H,W)
    assert out.shape == (2, 8, 64, 8, 8), out.shape
    assert out.dtype == jnp.float32

    # Loose self-check vs. a pure-XLA f32 reference (kernel matmuls are bf16).
    ref = _reference_forward(x, params)
    max_err = float(jnp.max(jnp.abs(out - ref)))
    assert max_err < 0.1, f"max abs error vs reference: {max_err}"

    print("KERNEL_OK")
</pallas_src>

<mosaic_0001>
module attributes {stable_mosaic.version = 11 : i64} {
  func.func @_conv_relu_pool_kernel(%arg0: i32, %arg1: memref<4x4x256x27xbf16, #tpu.memory_space<vmem>>, %arg2: memref<27x32xbf16, #tpu.memory_space<vmem>>, %arg3: memref<1x32xf32, #tpu.memory_space<vmem>>, %arg4: memref<4x16x512xf32, #tpu.memory_space<vmem>>, %arg5: memref<1x2x32xf32, #tpu.memory_space<vmem>>) attributes {dimension_semantics = [#tpu.dimension_semantics<parallel>], iteration_bounds = array<i64: 3>, scalar_prefetch = 0 : i64, scratch_operands = 0 : i64, tpu.core_type = #tpu.core_type<tc>, window_params = [{transform_indices = @transform_0, window_bounds = array<i64: 4, 4, 256, 27>}, {pipeline_mode = #tpu.pipeline_mode<synchronous>, transform_indices = @transform_1, window_bounds = array<i64: 27, 32>}, {pipeline_mode = #tpu.pipeline_mode<synchronous>, transform_indices = @transform_2, window_bounds = array<i64: 1, 32>}, {transform_indices = @transform_3, window_bounds = array<i64: 4, 16, 512>}, {transform_indices = @transform_4, window_bounds = array<i64: 1, 2, 32>}]} {
    %c0 = arith.constant 0 : index
    %c0_0 = arith.constant 0 : index
    %c0_1 = arith.constant 0 : index
    %c0_2 = arith.constant 0 : index
    %0 = vector.load %arg1[%c0, %c0_0, %c0_1, %c0_2] : memref<4x4x256x27xbf16, #tpu.memory_space<vmem>>, vector<4x4x256x27xbf16>
    %1 = vector.shape_cast %0 : vector<4x4x256x27xbf16> to vector<4096x27xbf16>
    %c0_3 = arith.constant 0 : index
    %c0_4 = arith.constant 0 : index
    %2 = vector.load %arg2[%c0_3, %c0_4] : memref<27x32xbf16, #tpu.memory_space<vmem>>, vector<27x32xbf16>
    %cst = arith.constant dense<0.000000e+00> : vector<4096x32xf32>
    %3 = tpu.matmul %1, %2, %cst {dimension_numbers = #tpu.dot_dimension_numbers<[1], [0], [0], [1], [0, 0, 1, 1], [], []>} : vector<4096x27xbf16>, vector<27x32xbf16>, vector<4096x32xf32> -> vector<4096x32xf32>
    %c0_5 = arith.constant 0 : index
    %c0_6 = arith.constant 0 : index
    %4 = vector.load %arg3[%c0_5, %c0_6] : memref<1x32xf32, #tpu.memory_space<vmem>>, vector<1x32xf32>
    %5 = vector.broadcast %4 : vector<1x32xf32> to vector<4096x32xf32>
    %6 = arith.addf %3, %5 : vector<4096x32xf32>
    %cst_7 = arith.constant 0.000000e+00 : f32
    %7 = vector.broadcast %cst_7 : f32 to vector<4096x32xf32>
    %8 = arith.maximumf %6, %7 : vector<4096x32xf32>
    %9 = vector.shape_cast %8 : vector<4096x32xf32> to vector<4x4x16x16x32xf32>
    %10 = vector.extract_strided_slice %9 {offsets = [0, 0, 0, 0, 0], sizes = [4, 1, 16, 16, 32], strides = [1, 1, 1, 1, 1]} : vector<4x4x16x16x32xf32> to vector<4x1x16x16x32xf32>
    %11 = vector.shape_cast %10 : vector<4x1x16x16x32xf32> to vector<4x16x16x32xf32>
    %12 = vector.extract_strided_slice %9 {offsets = [0, 1, 0, 0, 0], sizes = [4, 1, 16, 16, 32], strides = [1, 1, 1, 1, 1]} : vector<4x4x16x16x32xf32> to vector<4x1x16x16x32xf32>
    %13 = vector.shape_cast %12 : vector<4x1x16x16x32xf32> to vector<4x16x16x32xf32>
    %14 = arith.maximumf %11, %13 : vector<4x16x16x32xf32>
    %15 = vector.extract_strided_slice %9 {offsets = [0, 2, 0, 0, 0], sizes = [4, 1, 16, 16, 32], strides = [1, 1, 1, 1, 1]} : vector<4x4x16x16x32xf32> to vector<4x1x16x16x32xf32>
    %16 = vector.shape_cast %15 : vector<4x1x16x16x32xf32> to vector<4x16x16x32xf32>
    %17 = vector.extract_strided_slice %9 {offsets = [0, 3, 0, 0, 0], sizes = [4, 1, 16, 16, 32], strides = [1, 1, 1, 1, 1]} : vector<4x4x16x16x32xf32> to vector<4x1x16x16x32xf32>
    %18 = vector.shape_cast %17 : vector<4x1x16x16x32xf32> to vector<4x16x16x32xf32>
    %19 = arith.maximumf %16, %18 : vector<4x16x16x32xf32>
    %20 = arith.maximumf %14, %19 : vector<4x16x16x32xf32>
    %21 = vector.extract_strided_slice %20 {offsets = [0, 0, 0, 0], sizes = [4, 1, 16, 32], strides = [1, 1, 1, 1]} : vector<4x16x16x32xf32> to vector<4x1x16x32xf32>
    %22 = vector.shape_cast %21 : vector<4x1x16x32xf32> to vector<4x16x32xf32>
    %c0_8 = arith.constant 0 : index
    %c0_9 = arith.constant 0 : index
    %c0_10 = arith.constant 0 : index
    %23 = vector.load %arg4[%c0_8, %c0_9, %c0_10] : memref<4x16x512xf32, #tpu.memory_space<vmem>>, vector<4x16x32xf32>
    tpu.vector_store %arg4[%c0_8, %c0_9, %c0_10], %22 {strides = array<i32>} : memref<4x16x512xf32, #tpu.memory_space<vmem>>, vector<4x16x32xf32>,
    %24 = vector.extract_strided_slice %20 {offsets = [0, 1, 0, 0], sizes = [4, 1, 16, 32], strides = [1, 1, 1, 1]} : vector<4x16x16x32xf32> to vector<4x1x16x32xf32>
    %25 = vector.shape_cast %24 : vector<4x1x16x32xf32> to vector<4x16x32xf32>
    %c0_11 = arith.constant 0 : index
    %c0_12 = arith.constant 0 : index
    %c32 = arith.constant 32 : index
    %26 = vector.load %arg4[%c0_11, %c0_12, %c32] : memref<4x16x512xf32, #tpu.memory_space<vmem>>, vector<4x16x32xf32>
    tpu.vector_store %arg4[%c0_11, %c0_12, %c32], %25 {strides = array<i32>} : memref<4x16x512xf32, #tpu.memory_space<vmem>>, vector<4x16x32xf32>,
    %27 = vector.extract_strided_slice %20 {offsets = [0, 2, 0, 0], sizes = [4, 1, 16, 32], strides = [1, 1, 1, 1]} : vector<4x16x16x32xf32> to vector<4x1x16x32xf32>
    %28 = vector.shape_cast %27 : vector<4x1x16x32xf32> to vector<4x16x32xf32>
    %c0_13 = arith.constant 0 : index
    %c0_14 = arith.constant 0 : index
    %c64 = arith.constant 64 : index
    %29 = vector.load %arg4[%c0_13, %c0_14, %c64] : memref<4x16x512xf32, #tpu.memory_space<vmem>>, vector<4x16x32xf32>
    tpu.vector_store %arg4[%c0_13, %c0_14, %c64], %28 {strides = array<i32>} : memref<4x16x512xf32, #tpu.memory_space<vmem>>, vector<4x16x32xf32>,
    %30 = vector.extract_strided_slice %20 {offsets = [0, 3, 0, 0], sizes = [4, 1, 16, 32], strides = [1, 1, 1, 1]} : vector<4x16x16x32xf32> to vector<4x1x16x32xf32>
    %31 = vector.shape_cast %30 : vector<4x1x16x32xf32> to vector<4x16x32xf32>
    %c0_15 = arith.constant 0 : index
    %c0_16 = arith.constant 0 : index
    %c96 = arith.constant 96 : index
    %32 = vector.load %arg4[%c0_15, %c0_16, %c96] : memref<4x16x512xf32, #tpu.memory_space<vmem>>, vector<4x16x32xf32>
    tpu.vector_store %arg4[%c0_15, %c0_16, %c96], %31 {strides = array<i32>} : memref<4x16x512xf32, #tpu.memory_space<vmem>>, vector<4x16x32xf32>,
    %33 = vector.extract_strided_slice %20 {offsets = [0, 4, 0, 0], sizes = [4, 1, 16, 32], strides = [1, 1, 1, 1]} : vector<4x16x16x32xf32> to vector<4x1x16x32xf32>
    %34 = vector.shape_cast %33 : vector<4x1x16x32xf32> to vector<4x16x32xf32>
    %c0_17 = arith.constant 0 : index
    %c0_18 = arith.constant 0 : index
    %c128 = arith.constant 128 : index
    %35 = vector.load %arg4[%c0_17, %c0_18, %c128] : memref<4x16x512xf32, #tpu.memory_space<vmem>>, vector<4x16x32xf32>
    tpu.vector_store %arg4[%c0_17, %c0_18, %c128], %34 {strides = array<i32>} : memref<4x16x512xf32, #tpu.memory_space<vmem>>, vector<4x16x32xf32>,
    %36 = vector.extract_strided_slice %20 {offsets = [0, 5, 0, 0], sizes = [4, 1, 16, 32], strides = [1, 1, 1, 1]} : vector<4x16x16x32xf32> to vector<4x1x16x32xf32>
    %37 = vector.shape_cast %36 : vector<4x1x16x32xf32> to vector<4x16x32xf32>
    %c0_19 = arith.constant 0 : index
    %c0_20 = arith.constant 0 : index
    %c160 = arith.constant 160 : index
    %38 = vector.load %arg4[%c0_19, %c0_20, %c160] : memref<4x16x512xf32, #tpu.memory_space<vmem>>, vector<4x16x32xf32>
    tpu.vector_store %arg4[%c0_19, %c0_20, %c160], %37 {strides = array<i32>} : memref<4x16x512xf32, #tpu.memory_space<vmem>>, vector<4x16x32xf32>,
    %39 = vector.extract_strided_slice %20 {offsets = [0, 6, 0, 0], sizes = [4, 1, 16, 32], strides = [1, 1, 1, 1]} : vector<4x16x16x32xf32> to vector<4x1x16x32xf32>
    %40 = vector.shape_cast %39 : vector<4x1x16x32xf32> to vector<4x16x32xf32>
    %c0_21 = arith.constant 0 : index
    %c0_22 = arith.constant 0 : index
    %c192 = arith.constant 192 : index
    %41 = vector.load %arg4[%c0_21, %c0_22, %c192] : memref<4x16x512xf32, #tpu.memory_space<vmem>>, vector<4x16x32xf32>
    tpu.vector_store %arg4[%c0_21, %c0_22, %c192], %40 {strides = array<i32>} : memref<4x16x512xf32, #tpu.memory_space<vmem>>, vector<4x16x32xf32>,
    %42 = vector.extract_strided_slice %20 {offsets = [0, 7, 0, 0], sizes = [4, 1, 16, 32], strides = [1, 1, 1, 1]} : vector<4x16x16x32xf32> to vector<4x1x16x32xf32>
    %43 = vector.shape_cast %42 : vector<4x1x16x32xf32> to vector<4x16x32xf32>
    %c0_23 = arith.constant 0 : index
    %c0_24 = arith.constant 0 : index
    %c224 = arith.constant 224 : index
    %44 = vector.load %arg4[%c0_23, %c0_24, %c224] : memref<4x16x512xf32, #tpu.memory_space<vmem>>, vector<4x16x32xf32>
    tpu.vector_store %arg4[%c0_23, %c0_24, %c224], %43 {strides = array<i32>} : memref<4x16x512xf32, #tpu.memory_space<vmem>>, vector<4x16x32xf32>,
    %45 = vector.extract_strided_slice %20 {offsets = [0, 8, 0, 0], sizes = [4, 1, 16, 32], strides = [1, 1, 1, 1]} : vector<4x16x16x32xf32> to vector<4x1x16x32xf32>
    %46 = vector.shape_cast %45 : vector<4x1x16x32xf32> to vector<4x16x32xf32>
    %c0_25 = arith.constant 0 : index
    %c0_26 = arith.constant 0 : index
    %c256 = arith.constant 256 : index
    %47 = vector.load %arg4[%c0_25, %c0_26, %c256] : memref<4x16x512xf32, #tpu.memory_space<vmem>>, vector<4x16x32xf32>
    tpu.vector_store %arg4[%c0_25, %c0_26, %c256], %46 {strides = array<i32>} : memref<4x16x512xf32, #tpu.memory_space<vmem>>, vector<4x16x32xf32>,
    %48 = vector.extract_strided_slice %20 {offsets = [0, 9, 0, 0], sizes = [4, 1, 16, 32], strides = [1, 1, 1, 1]} : vector<4x16x16x32xf32> to vector<4x1x16x32xf32>
    %49 = vector.shape_cast %48 : vector<4x1x16x32xf32> to vector<4x16x32xf32>
    %c0_27 = arith.constant 0 : index
    %c0_28 = arith.constant 0 : index
    %c288 = arith.constant 288 : index
    %50 = vector.load %arg4[%c0_27, %c0_28, %c288] : memref<4x16x512xf32, #tpu.memory_space<vmem>>, vector<4x16x32xf32>
    tpu.vector_store %arg4[%c0_27, %c0_28, %c288], %49 {strides = array<i32>} : memref<4x16x512xf32, #tpu.memory_space<vmem>>, vector<4x16x32xf32>,
    %51 = vector.extract_strided_slice %20 {offsets = [0, 10, 0, 0], sizes = [4, 1, 16, 32], strides = [1, 1, 1, 1]} : vector<4x16x16x32xf32> to vector<4x1x16x32xf32>
    %52 = vector.shape_cast %51 : vector<4x1x16x32xf32> to vector<4x16x32xf32>
    %c0_29 = arith.constant 0 : index
    %c0_30 = arith.constant 0 : index
    %c320 = arith.constant 320 : index
    %53 = vector.load %arg4[%c0_29, %c0_30, %c320] : memref<4x16x512xf32, #tpu.memory_space<vmem>>, vector<4x16x32xf32>
    tpu.vector_store %arg4[%c0_29, %c0_30, %c320], %52 {strides = array<i32>} : memref<4x16x512xf32, #tpu.memory_space<vmem>>, vector<4x16x32xf32>,
    %54 = vector.extract_strided_slice %20 {offsets = [0, 11, 0, 0], sizes = [4, 1, 16, 32], strides = [1, 1, 1, 1]} : vector<4x16x16x32xf32> to vector<4x1x16x32xf32>
    %55 = vector.shape_cast %54 : vector<4x1x16x32xf32> to vector<4x16x32xf32>
    %c0_31 = arith.constant 0 : index
    %c0_32 = arith.constant 0 : index
    %c352 = arith.constant 352 : index
    %56 = vector.load %arg4[%c0_31, %c0_32, %c352] : memref<4x16x512xf32, #tpu.memory_space<vmem>>, vector<4x16x32xf32>
    tpu.vector_store %arg4[%c0_31, %c0_32, %c352], %55 {strides = array<i32>} : memref<4x16x512xf32, #tpu.memory_space<vmem>>, vector<4x16x32xf32>,
    %57 = vector.extract_strided_slice %20 {offsets = [0, 12, 0, 0], sizes = [4, 1, 16, 32], strides = [1, 1, 1, 1]} : vector<4x16x16x32xf32> to vector<4x1x16x32xf32>
    %58 = vector.shape_cast %57 : vector<4x1x16x32xf32> to vector<4x16x32xf32>
    %c0_33 = arith.constant 0 : index
    %c0_34 = arith.constant 0 : index
    %c384 = arith.constant 384 : index
    %59 = vector.load %arg4[%c0_33, %c0_34, %c384] : memref<4x16x512xf32, #tpu.memory_space<vmem>>, vector<4x16x32xf32>
    tpu.vector_store %arg4[%c0_33, %c0_34, %c384], %58 {strides = array<i32>} : memref<4x16x512xf32, #tpu.memory_space<vmem>>, vector<4x16x32xf32>,
    %60 = vector.extract_strided_slice %20 {offsets = [0, 13, 0, 0], sizes = [4, 1, 16, 32], strides = [1, 1, 1, 1]} : vector<4x16x16x32xf32> to vector<4x1x16x32xf32>
    %61 = vector.shape_cast %60 : vector<4x1x16x32xf32> to vector<4x16x32xf32>
    %c0_35 = arith.constant 0 : index
    %c0_36 = arith.constant 0 : index
    %c416 = arith.constant 416 : index
    %62 = vector.load %arg4[%c0_35, %c0_36, %c416] : memref<4x16x512xf32, #tpu.memory_space<vmem>>, vector<4x16x32xf32>
    tpu.vector_store %arg4[%c0_35, %c0_36, %c416], %61 {strides = array<i32>} : memref<4x16x512xf32, #tpu.memory_space<vmem>>, vector<4x16x32xf32>,
    %63 = vector.extract_strided_slice %20 {offsets = [0, 14, 0, 0], sizes = [4, 1, 16, 32], strides = [1, 1, 1, 1]} : vector<4x16x16x32xf32> to vector<4x1x16x32xf32>
    %64 = vector.shape_cast %63 : vector<4x1x16x32xf32> to vector<4x16x32xf32>
    %c0_37 = arith.constant 0 : index
    %c0_38 = arith.constant 0 : index
    %c448 = arith.constant 448 : index
    %65 = vector.load %arg4[%c0_37, %c0_38, %c448] : memref<4x16x512xf32, #tpu.memory_space<vmem>>, vector<4x16x32xf32>
    tpu.vector_store %arg4[%c0_37, %c0_38, %c448], %64 {strides = array<i32>} : memref<4x16x512xf32, #tpu.memory_space<vmem>>, vector<4x16x32xf32>,
    %66 = vector.extract_strided_slice %20 {offsets = [0, 15, 0, 0], sizes = [4, 1, 16, 32], strides = [1, 1, 1, 1]} : vector<4x16x16x32xf32> to vector<4x1x16x32xf32>
    %67 = vector.shape_cast %66 : vector<4x1x16x32xf32> to vector<4x16x32xf32>
    %c0_39 = arith.constant 0 : index
    %c0_40 = arith.constant 0 : index
    %c480 = arith.constant 480 : index
    %68 = vector.load %arg4[%c0_39, %c0_40, %c480] : memref<4x16x512xf32, #tpu.memory_space<vmem>>, vector<4x16x32xf32>
    tpu.vector_store %arg4[%c0_39, %c0_40, %c480], %67 {strides = array<i32>} : memref<4x16x512xf32, #tpu.memory_space<vmem>>, vector<4x16x32xf32>,
    %69 = vector.shape_cast %20 : vector<4x16x16x32xf32> to vector<1024x32xf32>
    %cst_41 = arith.constant dense<0.000000e+00> : vector<32xf32>
    %70 = vector.multi_reduction <add>, %69, %cst_41 [0] : vector<1024x32xf32> to vector<32xf32>
    %71 = vector.shape_cast %70 : vector<32xf32> to vector<1x32xf32>
    %c0_42 = arith.constant 0 : index
    %c0_43 = arith.constant 0 : index
    %c0_44 = arith.constant 0 : index
    %72 = vector.load %arg5[%c0_42, %c0_43, %c0_44] : memref<1x2x32xf32, #tpu.memory_space<vmem>>, vector<1x1x32xf32>
    %73 = vector.shape_cast %72 : vector<1x1x32xf32> to vector<1x32xf32>
    %74 = vector.shape_cast %71 : vector<1x32xf32> to vector<1x1x32xf32>
    tpu.vector_store %arg5[%c0_42, %c0_43, %c0_44], %74 {strides = array<i32>} : memref<1x2x32xf32, #tpu.memory_space<vmem>>, vector<1x1x32xf32>,
    %75 = arith.mulf %69, %69 : vector<1024x32xf32>
    %cst_45 = arith.constant dense<0.000000e+00> : vector<32xf32>
    %76 = vector.multi_reduction <add>, %75, %cst_45 [0] : vector<1024x32xf32> to vector<32xf32>
    %77 = vector.shape_cast %76 : vector<32xf32> to vector<1x32xf32>
    %c0_46 = arith.constant 0 : index
    %c1 = arith.constant 1 : index
    %c0_47 = arith.constant 0 : index
    %78 = vector.load %arg5[%c0_46, %c1, %c0_47] : memref<1x2x32xf32, #tpu.memory_space<vmem>>, vector<1x1x32xf32>
    %79 = vector.shape_cast %78 : vector<1x1x32xf32> to vector<1x32xf32>
    %80 = vector.shape_cast %77 : vector<1x32xf32> to vector<1x1x32xf32>
    tpu.vector_store %arg5[%c0_46, %c1, %c0_47], %80 {strides = array<i32>} : memref<1x2x32xf32, #tpu.memory_space<vmem>>, vector<1x1x32xf32>,
    return
  }
  func.func @transform_0(%arg0: i32) -> (i32, i32, i32, i32) {
    %c0_i32 = arith.constant 0 : i32
    %c0_i32_0 = arith.constant 0 : i32
    %c0_i32_1 = arith.constant 0 : i32
    %c0_i32_2 = arith.constant 0 : i32
    return %arg0, %c0_i32, %c0_i32_0, %c0_i32_1 : i32, i32, i32, i32
  }
  func.func @transform_1(%arg0: i32) -> (i32, i32) {
    %c0_i32 = arith.constant 0 : i32
    %c0_i32_0 = arith.constant 0 : i32
    %c0_i32_1 = arith.constant 0 : i32
    return %c0_i32, %c0_i32_0 : i32, i32
  }
  func.func @transform_2(%arg0: i32) -> (i32, i32) {
    %c0_i32 = arith.constant 0 : i32
    %c0_i32_0 = arith.constant 0 : i32
    %c0_i32_1 = arith.constant 0 : i32
    return %c0_i32, %c0_i32_0 : i32, i32
  }
  func.func @transform_3(%arg0: i32) -> (i32, i32, i32) {
    %c0_i32 = arith.constant 0 : i32
    %c0_i32_0 = arith.constant 0 : i32
    %c0_i32_1 = arith.constant 0 : i32
    return %arg0, %c0_i32, %c0_i32_0 : i32, i32, i32
  }
  func.func @transform_4(%arg0: i32) -> (i32, i32, i32) {
    %c0_i32 = arith.constant 0 : i32
    %c0_i32_0 = arith.constant 0 : i32
    %c0_i32_1 = arith.constant 0 : i32
    return %arg0, %c0_i32, %c0_i32_0 : i32, i32, i32
  }
}

module attributes {stable_mosaic.version = 11 : i64} {
  func.func @_conv_relu_pool_kernel(%arg0: i32, %arg1: memref<4x4x64x288xbf16, #tpu.memory_space<vmem>>, %arg2: memref<288x64xbf16, #tpu.memory_space<vmem>>, %arg3: memref<1x64xf32, #tpu.memory_space<vmem>>, %arg4: memref<4x8x512xf32, #tpu.memory_space<vmem>>, %arg5: memref<1x2x64xf32, #tpu.memory_space<vmem>>) attributes {dimension_semantics = [#tpu.dimension_semantics<parallel>], iteration_bounds = array<i64: 4>, scalar_prefetch = 0 : i64, scratch_operands = 0 : i64, tpu.core_type = #tpu.core_type<tc>, window_params = [{transform_indices = @transform_0, window_bounds = array<i64: 4, 4, 64, 288>}, {pipeline_mode = #tpu.pipeline_mode<synchronous>, transform_indices = @transform_1, window_bounds = array<i64: 288, 64>}, {pipeline_mode = #tpu.pipeline_mode<synchronous>, transform_indices = @transform_2, window_bounds = array<i64: 1, 64>}, {transform_indices = @transform_3, window_bounds = array<i64: 4, 8, 512>}, {transform_indices = @transform_4, window_bounds = array<i64: 1, 2, 64>}]} {
    %c0 = arith.constant 0 : index
    %c0_0 = arith.constant 0 : index
    %c0_1 = arith.constant 0 : index
    %c0_2 = arith.constant 0 : index
    %0 = vector.load %arg1[%c0, %c0_0, %c0_1, %c0_2] : memref<4x4x64x288xbf16, #tpu.memory_space<vmem>>, vector<4x4x64x288xbf16>
    %1 = vector.shape_cast %0 : vector<4x4x64x288xbf16> to vector<1024x288xbf16>
    %c0_3 = arith.constant 0 : index
    %c0_4 = arith.constant 0 : index
    %2 = vector.load %arg2[%c0_3, %c0_4] : memref<288x64xbf16, #tpu.memory_space<vmem>>, vector<288x64xbf16>
    %cst = arith.constant dense<0.000000e+00> : vector<1024x64xf32>
    %3 = tpu.matmul %1, %2, %cst {dimension_numbers = #tpu.dot_dimension_numbers<[1], [0], [0], [1], [0, 0, 1, 1], [], []>} : vector<1024x288xbf16>, vector<288x64xbf16>, vector<1024x64xf32> -> vector<1024x64xf32>
    %c0_5 = arith.constant 0 : index
    %c0_6 = arith.constant 0 : index
    %4 = vector.load %arg3[%c0_5, %c0_6] : memref<1x64xf32, #tpu.memory_space<vmem>>, vector<1x64xf32>
    %5 = vector.broadcast %4 : vector<1x64xf32> to vector<1024x64xf32>
    %6 = arith.addf %3, %5 : vector<1024x64xf32>
    %cst_7 = arith.constant 0.000000e+00 : f32
    %7 = vector.broadcast %cst_7 : f32 to vector<1024x64xf32>
    %8 = arith.maximumf %6, %7 : vector<1024x64xf32>
    %9 = vector.shape_cast %8 : vector<1024x64xf32> to vector<4x4x8x8x64xf32>
    %10 = vector.extract_strided_slice %9 {offsets = [0, 0, 0, 0, 0], sizes = [4, 1, 8, 8, 64], strides = [1, 1, 1, 1, 1]} : vector<4x4x8x8x64xf32> to vector<4x1x8x8x64xf32>
    %11 = vector.shape_cast %10 : vector<4x1x8x8x64xf32> to vector<4x8x8x64xf32>
    %12 = vector.extract_strided_slice %9 {offsets = [0, 1, 0, 0, 0], sizes = [4, 1, 8, 8, 64], strides = [1, 1, 1, 1, 1]} : vector<4x4x8x8x64xf32> to vector<4x1x8x8x64xf32>
    %13 = vector.shape_cast %12 : vector<4x1x8x8x64xf32> to vector<4x8x8x64xf32>
    %14 = arith.maximumf %11, %13 : vector<4x8x8x64xf32>
    %15 = vector.extract_strided_slice %9 {offsets = [0, 2, 0, 0, 0], sizes = [4, 1, 8, 8, 64], strides = [1, 1, 1, 1, 1]} : vector<4x4x8x8x64xf32> to vector<4x1x8x8x64xf32>
    %16 = vector.shape_cast %15 : vector<4x1x8x8x64xf32> to vector<4x8x8x64xf32>
    %17 = vector.extract_strided_slice %9 {offsets = [0, 3, 0, 0, 0], sizes = [4, 1, 8, 8, 64], strides = [1, 1, 1, 1, 1]} : vector<4x4x8x8x64xf32> to vector<4x1x8x8x64xf32>
    %18 = vector.shape_cast %17 : vector<4x1x8x8x64xf32> to vector<4x8x8x64xf32>
    %19 = arith.maximumf %16, %18 : vector<4x8x8x64xf32>
    %20 = arith.maximumf %14, %19 : vector<4x8x8x64xf32>
    %21 = vector.extract_strided_slice %20 {offsets = [0, 0, 0, 0], sizes = [4, 1, 8, 64], strides = [1, 1, 1, 1]} : vector<4x8x8x64xf32> to vector<4x1x8x64xf32>
    %22 = vector.shape_cast %21 : vector<4x1x8x64xf32> to vector<4x8x64xf32>
    %c0_8 = arith.constant 0 : index
    %c0_9 = arith.constant 0 : index
    %c0_10 = arith.constant 0 : index
    %23 = vector.load %arg4[%c0_8, %c0_9, %c0_10] : memref<4x8x512xf32, #tpu.memory_space<vmem>>, vector<4x8x64xf32>
    tpu.vector_store %arg4[%c0_8, %c0_9, %c0_10], %22 {strides = array<i32>} : memref<4x8x512xf32, #tpu.memory_space<vmem>>, vector<4x8x64xf32>,
    %24 = vector.extract_strided_slice %20 {offsets = [0, 1, 0, 0], sizes = [4, 1, 8, 64], strides = [1, 1, 1, 1]} : vector<4x8x8x64xf32> to vector<4x1x8x64xf32>
    %25 = vector.shape_cast %24 : vector<4x1x8x64xf32> to vector<4x8x64xf32>
    %c0_11 = arith.constant 0 : index
    %c0_12 = arith.constant 0 : index
    %c64 = arith.constant 64 : index
    %26 = vector.load %arg4[%c0_11, %c0_12, %c64] : memref<4x8x512xf32, #tpu.memory_space<vmem>>, vector<4x8x64xf32>
    tpu.vector_store %arg4[%c0_11, %c0_12, %c64], %25 {strides = array<i32>} : memref<4x8x512xf32, #tpu.memory_space<vmem>>, vector<4x8x64xf32>,
    %27 = vector.extract_strided_slice %20 {offsets = [0, 2, 0, 0], sizes = [4, 1, 8, 64], strides = [1, 1, 1, 1]} : vector<4x8x8x64xf32> to vector<4x1x8x64xf32>
    %28 = vector.shape_cast %27 : vector<4x1x8x64xf32> to vector<4x8x64xf32>
    %c0_13 = arith.constant 0 : index
    %c0_14 = arith.constant 0 : index
    %c128 = arith.constant 128 : index
    %29 = vector.load %arg4[%c0_13, %c0_14, %c128] : memref<4x8x512xf32, #tpu.memory_space<vmem>>, vector<4x8x64xf32>
    tpu.vector_store %arg4[%c0_13, %c0_14, %c128], %28 {strides = array<i32>} : memref<4x8x512xf32, #tpu.memory_space<vmem>>, vector<4x8x64xf32>,
    %30 = vector.extract_strided_slice %20 {offsets = [0, 3, 0, 0], sizes = [4, 1, 8, 64], strides = [1, 1, 1, 1]} : vector<4x8x8x64xf32> to vector<4x1x8x64xf32>
    %31 = vector.shape_cast %30 : vector<4x1x8x64xf32> to vector<4x8x64xf32>
    %c0_15 = arith.constant 0 : index
    %c0_16 = arith.constant 0 : index
    %c192 = arith.constant 192 : index
    %32 = vector.load %arg4[%c0_15, %c0_16, %c192] : memref<4x8x512xf32, #tpu.memory_space<vmem>>, vector<4x8x64xf32>
    tpu.vector_store %arg4[%c0_15, %c0_16, %c192], %31 {strides = array<i32>} : memref<4x8x512xf32, #tpu.memory_space<vmem>>, vector<4x8x64xf32>,
    %33 = vector.extract_strided_slice %20 {offsets = [0, 4, 0, 0], sizes = [4, 1, 8, 64], strides = [1, 1, 1, 1]} : vector<4x8x8x64xf32> to vector<4x1x8x64xf32>
    %34 = vector.shape_cast %33 : vector<4x1x8x64xf32> to vector<4x8x64xf32>
    %c0_17 = arith.constant 0 : index
    %c0_18 = arith.constant 0 : index
    %c256 = arith.constant 256 : index
    %35 = vector.load %arg4[%c0_17, %c0_18, %c256] : memref<4x8x512xf32, #tpu.memory_space<vmem>>, vector<4x8x64xf32>
    tpu.vector_store %arg4[%c0_17, %c0_18, %c256], %34 {strides = array<i32>} : memref<4x8x512xf32, #tpu.memory_space<vmem>>, vector<4x8x64xf32>,
    %36 = vector.extract_strided_slice %20 {offsets = [0, 5, 0, 0], sizes = [4, 1, 8, 64], strides = [1, 1, 1, 1]} : vector<4x8x8x64xf32> to vector<4x1x8x64xf32>
    %37 = vector.shape_cast %36 : vector<4x1x8x64xf32> to vector<4x8x64xf32>
    %c0_19 = arith.constant 0 : index
    %c0_20 = arith.constant 0 : index
    %c320 = arith.constant 320 : index
    %38 = vector.load %arg4[%c0_19, %c0_20, %c320] : memref<4x8x512xf32, #tpu.memory_space<vmem>>, vector<4x8x64xf32>
    tpu.vector_store %arg4[%c0_19, %c0_20, %c320], %37 {strides = array<i32>} : memref<4x8x512xf32, #tpu.memory_space<vmem>>, vector<4x8x64xf32>,
    %39 = vector.extract_strided_slice %20 {offsets = [0, 6, 0, 0], sizes = [4, 1, 8, 64], strides = [1, 1, 1, 1]} : vector<4x8x8x64xf32> to vector<4x1x8x64xf32>
    %40 = vector.shape_cast %39 : vector<4x1x8x64xf32> to vector<4x8x64xf32>
    %c0_21 = arith.constant 0 : index
    %c0_22 = arith.constant 0 : index
    %c384 = arith.constant 384 : index
    %41 = vector.load %arg4[%c0_21, %c0_22, %c384] : memref<4x8x512xf32, #tpu.memory_space<vmem>>, vector<4x8x64xf32>
    tpu.vector_store %arg4[%c0_21, %c0_22, %c384], %40 {strides = array<i32>} : memref<4x8x512xf32, #tpu.memory_space<vmem>>, vector<4x8x64xf32>,
    %42 = vector.extract_strided_slice %20 {offsets = [0, 7, 0, 0], sizes = [4, 1, 8, 64], strides = [1, 1, 1, 1]} : vector<4x8x8x64xf32> to vector<4x1x8x64xf32>
    %43 = vector.shape_cast %42 : vector<4x1x8x64xf32> to vector<4x8x64xf32>
    %c0_23 = arith.constant 0 : index
    %c0_24 = arith.constant 0 : index
    %c448 = arith.constant 448 : index
    %44 = vector.load %arg4[%c0_23, %c0_24, %c448] : memref<4x8x512xf32, #tpu.memory_space<vmem>>, vector<4x8x64xf32>
    tpu.vector_store %arg4[%c0_23, %c0_24, %c448], %43 {strides = array<i32>} : memref<4x8x512xf32, #tpu.memory_space<vmem>>, vector<4x8x64xf32>,
    %45 = vector.shape_cast %20 : vector<4x8x8x64xf32> to vector<256x64xf32>
    %cst_25 = arith.constant dense<0.000000e+00> : vector<64xf32>
    %46 = vector.multi_reduction <add>, %45, %cst_25 [0] : vector<256x64xf32> to vector<64xf32>
    %47 = vector.shape_cast %46 : vector<64xf32> to vector<1x64xf32>
    %c0_26 = arith.constant 0 : index
    %c0_27 = arith.constant 0 : index
    %c0_28 = arith.constant 0 : index
    %48 = vector.load %arg5[%c0_26, %c0_27, %c0_28] : memref<1x2x64xf32, #tpu.memory_space<vmem>>, vector<1x1x64xf32>
    %49 = vector.shape_cast %48 : vector<1x1x64xf32> to vector<1x64xf32>
    %50 = vector.shape_cast %47 : vector<1x64xf32> to vector<1x1x64xf32>
    tpu.vector_store %arg5[%c0_26, %c0_27, %c0_28], %50 {strides = array<i32>} : memref<1x2x64xf32, #tpu.memory_space<vmem>>, vector<1x1x64xf32>,
    %51 = arith.mulf %45, %45 : vector<256x64xf32>
    %cst_29 = arith.constant dense<0.000000e+00> : vector<64xf32>
    %52 = vector.multi_reduction <add>, %51, %cst_29 [0] : vector<256x64xf32> to vector<64xf32>
    %53 = vector.shape_cast %52 : vector<64xf32> to vector<1x64xf32>
    %c0_30 = arith.constant 0 : index
    %c1 = arith.constant 1 : index
    %c0_31 = arith.constant 0 : index
    %54 = vector.load %arg5[%c0_30, %c1, %c0_31] : memref<1x2x64xf32, #tpu.memory_space<vmem>>, vector<1x1x64xf32>
    %55 = vector.shape_cast %54 : vector<1x1x64xf32> to vector<1x64xf32>
    %56 = vector.shape_cast %53 : vector<1x64xf32> to vector<1x1x64xf32>
    tpu.vector_store %arg5[%c0_30, %c1, %c0_31], %56 {strides = array<i32>} : memref<1x2x64xf32, #tpu.memory_space<vmem>>, vector<1x1x64xf32>,
    return
  }
  func.func @transform_0(%arg0: i32) -> (i32, i32, i32, i32) {
    %c0_i32 = arith.constant 0 : i32
    %c0_i32_0 = arith.constant 0 : i32
    %c0_i32_1 = arith.constant 0 : i32
    %c0_i32_2 = arith.constant 0 : i32
    return %arg0, %c0_i32, %c0_i32_0, %c0_i32_1 : i32, i32, i32, i32
  }
  func.func @transform_1(%arg0: i32) -> (i32, i32) {
    %c0_i32 = arith.constant 0 : i32
    %c0_i32_0 = arith.constant 0 : i32
    %c0_i32_1 = arith.constant 0 : i32
    return %c0_i32, %c0_i32_0 : i32, i32
  }
  func.func @transform_2(%arg0: i32) -> (i32, i32) {
    %c0_i32 = arith.constant 0 : i32
    %c0_i32_0 = arith.constant 0 : i32
    %c0_i32_1 = arith.constant 0 : i32
    return %c0_i32, %c0_i32_0 : i32, i32
  }
  func.func @transform_3(%arg0: i32) -> (i32, i32, i32) {
    %c0_i32 = arith.constant 0 : i32
    %c0_i32_0 = arith.constant 0 : i32
    %c0_i32_1 = arith.constant 0 : i32
    return %arg0, %c0_i32, %c0_i32_0 : i32, i32, i32
  }
  func.func @transform_4(%arg0: i32) -> (i32, i32, i32) {
    %c0_i32 = arith.constant 0 : i32
    %c0_i32_0 = arith.constant 0 : i32
    %c0_i32_1 = arith.constant 0 : i32
    return %arg0, %c0_i32, %c0_i32_0 : i32, i32, i32
  }
}

</mosaic_0001>

<bundles_post_ra>
// kernel: primary_conv3d.2
= control target key start
LH: loop header
LB: loop body
LE: loop exit
PB: predicated region body
PF: predicated region fallthrough
CT: control target
= control target key end

     0   :  { %s8663_s15 = smov 0   ;;  %s14033_s0 = inlined_call_operand.vmem [shape: bf16[12,4,256,27], index: 0, kind: input, shape index: {}]   ;;  %s14034_s1 = inlined_call_operand.vmem [shape: bf16[27,32], index: 1, kind: input, shape index: {}]   ;;  %s14035_s2 = inlined_call_operand.vmem [shape: f32[1,32], index: 2, kind: input, shape index: {}]   ;;  %s14036_s3 = inlined_call_operand.vmem [shape: f32[12,16,512], index: 3, kind: output, shape index: {0}]   ;;  %s14037_s4 = inlined_call_operand.vmem [shape: f32[3,2,32], index: 4, kind: output, shape index: {1}]  }
   0x1 LB: > { %s8669_s16 = sadd.s32 4294967295, %s8632_s15   ;;  %p7047_p0 = scmp.ge.s32.totalorder %s8632_s15, 1  ;;  %s8632_s15 = sphi %s8663_s15, %s15_s15  }
   0x2   : > { %p167_p1 = scmp.lt.s32.totalorder %s8632_s15, 4 }
   0x4   : > { %p168_p2 = pnand %p7047_p0, %p167_p1 }
   0x6   : > { %171 = sbr.rel (%p168_p2) target bundleno = 976 (0x3d0), region = 32 }
   0xd   : > { %v8364_v0 = vld [vmem:[%s14034_s1] sm:$0xff]   ;;  %vm2801_vm0 = vcmask 1044480   ;;  %v8365_v1 = vld [vmem:[%s14034_s1 + $0x8] sm:$0x3f]   ;;  %vm2802_vm1 = vcmask 1045504   ;;  %s7048_s21 = sshll.u32 %s8669_s16, 2 }
   0xe   : > { %7832 = vmatprep.subr.bf16.mxu0 %v8364_v0  ;;  %8348 = vmatprep.subr.bf16.mxu1 %v8364_v0  ;;  %v8634_v2 = vmov 65535   ;;  %p200_p3 = scmp.lt.s32.totalorder %s7048_s21, 11  ;;  %vm2032_vm2 = vcmask 220160   ;;  %vm5785_vm3 = vcmask 261120   ;;  %s8635_s8 = smov 32   ;;  %vm5826_vm4 = vcmask 523520  }
   0xf   : > { %7833 = vmatpush3.bf16.msra.mxu0 %v8364_v0  ;;  %8350 = vmatpush3.bf16.msra.mxu1 %v8364_v0  ;;  %v2803_v3 = vsel %vm2801_vm0, 4294967295, %v8634_v2  ;;  %s8636_s9 = smov 96   ;;  %s8637_s10 = smov 64   ;;  %vm5867_vm5 = vcmask 785920   ;;  %vm5908_vm6 = vcmask 1048320   ;;  %vm6562_vm7 = vcmask 253952  }
  0x10   : > { %v2804_v4 = vsel %vm2802_vm1, %v2803_v3, 0  ;;  %s15202_s21 = smov (!%p200_p3, %s7048_s21), 11  ;;  %p213_p4 = scmp.lt.s32.totalorder %s8669_s16, 2 }
  0x11   : > { %v2806_v5 = vand.u32 %v8365_v1, %v2804_v4  ;;  %s7572_s22 = sshll.u32 %s15202_s21, 9  ;;  %s7573_s30 = sshll.u32 %s15202_s21, 6 }
  0x12   : > { %s8686_s25 = scalar_lea.vmem %s14033_s0, %s7572_s22  ;;  %s10174_s7 = scalar_lea.vmem %s14036_s3, %s7573_s30 }
  0x13   : > { %7834 = vmatprep.subr.bf16.mxu0 %v2806_v5  ;;  %8349 = vmatprep.subr.bf16.mxu1 %v2806_v5  ;;  %v8366_v6 = vld [vmem:[%s8686_s25] sm:$0xff]   ;;  %v8368_v8 = vld [vmem:[%s8686_s25 + $0x8] sm:$0xff]   ;;  %v8370_v10 = vld [vmem:[%s8686_s25 + $0x10] sm:$0xff]   ;;  %s15204_s16 = smov (!%p213_p4, %s8669_s16), 2 }
  0x14   : > { %7835 = vmatpush3.bf16.msra.mxu0 %v2806_v5  ;;  %8351 = vmatpush3.bf16.msra.mxu1 %v2806_v5  ;;  %v8367_v7 = vld [vmem:[%s8686_s25 + $0x400] sm:$0xff]   ;;  %v8369_v9 = vld [vmem:[%s8686_s25 + $0x408] sm:$0xff]   ;;  %v8371_v11 = vld [vmem:[%s8686_s25 + $0x410] sm:$0xff]   ;;  %s7054_s19 = sshll.u32 %s15204_s16, 1 }
  0x15   : > { %7836 = vmatprep.mubr.msk.bf16.mxu0 %vm2032_vm2, %v8366_v6  ;;  %8092 = vmatprep.mubr.msk.bf16.mxu1 %vm2032_vm2, %v8367_v7  ;;  %v8372_v12 = vld [vmem:[%s8686_s25 + $0x18] sm:$0xff]   ;;  %v8374_v14 = vld [vmem:[%s8686_s25 + $0x20] sm:$0xff]   ;;  %v8376_v16 = vld [vmem:[%s8686_s25 + $0x28] sm:$0xff]   ;;  %s216_s22 = scalar_lea.vmem %s14037_s4, %s7054_s19 }
  0x16   : > { %v8373_v13 = vld [vmem:[%s8686_s25 + $0x418] sm:$0xff]   ;;  %v8375_v15 = vld [vmem:[%s8686_s25 + $0x420] sm:$0xff]   ;;  %v8377_v17 = vld [vmem:[%s8686_s25 + $0x428] sm:$0xff]  }
  0x17   : > { %7837 = vmatmul.mubr.msk.bf16.vlgmr.msra.gmra.mrb[0].mxu0 %vm2032_vm2, %v8368_v8  ;;  %8093 = vmatmul.mubr.msk.bf16.vlgmr.msra.gmra.mrb[0].mxu1 %vm2032_vm2, %v8369_v9  ;;  %v8378_v18 = vld [vmem:[%s8686_s25 + $0x30] sm:$0xff]   ;;  %v8380_v20 = vld [vmem:[%s8686_s25 + $0x38] sm:$0xff]   ;;  %v8382_v22 = vld [vmem:[%s8686_s25 + $0x40] sm:$0xff]  }
  0x18   : > { %7840 = vmatprep.mubr.msk.bf16.mxu0 %vm2032_vm2, %v8370_v10  ;;  %8096 = vmatprep.mubr.msk.bf16.mxu1 %vm2032_vm2, %v8371_v11  ;;  %v8379_v19 = vld [vmem:[%s8686_s25 + $0x430] sm:$0xff]   ;;  %v8381_v21 = vld [vmem:[%s8686_s25 + $0x438] sm:$0xff]   ;;  %v8383_v23 = vld [vmem:[%s8686_s25 + $0x440] sm:$0xff]  }
  0x19   : > { %v8384_v24 = vld [vmem:[%s8686_s25 + $0x48] sm:$0xff]   ;;  %v8386_v26 = vld [vmem:[%s8686_s25 + $0x50] sm:$0xff]   ;;  %v8388_v28 = vld [vmem:[%s8686_s25 + $0x58] sm:$0xff]  }
  0x1a   : > { %v8385_v25 = vld [vmem:[%s8686_s25 + $0x448] sm:$0xff]   ;;  %v8387_v27 = vld [vmem:[%s8686_s25 + $0x450] sm:$0xff]   ;;  %v8389_v29 = vld [vmem:[%s8686_s25 + $0x458] sm:$0xff]  }
  0x1b   : > { %v8390_v30 = vld [vmem:[%s8686_s25 + $0x60] sm:$0xff]   ;;  %v8392_v32 = vld [vmem:[%s8686_s25 + $0x68] sm:$0xff]   ;;  %v8394_v34 = vld [vmem:[%s8686_s25 + $0x70] sm:$0xff]  }
  0x1c   : > { %v8391_v31 = vld [vmem:[%s8686_s25 + $0x460] sm:$0xff]   ;;  %v8393_v33 = vld [vmem:[%s8686_s25 + $0x468] sm:$0xff]   ;;  %v8395_v35 = vld [vmem:[%s8686_s25 + $0x470] sm:$0xff]  }
  0x1d   : > { %v8396_v36 = vld [vmem:[%s8686_s25 + $0x78] sm:$0xff]   ;;  %v8398_v38 = vld [vmem:[%s8686_s25 + $0x80] sm:$0xff]   ;;  %v8400_v40 = vld [vmem:[%s8686_s25 + $0x88] sm:$0xff]  }
  0x1e   : > { %v8397_v37 = vld [vmem:[%s8686_s25 + $0x478] sm:$0xff]   ;;  %v8399_v39 = vld [vmem:[%s8686_s25 + $0x480] sm:$0xff]   ;;  %v8401_v41 = vld [vmem:[%s8686_s25 + $0x488] sm:$0xff]  }
  0x1f   : > { %7841 = vmatmul.mubr.msk.bf16.gmra.mrb[4].mxu0 %vm2032_vm2, %v8372_v12  ;;  %8097 = vmatmul.mubr.msk.bf16.gmra.mrb[4].mxu1 %vm2032_vm2, %v8373_v13  ;;  %v8402_v42 = vld [vmem:[%s8686_s25 + $0x90] sm:$0xff]   ;;  %v8404_v44 = vld [vmem:[%s8686_s25 + $0x98] sm:$0xff]   ;;  %v8406_v46 = vld [vmem:[%s8686_s25 + $0xa0] sm:$0xff]  }
  0x20   : > { %7844 = vmatprep.mubr.msk.bf16.mxu0 %vm2032_vm2, %v8374_v14  ;;  %8100 = vmatprep.mubr.msk.bf16.mxu1 %vm2032_vm2, %v8375_v15  ;;  %v8403_v43 = vld [vmem:[%s8686_s25 + $0x490] sm:$0xff]   ;;  %v8405_v45 = vld [vmem:[%s8686_s25 + $0x498] sm:$0xff]   ;;  %v8407_v47 = vld [vmem:[%s8686_s25 + $0x4a0] sm:$0xff]  }
  0x21   : > { %v8408_v48 = vld [vmem:[%s8686_s25 + $0xa8] sm:$0xff]   ;;  %v8410_v50 = vld [vmem:[%s8686_s25 + $0xb0] sm:$0xff]   ;;  %v8412_v52 = vld [vmem:[%s8686_s25 + $0xb8] sm:$0xff]  }
  0x22   : > { %v8409_v49 = vld [vmem:[%s8686_s25 + $0x4a8] sm:$0xff]   ;;  %v8411_v51 = vld [vmem:[%s8686_s25 + $0x4b0] sm:$0xff]   ;;  %v8413_v53 = vld [vmem:[%s8686_s25 + $0x4b8] sm:$0xff]  }
  0x23   : > { %v8414_v54 = vld [vmem:[%s8686_s25 + $0xc0] sm:$0xff]   ;;  %v8416_v56 = vld [vmem:[%s8686_s25 + $0xc8] sm:$0xff]   ;;  %v8418_v58 = vld [vmem:[%s8686_s25 + $0xd0] sm:$0xff]  }
  0x24   : > { %v8415_v55 = vld [vmem:[%s8686_s25 + $0x4c0] sm:$0xff]   ;;  %v8417_v57 = vld [vmem:[%s8686_s25 + $0x4c8] sm:$0xff]   ;;  %v8419_v59 = vld [vmem:[%s8686_s25 + $0x4d0] sm:$0xff]  }
  0x25   : > { %v8420_v60 = vld [vmem:[%s8686_s25 + $0xd8] sm:$0xff]   ;;  %v8422_v62 = vld [vmem:[%s8686_s25 + $0xe0] sm:$0xff]   ;;  %v8424_v0 = vld [vmem:[%s8686_s25 + $0xe8] sm:$0xff]  }
  0x26   : > { %v8421_v61 = vld [vmem:[%s8686_s25 + $0x4d8] sm:$0xff]   ;;  %v8423_v63 = vld [vmem:[%s8686_s25 + $0x4e0] sm:$0xff]   ;;  %v8425_v1 = vld [vmem:[%s8686_s25 + $0x4e8] sm:$0xff]  }
  0x27   : > { %7845 = vmatmul.mubr.msk.bf16.gmra.mrb[8].mxu0 %vm2032_vm2, %v8376_v16  ;;  %8101 = vmatmul.mubr.msk.bf16.gmra.mrb[8].mxu1 %vm2032_vm2, %v8377_v17  ;;  %v8426_v2 = vld [vmem:[%s8686_s25 + $0xf0] sm:$0xff]   ;;  %v8428_v4 = vld [vmem:[%s8686_s25 + $0xf8] sm:$0xff]   ;;  %v8430_v6 = vld [vmem:[%s8686_s25 + $0x100] sm:$0xff]  }
  0x28   : > { %7848 = vmatprep.mubr.msk.bf16.mxu0 %vm2032_vm2, %v8378_v18  ;;  %8104 = vmatprep.mubr.msk.bf16.mxu1 %vm2032_vm2, %v8379_v19  ;;  %v8427_v3 = vld [vmem:[%s8686_s25 + $0x4f0] sm:$0xff]   ;;  %v8429_v5 = vld [vmem:[%s8686_s25 + $0x4f8] sm:$0xff]   ;;  %v8431_v7 = vld [vmem:[%s8686_s25 + $0x500] sm:$0xff]  }
  0x29   : > { %v8432_v8 = vld [vmem:[%s8686_s25 + $0x108] sm:$0xff]   ;;  %v8434_v10 = vld [vmem:[%s8686_s25 + $0x110] sm:$0xff]   ;;  %v8436_v12 = vld [vmem:[%s8686_s25 + $0x118] sm:$0xff]  }
  0x2a   : > { %v8433_v9 = vld [vmem:[%s8686_s25 + $0x508] sm:$0xff]   ;;  %v8435_v11 = vld [vmem:[%s8686_s25 + $0x510] sm:$0xff]   ;;  %v8437_v13 = vld [vmem:[%s8686_s25 + $0x518] sm:$0xff]  }
  0x2b   : > { %v8438_v14 = vld [vmem:[%s8686_s25 + $0x120] sm:$0xff]   ;;  %v8440_v16 = vld [vmem:[%s8686_s25 + $0x128] sm:$0xff]   ;;  %v8442_v18 = vld [vmem:[%s8686_s25 + $0x130] sm:$0xff]  }
  0x2c   : > { %v8439_v15 = vld [vmem:[%s8686_s25 + $0x520] sm:$0xff]   ;;  %v8441_v17 = vld [vmem:[%s8686_s25 + $0x528] sm:$0xff]   ;;  %v8443_v19 = vld [vmem:[%s8686_s25 + $0x530] sm:$0xff]  }
  0x2f   : > { %7849 = vmatmul.mubr.msk.bf16.gmra.mrb[12].mxu0 %vm2032_vm2, %v8380_v20  ;;  %8105 = vmatmul.mubr.msk.bf16.gmra.mrb[12].mxu1 %vm2032_vm2, %v8381_v21  ;;  %v8444_v20 = vld [vmem:[%s8686_s25 + $0x138] sm:$0xff]  }
  0x30   : > { %7852 = vmatprep.mubr.msk.bf16.mxu0 %vm2032_vm2, %v8382_v22  ;;  %8108 = vmatprep.mubr.msk.bf16.mxu1 %vm2032_vm2, %v8383_v23  ;;  %v8445_v21 = vld [vmem:[%s8686_s25 + $0x538] sm:$0xff]   ;;  %v8446_v22 = vld [vmem:[%s8686_s25 + $0x140] sm:$0xff]  }
  0x31   : > { %v8447_v23 = vld [vmem:[%s8686_s25 + $0x540] sm:$0xff]  }
  0x37   : > { %7853 = vmatmul.mubr.msk.bf16.gmra.mrb[16].mxu0 %vm2032_vm2, %v8384_v24  ;;  %8109 = vmatmul.mubr.msk.bf16.gmra.mrb[16].mxu1 %vm2032_vm2, %v8385_v25  ;;  %v8448_v24 = vld [vmem:[%s8686_s25 + $0x148] sm:$0xff]  }
  0x38   : > { %7856 = vmatprep.mubr.msk.bf16.mxu0 %vm2032_vm2, %v8386_v26  ;;  %8112 = vmatprep.mubr.msk.bf16.mxu1 %vm2032_vm2, %v8387_v27  ;;  %v8449_v25 = vld [vmem:[%s8686_s25 + $0x548] sm:$0xff]   ;;  %v8450_v26 = vld [vmem:[%s8686_s25 + $0x150] sm:$0xff]  }
  0x39   : > { %v8451_v27 = vld [vmem:[%s8686_s25 + $0x550] sm:$0xff]  }
  0x3f   : > { %7857 = vmatmul.mubr.msk.bf16.gmra.mrb[20].mxu0 %vm2032_vm2, %v8388_v28  ;;  %8113 = vmatmul.mubr.msk.bf16.gmra.mrb[20].mxu1 %vm2032_vm2, %v8389_v29  ;;  %v8452_v28 = vld [vmem:[%s8686_s25 + $0x158] sm:$0xff]  }
  0x40   : > { %7860 = vmatprep.mubr.msk.bf16.mxu0 %vm2032_vm2, %v8390_v30  ;;  %8116 = vmatprep.mubr.msk.bf16.mxu1 %vm2032_vm2, %v8391_v31  ;;  %v8453_v29 = vld [vmem:[%s8686_s25 + $0x558] sm:$0xff]   ;;  %v8454_v30 = vld [vmem:[%s8686_s25 + $0x160] sm:$0xff]  }
  0x41   : > { %v8455_v31 = vld [vmem:[%s8686_s25 + $0x560] sm:$0xff]  }
  0x47   : > { %7861 = vmatmul.mubr.msk.bf16.gmra.mrb[24].mxu0 %vm2032_vm2, %v8392_v32  ;;  %8117 = vmatmul.mubr.msk.bf16.gmra.mrb[24].mxu1 %vm2032_vm2, %v8393_v33  ;;  %v8456_v32 = vld [vmem:[%s8686_s25 + $0x168] sm:$0xff]  }
  0x48   : > { %7864 = vmatprep.mubr.msk.bf16.mxu0 %vm2032_vm2, %v8394_v34  ;;  %8120 = vmatprep.mubr.msk.bf16.mxu1 %vm2032_vm2, %v8395_v35  ;;  %v8457_v33 = vld [vmem:[%s8686_s25 + $0x568] sm:$0xff]   ;;  %v8458_v34 = vld [vmem:[%s8686_s25 + $0x170] sm:$0xff]  }
  0x49   : > { %v8459_v35 = vld [vmem:[%s8686_s25 + $0x570] sm:$0xff]  }
  0x4f   : > { %7865 = vmatmul.mubr.msk.bf16.gmra.mrb[28].mxu0 %vm2032_vm2, %v8396_v36  ;;  %8121 = vmatmul.mubr.msk.bf16.gmra.mrb[28].mxu1 %vm2032_vm2, %v8397_v37  ;;  %v8460_v36 = vld [vmem:[%s8686_s25 + $0x178] sm:$0xff]  }
  0x50   : > { %7868 = vmatprep.mubr.msk.bf16.mxu0 %vm2032_vm2, %v8398_v38  ;;  %8124 = vmatprep.mubr.msk.bf16.mxu1 %vm2032_vm2, %v8399_v39  ;;  %v8461_v37 = vld [vmem:[%s8686_s25 + $0x578] sm:$0xff]   ;;  %v8462_v38 = vld [vmem:[%s8686_s25 + $0x180] sm:$0xff]  }
  0x51   : > { %v8463_v39 = vld [vmem:[%s8686_s25 + $0x580] sm:$0xff]  }
  0x57   : > { %7869 = vmatmul.mubr.msk.bf16.gmra.mrb[32].mxu0 %vm2032_vm2, %v8400_v40  ;;  %8125 = vmatmul.mubr.msk.bf16.gmra.mrb[32].mxu1 %vm2032_vm2, %v8401_v41  ;;  %v8464_v40 = vld [vmem:[%s8686_s25 + $0x188] sm:$0xff]  }
  0x58   : > { %7872 = vmatprep.mubr.msk.bf16.mxu0 %vm2032_vm2, %v8402_v42  ;;  %8128 = vmatprep.mubr.msk.bf16.mxu1 %vm2032_vm2, %v8403_v43  ;;  %v8465_v41 = vld [vmem:[%s8686_s25 + $0x588] sm:$0xff]   ;;  %v8466_v42 = vld [vmem:[%s8686_s25 + $0x190] sm:$0xff]  }
  0x59   : > { %v8467_v43 = vld [vmem:[%s8686_s25 + $0x590] sm:$0xff]  }
  0x5f   : > { %7873 = vmatmul.mubr.msk.bf16.gmra.mrb[36].mxu0 %vm2032_vm2, %v8404_v44  ;;  %8129 = vmatmul.mubr.msk.bf16.gmra.mrb[36].mxu1 %vm2032_vm2, %v8405_v45  ;;  %v8468_v44 = vld [vmem:[%s8686_s25 + $0x198] sm:$0xff]  }
  0x60   : > { %7876 = vmatprep.mubr.msk.bf16.mxu0 %vm2032_vm2, %v8406_v46  ;;  %8132 = vmatprep.mubr.msk.bf16.mxu1 %vm2032_vm2, %v8407_v47  ;;  %v8469_v45 = vld [vmem:[%s8686_s25 + $0x598] sm:$0xff]   ;;  %v8470_v46 = vld [vmem:[%s8686_s25 + $0x1a0] sm:$0xff]  }
  0x61   : > { %v8471_v47 = vld [vmem:[%s8686_s25 + $0x5a0] sm:$0xff]  }
  0x67   : > { %7877 = vmatmul.mubr.msk.bf16.gmra.mrb[40].mxu0 %vm2032_vm2, %v8408_v48  ;;  %8133 = vmatmul.mubr.msk.bf16.gmra.mrb[40].mxu1 %vm2032_vm2, %v8409_v49  ;;  %v8472_v48 = vld [vmem:[%s8686_s25 + $0x1a8] sm:$0xff]  }
  0x68   : > { %7880 = vmatprep.mubr.msk.bf16.mxu0 %vm2032_vm2, %v8410_v50  ;;  %8136 = vmatprep.mubr.msk.bf16.mxu1 %vm2032_vm2, %v8411_v51  ;;  %v8473_v49 = vld [vmem:[%s8686_s25 + $0x5a8] sm:$0xff]   ;;  %v8474_v50 = vld [vmem:[%s8686_s25 + $0x1b0] sm:$0xff]  }
  0x69   : > { %v8475_v51 = vld [vmem:[%s8686_s25 + $0x5b0] sm:$0xff]  }
  0x6f   : > { %7881 = vmatmul.mubr.msk.bf16.gmra.mrb[44].mxu0 %vm2032_vm2, %v8412_v52  ;;  %8137 = vmatmul.mubr.msk.bf16.gmra.mrb[44].mxu1 %vm2032_vm2, %v8413_v53  ;;  %v8476_v52 = vld [vmem:[%s8686_s25 + $0x1b8] sm:$0xff]  }
  0x70   : > { %7884 = vmatprep.mubr.msk.bf16.mxu0 %vm2032_vm2, %v8414_v54  ;;  %8140 = vmatprep.mubr.msk.bf16.mxu1 %vm2032_vm2, %v8415_v55  ;;  %v8477_v54 = vld [vmem:[%s8686_s25 + $0x5b8] sm:$0xff]   ;;  %v8478_v55 = vld [vmem:[%s8686_s25 + $0x1c0] sm:$0xff]  }
  0x77   : > { %7885 = vmatmul.mubr.msk.bf16.gmra.mrb[48].mxu0 %vm2032_vm2, %v8416_v56  ;;  %8141 = vmatmul.mubr.msk.bf16.gmra.mrb[48].mxu1 %vm2032_vm2, %v8417_v57 }
  0x78   : > { %7888 = vmatprep.mubr.msk.bf16.mxu0 %vm2032_vm2, %v8418_v58  ;;  %8144 = vmatprep.mubr.msk.bf16.mxu1 %vm2032_vm2, %v8419_v59 }
  0x7f   : > { %7889 = vmatmul.mubr.msk.bf16.gmra.mrb[52].mxu0 %vm2032_vm2, %v8420_v60  ;;  %8145 = vmatmul.mubr.msk.bf16.gmra.mrb[52].mxu1 %vm2032_vm2, %v8421_v61 }
  0x80   : > { %7892 = vmatprep.mubr.msk.bf16.mxu0 %vm2032_vm2, %v8422_v62  ;;  %8148 = vmatprep.mubr.msk.bf16.mxu1 %vm2032_vm2, %v8423_v63  ;;  %v8479_v62 = vld [vmem:[%s8686_s25 + $0x5c0] sm:$0xff]  }
  0x87   : > { %7893 = vmatmul.mubr.msk.bf16.gmra.mrb[56].mxu0 %vm2032_vm2, %v8424_v0  ;;  %8149 = vmatmul.mubr.msk.bf16.gmra.mrb[56].mxu1 %vm2032_vm2, %v8425_v1  ;;  %v8480_v0 = vld [vmem:[%s8686_s25 + $0x1c8] sm:$0xff]  }
  0x88   : > { %7896 = vmatprep.mubr.msk.bf16.mxu0 %vm2032_vm2, %v8426_v2  ;;  %8152 = vmatprep.mubr.msk.bf16.mxu1 %vm2032_vm2, %v8427_v3  ;;  %v8481_v2 = vld [vmem:[%s8686_s25 + $0x5c8] sm:$0xff]   ;;  %v8482_v3 = vld [vmem:[%s8686_s25 + $0x1d0] sm:$0xff]  }
  0x8f   : > { %7897 = vmatmul.mubr.msk.bf16.gmra.mrb[60].mxu0 %vm2032_vm2, %v8428_v4  ;;  %8153 = vmatmul.mubr.msk.bf16.gmra.mrb[60].mxu1 %vm2032_vm2, %v8429_v5 }
  0x90   : > { %7900 = vmatprep.mubr.msk.bf16.mxu0 %vm2032_vm2, %v8430_v6  ;;  %8156 = vmatprep.mubr.msk.bf16.mxu1 %vm2032_vm2, %v8431_v7 }
  0x97   : > { %7901 = vmatmul.mubr.msk.bf16.gmra.mrb[64].mxu0 %vm2032_vm2, %v8432_v8  ;;  %8157 = vmatmul.mubr.msk.bf16.gmra.mrb[64].mxu1 %vm2032_vm2, %v8433_v9 }
  0x98   : > { %7904 = vmatprep.mubr.msk.bf16.mxu0 %vm2032_vm2, %v8434_v10  ;;  %8160 = vmatprep.mubr.msk.bf16.mxu1 %vm2032_vm2, %v8435_v11  ;;  %v8483_v10 = vld [vmem:[%s8686_s25 + $0x5d0] sm:$0xff]  }
  0x9f   : > { %7905 = vmatmul.mubr.msk.bf16.gmra.mrb[68].mxu0 %vm2032_vm2, %v8436_v12  ;;  %8161 = vmatmul.mubr.msk.bf16.gmra.mrb[68].mxu1 %vm2032_vm2, %v8437_v13  ;;  %v8484_v12 = vld [vmem:[%s8686_s25 + $0x1d8] sm:$0xff]  }
  0xa0   : > { %7908 = vmatprep.mubr.msk.bf16.mxu0 %vm2032_vm2, %v8438_v14  ;;  %8164 = vmatprep.mubr.msk.bf16.mxu1 %vm2032_vm2, %v8439_v15  ;;  %v8485_v14 = vld [vmem:[%s8686_s25 + $0x5d8] sm:$0xff]   ;;  %v8486_v15 = vld [vmem:[%s8686_s25 + $0x1e0] sm:$0xff]  }
  0xa7   : > { %7909 = vmatmul.mubr.msk.bf16.gmra.mrb[72].mxu0 %vm2032_vm2, %v8440_v16  ;;  %8165 = vmatmul.mubr.msk.bf16.gmra.mrb[72].mxu1 %vm2032_vm2, %v8441_v17 }
  0xa8   : > { %7912 = vmatprep.mubr.msk.bf16.mxu0 %vm2032_vm2, %v8442_v18  ;;  %8168 = vmatprep.mubr.msk.bf16.mxu1 %vm2032_vm2, %v8443_v19 }
  0xaf   : > { %7913 = vmatmul.mubr.msk.bf16.gmra.mrb[76].mxu0 %vm2032_vm2, %v8444_v20  ;;  %8169 = vmatmul.mubr.msk.bf16.gmra.mrb[76].mxu1 %vm2032_vm2, %v8445_v21 }
  0xb0   : > { %7916 = vmatprep.mubr.msk.bf16.mxu0 %vm2032_vm2, %v8446_v22  ;;  %8172 = vmatprep.mubr.msk.bf16.mxu1 %vm2032_vm2, %v8447_v23  ;;  %v8487_v22 = vld [vmem:[%s8686_s25 + $0x5e0] sm:$0xff]  }
  0xb7   : > { %7917 = vmatmul.mubr.msk.bf16.gmra.mrb[80].mxu0 %vm2032_vm2, %v8448_v24  ;;  %8173 = vmatmul.mubr.msk.bf16.gmra.mrb[80].mxu1 %vm2032_vm2, %v8449_v25  ;;  %v8488_v25 = vld [vmem:[%s8686_s25 + $0x1e8] sm:$0xff]  }
  0xb8   : > { %7920 = vmatprep.mubr.msk.bf16.mxu0 %vm2032_vm2, %v8450_v26  ;;  %8176 = vmatprep.mubr.msk.bf16.mxu1 %vm2032_vm2, %v8451_v27 }
  0xbf   : > { %7921 = vmatmul.mubr.msk.bf16.gmra.mrb[84].mxu0 %vm2032_vm2, %v8452_v28  ;;  %8177 = vmatmul.mubr.msk.bf16.gmra.mrb[84].mxu1 %vm2032_vm2, %v8453_v29 }
  0xc0   : > { %7924 = vmatprep.mubr.msk.bf16.mxu0 %vm2032_vm2, %v8454_v30  ;;  %8180 = vmatprep.mubr.msk.bf16.mxu1 %vm2032_vm2, %v8455_v31  ;;  %v8489_v30 = vld [vmem:[%s8686_s25 + $0x5e8] sm:$0xff]   ;;  %v8490_v31 = vld [vmem:[%s8686_s25 + $0x1f0] sm:$0xff]  }
  0xc7   : > { %7925 = vmatmul.mubr.msk.bf16.gmra.mrb[88].mxu0 %vm2032_vm2, %v8456_v32  ;;  %8181 = vmatmul.mubr.msk.bf16.gmra.mrb[88].mxu1 %vm2032_vm2, %v8457_v33 }
  0xc8   : > { %7928 = vmatprep.mubr.msk.bf16.mxu0 %vm2032_vm2, %v8458_v34  ;;  %8184 = vmatprep.mubr.msk.bf16.mxu1 %vm2032_vm2, %v8459_v35  ;;  %v8491_v34 = vld [vmem:[%s8686_s25 + $0x5f0] sm:$0xff]  }
  0xcf   : > { %7929 = vmatmul.mubr.msk.bf16.gmra.mrb[92].mxu0 %vm2032_vm2, %v8460_v36  ;;  %8185 = vmatmul.mubr.msk.bf16.gmra.mrb[92].mxu1 %vm2032_vm2, %v8461_v37 }
  0xd0   : > { %7932 = vmatprep.mubr.msk.bf16.mxu0 %vm2032_vm2, %v8462_v38  ;;  %8188 = vmatprep.mubr.msk.bf16.mxu1 %vm2032_vm2, %v8463_v39  ;;  %v8492_v39 = vld [vmem:[%s8686_s25 + $0x1f8] sm:$0xff]  }
  0xd7   : > { %7933 = vmatmul.mubr.msk.bf16.gmra.mrb[96].mxu0 %vm2032_vm2, %v8464_v40  ;;  %8189 = vmatmul.mubr.msk.bf16.gmra.mrb[96].mxu1 %vm2032_vm2, %v8465_v41 }
  0xd8   : > { %7936 = vmatprep.mubr.msk.bf16.mxu0 %vm2032_vm2, %v8466_v42  ;;  %8192 = vmatprep.mubr.msk.bf16.mxu1 %vm2032_vm2, %v8467_v43  ;;  %v8493_v42 = vld [vmem:[%s8686_s25 + $0x5f8] sm:$0xff]   ;;  %v8494_v43 = vld [vmem:[%s8686_s25 + $0x200] sm:$0xff]  }
  0xdf   : > { %7937 = vmatmul.mubr.msk.bf16.gmra.mrb[100].mxu0 %vm2032_vm2, %v8468_v44  ;;  %8193 = vmatmul.mubr.msk.bf16.gmra.mrb[100].mxu1 %vm2032_vm2, %v8469_v45 }
  0xe0   : > { %7940 = vmatprep.mubr.msk.bf16.mxu0 %vm2032_vm2, %v8470_v46  ;;  %8196 = vmatprep.mubr.msk.bf16.mxu1 %vm2032_vm2, %v8471_v47  ;;  %v8495_v46 = vld [vmem:[%s8686_s25 + $0x600] sm:$0xff]  }
  0xe7   : > { %7941 = vmatmul.mubr.msk.bf16.gmra.mrb[104].mxu0 %vm2032_vm2, %v8472_v48  ;;  %8197 = vmatmul.mubr.msk.bf16.gmra.mrb[104].mxu1 %vm2032_vm2, %v8473_v49 }
  0xe8   : > { %7944 = vmatprep.mubr.msk.bf16.mxu0 %vm2032_vm2, %v8474_v50  ;;  %8200 = vmatprep.mubr.msk.bf16.mxu1 %vm2032_vm2, %v8475_v51  ;;  %v8496_v51 = vld [vmem:[%s8686_s25 + $0x208] sm:$0xff]  }
  0xea   : > { %v8909_v53 = vpop.f32.mrb[0].mxu0  ;;  %v8915_v57 = vpop.f32.mrb[0].mxu1 }
  0xeb   : > { %v8913_v56 = vpop.f32.mrb[1].mxu0  ;;  %v8919_v59 = vpop.f32.mrb[1].mxu1 }
  0xec   : > { %v8917_v58 = vpop.f32.mrb[2].mxu0  ;;  %v8923_v61 = vpop.f32.mrb[2].mxu1 }
  0xed   : > { %v8921_v60 = vpop.f32.mrb[3].mxu0  ;;  %v8926_v63 = vpop.f32.mrb[3].mxu1 }
  0xef   : > { %7945 = vmatmul.mubr.msk.bf16.gmra.mrb[108].mxu0 %vm2032_vm2, %v8476_v52  ;;  %8201 = vmatmul.mubr.msk.bf16.gmra.mrb[108].mxu1 %vm2032_vm2, %v8477_v54  ;;  %v9038_v52 = vld [vmem:[%s14035_s2] ss:$0 sm:$0xff] }
  0xf0   : > { %7948 = vmatprep.mubr.msk.bf16.mxu0 %vm2032_vm2, %v8478_v55  ;;  %8204 = vmatprep.mubr.msk.bf16.mxu1 %vm2032_vm2, %v8479_v62  ;;  %v8497_v62 = vld [vmem:[%s8686_s25 + $0x608] sm:$0xff]  }
  0xf2   : > { %v8933_v1 = vpop.f32.mrb[4].mxu0  ;;  %v8939_v5 = vpop.f32.mrb[4].mxu1 }
  0xf3   : > { %v8937_v4 = vpop.f32.mrb[5].mxu0  ;;  %v8943_v7 = vpop.f32.mrb[5].mxu1 }
  0xf4   : > { %v8941_v6 = vpop.f32.mrb[6].mxu0  ;;  %v8947_v9 = vpop.f32.mrb[6].mxu1 }
  0xf5   : > { %v8945_v8 = vpop.f32.mrb[7].mxu0  ;;  %v8950_v11 = vpop.f32.mrb[7].mxu1 }
  0xf7   : > { %7949 = vmatmul.mubr.msk.bf16.gmra.mrb[112].mxu0 %vm2032_vm2, %v8480_v0  ;;  %8205 = vmatmul.mubr.msk.bf16.gmra.mrb[112].mxu1 %vm2032_vm2, %v8481_v2  ;;  %v8498_v0 = vld [vmem:[%s8686_s25 + $0x210] sm:$0xff]  }
  0xf8   : > { %7952 = vmatprep.mubr.msk.bf16.mxu0 %vm2032_vm2, %v8482_v3  ;;  %8208 = vmatprep.mubr.msk.bf16.mxu1 %vm2032_vm2, %v8483_v10  ;;  %v8499_v10 = vld [vmem:[%s8686_s25 + $0x610] sm:$0xff]  }
  0xfa   : > { %v8957_v13 = vpop.f32.mrb[8].mxu0  ;;  %v8963_v17 = vpop.f32.mrb[8].mxu1 }
  0xfb   : > { %v8961_v16 = vpop.f32.mrb[9].mxu0  ;;  %v8967_v19 = vpop.f32.mrb[9].mxu1 }
  0xfc   : > { %v8965_v18 = vpop.f32.mrb[10].mxu0  ;;  %v8971_v21 = vpop.f32.mrb[10].mxu1 }
  0xfd   : > { %v8969_v20 = vpop.f32.mrb[11].mxu0  ;;  %v8974_v23 = vpop.f32.mrb[11].mxu1 }
  0xff   : > { %7953 = vmatmul.mubr.msk.bf16.gmra.mrb[116].mxu0 %vm2032_vm2, %v8484_v12  ;;  %8209 = vmatmul.mubr.msk.bf16.gmra.mrb[116].mxu1 %vm2032_vm2, %v8485_v14  ;;  %v9055_v14 = vadd.f32 %v8909_v53, %v9038_v52  ;;  %v9070_v53 = vadd.f32 %v8917_v58, %v9038_v52  ;;  %v9091_v58 = vadd.f32 %v8923_v61, %v9038_v52 }
 0x100   : > { %7956 = vmatprep.mubr.msk.bf16.mxu0 %vm2032_vm2, %v8486_v15  ;;  %8212 = vmatprep.mubr.msk.bf16.mxu1 %vm2032_vm2, %v8487_v22  ;;  %v9113_v61 = vadd.f32 %v8941_v6, %v9038_v52  ;;  %v8503_v22 = vld [vmem:[%s8686_s25 + $0x620] sm:$0xff]   ;;  %v9134_v6 = vadd.f32 %v8947_v9, %v9038_v52  ;;  %v9178_v9 = vadd.f32 %v8963_v17, %v9038_v52 }
 0x101   : > { %v9199_v17 = vadd.f32 %v9038_v52, %v8974_v23 }
 0x102   : > { %v8980_v24 = vpop.f32.mrb[12].mxu0  ;;  %v8985_v27 = vpop.f32.mrb[12].mxu1 }
 0x103   : > { %v8983_v26 = vpop.f32.mrb[13].mxu0  ;;  %v8989_v29 = vpop.f32.mrb[13].mxu1  ;;  %v9221_v23 = vadd.f32 %v8985_v27, %v9038_v52 }
 0x104   : > { %v8987_v28 = vpop.f32.mrb[14].mxu0  ;;  %v8995_v33 = vpop.f32.mrb[14].mxu1 }
 0x105   : > { %v8993_v32 = vpop.f32.mrb[15].mxu0  ;;  %v8998_v35 = vpop.f32.mrb[15].mxu1  ;;  %14242 = vst [vmem:[#allocation17_spill] sm:$0xff] %v9221_v23 }
 0x106   : > { %v9242_v27 = vadd.f32 %v9038_v52, %v8998_v35 }
 0x107   : > { %7957 = vmatmul.mubr.msk.bf16.gmra.mrb[120].mxu0 %vm2032_vm2, %v8488_v25  ;;  %8213 = vmatmul.mubr.msk.bf16.gmra.mrb[120].mxu1 %vm2032_vm2, %v8489_v30  ;;  %v9066_v25 = vadd.f32 %v9038_v52, %v8913_v56  ;;  %v9074_v30 = vadd.f32 %v8915_v57, %v9038_v52  ;;  %v9087_v56 = vadd.f32 %v9038_v52, %v8919_v59 }
 0x108   : > { %7960 = vmatprep.mubr.msk.bf16.mxu0 %vm2032_vm2, %v8490_v31  ;;  %8216 = vmatprep.mubr.msk.bf16.mxu1 %vm2032_vm2, %v8491_v34  ;;  %v9095_v57 = vadd.f32 %v9038_v52, %v8926_v63  ;;  %v9109_v59 = vadd.f32 %v9038_v52, %v8937_v4  ;;  %v9117_v63 = vadd.f32 %v8939_v5, %v9038_v52 }
 0x109   : > { %v9130_v4 = vadd.f32 %v9038_v52, %v8943_v7  ;;  %v9138_v5 = vadd.f32 %v9038_v52, %v8950_v11  ;;  %v9147_v7 = vadd.f32 %v8957_v13, %v9038_v52  ;;  %v8504_v11 = vld [vmem:[%s8686_s25 + $0x228] sm:$0xff]   ;;  %v9187_v13 = vadd.f32 %v9038_v52, %v8969_v20  ;;  %14248 = vst [vmem:[#allocation23_spill] sm:$0xff] %v9242_v27 }
 0x10a   : > { %v9004_v36 = vpop.f32.mrb[16].mxu0  ;;  %v9008_v38 = vpop.f32.mrb[16].mxu1  ;;  %v9209_v20 = vadd.f32 %v8980_v24, %v9038_v52  ;;  %v9230_v24 = vadd.f32 %v9038_v52, %v8993_v32  ;;  %v8509_v32 = vld [vmem:[%s8686_s25 + $0x638] sm:$0xff]  }
 0x10b   : > { %v9006_v37 = vpop.f32.mrb[17].mxu0  ;;  %v9013_v41 = vpop.f32.mrb[17].mxu1 }
 0x10c   : > { %v9011_v40 = vpop.f32.mrb[18].mxu0  ;;  %v9019_v45 = vpop.f32.mrb[18].mxu1  ;;  %14239 = vst [vmem:[#allocation14_spill] sm:$0xff] %v9209_v20  ;;  %14245 = vst [vmem:[#allocation20_spill] sm:$0xff] %v9230_v24 }
 0x10d   : > { %v9017_v44 = vpop.f32.mrb[19].mxu0  ;;  %v9022_v47 = vpop.f32.mrb[19].mxu1 }
 0x10f   : > { %7961 = vmatmul.mubr.msk.bf16.gmra.mrb[124].mxu0 %vm2032_vm2, %v8492_v39  ;;  %8217 = vmatmul.mubr.msk.bf16.gmra.mrb[124].mxu1 %vm2032_vm2, %v8493_v42  ;;  %v8500_v39 = vld [vmem:[%s8686_s25 + $0x218] sm:$0xff]   ;;  %v9083_v42 = vadd.f32 %v9038_v52, %v8921_v60  ;;  %v9105_v60 = vadd.f32 %v8933_v1, %v9038_v52  ;;  %v9126_v1 = vadd.f32 %v9038_v52, %v8945_v8  ;;  %v8506_v8 = vld [vmem:[%s8686_s25 + $0x230] sm:$0xff]  }
 0x110   : > { %7964 = vmatprep.mubr.msk.bf16.mxu0 %vm2032_vm2, %v8494_v43  ;;  %8220 = vmatprep.mubr.msk.bf16.mxu1 %vm2032_vm2, %v8495_v46 }
 0x112   : > { %v9028_v48 = vpop.f32.mrb[20].mxu0  ;;  %v9032_v50 = vpop.f32.mrb[20].mxu1 }
 0x113   : > { %v9030_v49 = vpop.f32.mrb[21].mxu0  ;;  %v9042_v55 = vpop.f32.mrb[21].mxu1 }
 0x114   : > { %v9040_v54 = vpop.f32.mrb[22].mxu0  ;;  %v9048_v3 = vpop.f32.mrb[22].mxu1 }
 0x115   : > { %v9046_v2 = vpop.f32.mrb[23].mxu0  ;;  %v9051_v12 = vpop.f32.mrb[23].mxu1 }
 0x117   : > { %7965 = vmatmul.mubr.msk.bf16.gmra.mrb[128].mxu0 %vm2032_vm2, %v8496_v51  ;;  %8221 = vmatmul.mubr.msk.bf16.gmra.mrb[128].mxu1 %vm2032_vm2, %v8497_v62  ;;  %v8501_v51 = vld [vmem:[%s8686_s25 + $0x618] sm:$0xff]   ;;  %v8502_v62 = vld [vmem:[%s8686_s25 + $0x220] sm:$0xff]  }
 0x118   : > { %7968 = vmatprep.mubr.msk.bf16.mxu0 %vm2032_vm2, %v8498_v0  ;;  %8224 = vmatprep.mubr.msk.bf16.mxu1 %vm2032_vm2, %v8499_v10 }
 0x11a   : > { %v9061_v15 = vpop.f32.mrb[24].mxu0  ;;  %v9078_v34 = vpop.f32.mrb[24].mxu1 }
 0x11b   : > { %v9076_v31 = vpop.f32.mrb[25].mxu0  ;;  %14228 = vst [vmem:[#allocation3_spill] sm:$0xff] %v9078_v34  ;;  %v9099_v46 = vpop.f32.mrb[25].mxu1 }
 0x11c   : > { %14227 = vst [vmem:[#allocation2_spill] sm:$0xff] %v9076_v31  ;;  %v9097_v43 = vpop.f32.mrb[26].mxu0  ;;  %14230 = vst [vmem:[#allocation5_spill] sm:$0xff] %v9099_v46  ;;  %v9121_v10 = vpop.f32.mrb[26].mxu1 }
 0x11d   : > { %14229 = vst [vmem:[#allocation4_spill] sm:$0xff] %v9097_v43  ;;  %v9119_v0 = vpop.f32.mrb[27].mxu0  ;;  %14232 = vst [vmem:[#allocation7_spill] sm:$0xff] %v9121_v10  ;;  %v9170_v10 = vadd.f32 %v9038_v52, %v8961_v16  ;;  %v9191_v16 = vadd.f32 %v9038_v52, %v8967_v19  ;;  %v8505_v43 = vld [vmem:[%s8686_s25 + $0x628] sm:$0xff]   ;;  %v9213_v19 = vadd.f32 %v9038_v52, %v8983_v26 }
 0x11e   : > { %14231 = vst [vmem:[#allocation6_spill] sm:$0xff] %v9119_v0  ;;  %v9140_v0 = vpop.f32.mrb[27].mxu1  ;;  %v9234_v26 = vadd.f32 %v9038_v52, %v8989_v29  ;;  %v9251_v29 = vadd.f32 %v9004_v36, %v9038_v52 }
 0x11f   : > { %14233 = vst [vmem:[#allocation8_spill] sm:$0xff] %v9140_v0  ;;  %7969 = vmatmul.mubr.msk.bf16.gmra.mrb[132].mxu0 %vm2032_vm2, %v8500_v39  ;;  %8225 = vmatmul.mubr.msk.bf16.gmra.mrb[132].mxu1 %vm2032_vm2, %v8501_v51  ;;  %14240 = vst [vmem:[#allocation15_spill] sm:$0xff] %v9213_v19  ;;  %v14251_v19 = vmax.f32 %v9055_v14, 0.0 }
 0x120   : > { %7972 = vmatprep.mubr.msk.bf16.mxu0 %vm2032_vm2, %v8502_v62  ;;  %8228 = vmatprep.mubr.msk.bf16.mxu1 %vm2032_vm2, %v8503_v22  ;;  %v9174_v22 = vadd.f32 %v8965_v18, %v9038_v52  ;;  %v9195_v18 = vadd.f32 %v8971_v21, %v9038_v52  ;;  %v9217_v21 = vadd.f32 %v8987_v28, %v9038_v52 }
 0x121   : > { %14246 = vst [vmem:[#allocation21_spill] sm:$0xff] %v9234_v26  ;;  %v9238_v28 = vadd.f32 %v8995_v33, %v9038_v52  ;;  %14250 = vst [vmem:[#allocation25_spill] sm:$0xff] %v9251_v29  ;;  %v9294_v29 = vadd.f32 %v9038_v52, %v9017_v44 }
 0x122   : > { %v9165_v62 = vpop.f32.mrb[28].mxu0  ;;  %v9182_v51 = vpop.f32.mrb[28].mxu1  ;;  %14241 = vst [vmem:[#allocation16_spill] sm:$0xff] %v9217_v21 }
 0x123   : > { %14234 = vst [vmem:[#allocation9_spill] sm:$0xff] %v9165_v62  ;;  %v9180_v0 = vpop.f32.mrb[29].mxu0  ;;  %14236 = vst [vmem:[#allocation11_spill] sm:$0xff] %v9182_v51  ;;  %v9203_v46 = vpop.f32.mrb[29].mxu1  ;;  %v8507_v51 = vld [vmem:[%s8686_s25 + $0x630] sm:$0xff]  }
 0x124   : > { %14235 = vst [vmem:[#allocation10_spill] sm:$0xff] %v9180_v0  ;;  %v9201_v39 = vpop.f32.mrb[30].mxu0  ;;  %14238 = vst [vmem:[#allocation13_spill] sm:$0xff] %v9203_v46  ;;  %v9225_v46 = vpop.f32.mrb[30].mxu1  ;;  %v9286_v0 = vadd.f32 %v9038_v52, %v9013_v41 }
 0x125   : > { %14237 = vst [vmem:[#allocation12_spill] sm:$0xff] %v9201_v39  ;;  %v9223_v39 = vpop.f32.mrb[31].mxu0  ;;  %14244 = vst [vmem:[#allocation19_spill] sm:$0xff] %v9225_v46  ;;  %v9272_v46 = vadd.f32 %v9038_v52, %v9006_v37 }
 0x126   : > { %14243 = vst [vmem:[#allocation18_spill] sm:$0xff] %v9223_v39  ;;  %14247 = vst [vmem:[#allocation22_spill] sm:$0xff] %v9238_v28  ;;  %v9244_v39 = vpop.f32.mrb[31].mxu1  ;;  %v8511_v28 = vld [vmem:[%s8686_s25 + $0x640] sm:$0xff]  }
 0x127   : > { %14249 = vst [vmem:[#allocation24_spill] sm:$0xff] %v9244_v39  ;;  %7973 = vmatmul.mubr.msk.bf16.gmra.mrb[136].mxu0 %vm2032_vm2, %v8504_v11  ;;  %8229 = vmatmul.mubr.msk.bf16.gmra.mrb[136].mxu1 %vm2032_vm2, %v8505_v43  ;;  %v8508_v39 = vld [vmem:[%s8686_s25 + $0x238] sm:$0xff]   ;;  %v9282_v43 = vadd.f32 %v9011_v40, %v9038_v52 }
 0x128   : > { %7976 = vmatprep.mubr.msk.bf16.mxu0 %vm2032_vm2, %v8506_v8  ;;  %8232 = vmatprep.mubr.msk.bf16.mxu1 %vm2032_vm2, %v8507_v51  ;;  %v9276_v51 = vadd.f32 %v9008_v38, %v9038_v52 }
 0x12a   : > { %v7870_v8 = vpop.f32.mrb[32].mxu0  ;;  %v8126_v35 = vpop.f32.mrb[32].mxu1 }
 0x12b   : > { %v2979_v33 = vadd.f32 %v7870_v8, %v9038_v52  ;;  %v2970_v36 = vpop.f32.mrb[33].mxu0  ;;  %v4003_v37 = vadd.f32 %v8126_v35, %v9038_v52  ;;  %v3994_v38 = vpop.f32.mrb[33].mxu1  ;;  %v8510_v8 = vld [vmem:[%s8686_s25 + $0x240] sm:$0xff]  }
 0x12c   : > { %v2971_v11 = vadd.f32 %v9038_v52, %v2970_v36  ;;  %v7871_v62 = vpop.f32.mrb[34].mxu0  ;;  %v3995_v40 = vadd.f32 %v9038_v52, %v3994_v38  ;;  %v8127_v24 = vpop.f32.mrb[34].mxu1 }
 0x12d   : > { %v4923_v27 = vmax.f32 %v2979_v33, 0.0  ;;  %v2982_v34 = vadd.f32 %v7871_v62, %v9038_v52  ;;  %v2973_v41 = vpop.f32.mrb[35].mxu0  ;;  %v5179_v31 = vmax.f32 %v4003_v37, 0.0  ;;  %v4006_v36 = vadd.f32 %v8127_v24, %v9038_v52  ;;  %v3997_v26 = vpop.f32.mrb[35].mxu1 }
 0x12e   : > { %v4921_v35 = vmax.f32 %v2971_v11, 0.0  ;;  %v2974_v21 = vadd.f32 %v9038_v52, %v2973_v41  ;;  %v5177_v44 = vmax.f32 %v3995_v40, 0.0  ;;  %v3998_v38 = vadd.f32 %v9038_v52, %v3997_v26 }
 0x12f   : > { %v9303_v23 = vmax.f32 %v14251_v19, %v4923_v27  ;;  %v4924_v33 = vmax.f32 %v2982_v34, 0.0  ;;  %7977 = vmatmul.mubr.msk.bf16.gmra.mrb[140].mxu0 %vm2032_vm2, %v8508_v39  ;;  %v14252_v62 = vmax.f32 %v9074_v30, 0.0  ;;  %v14253_v11 = vmax.f32 %v9066_v25, 0.0  ;;  %8233 = vmatmul.mubr.msk.bf16.gmra.mrb[140].mxu1 %vm2032_vm2, %v8509_v32 }
 0x130   : > { %v5180_v37 = vmax.f32 %v4006_v36, 0.0  ;;  %v4922_v41 = vmax.f32 %v2974_v21, 0.0  ;;  %7980 = vmatprep.mubr.msk.bf16.mxu0 %vm2032_vm2, %v8510_v8  ;;  %v14254_v34 = vmax.f32 %v9087_v56, 0.0  ;;  %v14255_v30 = vmax.f32 %v9070_v53, 0.0  ;;  %8236 = vmatprep.mubr.msk.bf16.mxu1 %vm2032_vm2, %v8511_v28 }
 0x131   : > { %v9309_v20 = vmax.f32 %v14252_v62, %v5179_v31  ;;  %v9313_v24 = vmax.f32 %v14253_v11, %v4921_v35  ;;  %v5178_v25 = vmax.f32 %v3998_v38, 0.0  ;;  %v9330_v21 = vadd.f32 %v9019_v45, %v9038_v52 }
 0x132   : > { %v9320_v39 = vmax.f32 %v14254_v34, %v5177_v44  ;;  %v9324_v31 = vmax.f32 %v14255_v30, %v4924_v33  ;;  %v14256_v26 = vmax.f32 %v9091_v58, 0.0  ;;  %v14257_v56 = vmax.f32 %v9083_v42, 0.0  ;;  %v7874_v53 = vpop.f32.mrb[36].mxu0  ;;  %v8130_v58 = vpop.f32.mrb[36].mxu1  ;;  %v8512_v44 = vld [vmem:[%s8686_s25 + $0x248] sm:$0xff]  }
 0x133   : > { %v14258_v40 = vmax.f32 %v9095_v57, 0.0  ;;  %v2995_v45 = vadd.f32 %v7874_v53, %v9038_v52  ;;  %v2986_v36 = vpop.f32.mrb[37].mxu0  ;;  %v9351_v33 = vadd.f32 %v9038_v52, %v9022_v47  ;;  %v4019_v38 = vadd.f32 %v8130_v58, %v9038_v52  ;;  %v4010_v11 = vpop.f32.mrb[37].mxu1  ;;  %v8515_v53 = vld [vmem:[%s8686_s25 + $0x650] sm:$0xff]  }
 0x134   : > { %v9334_v27 = vmax.f32 %v14256_v26, %v5180_v37  ;;  %v9338_v32 = vmax.f32 %v14257_v56, %v4922_v41  ;;  %v2987_v62 = vadd.f32 %v9038_v52, %v2986_v36  ;;  %v7875_v57 = vpop.f32.mrb[38].mxu0  ;;  %v8513_v37 = vld [vmem:[%s8686_s25 + $0x648] sm:$0xff]   ;;  %v8514_v41 = vld [vmem:[%s8686_s25 + $0x250] sm:$0xff]   ;;  %v9359_v34 = vadd.f32 %v9028_v48, %v9038_v52  ;;  %v8131_v56 = vpop.f32.mrb[38].mxu1 }
 0x135   : > { %v9344_v35 = vmax.f32 %v14258_v40, %v5178_v25  ;;  %v4927_v30 = vmax.f32 %v2995_v45, 0.0  ;;  %v4011_v25 = vadd.f32 %v9038_v52, %v4010_v11  ;;  %v2998_v26 = vadd.f32 %v7875_v57, %v9038_v52  ;;  %v2989_v47 = vpop.f32.mrb[39].mxu0  ;;  %v4013_v8 = vpop.f32.mrb[39].mxu1 }
 0x136   : > { %v5183_v40 = vmax.f32 %v4019_v38, 0.0  ;;  %v4925_v58 = vmax.f32 %v2987_v62, 0.0  ;;  %v4022_v36 = vadd.f32 %v8131_v56, %v9038_v52  ;;  %v2990_v42 = vadd.f32 %v9038_v52, %v2989_v47 }
 0x137   : > { %v14259_v28 = vmax.f32 %v9105_v60, 0.0  ;;  %v5181_v48 = vmax.f32 %v4011_v25, 0.0  ;;  %v4928_v45 = vmax.f32 %v2998_v26, 0.0  ;;  %v4014_v11 = vadd.f32 %v9038_v52, %v4013_v8  ;;  %7981 = vmatmul.mubr.msk.bf16.gmra.mrb[144].mxu0 %vm2032_vm2, %v8512_v44  ;;  %8237 = vmatmul.mubr.msk.bf16.gmra.mrb[144].mxu1 %vm2032_vm2, %v8513_v37 }
 0x138   : > { %v14261_v57 = vmax.f32 %v9117_v63, 0.0  ;;  %v14263_v38 = vmax.f32 %v9109_v59, 0.0  ;;  %v5184_v56 = vmax.f32 %v4022_v36, 0.0  ;;  %v4926_v47 = vmax.f32 %v2990_v42, 0.0  ;;  %7984 = vmatprep.mubr.msk.bf16.mxu0 %vm2032_vm2, %v8514_v41  ;;  %8240 = vmatprep.mubr.msk.bf16.mxu1 %vm2032_vm2, %v8515_v53 }
 0x139   : > { %v9368_v14 = vmax.f32 %v14259_v28, %v4927_v30  ;;  %v14265_v8 = vmax.f32 %v9130_v4, 0.0  ;;  %v14267_v63 = vmax.f32 %v9113_v61, 0.0  ;;  %v5182_v59 = vmax.f32 %v4014_v11, 0.0 }
 0x13a   : > { %v9374_v19 = vmax.f32 %v14261_v57, %v5183_v40  ;;  %v9378_v62 = vmax.f32 %v14263_v38, %v4925_v58  ;;  %v9395_v37 = vadd.f32 %v9038_v52, %v9030_v49  ;;  %v14269_v41 = vmax.f32 %v9134_v6, 0.0  ;;  %v7878_v61 = vpop.f32.mrb[40].mxu0  ;;  %v8134_v58 = vpop.f32.mrb[40].mxu1  ;;  %v8517_v38 = vld [vmem:[%s8686_s25 + $0x658] sm:$0xff]  }
 0x13b   : > { %14260 = vst [vmem:[#allocation26_spill] sm:$0xff] %v9368_v14  ;;  %v9385_v28 = vmax.f32 %v14265_v8, %v5181_v48  ;;  %v9389_v44 = vmax.f32 %v14267_v63, %v4928_v45  ;;  %v14271_v4 = vmax.f32 %v9126_v1, 0.0  ;;  %v9408_v53 = vadd.f32 %v9032_v50, %v9038_v52  ;;  %v3002_v36 = vpop.f32.mrb[41].mxu0  ;;  %v8516_v1 = vld [vmem:[%s8686_s25 + $0x258] sm:$0xff]   ;;  %v4026_v11 = vpop.f32.mrb[41].mxu1 }
 0x13c   : > { %14262 = vst [vmem:[#allocation27_spill] sm:$0xff] %v9374_v19  ;;  %14264 = vst [vmem:[#allocation28_spill] sm:$0xff] %v9378_v62  ;;  %v9399_v30 = vmax.f32 %v14269_v41, %v5184_v56  ;;  %v14273_v49 = vmax.f32 %v9138_v5, 0.0  ;;  %v3011_v6 = vadd.f32 %v7878_v61, %v9038_v52  ;;  %v9418_v48 = vadd.f32 %v9040_v54, %v9038_v52  ;;  %v7879_v57 = vpop.f32.mrb[42].mxu0  ;;  %v8518_v56 = vld [vmem:[%s8686_s25 + $0x260] sm:$0xff]  }
 0x13d   : > { %14266 = vst [vmem:[#allocation29_spill] sm:$0xff] %v9385_v28  ;;  %14268 = vst [vmem:[#allocation30_spill] sm:$0xff] %v9389_v44  ;;  %v9403_v25 = vmax.f32 %v14271_v4, %v4926_v47  ;;  %v9422_v45 = vadd.f32 %v9038_v52, %v9042_v55  ;;  %v4035_v50 = vadd.f32 %v8134_v58, %v9038_v52  ;;  %v3005_v55 = vpop.f32.mrb[43].mxu0  ;;  %v8519_v41 = vld [vmem:[%s8686_s25 + $0x660] sm:$0xff]   ;;  %v14275_v26 = vmax.f32 %v9147_v7, 0.0 }
 0x13e   : > { %14270 = vst [vmem:[#allocation31_spill] sm:$0xff] %v9399_v30  ;;  %v9412_v40 = vmax.f32 %v14273_v49, %v5182_v59  ;;  %v3003_v5 = vadd.f32 %v9038_v52, %v3002_v36  ;;  %v9430_v47 = vadd.f32 %v9038_v52, %v9046_v2  ;;  %v4931_v8 = vmax.f32 %v3011_v6, 0.0  ;;  %v8135_v59 = vpop.f32.mrb[42].mxu1 }
 0x13f   : > { %14272 = vst [vmem:[#allocation32_spill] sm:$0xff] %v9403_v25  ;;  %v4027_v54 = vadd.f32 %v9038_v52, %v4026_v11  ;;  %v3014_v63 = vadd.f32 %v7879_v57, %v9038_v52  ;;  %v5187_v4 = vmax.f32 %v4035_v50, 0.0  ;;  %v4038_v49 = vadd.f32 %v8135_v59, %v9038_v52  ;;  %v4029_v36 = vpop.f32.mrb[43].mxu1  ;;  %7985 = vmatmul.mubr.msk.bf16.gmra.mrb[148].mxu0 %vm2032_vm2, %v8516_v1  ;;  %v8560_v25 = vld [vmem:[%s8686_s25 + $0x308] sm:$0xff]  }
 0x140   : > { %14274 = vst [vmem:[#allocation33_spill] sm:$0xff] %v9412_v40  ;;  %v4929_v61 = vmax.f32 %v3003_v5, 0.0  ;;  %v3006_v58 = vadd.f32 %v9038_v52, %v3005_v55  ;;  %v9439_v42 = vmax.f32 %v14275_v26, %v4931_v8  ;;  %v4030_v11 = vadd.f32 %v9038_v52, %v4029_v36  ;;  %8241 = vmatmul.mubr.msk.bf16.gmra.mrb[148].mxu1 %vm2032_vm2, %v8517_v38 }
 0x141   : > { %v5185_v2 = vmax.f32 %v4027_v54, 0.0  ;;  %v4932_v6 = vmax.f32 %v3014_v63, 0.0  ;;  %v14277_v57 = vmax.f32 %v9178_v9, 0.0  ;;  %v14279_v50 = vmax.f32 %v9170_v10, 0.0  ;;  %7988 = vmatprep.mubr.msk.bf16.mxu0 %vm2032_vm2, %v8518_v56  ;;  %8244 = vmatprep.mubr.msk.bf16.mxu1 %vm2032_vm2, %v8519_v41  ;;  %v14290_v41 = vld [vmem:[#allocation14_spill] sm:$0xff] }
 0x142   : > { %14276 = vst [vmem:[#allocation34_spill] sm:$0xff] %v9439_v42  ;;  %v5188_v59 = vmax.f32 %v4038_v49, 0.0  ;;  %v4930_v55 = vmax.f32 %v3006_v58, 0.0  ;;  %v14281_v26 = vmax.f32 %v9191_v16, 0.0  ;;  %v14282_v9 = vmax.f32 %v9174_v22, 0.0  ;;  %v7882_v22 = vpop.f32.mrb[44].mxu0 }
 0x143   : > { %v9445_v60 = vmax.f32 %v14277_v57, %v5187_v4  ;;  %v9449_v5 = vmax.f32 %v14279_v50, %v4929_v61  ;;  %v5186_v10 = vmax.f32 %v4030_v11, 0.0  ;;  %v9466_v38 = vadd.f32 %v9048_v3, %v9038_v52  ;;  %v3018_v36 = vpop.f32.mrb[45].mxu0 }
 0x144   : > { %v9456_v1 = vmax.f32 %v14281_v26, %v5185_v2  ;;  %v9460_v8 = vmax.f32 %v14282_v9, %v4932_v6  ;;  %v14284_v56 = vmax.f32 %v9195_v18, 0.0  ;;  %v14286_v16 = vmax.f32 %v9187_v13, 0.0  ;;  %v8138_v18 = vpop.f32.mrb[44].mxu1  ;;  %v8520_v2 = vld [vmem:[%s8686_s25 + $0x268] sm:$0xff]  }
 0x145   : > { %14278 = vst [vmem:[#allocation35_spill] sm:$0xff] %v9445_v60  ;;  %14280 = vst [vmem:[#allocation36_spill] sm:$0xff] %v9449_v5  ;;  %v14288_v49 = vmax.f32 %v9199_v17, 0.0  ;;  %v3027_v3 = vadd.f32 %v7882_v22, %v9038_v52  ;;  %v9487_v6 = vadd.f32 %v9038_v52, %v9051_v12  ;;  %v4051_v11 = vadd.f32 %v8138_v18, %v9038_v52  ;;  %v4042_v50 = vpop.f32.mrb[45].mxu1  ;;  %v7883_v17 = vpop.f32.mrb[46].mxu0  ;;  %v8523_v22 = vld [vmem:[%s8686_s25 + $0x670] sm:$0xff]  }
 0x146   : > { %14283 = vst [vmem:[#allocation37_spill] sm:$0xff] %v9460_v8  ;;  %v9470_v63 = vmax.f32 %v14284_v56, %v5188_v59  ;;  %v9474_v4 = vmax.f32 %v14286_v16, %v4930_v55  ;;  %v3019_v57 = vadd.f32 %v9038_v52, %v3018_v36  ;;  %v8521_v59 = vld [vmem:[%s8686_s25 + $0x668] sm:$0xff]   ;;  %v8522_v55 = vld [vmem:[%s8686_s25 + $0x270] sm:$0xff]   ;;  %v9495_v26 = vadd.f32 %v9061_v15, %v9038_v52  ;;  %v8139_v16 = vpop.f32.mrb[46].mxu1  ;;  %v3021_v12 = vpop.f32.mrb[47].mxu0 }
 0x147   : > { %v9480_v58 = vmax.f32 %v14288_v49, %v5186_v10  ;;  %v4935_v9 = vmax.f32 %v3027_v3, 0.0  ;;  %v4043_v10 = vadd.f32 %v9038_v52, %v4042_v50  ;;  %v3030_v56 = vadd.f32 %v7883_v17, %v9038_v52  ;;  %v4045_v61 = vpop.f32.mrb[47].mxu1  ;;  %7989 = vmatmul.mubr.msk.bf16.gmra.mrb[152].mxu0 %vm2032_vm2, %v8520_v2  ;;  %v14293_v17 = vld [vmem:[#allocation17_spill] sm:$0xff] }
 0x148   : > { %14285 = vst [vmem:[#allocation38_spill] sm:$0xff] %v9470_v63  ;;  %14287 = vst [vmem:[#allocation39_spill] sm:$0xff] %v9474_v4  ;;  %v5191_v49 = vmax.f32 %v4051_v11, 0.0  ;;  %v4933_v18 = vmax.f32 %v3019_v57, 0.0  ;;  %v4054_v36 = vadd.f32 %v8139_v16, %v9038_v52  ;;  %v3022_v13 = vadd.f32 %v9038_v52, %v3021_v12  ;;  %v14296_v11 = vld [vmem:[#allocation15_spill] sm:$0xff]  ;;  %8245 = vmatmul.mubr.msk.bf16.gmra.mrb[152].mxu1 %vm2032_vm2, %v8521_v59 }
 0x149   : > { %14289 = vst [vmem:[#allocation40_spill] sm:$0xff] %v9480_v58  ;;  %v14291_v7 = vmax.f32 %v14290_v41, 0.0  ;;  %v5189_v15 = vmax.f32 %v4043_v10, 0.0  ;;  %v4936_v3 = vmax.f32 %v3030_v56, 0.0  ;;  %v4046_v50 = vadd.f32 %v9038_v52, %v4045_v61  ;;  %7992 = vmatprep.mubr.msk.bf16.mxu0 %vm2032_vm2, %v8522_v55  ;;  %v14299_v41 = vld [vmem:[#allocation21_spill] sm:$0xff]  ;;  %8248 = vmatprep.mubr.msk.bf16.mxu1 %vm2032_vm2, %v8523_v22  ;;  %v14306_v55 = vld [vmem:[#allocation22_spill] sm:$0xff] }
 0x14a   : > { %v14294_v60 = vmax.f32 %v14293_v17, 0.0  ;;  %v14297_v57 = vmax.f32 %v14296_v11, 0.0  ;;  %v5192_v12 = vmax.f32 %v4054_v36, 0.0  ;;  %v4934_v42 = vmax.f32 %v3022_v13, 0.0  ;;  %v14309_v17 = vld [vmem:[#allocation20_spill] sm:$0xff]  ;;  %v14312_v22 = vld [vmem:[#allocation3_spill] sm:$0xff] }
 0x14b   : > { %v9504_v54 = vmax.f32 %v14291_v7, %v4935_v9  ;;  %v14300_v61 = vmax.f32 %v14299_v41, 0.0  ;;  %v14302_v9 = vld [vmem:[#allocation16_spill] sm:$0xff]  ;;  %v5190_v56 = vmax.f32 %v4046_v50, 0.0  ;;  %v14313_v41 = vld [vmem:[#allocation23_spill] sm:$0xff]  ;;  %v8525_v50 = vld [vmem:[%s8686_s25 + $0x678] sm:$0xff]  }
 0x14c   : > { %v9510_v63 = vmax.f32 %v14294_v60, %v5191_v49  ;;  %v9514_v16 = vmax.f32 %v14297_v57, %v4933_v18  ;;  %v14303_v60 = vmax.f32 %v14302_v9, 0.0  ;;  %v14305_v49 = vld [vmem:[#allocation2_spill] sm:$0xff]  ;;  %v14307_v18 = vmax.f32 %v14306_v55, 0.0  ;;  %v8524_v55 = vld [vmem:[%s8686_s25 + $0x278] sm:$0xff]   ;;  %v8561_v58 = vld [vmem:[%s8686_s25 + $0x708] sm:$0xff]  }
 0x14d   : > { %14292 = vst [vmem:[#allocation14_spill] sm:$0xff] %v9504_v54  ;;  %v9521_v2 = vmax.f32 %v14300_v61, %v5189_v15  ;;  %v9531_v59 = vadd.f32 %v9038_v52, %v14305_v49  ;;  %v14310_v15 = vmax.f32 %v14309_v17, 0.0  ;;  %v9544_v57 = vadd.f32 %v14312_v22, %v9038_v52  ;;  %v14317_v17 = vld [vmem:[#allocation5_spill] sm:$0xff]  ;;  %v14318_v13 = vld [vmem:[#allocation6_spill] sm:$0xff] }
 0x14e   : > { %14295 = vst [vmem:[#allocation17_spill] sm:$0xff] %v9510_v63  ;;  %14298 = vst [vmem:[#allocation15_spill] sm:$0xff] %v9514_v16  ;;  %v9525_v10 = vmax.f32 %v14303_v60, %v4936_v3  ;;  %v9535_v36 = vmax.f32 %v14307_v18, %v5192_v12  ;;  %v7886_v3 = vpop.f32.mrb[48].mxu0  ;;  %v14314_v61 = vmax.f32 %v14313_v41, 0.0  ;;  %v8142_v60 = vpop.f32.mrb[48].mxu1  ;;  %v9566_v7 = vadd.f32 %v9038_v52, %v14318_v13 }
 0x14f   : > { %14301 = vst [vmem:[#allocation21_spill] sm:$0xff] %v9521_v2  ;;  %v9539_v11 = vmax.f32 %v14310_v15, %v4934_v42  ;;  %v3043_v12 = vadd.f32 %v7886_v3, %v9038_v52  ;;  %v3034_v49 = vpop.f32.mrb[49].mxu0  ;;  %v14316_v42 = vld [vmem:[#allocation4_spill] sm:$0xff]  ;;  %v9558_v15 = vadd.f32 %v9038_v52, %v14317_v17  ;;  %v4067_v22 = vadd.f32 %v8142_v60, %v9038_v52  ;;  %v8526_v3 = vld [vmem:[%s8686_s25 + $0x280] sm:$0xff]  }
 0x150   : > { %14304 = vst [vmem:[#allocation16_spill] sm:$0xff] %v9525_v10  ;;  %14308 = vst [vmem:[#allocation2_spill] sm:$0xff] %v9535_v36  ;;  %v9548_v9 = vmax.f32 %v14314_v61, %v5190_v56  ;;  %v9554_v18 = vadd.f32 %v14316_v42, %v9038_v52  ;;  %v3035_v41 = vadd.f32 %v9038_v52, %v3034_v49  ;;  %v4058_v56 = vpop.f32.mrb[49].mxu1  ;;  %v7887_v61 = vpop.f32.mrb[50].mxu0  ;;  %v14319_v10 = vld [vmem:[#allocation25_spill] sm:$0xff]  ;;  %7993 = vmatmul.mubr.msk.bf16.gmra.mrb[156].mxu0 %vm2032_vm2, %v8524_v55 }
 0x151   : > { %14311 = vst [vmem:[#allocation22_spill] sm:$0xff] %v9539_v11  ;;  %v4939_v2 = vmax.f32 %v3043_v12, 0.0  ;;  %v4059_v42 = vadd.f32 %v9038_v52, %v4058_v56  ;;  %v8143_v16 = vpop.f32.mrb[50].mxu1  ;;  %v3037_v17 = vpop.f32.mrb[51].mxu0  ;;  %v8527_v11 = vld [vmem:[%s8686_s25 + $0x680] sm:$0xff]   ;;  %v5195_v63 = vmax.f32 %v4067_v22, 0.0  ;;  %8249 = vmatmul.mubr.msk.bf16.gmra.mrb[156].mxu1 %vm2032_vm2, %v8525_v50  ;;  %7996 = vmatprep.mubr.msk.bf16.mxu0 %vm2032_vm2, %v8526_v3 }
 0x152   : > { %14315 = vst [vmem:[#allocation20_spill] sm:$0xff] %v9548_v9  ;;  %v3046_v9 = vadd.f32 %v7887_v61, %v9038_v52  ;;  %v4937_v60 = vmax.f32 %v3035_v41, 0.0  ;;  %v4070_v49 = vadd.f32 %v8143_v16, %v9038_v52  ;;  %v3038_v36 = vadd.f32 %v9038_v52, %v3037_v17  ;;  %v4061_v54 = vpop.f32.mrb[51].mxu1  ;;  %8252 = vmatprep.mubr.msk.bf16.mxu1 %vm2032_vm2, %v8527_v11 }
 0x153   : > { %v14320_v8 = vmax.f32 %v14319_v10, 0.0  ;;  %v5193_v13 = vmax.f32 %v4059_v42, 0.0  ;;  %v4062_v56 = vadd.f32 %v9038_v52, %v4061_v54  ;;  %v14322_v61 = vmax.f32 %v9276_v51, 0.0  ;;  %v8531_v42 = vld [vmem:[%s8686_s25 + $0x690] sm:$0xff]  }
 0x154   : > { %v4940_v12 = vmax.f32 %v3046_v9, 0.0  ;;  %v14324_v22 = vmax.f32 %v9272_v46, 0.0  ;;  %v5196_v41 = vmax.f32 %v4070_v49, 0.0  ;;  %v4938_v17 = vmax.f32 %v3038_v36, 0.0  ;;  %v14330_v36 = vld [vmem:[#allocation7_spill] sm:$0xff] }
 0x155   : > { %v9575_v28 = vmax.f32 %v14320_v8, %v4939_v2  ;;  %v9581_v40 = vmax.f32 %v14322_v61, %v5195_v63  ;;  %v14326_v54 = vmax.f32 %v9286_v0, 0.0  ;;  %v14328_v51 = vmax.f32 %v9282_v43, 0.0  ;;  %v7890_v43 = vpop.f32.mrb[52].mxu0  ;;  %v14337_v61 = vld [vmem:[#allocation8_spill] sm:$0xff] }
 0x156   : > { %v9585_v16 = vmax.f32 %v14324_v22, %v4937_v60  ;;  %v5194_v46 = vmax.f32 %v4062_v56, 0.0  ;;  %v9602_v50 = vadd.f32 %v14330_v36, %v9038_v52  ;;  %v14331_v9 = vmax.f32 %v9330_v21, 0.0  ;;  %v8146_v21 = vpop.f32.mrb[52].mxu1  ;;  %v8528_v56 = vld [vmem:[%s8686_s25 + $0x288] sm:$0xff]   ;;  %v14338_v36 = vld [vmem:[#allocation9_spill] sm:$0xff] }
 0x157   : > { %14321 = vst [vmem:[#allocation3_spill] sm:$0xff] %v9575_v28  ;;  %14323 = vst [vmem:[#allocation23_spill] sm:$0xff] %v9581_v40  ;;  %v9592_v2 = vmax.f32 %v14326_v54, %v5193_v13  ;;  %v9596_v63 = vmax.f32 %v14328_v51, %v4940_v12  ;;  %v14333_v0 = vmax.f32 %v9294_v29, 0.0  ;;  %v14335_v60 = vmax.f32 %v9351_v33, 0.0  ;;  %v3050_v12 = vpop.f32.mrb[53].mxu0  ;;  %v4074_v54 = vpop.f32.mrb[53].mxu1 }
 0x158   : > { %14325 = vst [vmem:[#allocation4_spill] sm:$0xff] %v9585_v16  ;;  %v9606_v55 = vmax.f32 %v14331_v9, %v5196_v41  ;;  %v3059_v13 = vadd.f32 %v7890_v43, %v9038_v52  ;;  %v9623_v22 = vadd.f32 %v9038_v52, %v14337_v61  ;;  %v4083_v41 = vadd.f32 %v8146_v21, %v9038_v52  ;;  %v7891_v33 = vpop.f32.mrb[54].mxu0  ;;  %v8529_v51 = vld [vmem:[%s8686_s25 + $0x688] sm:$0xff]   ;;  %v8147_v29 = vpop.f32.mrb[54].mxu1 }
 0x159   : > { %14327 = vst [vmem:[#allocation5_spill] sm:$0xff] %v9592_v2  ;;  %14329 = vst [vmem:[#allocation6_spill] sm:$0xff] %v9596_v63  ;;  %v9610_v3 = vmax.f32 %v14333_v0, %v4938_v17  ;;  %v9616_v49 = vmax.f32 %v14335_v60, %v5194_v46  ;;  %v3051_v17 = vadd.f32 %v9038_v52, %v3050_v12  ;;  %v8530_v46 = vld [vmem:[%s8686_s25 + $0x290] sm:$0xff]   ;;  %v3053_v61 = vpop.f32.mrb[55].mxu0  ;;  %v4077_v10 = vpop.f32.mrb[55].mxu1  ;;  %v14339_v40 = vmax.f32 %v9359_v34, 0.0 }
 0x15a   : > { %14332 = vst [vmem:[#allocation25_spill] sm:$0xff] %v9606_v55  ;;  %v9631_v9 = vadd.f32 %v14338_v36, %v9038_v52  ;;  %v4943_v0 = vmax.f32 %v3059_v13, 0.0  ;;  %v4075_v43 = vadd.f32 %v9038_v52, %v4074_v54  ;;  %v3062_v60 = vadd.f32 %v7891_v33, %v9038_v52  ;;  %7997 = vmatmul.mubr.msk.bf16.gmra.mrb[160].mxu0 %vm2032_vm2, %v8528_v56  ;;  %v14349_v56 = vld [vmem:[#allocation10_spill] sm:$0xff] }
 0x15b   : > { %14334 = vst [vmem:[#allocation7_spill] sm:$0xff] %v9610_v3  ;;  %14336 = vst [vmem:[#allocation41_spill] sm:$0xff] %v9616_v49  ;;  %v5199_v11 = vmax.f32 %v4083_v41, 0.0  ;;  %v4941_v21 = vmax.f32 %v3051_v17, 0.0  ;;  %v4086_v12 = vadd.f32 %v8147_v29, %v9038_v52  ;;  %v3054_v8 = vadd.f32 %v9038_v52, %v3053_v61  ;;  %8253 = vmatmul.mubr.msk.bf16.gmra.mrb[160].mxu1 %vm2032_vm2, %v8529_v51  ;;  %v8557_v49 = vld [vmem:[%s8686_s25 + $0x6f8] sm:$0xff]  }
 0x15c   : > { %v9640_v55 = vmax.f32 %v14339_v40, %v4943_v0  ;;  %v5197_v36 = vmax.f32 %v4075_v43, 0.0  ;;  %v4944_v13 = vmax.f32 %v3062_v60, 0.0  ;;  %v4078_v54 = vadd.f32 %v9038_v52, %v4077_v10  ;;  %8000 = vmatprep.mubr.msk.bf16.mxu0 %vm2032_vm2, %v8530_v46  ;;  %8256 = vmatprep.mubr.msk.bf16.mxu1 %vm2032_vm2, %v8531_v42  ;;  %v14354_v42 = vld [vmem:[#allocation11_spill] sm:$0xff] }
 0x15d   : > { %v14341_v33 = vmax.f32 %v9408_v53, 0.0  ;;  %v14343_v41 = vmax.f32 %v9395_v37, 0.0  ;;  %v5200_v17 = vmax.f32 %v4086_v12, 0.0  ;;  %v4942_v61 = vmax.f32 %v3054_v8, 0.0  ;;  %v8150_v12 = vpop.f32.mrb[56].mxu1 }
 0x15e   : > { %14340 = vst [vmem:[#allocation8_spill] sm:$0xff] %v9640_v55  ;;  %v5172_v34 = vmax.f32 %v9602_v50, 0.0  ;;  %v14345_v40 = vmax.f32 %v9422_v45, 0.0  ;;  %v14347_v53 = vmax.f32 %v9418_v48, 0.0  ;;  %v5198_v37 = vmax.f32 %v4078_v54, 0.0  ;;  %v7894_v48 = vpop.f32.mrb[56].mxu0 }
 0x15f   : > { %v9646_v28 = vmax.f32 %v14341_v33, %v5199_v11  ;;  %v9650_v29 = vmax.f32 %v14343_v41, %v4941_v21  ;;  %v5170_v8 = vmax.f32 %v9623_v22, 0.0  ;;  %v9667_v51 = vadd.f32 %v9038_v52, %v14349_v56  ;;  %v14358_v33 = vld [vmem:[#allocation13_spill] sm:$0xff]  ;;  %v14359_v56 = vld [vmem:[#allocation18_spill] sm:$0xff] }
 0x160   : > { %v9657_v10 = vmax.f32 %v14345_v40, %v5197_v36  ;;  %v9661_v11 = vmax.f32 %v14347_v53, %v4944_v13  ;;  %v14350_v50 = vmax.f32 %v9466_v38, 0.0  ;;  %v14352_v45 = vmax.f32 %v9430_v47, 0.0  ;;  %v3066_v36 = vpop.f32.mrb[57].mxu0  ;;  %v8532_v47 = vld [vmem:[%s8686_s25 + $0x298] sm:$0xff]   ;;  %v14357_v13 = vld [vmem:[#allocation12_spill] sm:$0xff] }
 0x161   : > { %14342 = vst [vmem:[#allocation9_spill] sm:$0xff] %v9646_v28  ;;  %14344 = vst [vmem:[#allocation42_spill] sm:$0xff] %v9650_v29  ;;  %v9680_v22 = vadd.f32 %v14354_v42, %v9038_v52  ;;  %v14355_v60 = vmax.f32 %v9487_v6, 0.0  ;;  %v3075_v38 = vadd.f32 %v7894_v48, %v9038_v52  ;;  %v9690_v54 = vadd.f32 %v14357_v13, %v9038_v52  ;;  %v7895_v40 = vpop.f32.mrb[58].mxu0  ;;  %v8533_v53 = vld [vmem:[%s8686_s25 + $0x698] sm:$0xff]  }
 0x162   : > { %14346 = vst [vmem:[#allocation43_spill] sm:$0xff] %v9657_v10  ;;  %14348 = vst [vmem:[#allocation44_spill] sm:$0xff] %v9661_v11  ;;  %v9671_v46 = vmax.f32 %v14350_v50, %v5200_v17  ;;  %v9675_v0 = vmax.f32 %v14352_v45, %v4942_v61  ;;  %v9694_v41 = vadd.f32 %v9038_v52, %v14358_v33  ;;  %v4090_v61 = vpop.f32.mrb[57].mxu1  ;;  %v3069_v13 = vpop.f32.mrb[59].mxu0  ;;  %v8535_v33 = vld [vmem:[%s8686_s25 + $0x6a0] sm:$0xff]   ;;  %v14360_v29 = vmax.f32 %v9495_v26, 0.0 }
 0x163   : > { %v9684_v21 = vmax.f32 %v14355_v60, %v5198_v37  ;;  %v4099_v17 = vadd.f32 %v8150_v12, %v9038_v52  ;;  %v3067_v6 = vadd.f32 %v9038_v52, %v3066_v36  ;;  %v8534_v37 = vld [vmem:[%s8686_s25 + $0x2a0] sm:$0xff]   ;;  %v9702_v50 = vadd.f32 %v9038_v52, %v14359_v56  ;;  %v8151_v60 = vpop.f32.mrb[58].mxu1  ;;  %8001 = vmatmul.mubr.msk.bf16.gmra.mrb[164].mxu0 %vm2032_vm2, %v8532_v47  ;;  %v14366_v26 = vld [vmem:[#allocation19_spill] sm:$0xff] }
 0x164   : > { %14351 = vst [vmem:[#allocation10_spill] sm:$0xff] %v9671_v46  ;;  %14353 = vst [vmem:[#allocation45_spill] sm:$0xff] %v9675_v0  ;;  %v4947_v45 = vmax.f32 %v3075_v38, 0.0  ;;  %v4091_v48 = vadd.f32 %v9038_v52, %v4090_v61  ;;  %v3078_v42 = vadd.f32 %v7895_v40, %v9038_v52  ;;  %v4102_v36 = vadd.f32 %v8151_v60, %v9038_v52  ;;  %v8553_v46 = vld [vmem:[%s8686_s25 + $0x6e8] sm:$0xff]  }
 0x165   : > { %14356 = vst [vmem:[#allocation11_spill] sm:$0xff] %v9684_v21  ;;  %v5203_v43 = vmax.f32 %v4099_v17, 0.0  ;;  %v4945_v12 = vmax.f32 %v3067_v6, 0.0  ;;  %v3070_v10 = vadd.f32 %v9038_v52, %v3069_v13  ;;  %v4093_v21 = vpop.f32.mrb[59].mxu1  ;;  %v14362_v40 = vmax.f32 %v9544_v57, 0.0  ;;  %8257 = vmatmul.mubr.msk.bf16.gmra.mrb[164].mxu1 %vm2032_vm2, %v8533_v53  ;;  %8004 = vmatprep.mubr.msk.bf16.mxu0 %vm2032_vm2, %v8534_v37 }
 0x166   : > { %v9711_v0 = vmax.f32 %v14360_v29, %v4947_v45  ;;  %v5201_v56 = vmax.f32 %v4091_v48, 0.0  ;;  %v4948_v38 = vmax.f32 %v3078_v42, 0.0  ;;  %v4094_v61 = vadd.f32 %v9038_v52, %v4093_v21  ;;  %8260 = vmatprep.mubr.msk.bf16.mxu1 %vm2032_vm2, %v8535_v33  ;;  %v7898_v48 = vpop.f32.mrb[60].mxu0 }
 0x167   : > { %v9717_v28 = vmax.f32 %v14362_v40, %v5203_v43  ;;  %v14364_v17 = vmax.f32 %v9531_v59, 0.0  ;;  %v5204_v60 = vmax.f32 %v4102_v36, 0.0  ;;  %v4946_v13 = vmax.f32 %v3070_v10, 0.0  ;;  %v3082_v36 = vpop.f32.mrb[61].mxu0 }
 0x168   : > { %14361 = vst [vmem:[#allocation12_spill] sm:$0xff] %v9711_v0  ;;  %v3990_v29 = vadd.f32 %v14366_v26, %v9038_v52  ;;  %v14367_v21 = vmax.f32 %v9558_v15, 0.0  ;;  %v14369_v57 = vmax.f32 %v9554_v18, 0.0  ;;  %v5202_v59 = vmax.f32 %v4094_v61, 0.0  ;;  %v7899_v40 = vpop.f32.mrb[62].mxu0 }
 0x169   : > { %14363 = vst [vmem:[#allocation13_spill] sm:$0xff] %v9717_v28  ;;  %v9721_v6 = vmax.f32 %v14364_v17, %v4945_v12  ;;  %v4917_v10 = vmax.f32 %v9667_v51, 0.0  ;;  %v5175_v53 = vmax.f32 %v9680_v22, 0.0  ;;  %v9738_v37 = vmax.f32 %v5172_v34, %v5204_v60  ;;  %v8154_v51 = vpop.f32.mrb[60].mxu1  ;;  %v8536_v34 = vld [vmem:[%s8686_s25 + $0x2a8] sm:$0xff]  }
 0x16a   : > { %v9729_v47 = vmax.f32 %v14367_v21, %v5201_v56  ;;  %v9733_v43 = vmax.f32 %v14369_v57, %v4948_v38  ;;  %v14372_v45 = vmax.f32 %v9566_v7, 0.0  ;;  %v4920_v18 = vmax.f32 %v9690_v54, 0.0  ;;  %v14375_v7 = vld [vmem:[#allocation24_spill] sm:$0xff]  ;;  %v4106_v54 = vpop.f32.mrb[61].mxu1  ;;  %v3085_v57 = vpop.f32.mrb[63].mxu0 }
 0x16b   : > { %14365 = vst [vmem:[#allocation18_spill] sm:$0xff] %v9721_v6  ;;  %14371 = vst [vmem:[#allocation47_spill] sm:$0xff] %v9738_v37  ;;  %v5173_v42 = vmax.f32 %v9694_v41, 0.0  ;;  %v9746_v12 = vmax.f32 %v5170_v8, %v5202_v59  ;;  %v3091_v33 = vadd.f32 %v7898_v48, %v9038_v52  ;;  %v4918_v22 = vmax.f32 %v9702_v50, 0.0  ;;  %v8537_v41 = vld [vmem:[%s8686_s25 + $0x6a8] sm:$0xff]   ;;  %v8538_v8 = vld [vmem:[%s8686_s25 + $0x2b0] sm:$0xff]   ;;  %8005 = vmatmul.mubr.msk.bf16.gmra.mrb[168].mxu0 %vm2032_vm2, %v8536_v34 }
 0x16c   : > { %14368 = vst [vmem:[#allocation19_spill] sm:$0xff] %v9729_v47  ;;  %14370 = vst [vmem:[#allocation46_spill] sm:$0xff] %v9733_v43  ;;  %v9742_v15 = vmax.f32 %v14372_v45, %v4946_v13  ;;  %v3982_v56 = vadd.f32 %v9038_v52, %v14375_v7  ;;  %v4115_v38 = vadd.f32 %v8154_v51, %v9038_v52  ;;  %v5176_v17 = vmax.f32 %v3990_v29, 0.0  ;;  %v8155_v21 = vpop.f32.mrb[62].mxu1  ;;  %v8539_v50 = vld [vmem:[%s8686_s25 + $0x6b0] sm:$0xff]   ;;  %v9783_v34 = vpop.f32.mrb[64].mxu0 }
 0x16d   : > { %14374 = vst [vmem:[#allocation49_spill] sm:$0xff] %v9746_v12  ;;  %v3083_v61 = vadd.f32 %v9038_v52, %v3082_v36  ;;  %v4951_v60 = vmax.f32 %v3091_v33, 0.0  ;;  %v4107_v13 = vadd.f32 %v9038_v52, %v4106_v54  ;;  %v3094_v26 = vadd.f32 %v7899_v40, %v9038_v52  ;;  %v4109_v36 = vpop.f32.mrb[63].mxu1  ;;  %8261 = vmatmul.mubr.msk.bf16.gmra.mrb[168].mxu1 %vm2032_vm2, %v8537_v41 }
 0x16e   : > { %14373 = vst [vmem:[#allocation48_spill] sm:$0xff] %v9742_v15  ;;  %v5207_v59 = vmax.f32 %v4115_v38, 0.0  ;;  %v4118_v48 = vadd.f32 %v8155_v21, %v9038_v52  ;;  %v3086_v51 = vadd.f32 %v9038_v52, %v3085_v57  ;;  %v14376_v7 = vmax.f32 %v9631_v9, 0.0  ;;  %8008 = vmatprep.mubr.msk.bf16.mxu0 %vm2032_vm2, %v8538_v8  ;;  %8264 = vmatprep.mubr.msk.bf16.mxu1 %vm2032_vm2, %v8539_v50  ;;  %v9789_v8 = vpop.f32.mrb[64].mxu1  ;;  %v8541_v21 = vld [vmem:[%s8686_s25 + $0x6b8] sm:$0xff]   ;;  %v8543_v50 = vld [vmem:[%s8686_s25 + $0x6c0] sm:$0xff]  }
 0x16f   : > { %v4949_v45 = vmax.f32 %v3083_v61, 0.0  ;;  %v5205_v29 = vmax.f32 %v4107_v13, 0.0  ;;  %v4952_v33 = vmax.f32 %v3094_v26, 0.0  ;;  %v4110_v54 = vadd.f32 %v9038_v52, %v4109_v36  ;;  %v9787_v26 = vpop.f32.mrb[65].mxu0  ;;  %v8544_v36 = vld [vmem:[%s8686_s25 + $0x2c8] sm:$0xff]   ;;  %v8556_v15 = vld [vmem:[%s8686_s25 + $0x2f8] sm:$0xff]  }
 0x170   : > { %v9764_v28 = vmax.f32 %v14376_v7, %v4951_v60  ;;  %v9768_v40 = vmax.f32 %v5175_v53, %v5207_v59  ;;  %v5208_v38 = vmax.f32 %v4118_v48, 0.0  ;;  %v4950_v61 = vmax.f32 %v3086_v51, 0.0 }
 0x171   : > { %v9770_v37 = vmax.f32 %v4917_v10, %v4949_v45  ;;  %v5174_v9 = vmax.f32 %v3982_v56, 0.0  ;;  %v9774_v60 = vmax.f32 %v5173_v42, %v5205_v29  ;;  %v9776_v13 = vmax.f32 %v4920_v18, %v4952_v33  ;;  %v8540_v42 = vld [vmem:[%s8686_s25 + $0x2b8] sm:$0xff]   ;;  %v9792_v18 = vpop.f32.mrb[66].mxu0  ;;  %v9794_v56 = vpop.f32.mrb[65].mxu1  ;;  %v8545_v33 = vld [vmem:[%s8686_s25 + $0x6c8] sm:$0xff]  }
 0x172   : > { %14377 = vst [vmem:[#allocation24_spill] sm:$0xff] %v9764_v28  ;;  %14378 = vst [vmem:[#allocation50_spill] sm:$0xff] %v9768_v40  ;;  %v5206_v52 = vmax.f32 %v4110_v54, 0.0  ;;  %v9779_v10 = vmax.f32 %v5176_v17, %v5208_v38  ;;  %v9781_v53 = vmax.f32 %v4918_v22, %v4950_v61  ;;  %v8542_v17 = vld [vmem:[%s8686_s25 + $0x2c0] sm:$0xff]   ;;  %v9798_v22 = vpop.f32.mrb[67].mxu0  ;;  %v9800_v57 = vpop.f32.mrb[66].mxu1 }
 0x173   : > { %14379 = vst [vmem:[#allocation51_spill] sm:$0xff] %v9770_v37  ;;  %14380 = vst [vmem:[#allocation52_spill] sm:$0xff] %v9774_v60  ;;  %v9803_v59 = vpop.f32.mrb[67].mxu1  ;;  %8009 = vmatmul.mubr.msk.bf16.gmra.mrb[172].mxu0 %vm2032_vm2, %v8540_v42  ;;  %v9809_v45 = vpop.f32.mrb[68].mxu0  ;;  %v8546_v54 = vld [vmem:[%s8686_s25 + $0x2d0] sm:$0xff]   ;;  %v8549_v37 = vld [vmem:[%s8686_s25 + $0x6d8] sm:$0xff]  }
 0x174   : > { %14381 = vst [vmem:[#allocation53_spill] sm:$0xff] %v9776_v13  ;;  %14382 = vst [vmem:[#allocation54_spill] sm:$0xff] %v9779_v10  ;;  %v9785_v41 = vmax.f32 %v5174_v9, %v5206_v52  ;;  %8012 = vmatprep.mubr.msk.bf16.mxu0 %vm2032_vm2, %v8542_v17  ;;  %v9811_v48 = vpop.f32.mrb[69].mxu0  ;;  %v9813_v51 = vpop.f32.mrb[68].mxu1  ;;  %v8547_v9 = vld [vmem:[%s8686_s25 + $0x6d0] sm:$0xff]   ;;  %v8552_v13 = vld [vmem:[%s8686_s25 + $0x2e8] sm:$0xff]  }
 0x175   : > { %14383 = vst [vmem:[#allocation55_spill] sm:$0xff] %v9781_v53  ;;  %8265 = vmatmul.mubr.msk.bf16.gmra.mrb[172].mxu1 %vm2032_vm2, %v8541_v21  ;;  %v9816_v7 = vpop.f32.mrb[70].mxu0  ;;  %v9818_v29 = vpop.f32.mrb[69].mxu1 }
 0x176   : > { %14384 = vst [vmem:[#allocation56_spill] sm:$0xff] %v9785_v41  ;;  %8268 = vmatprep.mubr.msk.bf16.mxu1 %vm2032_vm2, %v8543_v50  ;;  %v9822_v38 = vpop.f32.mrb[71].mxu0  ;;  %v9824_v61 = vpop.f32.mrb[70].mxu1  ;;  %v8548_v50 = vld [vmem:[%s8686_s25 + $0x2d8] sm:$0xff]  }
 0x177   : > { %v9827_v52 = vpop.f32.mrb[71].mxu1 }
 0x17a   : > { %v9833_v42 = vpop.f32.mrb[72].mxu0  ;;  %v9837_v17 = vpop.f32.mrb[72].mxu1 }
 0x17b   : > { %8013 = vmatmul.mubr.msk.bf16.gmra.mrb[176].mxu0 %vm2032_vm2, %v8544_v36  ;;  %v9835_v21 = vpop.f32.mrb[73].mxu0  ;;  %v9842_v41 = vpop.f32.mrb[73].mxu1  ;;  %v8550_v36 = vld [vmem:[%s8686_s25 + $0x2e0] sm:$0xff]  }
 0x17c   : > { %8016 = vmatprep.mubr.msk.bf16.mxu0 %vm2032_vm2, %v8546_v54  ;;  %v9840_v60 = vpop.f32.mrb[74].mxu0  ;;  %v9848_v54 = vpop.f32.mrb[74].mxu1 }
 0x17d   : > { %8269 = vmatmul.mubr.msk.bf16.gmra.mrb[176].mxu1 %vm2032_vm2, %v8545_v33  ;;  %v9846_v33 = vpop.f32.mrb[75].mxu0  ;;  %v9851_v53 = vpop.f32.mrb[75].mxu1 }
 0x17e   : > { %8272 = vmatprep.mubr.msk.bf16.mxu1 %vm2032_vm2, %v8547_v9  ;;  %v8551_v9 = vld [vmem:[%s8686_s25 + $0x6e0] sm:$0xff]  }
 0x182   : > { %v9857_v40 = vpop.f32.mrb[76].mxu0  ;;  %v9861_v28 = vpop.f32.mrb[76].mxu1 }
 0x183   : > { %8017 = vmatmul.mubr.msk.bf16.gmra.mrb[180].mxu0 %vm2032_vm2, %v8548_v50  ;;  %v9859_v10 = vpop.f32.mrb[77].mxu0  ;;  %v9866_v43 = vpop.f32.mrb[77].mxu1  ;;  %v8554_v50 = vld [vmem:[%s8686_s25 + $0x2f0] sm:$0xff]  }
 0x184   : > { %8020 = vmatprep.mubr.msk.bf16.mxu0 %vm2032_vm2, %v8550_v36  ;;  %v9864_v0 = vpop.f32.mrb[78].mxu0  ;;  %v9872_v36 = vpop.f32.mrb[78].mxu1 }
 0x185   : > { %8273 = vmatmul.mubr.msk.bf16.gmra.mrb[180].mxu1 %vm2032_vm2, %v8549_v37  ;;  %v9870_v37 = vpop.f32.mrb[79].mxu0  ;;  %v9875_v55 = vpop.f32.mrb[79].mxu1 }
 0x186   : > { %8276 = vmatprep.mubr.msk.bf16.mxu1 %vm2032_vm2, %v8551_v9  ;;  %v8555_v9 = vld [vmem:[%s8686_s25 + $0x6f0] sm:$0xff]  }
 0x18a   : > { %v9881_v11 = vpop.f32.mrb[80].mxu0  ;;  %v9885_v12 = vpop.f32.mrb[80].mxu1 }
 0x18b   : > { %8021 = vmatmul.mubr.msk.bf16.gmra.mrb[184].mxu0 %vm2032_vm2, %v8552_v13  ;;  %v9883_v63 = vpop.f32.mrb[81].mxu0  ;;  %v9890_v6 = vpop.f32.mrb[81].mxu1  ;;  %v8558_v13 = vld [vmem:[%s8686_s25 + $0x300] sm:$0xff]  }
 0x18c   : > { %8024 = vmatprep.mubr.msk.bf16.mxu0 %vm2032_vm2, %v8554_v50  ;;  %v9888_v47 = vpop.f32.mrb[82].mxu0  ;;  %v9896_v50 = vpop.f32.mrb[82].mxu1 }
 0x18d   : > { %8277 = vmatmul.mubr.msk.bf16.gmra.mrb[184].mxu1 %vm2032_vm2, %v8553_v46  ;;  %v9894_v46 = vpop.f32.mrb[83].mxu0  ;;  %v9899_v3 = vpop.f32.mrb[83].mxu1 }
 0x18e   : > { %8280 = vmatprep.mubr.msk.bf16.mxu1 %vm2032_vm2, %v8555_v9  ;;  %v8559_v9 = vld [vmem:[%s8686_s25 + $0x700] sm:$0xff]  }
 0x192   : > { %v9905_v2 = vpop.f32.mrb[84].mxu0  ;;  %v9909_v62 = vpop.f32.mrb[84].mxu1 }
 0x193   : > { %8025 = vmatmul.mubr.msk.bf16.gmra.mrb[188].mxu0 %vm2032_vm2, %v8556_v15  ;;  %14385 = vst [vmem:[#allocation57_spill] sm:$0xff] %v9905_v2  ;;  %v9907_v16 = vpop.f32.mrb[85].mxu0  ;;  %14387 = vst [vmem:[#allocation59_spill] sm:$0xff] %v9909_v62  ;;  %v9914_v4 = vpop.f32.mrb[85].mxu1  ;;  %v8562_v15 = vld [vmem:[%s8686_s25 + $0x310] sm:$0xff]  }
 0x194   : > { %8028 = vmatprep.mubr.msk.bf16.mxu0 %vm2032_vm2, %v8558_v13  ;;  %14386 = vst [vmem:[#allocation58_spill] sm:$0xff] %v9907_v16  ;;  %v9912_v19 = vpop.f32.mrb[86].mxu0  ;;  %14389 = vst [vmem:[#allocation61_spill] sm:$0xff] %v9914_v4  ;;  %v8563_v13 = vld [vmem:[%s8686_s25 + $0x710] sm:$0xff]  }
 0x195   : > { %8281 = vmatmul.mubr.msk.bf16.gmra.mrb[188].mxu1 %vm2032_vm2, %v8557_v49  ;;  %14388 = vst [vmem:[#allocation60_spill] sm:$0xff] %v9912_v19  ;;  %v9918_v30 = vpop.f32.mrb[87].mxu0  ;;  %v9920_v49 = vpop.f32.mrb[86].mxu1 }
 0x196   : > { %8284 = vmatprep.mubr.msk.bf16.mxu1 %vm2032_vm2, %v8559_v9  ;;  %14390 = vst [vmem:[#allocation62_spill] sm:$0xff] %v9918_v30  ;;  %14391 = vst [vmem:[#allocation63_spill] sm:$0xff] %v9920_v49  ;;  %v9923_v9 = vpop.f32.mrb[87].mxu1  ;;  %v8564_v49 = vld [vmem:[%s8686_s25 + $0x318] sm:$0xff]  }
 0x197   : > { %14392 = vst [vmem:[#allocation64_spill] sm:$0xff] %v9923_v9  ;;  %v9939_v9 = vld [vmem:[%s14035_s2] ss:$0 sm:$0xff] }
 0x198   : > { %v9961_v62 = vadd.f32 %v9939_v9, %v9792_v18  ;;  %v9982_v18 = vadd.f32 %v9939_v9, %v9803_v59  ;;  %v10004_v59 = vadd.f32 %v9939_v9, %v9818_v29  ;;  %v10049_v29 = vadd.f32 %v9939_v9, %v9835_v21 }
 0x199   : > { %v10068_v21 = vadd.f32 %v9939_v9, %v9846_v33  ;;  %v10089_v33 = vadd.f32 %v9939_v9, %v9857_v40  ;;  %v10108_v40 = vadd.f32 %v9939_v9, %v9866_v43 }
 0x19a   : > { %v9929_v4 = vpop.f32.mrb[88].mxu0  ;;  %v9933_v30 = vpop.f32.mrb[88].mxu1 }
 0x19b   : > { %8029 = vmatmul.mubr.msk.bf16.gmra.mrb[192].mxu0 %vm2032_vm2, %v8560_v25  ;;  %14393 = vst [vmem:[#allocation65_spill] sm:$0xff] %v9929_v4  ;;  %v9931_v19 = vpop.f32.mrb[89].mxu0  ;;  %14395 = vst [vmem:[#allocation67_spill] sm:$0xff] %v9933_v30  ;;  %v9943_v25 = vadd.f32 %v9939_v9, %v9783_v34  ;;  %v9955_v30 = vpop.f32.mrb[89].mxu1  ;;  %v8566_v4 = vld [vmem:[%s8686_s25 + $0x320] sm:$0xff]   ;;  %v9965_v34 = vadd.f32 %v9939_v9, %v9798_v22  ;;  %v9986_v22 = vadd.f32 %v9939_v9, %v9809_v45 }
 0x19c   : > { %8032 = vmatprep.mubr.msk.bf16.mxu0 %vm2032_vm2, %v8562_v15  ;;  %14394 = vst [vmem:[#allocation66_spill] sm:$0xff] %v9931_v19  ;;  %v9951_v15 = vadd.f32 %v9939_v9, %v9789_v8  ;;  %14397 = vst [vmem:[#allocation69_spill] sm:$0xff] %v9955_v30  ;;  %v8565_v19 = vld [vmem:[%s8686_s25 + $0x718] sm:$0xff]   ;;  %v9973_v16 = vpop.f32.mrb[90].mxu1  ;;  %v9978_v30 = vadd.f32 %v9939_v9, %v9800_v57  ;;  %v10000_v57 = vadd.f32 %v9939_v9, %v9813_v51 }
 0x19d   : > { %8285 = vmatmul.mubr.msk.bf16.gmra.mrb[192].mxu1 %vm2032_vm2, %v8561_v58  ;;  %v9947_v58 = vadd.f32 %v9939_v9, %v9787_v26  ;;  %v9969_v26 = vadd.f32 %v9939_v9, %v9794_v56  ;;  %14399 = vst [vmem:[#allocation71_spill] sm:$0xff] %v9973_v16  ;;  %v9990_v56 = vadd.f32 %v9939_v9, %v9811_v48  ;;  %14406 = vst [vmem:[#allocation78_spill] sm:$0xff] %v10068_v21 }
 0x19e   : > { %8288 = vmatprep.mubr.msk.bf16.mxu1 %vm2032_vm2, %v8563_v13  ;;  %v9953_v13 = vpop.f32.mrb[90].mxu0  ;;  %v9996_v16 = vadd.f32 %v9939_v9, %v9816_v7  ;;  %v10012_v7 = vadd.f32 %v9939_v9, %v9822_v38  ;;  %v10021_v48 = vadd.f32 %v9939_v9, %v9824_v61  ;;  %v10045_v45 = vadd.f32 %v9939_v9, %v9833_v42 }
 0x19f   : > { %14396 = vst [vmem:[#allocation68_spill] sm:$0xff] %v9953_v13  ;;  %v9971_v8 = vpop.f32.mrb[91].mxu0  ;;  %v8567_v13 = vld [vmem:[%s8686_s25 + $0x720] sm:$0xff]   ;;  %v10064_v42 = vadd.f32 %v9939_v9, %v9840_v60  ;;  %v10085_v60 = vadd.f32 %v9939_v9, %v9851_v53  ;;  %14411 = vst [vmem:[#allocation83_spill] sm:$0xff] %v10089_v33  ;;  %v10104_v53 = vadd.f32 %v9939_v9, %v9861_v28 }
 0x1a0   : > { %14398 = vst [vmem:[#allocation70_spill] sm:$0xff] %v9971_v8  ;;  %v9992_v8 = vpop.f32.mrb[91].mxu1  ;;  %14416 = vst [vmem:[#allocation88_spill] sm:$0xff] %v10108_v40 }
 0x1a1   : > { %14400 = vst [vmem:[#allocation72_spill] sm:$0xff] %v9992_v8  ;;  %14410 = vst [vmem:[#allocation82_spill] sm:$0xff] %v10085_v60 }
 0x1a2   : > { %v10028_v51 = vpop.f32.mrb[92].mxu0  ;;  %v10039_v8 = vpop.f32.mrb[92].mxu1  ;;  %14415 = vst [vmem:[#allocation87_spill] sm:$0xff] %v10104_v53 }
 0x1a3   : > { %8033 = vmatmul.mubr.msk.bf16.gmra.mrb[196].mxu0 %vm2032_vm2, %v8564_v49  ;;  %14401 = vst [vmem:[#allocation73_spill] sm:$0xff] %v10028_v51  ;;  %v10037_v38 = vpop.f32.mrb[93].mxu0  ;;  %14403 = vst [vmem:[#allocation75_spill] sm:$0xff] %v10039_v8  ;;  %v10057_v49 = vpop.f32.mrb[93].mxu1  ;;  %v8569_v8 = vld [vmem:[%s8686_s25 + $0x728] sm:$0xff]  }
 0x1a4   : > { %8036 = vmatprep.mubr.msk.bf16.mxu0 %vm2032_vm2, %v8566_v4  ;;  %14402 = vst [vmem:[#allocation74_spill] sm:$0xff] %v10037_v38  ;;  %v10055_v61 = vpop.f32.mrb[94].mxu0  ;;  %14405 = vst [vmem:[#allocation77_spill] sm:$0xff] %v10057_v49  ;;  %v8570_v38 = vld [vmem:[%s8686_s25 + $0x330] sm:$0xff]   ;;  %v10081_v4 = vadd.f32 %v9939_v9, %v9848_v54  ;;  %v10100_v54 = vadd.f32 %v9939_v9, %v9864_v0  ;;  %v10116_v0 = vadd.f32 %v9939_v9, %v9870_v37  ;;  %v8572_v37 = vld [vmem:[%s8686_s25 + $0x338] sm:$0xff]  }
 0x1a5   : > { %8289 = vmatmul.mubr.msk.bf16.gmra.mrb[196].mxu1 %vm2032_vm2, %v8565_v19  ;;  %v8568_v19 = vld [vmem:[%s8686_s25 + $0x328] sm:$0xff]   ;;  %14404 = vst [vmem:[#allocation76_spill] sm:$0xff] %v10055_v61  ;;  %v10074_v51 = vpop.f32.mrb[95].mxu0  ;;  %v10076_v61 = vpop.f32.mrb[94].mxu1  ;;  %v8571_v49 = vld [vmem:[%s8686_s25 + $0x730] sm:$0xff]  }
 0x1a6   : > { %8292 = vmatprep.mubr.msk.bf16.mxu1 %vm2032_vm2, %v8567_v13  ;;  %v10035_v13 = vadd.f32 %v9939_v9, %v9827_v52  ;;  %v10053_v52 = vadd.f32 %v9939_v9, %v9837_v17  ;;  %v10072_v17 = vadd.f32 %v9939_v9, %v9842_v41  ;;  %14407 = vst [vmem:[#allocation79_spill] sm:$0xff] %v10074_v51  ;;  %14408 = vst [vmem:[#allocation80_spill] sm:$0xff] %v10076_v61  ;;  %v10095_v51 = vpop.f32.mrb[95].mxu1 }
 0x1a7   : > { %14409 = vst [vmem:[#allocation81_spill] sm:$0xff] %v10081_v4  ;;  %v10093_v41 = vadd.f32 %v9939_v9, %v9859_v10  ;;  %14413 = vst [vmem:[#allocation85_spill] sm:$0xff] %v10095_v51  ;;  %v10125_v51 = vadd.f32 %v9939_v9, %v9872_v36  ;;  %v8573_v36 = vld [vmem:[%s8686_s25 + $0x738] sm:$0xff]   ;;  %v14419_v4 = vmax.f32 %v9943_v25, 0.0  ;;  %v14422_v25 = vmax.f32 %v9969_v26, 0.0 }
 0x1a8   : > { %14414 = vst [vmem:[#allocation86_spill] sm:$0xff] %v10100_v54  ;;  %14417 = vst [vmem:[#allocation89_spill] sm:$0xff] %v10116_v0 }
 0x1a9   : > { %14412 = vst [vmem:[#allocation84_spill] sm:$0xff] %v10093_v41  ;;  %14418 = vst [vmem:[#allocation90_spill] sm:$0xff] %v10125_v51  ;;  %v8574_v41 = vld [vmem:[%s8686_s25 + $0x340] sm:$0xff]  }
 0x1aa   : > { %v7934_v43 = vpop.f32.mrb[96].mxu0 }
 0x1ab   : > { %8037 = vmatmul.mubr.msk.bf16.gmra.mrb[200].mxu0 %vm2032_vm2, %v8568_v19  ;;  %v3235_v10 = vadd.f32 %v9939_v9, %v7934_v43  ;;  %v3226_v21 = vpop.f32.mrb[97].mxu0 }
 0x1ac   : > { %8040 = vmatprep.mubr.msk.bf16.mxu0 %vm2032_vm2, %v8570_v38  ;;  %v10140_v38 = vadd.f32 %v9939_v9, %v9875_v55  ;;  %v3227_v19 = vadd.f32 %v9939_v9, %v3226_v21  ;;  %v7935_v61 = vpop.f32.mrb[98].mxu0  ;;  %v8575_v55 = vld [vmem:[%s8686_s25 + $0x740] sm:$0xff]  }
 0x1ad   : > { %8293 = vmatmul.mubr.msk.bf16.gmra.mrb[200].mxu1 %vm2032_vm2, %v8569_v8  ;;  %v4987_v40 = vmax.f32 %v3235_v10, 0.0  ;;  %v3238_v8 = vadd.f32 %v9939_v9, %v7935_v61  ;;  %v3229_v33 = vpop.f32.mrb[99].mxu0  ;;  %v14420_v61 = vmax.f32 %v9951_v15, 0.0 }
 0x1ae   : > { %8296 = vmatprep.mubr.msk.bf16.mxu1 %vm2032_vm2, %v8571_v49  ;;  %v8190_v49 = vpop.f32.mrb[96].mxu1  ;;  %v4985_v2 = vmax.f32 %v3227_v19, 0.0  ;;  %v3230_v21 = vadd.f32 %v9939_v9, %v3229_v33  ;;  %v14423_v33 = vmax.f32 %v9961_v62, 0.0  ;;  %v14425_v62 = vmax.f32 %v9965_v34, 0.0 }
 0x1af   : > { %v4259_v28 = vadd.f32 %v9939_v9, %v8190_v49  ;;  %v4250_v54 = vpop.f32.mrb[97].mxu1  ;;  %v5531_v5 = vmax.f32 %v14419_v4, %v4987_v40  ;;  %v4988_v10 = vmax.f32 %v3238_v8, 0.0 }
 0x1b0   : > { %v4251_v53 = vadd.f32 %v9939_v9, %v4250_v54  ;;  %v8191_v0 = vpop.f32.mrb[98].mxu1  ;;  %v4986_v44 = vmax.f32 %v3230_v21, 0.0  ;;  %v10209_v21 = vadd.f32 %v9939_v9, %v9885_v12 }
 0x1b1   : > { %v5243_v60 = vmax.f32 %v4259_v28, 0.0  ;;  %v4262_v49 = vadd.f32 %v9939_v9, %v8191_v0  ;;  %v4253_v14 = vpop.f32.mrb[99].mxu1  ;;  %v14421_v28 = vmax.f32 %v9947_v58, 0.0  ;;  %v5659_v15 = vmax.f32 %v9303_v23, %v5531_v5 }
 0x1b2   : > { %v5241_v43 = vmax.f32 %v4251_v53, 0.0  ;;  %v4254_v54 = vadd.f32 %v9939_v9, %v4253_v14  ;;  %v10167_v14 = vmax.f32 %v14423_v33, %v4988_v10  ;;  %v14424_v58 = vmax.f32 %v9978_v30, 0.0 }
 0x1b3   : > { %8041 = vmatmul.mubr.msk.bf16.gmra.mrb[204].mxu0 %vm2032_vm2, %v8572_v37  ;;  %v5595_v51 = vmax.f32 %v14420_v61, %v5243_v60  ;;  %v5529_v19 = vmax.f32 %v14421_v28, %v4985_v2  ;;  %v5244_v0 = vmax.f32 %v4262_v49, 0.0  ;;  %v5530_v60 = vmax.f32 %v14425_v62, %v4986_v44  ;;  %v8194_v44 = vpop.f32.mrb[100].mxu1  ;;  %5802 = vrot.lane.b32.xlu0 %v5659_v15, %s8635_s8  ;;  %v8579_v28 = vld [vmem:[%s8686_s25 + $0x750] sm:$0xff]  }
 0x1b4   : > { %8044 = vmatprep.mubr.msk.bf16.mxu0 %vm2032_vm2, %v8574_v41  ;;  %v5593_v4 = vmax.f32 %v14422_v25, %v5241_v43  ;;  %v5242_v53 = vmax.f32 %v4254_v54, 0.0  ;;  %v7938_v41 = vpop.f32.mrb[100].mxu0  ;;  %v10186_v23 = vadd.f32 %v9939_v9, %v9881_v11  ;;  %v4275_v8 = vadd.f32 %v9939_v9, %v8194_v44  ;;  %v8577_v43 = vld [vmem:[%s8686_s25 + $0x748] sm:$0xff]  }
 0x1b5   : > { %8297 = vmatmul.mubr.msk.bf16.gmra.mrb[204].mxu1 %vm2032_vm2, %v8573_v36  ;;  %v5657_v2 = vmax.f32 %v9313_v24, %v5529_v19  ;;  %v5596_v26 = vmax.f32 %v14424_v58, %v5244_v0  ;;  %v10182_v40 = vmax.f32 %v9309_v20, %v5595_v51  ;;  %v14428_v24 = vmax.f32 %v9982_v18, 0.0  ;;  %v3242_v20 = vpop.f32.mrb[101].mxu0  ;;  %v8576_v51 = vld [vmem:[%s8686_s25 + $0x348] sm:$0xff]   ;;  %v4266_v18 = vpop.f32.mrb[101].mxu1 }
 0x1b6   : > { %8300 = vmatprep.mubr.msk.bf16.mxu1 %vm2032_vm2, %v8575_v55  ;;  %v10189_v5 = vmax.f32 %v9320_v39, %v5593_v4  ;;  %v3251_v34 = vadd.f32 %v9939_v9, %v7938_v41  ;;  %v5658_v39 = vmax.f32 %v9338_v32, %v5530_v60  ;;  %v7939_v36 = vpop.f32.mrb[102].mxu0  ;;  %v8578_v55 = vld [vmem:[%s8686_s25 + $0x350] sm:$0xff]   ;;  %v10205_v49 = vadd.f32 %v9939_v9, %v9883_v63  ;;  %v8195_v54 = vpop.f32.mrb[102].mxu1  ;;  %v14470_v11 = vld [vmem:[#allocation63_spill] sm:$0xff] }
 0x1b7   : > { %14426 = vst [vmem:[#allocation91_spill] sm:$0xff] %v10182_v40  ;;  %v5594_v30 = vmax.f32 %v14428_v24, %v5242_v53  ;;  %v6564_v37 = vmul.f32 %v5657_v2, %v5657_v2  ;;  %5786 = vst.msk [vmem:[%s10174_s7] sm:$0xff] %vm5785_vm3, %v5657_v2  ;;  %v3245_v61 = vpop.f32.mrb[103].mxu0  ;;  %v6301_v19 = vsel %vm5785_vm3, %v5657_v2, 0.0  ;;  %v5247_v25 = vmax.f32 %v4275_v8, 0.0  ;;  %v4269_v4 = vpop.f32.mrb[103].mxu1  ;;  %5810 = vrot.lane.b32.xlu0 %v10182_v40, %s8635_s8 }
 0x1b8   : > { %14427 = vst [vmem:[#allocation92_spill] sm:$0xff] %v10189_v5  ;;  %v4991_v32 = vmax.f32 %v3251_v34, 0.0  ;;  %5790 = vst.msk [vmem:[%s10174_s7 + $0x80] sm:$0xff] %vm5785_vm3, %v10189_v5  ;;  %v6302_v63 = vsel %vm5785_vm3, %v5658_v39, 0.0  ;;  %v6565_v0 = vmul.f32 %v5658_v39, %v5658_v39  ;;  %v6304_v53 = vsel %vm5785_vm3, %v5659_v15, 0.0  ;;  %v8593_v5 = vld [vmem:[%s8686_s25 + $0x788] sm:$0xff]  }
 0x1b9   : > { %v10212_v10 = vmax.f32 %v9344_v35, %v5594_v30  ;;  %5787 = vst.msk [vmem:[%s10174_s7 + $0x20] sm:$0xff] %vm5785_vm3, %v5658_v39  ;;  %v6692_v12 = vsel %vm5785_vm3, %v6564_v37, 0.0  ;;  %v6303_v33 = vadd.f32 %v6302_v63, %v6301_v19  ;;  %v14430_v58 = vmax.f32 %v9986_v22, 0.0 }
 0x1ba   : > { %v6693_v2 = vsel %vm5785_vm3, %v6565_v0, 0.0  ;;  %v14431_v60 = vmax.f32 %v10000_v57, 0.0  ;;  %v4267_v24 = vadd.f32 %v9939_v9, %v4266_v18  ;;  %v10245_v30 = vadd.f32 %v9939_v9, %v9888_v47  ;;  %v7942_v8 = vpop.f32.mrb[104].mxu0 }
 0x1bb   : > { %14429 = vst [vmem:[#allocation93_spill] sm:$0xff] %v10212_v10  ;;  %8045 = vmatmul.mubr.msk.bf16.gmra.mrb[208].mxu0 %vm2032_vm2, %v8576_v51  ;;  %5791 = vst.msk [vmem:[%s10174_s7 + $0xa0] sm:$0xff] %vm5785_vm3, %v10212_v10  ;;  %v10234_v62 = vmax.f32 %v14430_v58, %v4991_v32  ;;  %v6694_v34 = vadd.f32 %v6693_v2, %v6692_v12  ;;  %v10247_v44 = vadd.f32 %v6304_v53, %v6303_v33  ;;  %v3258_v32 = vpop.f32.mrb[105].mxu0  ;;  %v8583_v2 = vld [vmem:[%s8686_s25 + $0x760] sm:$0xff]   ;;  %v14480_v10 = vld [vmem:[#allocation88_spill] sm:$0xff] }
 0x1bc   : > { %v10238_v41 = vmax.f32 %v14431_v60, %v5247_v25  ;;  %8048 = vmatprep.mubr.msk.bf16.mxu0 %vm2032_vm2, %v8578_v55  ;;  %v6566_v22 = vmul.f32 %v5659_v15, %v5659_v15  ;;  %v5245_v57 = vmax.f32 %v4267_v24, 0.0  ;;  %v3243_v51 = vadd.f32 %v9939_v9, %v3242_v20  ;;  %v8198_v55 = vpop.f32.mrb[104].mxu1  ;;  %v7943_v25 = vpop.f32.mrb[106].mxu0 }
 0x1bd   : > { %8301 = vmatmul.mubr.msk.bf16.gmra.mrb[208].mxu1 %vm2032_vm2, %v8577_v43  ;;  %v3254_v37 = vadd.f32 %v9939_v9, %v7939_v36  ;;  %v4278_v39 = vadd.f32 %v9939_v9, %v8195_v54  ;;  %v10255_v18 = vmax.f32 %v9334_v27, %v5596_v26  ;;  %v3246_v43 = vadd.f32 %v9939_v9, %v3245_v61  ;;  %v4282_v0 = vpop.f32.mrb[105].mxu1  ;;  %v8581_v27 = vld [vmem:[%s8686_s25 + $0x758] sm:$0xff]   ;;  %v8582_v26 = vld [vmem:[%s8686_s25 + $0x360] sm:$0xff]   ;;  %v3261_v53 = vpop.f32.mrb[107].mxu0 }
 0x1be   : > { %8304 = vmatprep.mubr.msk.bf16.mxu1 %vm2032_vm2, %v8579_v28  ;;  %v6695_v47 = vsel %vm5785_vm3, %v6566_v22, 0.0  ;;  %v4270_v15 = vadd.f32 %v9939_v9, %v4269_v4  ;;  %v8580_v28 = vld [vmem:[%s8686_s25 + $0x358] sm:$0xff]   ;;  %v14433_v20 = vmax.f32 %v10004_v59, 0.0  ;;  %v4989_v19 = vmax.f32 %v3243_v51, 0.0  ;;  %v8199_v33 = vpop.f32.mrb[106].mxu1 }
 0x1bf   : > { %14432 = vst [vmem:[#allocation94_spill] sm:$0xff] %v10255_v18  ;;  %v10264_v54 = vadd.f32 %v6695_v47, %v6694_v34  ;;  %v4992_v63 = vmax.f32 %v3254_v37, 0.0  ;;  %v10271_v4 = vadd.f32 %v9939_v9, %v9890_v6  ;;  %v5248_v12 = vmax.f32 %v4278_v39, 0.0  ;;  %5812 = vrot.lane.b32.xlu1 %v10255_v18, %s8635_s8 }
 0x1c0   : > { %v10262_v36 = vmax.f32 %v14433_v20, %v5245_v57  ;;  %v4990_v59 = vmax.f32 %v3246_v43, 0.0  ;;  %v10278_v58 = vadd.f32 %v9939_v9, %v9894_v46  ;;  %v14434_v60 = vmax.f32 %v9990_v56, 0.0  ;;  %v4285_v57 = vpop.f32.mrb[107].mxu1 }
 0x1c1   : > { %v14435_v34 = vmax.f32 %v9996_v16, 0.0  ;;  %v5246_v22 = vmax.f32 %v4270_v15, 0.0  ;;  %v10288_v51 = vadd.f32 %v9939_v9, %v9896_v50  ;;  %v10292_v37 = vadd.f32 %v9939_v9, %v9899_v3 }
 0x1c2   : > { %v10282_v24 = vmax.f32 %v14434_v60, %v4989_v19  ;;  %v14436_v46 = vmax.f32 %v10021_v48, 0.0  ;;  %v14437_v56 = vmax.f32 %v10012_v7, 0.0  ;;  %v14438_v16 = vmax.f32 %v10035_v13, 0.0 }
 0x1c3   : > { %v5536_v6 = vmax.f32 %v14435_v34, %v4992_v63  ;;  %8049 = vmatmul.mubr.msk.bf16.gmra.mrb[212].mxu0 %vm2032_vm2, %v8580_v28  ;;  %v3267_v50 = vadd.f32 %v9939_v9, %v7942_v8  ;;  %v4291_v15 = vadd.f32 %v9939_v9, %v8198_v55  ;;  %v4283_v3 = vadd.f32 %v9939_v9, %v4282_v0  ;;  %v10319_v63 = vpop.f32.mrb[108].mxu0 }
 0x1c4   : > { %v10296_v39 = vmax.f32 %v14436_v46, %v5248_v12  ;;  %v10300_v47 = vmax.f32 %v14437_v56, %v4990_v59  ;;  %v10305_v43 = vmax.f32 %v14438_v16, %v5246_v22  ;;  %v5660_v7 = vmax.f32 %v9324_v31, %v10167_v14  ;;  %8052 = vmatprep.mubr.msk.bf16.mxu0 %vm2032_vm2, %v8582_v26  ;;  %v8584_v26 = vld [vmem:[%s8686_s25 + $0x368] sm:$0xff]  }
 0x1c5   : > { %8305 = vmatmul.mubr.msk.bf16.gmra.mrb[212].mxu1 %vm2032_vm2, %v8581_v27  ;;  %v3259_v20 = vadd.f32 %v9939_v9, %v3258_v32  ;;  %v3270_v13 = vadd.f32 %v9939_v9, %v7943_v25  ;;  %v4995_v8 = vmax.f32 %v3267_v50, 0.0  ;;  %v5251_v55 = vmax.f32 %v4291_v15, 0.0  ;;  %v8202_v25 = vpop.f32.mrb[108].mxu1  ;;  %v10323_v27 = vpop.f32.mrb[109].mxu0  ;;  %v8585_v16 = vld [vmem:[%s8686_s25 + $0x768] sm:$0xff]  }
 0x1c6   : > { %8308 = vmatprep.mubr.msk.bf16.mxu1 %vm2032_vm2, %v8583_v2  ;;  %v5249_v28 = vmax.f32 %v4283_v3, 0.0  ;;  %v4294_v19 = vadd.f32 %v9939_v9, %v8199_v33  ;;  %5804 = vrot.lane.b32.xlu0 %v5660_v7, %s8635_s8  ;;  %v6306_v31 = vsel %vm5785_vm3, %v5660_v7, 0.0  ;;  %v6567_v14 = vmul.f32 %v5660_v7, %v5660_v7  ;;  %v4298_v46 = vpop.f32.mrb[109].mxu1  ;;  %v10339_v56 = vpop.f32.mrb[110].mxu0 }
 0x1c7   : > { %v4993_v32 = vmax.f32 %v3259_v20, 0.0  ;;  %v4996_v0 = vmax.f32 %v3270_v13, 0.0  ;;  %v14439_v12 = vmax.f32 %v10045_v45, 0.0  ;;  %v14440_v33 = vmax.f32 %v10053_v52, 0.0  ;;  %v10351_v20 = vpop.f32.mrb[111].mxu0 }
 0x1c8   : > { %v14441_v60 = vmax.f32 %v10072_v17, 0.0  ;;  %v10337_v22 = vadd.f32 %v6306_v31, %v10247_v44  ;;  %v6697_v50 = vsel %vm5785_vm3, %v6567_v14, 0.0  ;;  %v14442_v45 = vmax.f32 %v10049_v29, 0.0  ;;  %v10349_v17 = vpop.f32.mrb[110].mxu1  ;;  %v8586_v44 = vld [vmem:[%s8686_s25 + $0x370] sm:$0xff]   ;;  %v14445_v29 = vld [vmem:[#allocation30_spill] sm:$0xff] }
 0x1c9   : > { %v10328_v59 = vmax.f32 %v14439_v12, %v4995_v8  ;;  %v10332_v2 = vmax.f32 %v14440_v33, %v5251_v55  ;;  %v14443_v52 = vmax.f32 %v10064_v42, 0.0  ;;  %v5252_v7 = vmax.f32 %v4294_v19, 0.0  ;;  %v10364_v42 = vpop.f32.mrb[111].mxu1  ;;  %v8587_v19 = vld [vmem:[%s8686_s25 + $0x770] sm:$0xff]  }
 0x1ca   : > { %v5601_v34 = vmax.f32 %v14441_v60, %v5249_v28  ;;  %v5537_v15 = vmax.f32 %v14442_v45, %v4993_v32  ;;  %v10358_v8 = vadd.f32 %v6697_v50, %v10264_v54  ;;  %v4286_v55 = vadd.f32 %v9939_v9, %v4285_v57  ;;  %v14446_v31 = vld [vmem:[#allocation36_spill] sm:$0xff]  ;;  %v14447_v32 = vld [vmem:[#allocation81_spill] sm:$0xff]  ;;  %v14449_v54 = vld [vmem:[#allocation26_spill] sm:$0xff] }
 0x1cb   : > { %v10347_v3 = vmax.f32 %v14443_v52, %v4996_v0  ;;  %v10362_v28 = vmax.f32 %v14445_v29, %v5536_v6  ;;  %v14448_v0 = vmax.f32 %v14447_v32, 0.0  ;;  %v10377_v33 = vmax.f32 %v14449_v54, %v10234_v62  ;;  %8053 = vmatmul.mubr.msk.bf16.gmra.mrb[216].mxu0 %vm2032_vm2, %v8584_v26  ;;  %v14450_v60 = vld [vmem:[#allocation57_spill] sm:$0xff]  ;;  %v14453_v45 = vld [vmem:[#allocation59_spill] sm:$0xff] }
 0x1cc   : > { %v10355_v13 = vmax.f32 %v9456_v1, %v5601_v34  ;;  %v10368_v14 = vmax.f32 %v14446_v31, %v5537_v15  ;;  %v3262_v1 = vadd.f32 %v9939_v9, %v3261_v53  ;;  %v10384_v34 = vadd.f32 %v9939_v9, %v14450_v60  ;;  %v14451_v53 = vld [vmem:[#allocation58_spill] sm:$0xff]  ;;  %8056 = vmatprep.mubr.msk.bf16.mxu0 %vm2032_vm2, %v8586_v44  ;;  %v14461_v60 = vld [vmem:[#allocation61_spill] sm:$0xff] }
 0x1cd   : > { %v10372_v12 = vmax.f32 %v14448_v0, %v5252_v7  ;;  %v5250_v50 = vmax.f32 %v4286_v55, 0.0  ;;  %5886 = vrot.lane.b32.xlu1 %v10362_v28, %s8636_s9  ;;  %8309 = vmatmul.mubr.msk.bf16.gmra.mrb[216].mxu1 %vm2032_vm2, %v8585_v16  ;;  %v10395_v26 = vadd.f32 %v9939_v9, %v14451_v53  ;;  %v10399_v15 = vadd.f32 %v9939_v9, %v14453_v45  ;;  %v14455_v55 = vld [vmem:[#allocation60_spill] sm:$0xff]  ;;  %v14457_v31 = vld [vmem:[#allocation82_spill] sm:$0xff] }
 0x1ce   : > { %14444 = vst [vmem:[#allocation95_spill] sm:$0xff] %v10355_v13  ;;  %5921 = vst.msk [vmem:[%s10174_s7 + $0x88] sm:$0xff] %vm5785_vm3, %v10355_v13  ;;  %v4994_v52 = vmax.f32 %v3262_v1, 0.0  ;;  %5884 = vrot.lane.b32.xlu0 %v10377_v33, %s8636_s9  ;;  %v10411_v29 = vadd.f32 %v9939_v9, %v14455_v55  ;;  %v14458_v32 = vmax.f32 %v14457_v31, 0.0  ;;  %v10415_v1 = vpop.f32.mrb[112].mxu0  ;;  %8312 = vmatprep.mubr.msk.bf16.mxu1 %vm2032_vm2, %v8587_v19  ;;  %v14459_v44 = vld [vmem:[#allocation62_spill] sm:$0xff] }
 0x1cf   : > { %14452 = vst [vmem:[#allocation30_spill] sm:$0xff] %v10395_v26  ;;  %14454 = vst [vmem:[#allocation36_spill] sm:$0xff] %v10399_v15  ;;  %v10420_v54 = vadd.f32 %v9939_v9, %v14459_v44  ;;  %v10424_v53 = vadd.f32 %v9939_v9, %v14461_v60  ;;  %v14463_v45 = vld [vmem:[#allocation78_spill] sm:$0xff]  ;;  %v14465_v31 = vld [vmem:[#allocation31_spill] sm:$0xff]  ;;  %v10434_v62 = vpop.f32.mrb[113].mxu0  ;;  %v3283_v60 = vadd.f32 %v9939_v9, %v10319_v63 }
 0x1d0   : > { %5917 = vst.msk [vmem:[%s10174_s7 + $0x8] sm:$0xff] %vm5785_vm3, %v10368_v14  ;;  %14456 = vst [vmem:[#allocation81_spill] sm:$0xff] %v10411_v29  ;;  %v5602_v0 = vmax.f32 %v14458_v32, %v5250_v50  ;;  %v14464_v55 = vmax.f32 %v14463_v45, 0.0  ;;  %v10430_v50 = vmax.f32 %v14465_v31, %v10296_v39  ;;  %v10432_v32 = vpop.f32.mrb[112].mxu1  ;;  %v8588_v19 = vld [vmem:[%s8686_s25 + $0x378] sm:$0xff]   ;;  %v14467_v16 = vld [vmem:[#allocation40_spill] sm:$0xff]  ;;  %v4299_v63 = vadd.f32 %v9939_v9, %v4298_v46 }
 0x1d1   : > { %14460 = vst [vmem:[#allocation26_spill] sm:$0xff] %v10420_v54  ;;  %14462 = vst [vmem:[#allocation57_spill] sm:$0xff] %v10424_v53  ;;  %v10444_v45 = vpop.f32.mrb[113].mxu1  ;;  %v10446_v39 = vpop.f32.mrb[114].mxu0  ;;  %v8590_v31 = vld [vmem:[%s8686_s25 + $0x380] sm:$0xff]   ;;  %v14469_v44 = vld [vmem:[#allocation39_spill] sm:$0xff]  ;;  %v10466_v57 = vadd.f32 %v9939_v9, %v14470_v11 }
 0x1d2   : > { %v5538_v7 = vmax.f32 %v14464_v55, %v4994_v52  ;;  %14466 = vst [vmem:[#allocation58_spill] sm:$0xff] %v10430_v50  ;;  %v10439_v6 = vmax.f32 %v14467_v16, %v5602_v0  ;;  %v4307_v52 = vadd.f32 %v9939_v9, %v8202_v25  ;;  %v8589_v55 = vld [vmem:[%s8686_s25 + $0x778] sm:$0xff]   ;;  %5894 = vrot.lane.b32.xlu1 %v10430_v50, %s8636_s9  ;;  %v10458_v25 = vpop.f32.mrb[114].mxu1  ;;  %v10460_v16 = vpop.f32.mrb[115].mxu0  ;;  %v8591_v0 = vld [vmem:[%s8686_s25 + $0x780] sm:$0xff]   ;;  %v4999_v61 = vmax.f32 %v3283_v60, 0.0 }
 0x1d3   : > { %v14471_v50 = vld [vmem:[#allocation64_spill] sm:$0xff]  ;;  %v5253_v35 = vmax.f32 %v4299_v63, 0.0  ;;  %8057 = vmatmul.mubr.msk.bf16.gmra.mrb[220].mxu0 %vm2032_vm2, %v8588_v19  ;;  %v10485_v11 = vsel %vm5785_vm3, %v10362_v28, 0.0  ;;  %v14472_v60 = vld [vmem:[#allocation83_spill] sm:$0xff]  ;;  %v10503_v19 = vsel %vm5785_vm3, %v10368_v14, 0.0  ;;  %v14488_v54 = vld [vmem:[#allocation86_spill] sm:$0xff] }
 0x1d4   : > { %14468 = vst [vmem:[#allocation59_spill] sm:$0xff] %v10439_v6  ;;  %v10453_v48 = vmax.f32 %v14469_v44, %v5538_v7  ;;  %v5255_v7 = vmax.f32 %v4307_v52, 0.0  ;;  %v10468_v44 = vpop.f32.mrb[115].mxu1  ;;  %5922 = vst.msk [vmem:[%s10174_s7 + $0xa8] sm:$0xff] %vm5785_vm3, %v10439_v6  ;;  %v10477_v18 = vadd.f32 %v9939_v9, %v14471_v50  ;;  %v14473_v52 = vmax.f32 %v14472_v60, 0.0  ;;  %v14475_v46 = vld [vmem:[#allocation87_spill] sm:$0xff]  ;;  %8060 = vmatprep.mubr.msk.bf16.mxu0 %vm2032_vm2, %v8590_v31 }
 0x1d5   : > { %v14476_v13 = vmax.f32 %v14475_v46, 0.0  ;;  %v14478_v50 = vld [vmem:[#allocation27_spill] sm:$0xff]  ;;  %8313 = vmatmul.mubr.msk.bf16.gmra.mrb[220].mxu1 %vm2032_vm2, %v8589_v55  ;;  %v14481_v60 = vmax.f32 %v14480_v10, 0.0  ;;  %v6572_v55 = vmul.f32 %v10368_v14, %v10368_v14  ;;  %v10518_v31 = vmul.f32 %v10362_v28, %v10362_v28  ;;  %v14483_v28 = vld [vmem:[#allocation32_spill] sm:$0xff]  ;;  %v10532_v46 = vpop.f32.mrb[116].mxu1  ;;  %v14492_v26 = vld [vmem:[#allocation90_spill] sm:$0xff] }
 0x1d6   : > { %5918 = vst.msk [vmem:[%s10174_s7 + $0x28] sm:$0xff] %vm5785_vm3, %v10453_v48  ;;  %v10489_v6 = vmax.f32 %v14473_v52, %v4999_v61  ;;  %v10497_v63 = vmax.f32 %v14478_v50, %v10238_v41  ;;  %v3286_v41 = vadd.f32 %v9939_v9, %v10339_v56  ;;  %8316 = vmatprep.mubr.msk.bf16.mxu1 %vm2032_vm2, %v8591_v0  ;;  %v14493_v15 = vmax.f32 %v14492_v26, 0.0 }
 0x1d7   : > { %v10493_v40 = vmax.f32 %v14476_v13, %v5255_v7  ;;  %v10507_v61 = vmax.f32 %v14481_v60, %v5253_v35  ;;  %v3275_v13 = vadd.f32 %v9939_v9, %v10323_v27  ;;  %v4310_v10 = vadd.f32 %v9939_v9, %v10349_v17  ;;  %v10526_v27 = vpop.f32.mrb[116].mxu0  ;;  %v8592_v17 = vld [vmem:[%s8686_s25 + $0x388] sm:$0xff]  }
 0x1d8   : > { %14474 = vst [vmem:[#allocation60_spill] sm:$0xff] %v10489_v6  ;;  %14479 = vst [vmem:[#allocation62_spill] sm:$0xff] %v10497_v63  ;;  %5892 = vrot.lane.b32.xlu0 %v10497_v63, %s8636_s9  ;;  %v3278_v35 = vadd.f32 %v9939_v9, %v10351_v20  ;;  %v5000_v0 = vmax.f32 %v3286_v41, 0.0  ;;  %v4302_v14 = vadd.f32 %v9939_v9, %v10364_v42  ;;  %v10534_v52 = vpop.f32.mrb[117].mxu0  ;;  %v10541_v63 = vpop.f32.mrb[117].mxu1  ;;  %v14489_v6 = vmax.f32 %v14488_v54, 0.0 }
 0x1d9   : > { %14477 = vst [vmem:[#allocation82_spill] sm:$0xff] %v10493_v40  ;;  %14482 = vst [vmem:[#allocation61_spill] sm:$0xff] %v10507_v61  ;;  %v4997_v56 = vmax.f32 %v3275_v13, 0.0  ;;  %v5662_v7 = vmax.f32 %v14483_v28, %v10300_v47  ;;  %v6570_v50 = vmul.f32 %v10377_v33, %v10377_v33  ;;  %v5256_v20 = vmax.f32 %v4310_v10, 0.0  ;;  %v14484_v13 = vld [vmem:[#allocation28_spill] sm:$0xff]  ;;  %v10543_v42 = vpop.f32.mrb[118].mxu0 }
 0x1da   : > { %v4998_v60 = vmax.f32 %v3278_v35, 0.0  ;;  %v5661_v41 = vmax.f32 %v14484_v13, %v10282_v24  ;;  %v8594_v47 = vld [vmem:[%s8686_s25 + $0x390] sm:$0xff]   ;;  %v10553_v29 = vmax.f32 %v14489_v6, %v5000_v0  ;;  %v5254_v53 = vmax.f32 %v4302_v14, 0.0  ;;  %v10557_v10 = vpop.f32.mrb[118].mxu1  ;;  %v10559_v35 = vpop.f32.mrb[119].mxu0 }
 0x1db   : > { %v14485_v28 = vld [vmem:[#allocation84_spill] sm:$0xff]  ;;  %5845 = vrot.lane.b32.xlu1 %v5662_v7, %s8637_s10  ;;  %v6310_v24 = vsel %vm5785_vm3, %v5662_v7, 0.0  ;;  %14491 = vst [vmem:[#allocation40_spill] sm:$0xff] %v10559_v35  ;;  %v6569_v6 = vmul.f32 %v5662_v7, %v5662_v7  ;;  %v10572_v14 = vpop.f32.mrb[119].mxu1  ;;  %8061 = vmatmul.mubr.msk.bf16.gmra.mrb[224].mxu0 %vm2032_vm2, %v8592_v17  ;;  %v6312_v7 = vsel %vm5785_vm3, %v10377_v33, 0.0  ;;  %v10601_v17 = vpop.f32.mrb[120].mxu0 }
 0x1dc   : > { %v14486_v61 = vmax.f32 %v14485_v28, 0.0  ;;  %14490 = vst [vmem:[#allocation31_spill] sm:$0xff] %v10553_v29  ;;  %v8595_v13 = vld [vmem:[%s8686_s25 + $0x790] sm:$0xff]   ;;  %v10564_v28 = vmax.f32 %v14493_v15, %v5256_v20  ;;  %5843 = vrot.lane.b32.xlu0 %v5661_v41, %s8637_s10  ;;  %v6308_v0 = vsel %vm5785_vm3, %v5661_v41, 0.0  ;;  %v6568_v26 = vmul.f32 %v5661_v41, %v5661_v41  ;;  %v14497_v15 = vld [vmem:[#allocation33_spill] sm:$0xff]  ;;  %8064 = vmatprep.mubr.msk.bf16.mxu0 %vm2032_vm2, %v8594_v47 }
 0x1dd   : > { %v6309_v35 = vadd.f32 %v6308_v0, %v10337_v22  ;;  %v10581_v20 = vmax.f32 %v14497_v15, %v10305_v43  ;;  %8317 = vmatmul.mubr.msk.bf16.gmra.mrb[224].mxu1 %vm2032_vm2, %v8593_v5  ;;  %v6707_v43 = vsel %vm5785_vm3, %v6572_v55, 0.0  ;;  %v6701_v22 = vsel %vm5785_vm3, %v6569_v6, 0.0 }
 0x1de   : > { %v10549_v40 = vmax.f32 %v14486_v61, %v4997_v56  ;;  %v14494_v61 = vld [vmem:[#allocation89_spill] sm:$0xff]  ;;  %v6699_v33 = vsel %vm5785_vm3, %v6568_v26, 0.0  ;;  %8320 = vmatprep.mubr.msk.bf16.mxu1 %vm2032_vm2, %v8595_v13  ;;  %v6573_v55 = vmul.f32 %v10453_v48, %v10453_v48  ;;  %v4315_v47 = vadd.f32 %v9939_v9, %v10444_v45  ;;  %v10611_v13 = vpop.f32.mrb[120].mxu1 }
 0x1df   : > { %v14495_v56 = vmax.f32 %v14494_v61, 0.0  ;;  %14498 = vst [vmem:[#allocation39_spill] sm:$0xff] %v10581_v20  ;;  %5853 = vrot.lane.b32.xlu1 %v10581_v20, %s8637_s10  ;;  %v8596_v61 = vld [vmem:[%s8686_s25 + $0x398] sm:$0xff]   ;;  %v14501_v6 = vmax.f32 %v10186_v23, 0.0  ;;  %v14502_v26 = vmax.f32 %v10209_v21, 0.0  ;;  %v14503_v45 = vmax.f32 %v10205_v49, 0.0 }
 0x1e0   : > { %14487 = vst [vmem:[#allocation78_spill] sm:$0xff] %v10549_v40  ;;  %v14496_v40 = vmax.f32 %v10140_v38, 0.0  ;;  %v4323_v38 = vadd.f32 %v9939_v9, %v10432_v32  ;;  %v6703_v23 = vsel %vm5785_vm3, %v6570_v50, 0.0  ;;  %v14538_v20 = vld [vmem:[#allocation73_spill] sm:$0xff] }
 0x1e1   : > { %v10568_v54 = vmax.f32 %v14495_v56, %v4998_v60  ;;  %v3299_v60 = vadd.f32 %v9939_v9, %v10415_v1  ;;  %v6700_v1 = vadd.f32 %v6699_v33, %v10358_v8  ;;  %v10613_v8 = vpop.f32.mrb[121].mxu0  ;;  %v5257_v33 = vmax.f32 %v4315_v47, 0.0 }
 0x1e2   : > { %v10576_v29 = vmax.f32 %v14496_v40, %v5254_v53  ;;  %v3291_v40 = vadd.f32 %v9939_v9, %v10434_v62  ;;  %v6311_v53 = vadd.f32 %v6310_v24, %v6309_v35  ;;  %v5259_v32 = vmax.f32 %v4323_v38, 0.0  ;;  %v14499_v24 = vld [vmem:[#allocation29_spill] sm:$0xff] }
 0x1e3   : > { %v5003_v62 = vmax.f32 %v3299_v60, 0.0  ;;  %v10609_v35 = vmax.f32 %v14499_v24, %v10262_v36  ;;  %v6702_v56 = vadd.f32 %v6701_v22, %v6700_v1  ;;  %v10626_v36 = vpop.f32.mrb[121].mxu1  ;;  %v10628_v60 = vpop.f32.mrb[122].mxu0  ;;  %v8597_v38 = vld [vmem:[%s8686_s25 + $0x798] sm:$0xff]   ;;  %v6318_v22 = vsel %vm5785_vm3, %v10453_v48, 0.0  ;;  %v8599_v1 = vld [vmem:[%s8686_s25 + $0x7a0] sm:$0xff]   ;;  %8065 = vmatmul.mubr.msk.bf16.gmra.mrb[228].mxu0 %vm2032_vm2, %v8596_v61 }
 0x1e4   : > { %v5001_v5 = vmax.f32 %v3291_v40, 0.0  ;;  %v6313_v41 = vadd.f32 %v6312_v7, %v6311_v53  ;;  %v10622_v15 = vmax.f32 %v14502_v26, %v5259_v32  ;;  %v8598_v40 = vld [vmem:[%s8686_s25 + $0x3a0] sm:$0xff]   ;;  %v10638_v21 = vpop.f32.mrb[122].mxu1  ;;  %v10640_v49 = vpop.f32.mrb[123].mxu0  ;;  %v14504_v32 = vld [vmem:[#allocation4_spill] sm:$0xff]  ;;  %v3302_v48 = vadd.f32 %v9939_v9, %v10446_v39 }
 0x1e5   : > { %14500 = vst [vmem:[#allocation63_spill] sm:$0xff] %v10609_v35  ;;  %v10618_v0 = vmax.f32 %v14501_v6, %v5003_v62  ;;  %5851 = vrot.lane.b32.xlu0 %v10609_v35, %s8637_s10  ;;  %v6704_v62 = vadd.f32 %v6703_v23, %v6702_v56  ;;  %v10650_v50 = vpop.f32.mrb[123].mxu1  ;;  %v14505_v24 = vmax.f32 %v10271_v4, 0.0  ;;  %v3294_v6 = vadd.f32 %v9939_v9, %v10460_v16 }
 0x1e6   : > { %v5545_v7 = vmax.f32 %v14503_v45, %v5001_v5  ;;  %v6315_v53 = vadd.f32 %v10485_v11, %v6313_v41  ;;  %v4326_v11 = vadd.f32 %v9939_v9, %v10458_v25  ;;  %v6705_v41 = vsel %vm5785_vm3, %v10518_v31, 0.0  ;;  %8321 = vmatmul.mubr.msk.bf16.gmra.mrb[228].mxu1 %vm2032_vm2, %v8597_v38  ;;  %8068 = vmatprep.mubr.msk.bf16.mxu0 %vm2032_vm2, %v8598_v40 }
 0x1e7   : > { %v5609_v56 = vmax.f32 %v14505_v24, %v5257_v33  ;;  %v6709_v26 = vsel %vm5785_vm3, %v6573_v55, 0.0  ;;  %v6706_v25 = vadd.f32 %v6705_v41, %v6704_v62  ;;  %v5004_v45 = vmax.f32 %v3302_v48, 0.0  ;;  %8324 = vmatprep.mubr.msk.bf16.mxu1 %vm2032_vm2, %v8599_v1  ;;  %v14510_v62 = vld [vmem:[#allocation66_spill] sm:$0xff]  ;;  %v8600_v41 = vld [vmem:[%s8686_s25 + $0x3a8] sm:$0xff]  }
 0x1e8   : > { %v10644_v5 = vmax.f32 %v14504_v32, %v5545_v7  ;;  %v6317_v47 = vadd.f32 %v10503_v19, %v6315_v53  ;;  %v14506_v19 = vld [vmem:[#allocation5_spill] sm:$0xff]  ;;  %v5260_v16 = vmax.f32 %v4326_v11, 0.0  ;;  %v5002_v61 = vmax.f32 %v3294_v6, 0.0 }
 0x1e9   : > { %v10668_v31 = vmax.f32 %v14506_v19, %v5609_v56  ;;  %v6708_v7 = vadd.f32 %v6707_v43, %v6706_v25  ;;  %v14508_v38 = vmax.f32 %v10245_v30, 0.0  ;;  %v4318_v40 = vadd.f32 %v9939_v9, %v10468_v44  ;;  %v14509_v53 = vld [vmem:[#allocation65_spill] sm:$0xff]  ;;  %v10694_v44 = vpop.f32.mrb[124].mxu1  ;;  %v8601_v19 = vld [vmem:[%s8686_s25 + $0x7a8] sm:$0xff]  }
 0x1ea   : > { %6045 = vst.msk [vmem:[%s10174_s7 + $0x10] sm:$0xff] %vm5785_vm3, %v10644_v5  ;;  %v6319_v4 = vadd.f32 %v6318_v22, %v6317_v47  ;;  %v10678_v22 = vpop.f32.mrb[124].mxu0  ;;  %v10682_v33 = vadd.f32 %v9939_v9, %v14509_v53  ;;  %v10686_v1 = vadd.f32 %v9939_v9, %v14510_v62  ;;  %v14511_v43 = vmax.f32 %v10288_v51, 0.0  ;;  %v14513_v56 = vld [vmem:[#allocation37_spill] sm:$0xff]  ;;  %v14514_v51 = vld [vmem:[#allocation34_spill] sm:$0xff]  ;;  %v14516_v53 = vld [vmem:[#allocation7_spill] sm:$0xff] }
 0x1eb   : > { %14507 = vst [vmem:[#allocation64_spill] sm:$0xff] %v10668_v31  ;;  %v10674_v23 = vmax.f32 %v14508_v38, %v5004_v45  ;;  %v14512_v32 = vmax.f32 %v10278_v58, 0.0  ;;  %v10696_v11 = vpop.f32.mrb[125].mxu0  ;;  %6049 = vst.msk [vmem:[%s10174_s7 + $0x90] sm:$0xff] %vm5785_vm3, %v10668_v31  ;;  %v6710_v47 = vadd.f32 %v6709_v26, %v6708_v7  ;;  %v5258_v24 = vmax.f32 %v4318_v40, 0.0  ;;  %v10706_v45 = vpop.f32.mrb[125].mxu1  ;;  %8069 = vmatmul.mubr.msk.bf16.gmra.mrb[232].mxu0 %vm2032_vm2, %v8600_v41 }
 0x1ec   : > { %v10690_v30 = vmax.f32 %v14511_v43, %v5260_v16  ;;  %v5668_v6 = vmax.f32 %v14513_v56, %v10347_v3  ;;  %v5667_v25 = vmax.f32 %v14514_v51, %v10328_v59  ;;  %v10708_v58 = vpop.f32.mrb[126].mxu0  ;;  %v8602_v16 = vld [vmem:[%s8686_s25 + $0x3b0] sm:$0xff]   ;;  %v14517_v26 = vld [vmem:[#allocation38_spill] sm:$0xff]  ;;  %v3315_v59 = vadd.f32 %v9939_v9, %v10526_v27  ;;  %v10725_v3 = vpop.f32.mrb[126].mxu1  ;;  %v14523_v31 = vld [vmem:[#allocation41_spill] sm:$0xff] }
 0x1ed   : > { %v5546_v48 = vmax.f32 %v14512_v32, %v5002_v61  ;;  %v14515_v61 = vld [vmem:[#allocation67_spill] sm:$0xff]  ;;  %v10721_v7 = vmax.f32 %v14517_v26, %v10372_v12  ;;  %v10727_v40 = vpop.f32.mrb[127].mxu0  ;;  %v8603_v43 = vld [vmem:[%s8686_s25 + $0x7b0] sm:$0xff]   ;;  %v10739_v27 = vpop.f32.mrb[127].mxu1  ;;  %v14521_v26 = vld [vmem:[#allocation69_spill] sm:$0xff]  ;;  %8072 = vmatprep.mubr.msk.bf16.mxu0 %vm2032_vm2, %v8602_v16 }
 0x1ee   : > { %v10714_v38 = vadd.f32 %v9939_v9, %v14515_v61  ;;  %v14519_v32 = vld [vmem:[#allocation68_spill] sm:$0xff]  ;;  %v6575_v61 = vmul.f32 %v5668_v6, %v5668_v6  ;;  %5935 = vrot.lane.b32.xlu1 %v5668_v6, %s8635_s8  ;;  %v6320_v12 = vsel %vm5785_vm3, %v5667_v25, 0.0  ;;  %5933 = vrot.lane.b32.xlu0 %v5667_v25, %s8635_s8  ;;  %v10744_v55 = vadd.f32 %v9939_v9, %v14521_v26  ;;  %v10774_v16 = vpop.f32.mrb[128].mxu0 }
 0x1ef   : > { %v10717_v62 = vmax.f32 %v14516_v53, %v5546_v48  ;;  %14518 = vst [vmem:[#allocation83_spill] sm:$0xff] %v10721_v7  ;;  %v10732_v56 = vadd.f32 %v9939_v9, %v14519_v32  ;;  %v14520_v48 = vmax.f32 %v10292_v37, 0.0  ;;  %v6574_v32 = vmul.f32 %v5667_v25, %v5667_v25  ;;  %8325 = vmatmul.mubr.msk.bf16.gmra.mrb[232].mxu1 %vm2032_vm2, %v8601_v19 }
 0x1f0   : > { %v6321_v39 = vadd.f32 %v6320_v12, %v6319_v4  ;;  %v6322_v26 = vsel %vm5785_vm3, %v5668_v6, 0.0  ;;  %v5007_v12 = vmax.f32 %v3315_v59, 0.0  ;;  %8328 = vmatprep.mubr.msk.bf16.mxu1 %vm2032_vm2, %v8603_v43  ;;  %v6713_v6 = vsel %vm5785_vm3, %v6575_v61, 0.0  ;;  %14526 = vst [vmem:[#allocation27_spill] sm:$0xff] %v10774_v16 }
 0x1f1   : > { %v5610_v51 = vmax.f32 %v14520_v48, %v5258_v24  ;;  %6046 = vst.msk [vmem:[%s10174_s7 + $0x30] sm:$0xff] %vm5785_vm3, %v10717_v62  ;;  %v14522_v24 = vld [vmem:[#allocation70_spill] sm:$0xff]  ;;  %v6711_v41 = vsel %vm5785_vm3, %v6574_v32, 0.0  ;;  %v4339_v43 = vadd.f32 %v9939_v9, %v10532_v46  ;;  %v4331_v61 = vadd.f32 %v9939_v9, %v10541_v63  ;;  %v10789_v32 = vpop.f32.mrb[129].mxu0 }
 0x1f2   : > { %v10753_v48 = vadd.f32 %v9939_v9, %v14522_v24  ;;  %v10763_v25 = vadd.f32 %v6322_v26, %v6321_v39  ;;  %v6712_v19 = vadd.f32 %v6711_v41, %v6710_v47  ;;  %5943 = vrot.lane.b32.xlu1 %v10721_v7, %s8635_s8  ;;  %v14527_v39 = vmax.f32 %v10384_v34, 0.0  ;;  %14529 = vst [vmem:[#allocation32_spill] sm:$0xff] %v10789_v32  ;;  %v10791_v26 = vpop.f32.mrb[128].mxu1  ;;  %v8604_v41 = vld [vmem:[%s8686_s25 + $0x3b8] sm:$0xff]   ;;  %v10804_v46 = vld [vmem:[%s14035_s2] ss:$0 sm:$0xff] }
 0x1f3   : > { %v10756_v53 = vmax.f32 %v14523_v31, %v5610_v51  ;;  %v14525_v31 = vld [vmem:[#allocation71_spill] sm:$0xff]  ;;  %v3307_v47 = vadd.f32 %v9939_v9, %v10534_v52  ;;  %14530 = vst [vmem:[#allocation28_spill] sm:$0xff] %v10791_v26  ;;  %v10808_v63 = vpop.f32.mrb[130].mxu0  ;;  %v10810_v52 = vpop.f32.mrb[129].mxu1  ;;  %v8605_v24 = vld [vmem:[%s8686_s25 + $0x7b8] sm:$0xff]   ;;  %v8606_v34 = vld [vmem:[%s8686_s25 + $0x3c0] sm:$0xff]   ;;  %v10827_v35 = vadd.f32 %v10804_v46, %v14538_v20  ;;  %8073 = vmatmul.mubr.msk.bf16.gmra.mrb[236].mxu0 %vm2032_vm2, %v8604_v41 }
 0x1f4   : > { %v10769_v51 = vadd.f32 %v9939_v9, %v14525_v31  ;;  %v10781_v59 = vmax.f32 %v14527_v39, %v5007_v12  ;;  %v10795_v31 = vadd.f32 %v6713_v6, %v6712_v19  ;;  %v14531_v12 = vld [vmem:[#allocation35_spill] sm:$0xff]  ;;  %v3318_v9 = vadd.f32 %v10804_v46, %v10543_v42  ;;  %14533 = vst [vmem:[#allocation86_spill] sm:$0xff] %v10808_v63  ;;  %v10818_v4 = vpop.f32.mrb[130].mxu1  ;;  %v14537_v7 = vld [vmem:[#allocation72_spill] sm:$0xff]  ;;  %v14545_v32 = vld [vmem:[#allocation57_spill] sm:$0xff] }
 0x1f5   : > { %14524 = vst [vmem:[#allocation87_spill] sm:$0xff] %v10756_v53  ;;  %6050 = vst.msk [vmem:[%s10174_s7 + $0xb0] sm:$0xff] %vm5785_vm3, %v10756_v53  ;;  %v10799_v39 = vmax.f32 %v14531_v12, %v10332_v2  ;;  %v5263_v6 = vmax.f32 %v4339_v43, 0.0  ;;  %v5005_v19 = vmax.f32 %v3307_v47, 0.0  ;;  %v5261_v37 = vmax.f32 %v4331_v61, 0.0  ;;  %v10816_v12 = vpop.f32.mrb[131].mxu0  ;;  %8076 = vmatprep.mubr.msk.bf16.mxu0 %vm2032_vm2, %v8606_v34 }
 0x1f6   : > { %14528 = vst [vmem:[#allocation88_spill] sm:$0xff] %v10781_v59  ;;  %14534 = vst [vmem:[#allocation90_spill] sm:$0xff] %v10810_v52  ;;  %v4342_v2 = vadd.f32 %v10804_v46, %v10557_v10  ;;  %v8607_v53 = vld [vmem:[%s8686_s25 + $0x7c0] sm:$0xff]   ;;  %v10823_v42 = vadd.f32 %v10804_v46, %v14537_v7  ;;  %v5008_v43 = vmax.f32 %v3318_v9, 0.0  ;;  %v14539_v47 = vld [vmem:[#allocation40_spill] sm:$0xff]  ;;  %v10833_v61 = vpop.f32.mrb[131].mxu1 }
 0x1f7   : > { %14532 = vst [vmem:[#allocation84_spill] sm:$0xff] %v10799_v39  ;;  %14535 = vst [vmem:[#allocation89_spill] sm:$0xff] %v10816_v12  ;;  %5941 = vrot.lane.b32.xlu0 %v10799_v39, %s8635_s8  ;;  %v3310_v10 = vadd.f32 %v10804_v46, %v14539_v47  ;;  %v14541_v52 = vld [vmem:[#allocation36_spill] sm:$0xff]  ;;  %v14543_v12 = vld [vmem:[#allocation30_spill] sm:$0xff]  ;;  %v14546_v20 = vmax.f32 %v14545_v32, 0.0  ;;  %8329 = vmatmul.mubr.msk.bf16.gmra.mrb[236].mxu1 %vm2032_vm2, %v8605_v24 }
 0x1f8   : > { %14536 = vst [vmem:[#allocation33_spill] sm:$0xff] %v10818_v4  ;;  %14540 = vst [vmem:[#allocation29_spill] sm:$0xff] %v10833_v61  ;;  %v14542_v4 = vmax.f32 %v14541_v52, 0.0  ;;  %v14544_v7 = vmax.f32 %v14543_v12, 0.0  ;;  %v5264_v59 = vmax.f32 %v4342_v2, 0.0  ;;  %v14547_v9 = vld [vmem:[#allocation74_spill] sm:$0xff]  ;;  %8332 = vmatprep.mubr.msk.bf16.mxu1 %vm2032_vm2, %v8607_v53 }
 0x1f9   : > { %v10845_v16 = vmax.f32 %v14546_v20, %v5261_v37  ;;  %v10850_v47 = vadd.f32 %v10804_v46, %v14547_v9  ;;  %v14548_v39 = vld [vmem:[#allocation81_spill] sm:$0xff]  ;;  %v14550_v37 = vmax.f32 %v10466_v57, 0.0  ;;  %v14551_v41 = vld [vmem:[#allocation31_spill] sm:$0xff]  ;;  %v14553_v12 = vld [vmem:[#allocation60_spill] sm:$0xff]  ;;  %v10885_v20 = vpop.f32.mrb[132].mxu0  ;;  %v4978_v9 = vmax.f32 %v10753_v48, 0.0 }
 0x1fa   : > { %v10837_v26 = vmax.f32 %v14542_v4, %v5263_v6  ;;  %v10841_v63 = vmax.f32 %v14544_v7, %v5005_v19  ;;  %v14549_v61 = vmax.f32 %v14548_v39, 0.0  ;;  %v5006_v4 = vmax.f32 %v3310_v10, 0.0  ;;  %v14552_v19 = vld [vmem:[#allocation16_spill] sm:$0xff]  ;;  %v14554_v39 = vld [vmem:[#allocation14_spill] sm:$0xff]  ;;  %14559 = vst [vmem:[#allocation5_spill] sm:$0xff] %v10885_v20  ;;  %v14562_v48 = vld [vmem:[#allocation75_spill] sm:$0xff] }
 0x1fb   : > { %v4334_v6 = vadd.f32 %v10804_v46, %v10572_v14  ;;  %v10862_v32 = vmax.f32 %v14550_v37, %v5264_v59  ;;  %v10866_v2 = vmax.f32 %v14552_v19, %v14551_v41  ;;  %v14555_v10 = vld [vmem:[#allocation2_spill] sm:$0xff]  ;;  %v4355_v7 = vadd.f32 %v10804_v46, %v10611_v13  ;;  %v8608_v13 = vld [vmem:[%s8686_s25 + $0x3c8] sm:$0xff]   ;;  %v14567_v53 = vld [vmem:[#allocation77_spill] sm:$0xff] }
 0x1fc   : > { %v10854_v52 = vmax.f32 %v14549_v61, %v5008_v43  ;;  %v10870_v43 = vmax.f32 %v14554_v39, %v14553_v12  ;;  %v10874_v14 = vmax.f32 %v14555_v10, %v10564_v28  ;;  %v14557_v24 = vld [vmem:[#allocation26_spill] sm:$0xff]  ;;  %v3331_v61 = vadd.f32 %v10804_v46, %v10601_v17  ;;  %v10896_v17 = vpop.f32.mrb[132].mxu1  ;;  %v8609_v10 = vld [vmem:[%s8686_s25 + $0x7c8] sm:$0xff]   ;;  %8077 = vmatmul.mubr.msk.bf16.gmra.mrb[240].mxu0 %vm2032_vm2, %v8608_v13 }
 0x1fd   : > { %v14558_v34 = vmax.f32 %v14557_v24, 0.0  ;;  %v5262_v59 = vmax.f32 %v4334_v6, 0.0  ;;  %v5236_v28 = vmax.f32 %v10769_v51, 0.0  ;;  %6015 = vrot.lane.b32.xlu1 %v10866_v2, %s8636_s9  ;;  %14561 = vst [vmem:[#allocation66_spill] sm:$0xff] %v10896_v17  ;;  %v10902_v51 = vadd.f32 %v10804_v46, %v14562_v48  ;;  %v10910_v39 = vpop.f32.mrb[133].mxu1  ;;  %v14566_v24 = vld [vmem:[#allocation76_spill] sm:$0xff] }
 0x1fe   : > { %14556 = vst [vmem:[#allocation4_spill] sm:$0xff] %v10874_v14  ;;  %6013 = vrot.lane.b32.xlu0 %v10870_v43, %s8636_s9  ;;  %v14563_v37 = vmax.f32 %v10477_v18, 0.0  ;;  %v5011_v19 = vmax.f32 %v3331_v61, 0.0  ;;  %14565 = vst [vmem:[#allocation34_spill] sm:$0xff] %v10910_v39  ;;  %v10919_v6 = vadd.f32 %v10804_v46, %v14567_v53  ;;  %v5267_v48 = vmax.f32 %v4355_v7, 0.0  ;;  %v10925_v61 = vpop.f32.mrb[134].mxu1 }
 0x1ff   : > { %v10879_v57 = vmax.f32 %v14558_v34, %v5006_v4  ;;  %v10894_v4 = vpop.f32.mrb[133].mxu0  ;;  %v10915_v34 = vadd.f32 %v10804_v46, %v14566_v24  ;;  %v3323_v18 = vadd.f32 %v10804_v46, %v10613_v8  ;;  %14569 = vst [vmem:[#allocation7_spill] sm:$0xff] %v10925_v61  ;;  %v8611_v17 = vld [vmem:[%s8686_s25 + $0x7d0] sm:$0xff]   ;;  %v4347_v53 = vadd.f32 %v10804_v46, %v10626_v36  ;;  %v14572_v7 = vld [vmem:[#allocation17_spill] sm:$0xff]  ;;  %v10940_v8 = vpop.f32.mrb[135].mxu1 }
 0x200   : > { %14560 = vst [vmem:[#allocation65_spill] sm:$0xff] %v10894_v4  ;;  %v10906_v41 = vmax.f32 %v14563_v37, %v5262_v59  ;;  %v10908_v12 = vpop.f32.mrb[134].mxu0  ;;  %v8610_v37 = vld [vmem:[%s8686_s25 + $0x3d0] sm:$0xff]   ;;  %v14571_v4 = vld [vmem:[#allocation82_spill] sm:$0xff]  ;;  %v14574_v61 = vmax.f32 %v10714_v38, 0.0  ;;  %v4358_v36 = vadd.f32 %v10804_v46, %v10638_v21  ;;  %v3326_v38 = vadd.f32 %v10804_v46, %v10640_v49  ;;  %8333 = vmatmul.mubr.msk.bf16.gmra.mrb[240].mxu1 %vm2032_vm2, %v8609_v10 }
 0x201   : > { %14564 = vst [vmem:[#allocation37_spill] sm:$0xff] %v10908_v12  ;;  %v10923_v59 = vpop.f32.mrb[135].mxu0  ;;  %v14570_v12 = vmax.f32 %v10682_v33, 0.0  ;;  %v10938_v20 = vmax.f32 %v14572_v7, %v14571_v4  ;;  %6023 = vrot.lane.b32.xlu1 %v10874_v14, %s8636_s9  ;;  %v5009_v39 = vmax.f32 %v3323_v18, 0.0  ;;  %v3334_v33 = vadd.f32 %v10804_v46, %v10628_v60  ;;  %v14576_v4 = vld [vmem:[#allocation79_spill] sm:$0xff]  ;;  %8080 = vmatprep.mubr.msk.bf16.mxu0 %vm2032_vm2, %v8610_v37 }
 0x202   : > { %14568 = vst [vmem:[#allocation67_spill] sm:$0xff] %v10923_v59  ;;  %v10946_v59 = vmax.f32 %v14574_v61, %v5267_v48  ;;  %v5265_v7 = vmax.f32 %v4347_v53, 0.0  ;;  %v14577_v60 = vmax.f32 %v10686_v1, 0.0  ;;  %v5268_v13 = vmax.f32 %v4358_v36, 0.0  ;;  %8336 = vmatprep.mubr.msk.bf16.mxu1 %vm2032_vm2, %v8611_v17  ;;  %v14578_v61 = vld [vmem:[#allocation80_spill] sm:$0xff]  ;;  %v14580_v1 = vld [vmem:[#allocation22_spill] sm:$0xff] }
 0x203   : > { %v10932_v24 = vmax.f32 %v14570_v12, %v5011_v19  ;;  %14573 = vst [vmem:[#allocation38_spill] sm:$0xff] %v10938_v20  ;;  %v10955_v19 = vadd.f32 %v10804_v46, %v14576_v4  ;;  %6021 = vrot.lane.b32.xlu0 %v10938_v20, %s8636_s9  ;;  %v5012_v48 = vmax.f32 %v3334_v33, 0.0  ;;  %v4350_v18 = vadd.f32 %v10804_v46, %v10650_v50  ;;  %v10977_v33 = vpop.f32.mrb[136].mxu0  ;;  %v14581_v36 = vld [vmem:[#allocation18_spill] sm:$0xff] }
 0x204   : > { %14575 = vst [vmem:[#allocation68_spill] sm:$0xff] %v10946_v59  ;;  %v5553_v21 = vmax.f32 %v14577_v60, %v5009_v39  ;;  %v10971_v53 = vadd.f32 %v10804_v46, %v14578_v61  ;;  %v14579_v49 = vmax.f32 %v10744_v55, 0.0  ;;  %v5010_v4 = vmax.f32 %v3326_v38, 0.0  ;;  %v10988_v55 = vpop.f32.mrb[137].mxu0  ;;  %v8612_v38 = vld [vmem:[%s8686_s25 + $0x3d8] sm:$0xff]   ;;  %v14589_v20 = vld [vmem:[#allocation78_spill] sm:$0xff] }
 0x205   : > { %v5670_v39 = vmax.f32 %v14580_v1, %v10568_v54  ;;  %v14582_v17 = vmax.f32 %v10732_v56, 0.0  ;;  %v10986_v60 = vmax.f32 %v5236_v28, %v5268_v13  ;;  %v5266_v61 = vmax.f32 %v4350_v18, 0.0  ;;  %v14584_v54 = vld [vmem:[#allocation85_spill] sm:$0xff]  ;;  %v14585_v56 = vld [vmem:[#allocation19_spill] sm:$0xff]  ;;  %v11003_v13 = vpop.f32.mrb[138].mxu0  ;;  %8081 = vmatmul.mubr.msk.bf16.gmra.mrb[244].mxu0 %vm2032_vm2, %v8612_v38 }
 0x206   : > { %v5617_v10 = vmax.f32 %v14579_v49, %v5265_v7  ;;  %v10980_v50 = vmax.f32 %v14581_v36, %v5553_v21  ;;  %v10990_v7 = vpop.f32.mrb[136].mxu1  ;;  %v10995_v49 = vadd.f32 %v10804_v46, %v14584_v54  ;;  %v6580_v21 = vmul.f32 %v10644_v5, %v10644_v5  ;;  %v8613_v1 = vld [vmem:[%s8686_s25 + $0x7d8] sm:$0xff]   ;;  %v8614_v36 = vld [vmem:[%s8686_s25 + $0x3e0] sm:$0xff]   ;;  %v14590_v59 = vld [vmem:[#allocation15_spill] sm:$0xff] }
 0x207   : > { %v10984_v37 = vmax.f32 %v14582_v17, %v5012_v48  ;;  %14583 = vst [vmem:[#allocation69_spill] sm:$0xff] %v10990_v7  ;;  %v5554_v28 = vmax.f32 %v4978_v9, %v5010_v4  ;;  %5975 = vrot.lane.b32.xlu1 %v5670_v39, %s8637_s10  ;;  %v11005_v18 = vpop.f32.mrb[137].mxu1  ;;  %v14588_v54 = vmax.f32 %v10823_v42, 0.0  ;;  %v6577_v14 = vmul.f32 %v5670_v39, %v5670_v39  ;;  %v8615_v4 = vld [vmem:[%s8686_s25 + $0x7e0] sm:$0xff]   ;;  %v14592_v42 = vld [vmem:[#allocation48_spill] sm:$0xff] }
 0x208   : > { %v11000_v48 = vmax.f32 %v14585_v56, %v5617_v10  ;;  %14587 = vst [vmem:[#allocation41_spill] sm:$0xff] %v11005_v18  ;;  %v5669_v10 = vmax.f32 %v14590_v59, %v14589_v20  ;;  %v11014_v56 = vpop.f32.mrb[139].mxu0  ;;  %v11016_v9 = vpop.f32.mrb[138].mxu1  ;;  %6173 = vst.msk [vmem:[%s10174_s7 + $0x18] sm:$0xff] %vm5785_vm3, %v10980_v50  ;;  %v14593_v20 = vld [vmem:[#allocation49_spill] sm:$0xff]  ;;  %v6723_v17 = vsel %vm5785_vm3, %v6580_v21, 0.0  ;;  %8337 = vmatmul.mubr.msk.bf16.gmra.mrb[244].mxu1 %vm2032_vm2, %v8613_v1  ;;  %8084 = vmatprep.mubr.msk.bf16.mxu0 %vm2032_vm2, %v8614_v36 }
 0x209   : > { %v5618_v12 = vmax.f32 %v14588_v54, %v5266_v61  ;;  %14591 = vst [vmem:[#allocation71_spill] sm:$0xff] %v11016_v9  ;;  %v11026_v61 = vmax.f32 %v14592_v42, %v5554_v28  ;;  %v11028_v54 = vpop.f32.mrb[139].mxu1  ;;  %v6326_v9 = vsel %vm5785_vm3, %v5670_v39, 0.0  ;;  %v6332_v42 = vsel %vm5785_vm3, %v10644_v5, 0.0  ;;  %v14595_v5 = vld [vmem:[#allocation20_spill] sm:$0xff]  ;;  %8340 = vmatprep.mubr.msk.bf16.mxu1 %vm2032_vm2, %v8615_v4 }
 0x20a   : > { %14586 = vst [vmem:[#allocation70_spill] sm:$0xff] %v11000_v48  ;;  %6177 = vst.msk [vmem:[%s10174_s7 + $0x98] sm:$0xff] %vm5785_vm3, %v11000_v48  ;;  %v6324_v18 = vsel %vm5785_vm3, %v5669_v10, 0.0  ;;  %v6576_v7 = vmul.f32 %v5669_v10, %v5669_v10  ;;  %5973 = vrot.lane.b32.xlu0 %v5669_v10, %s8637_s10  ;;  %v6578_v39 = vmul.f32 %v10870_v43, %v10870_v43  ;;  %v6717_v38 = vsel %vm5785_vm3, %v6577_v14, 0.0 }
 0x20b   : > { %v11034_v59 = vmax.f32 %v14593_v20, %v5618_v12  ;;  %v6325_v12 = vadd.f32 %v6324_v18, %v10763_v25  ;;  %6174 = vst.msk [vmem:[%s10174_s7 + $0x38] sm:$0xff] %vm5785_vm3, %v11026_v61  ;;  %v11056_v21 = vmax.f32 %v14595_v5, %v10576_v29  ;;  %v6581_v25 = vmul.f32 %v10717_v62, %v10717_v62  ;;  %v8616_v20 = vld [vmem:[%s8686_s25 + $0x3e8] sm:$0xff]  }
 0x20c   : > { %v6715_v10 = vsel %vm5785_vm3, %v6576_v7, 0.0  ;;  %v3347_v14 = vadd.f32 %v10804_v46, %v10678_v22  ;;  %v11067_v7 = vpop.f32.mrb[140].mxu0  ;;  %v6330_v29 = vsel %vm5785_vm3, %v10866_v2, 0.0  ;;  %v6579_v36 = vmul.f32 %v10866_v2, %v10866_v2  ;;  %v11081_v22 = vpop.f32.mrb[140].mxu1 }
 0x20d   : > { %14594 = vst [vmem:[#allocation35_spill] sm:$0xff] %v11034_v59  ;;  %14596 = vst [vmem:[#allocation72_spill] sm:$0xff] %v11056_v21  ;;  %v6327_v18 = vadd.f32 %v6326_v9, %v6325_v12  ;;  %v6716_v1 = vadd.f32 %v6715_v10, %v10795_v31  ;;  %v6328_v4 = vsel %vm5785_vm3, %v10870_v43, 0.0  ;;  %5983 = vrot.lane.b32.xlu1 %v11056_v21, %s8637_s10  ;;  %v11079_v9 = vpop.f32.mrb[141].mxu0  ;;  %v11088_v28 = vpop.f32.mrb[141].mxu1  ;;  %8085 = vmatmul.mubr.msk.bf16.gmra.mrb[248].mxu0 %vm2032_vm2, %v8616_v20 }
 0x20e   : > { %6178 = vst.msk [vmem:[%s10174_s7 + $0xb8] sm:$0xff] %vm5785_vm3, %v11034_v59  ;;  %14597 = vst [vmem:[#allocation73_spill] sm:$0xff] %v11067_v7  ;;  %v4371_v31 = vadd.f32 %v10804_v46, %v10694_v44  ;;  %v5015_v5 = vmax.f32 %v3347_v14, 0.0  ;;  %v3339_v2 = vadd.f32 %v10804_v46, %v10696_v11  ;;  %v11086_v43 = vpop.f32.mrb[142].mxu0  ;;  %v8617_v59 = vld [vmem:[%s8686_s25 + $0x7e8] sm:$0xff]   ;;  %v6719_v44 = vsel %vm5785_vm3, %v6578_v39, 0.0 }
 0x20f   : > { %14598 = vst [vmem:[#allocation40_spill] sm:$0xff] %v11079_v9  ;;  %14599 = vst [vmem:[#allocation36_spill] sm:$0xff] %v11081_v22  ;;  %v6329_v12 = vadd.f32 %v6328_v4, %v6327_v18  ;;  %v6718_v10 = vadd.f32 %v6717_v38, %v6716_v1  ;;  %v4363_v21 = vadd.f32 %v10804_v46, %v10706_v45  ;;  %v14602_v22 = vld [vmem:[#allocation61_spill] sm:$0xff]  ;;  %v11098_v38 = vpop.f32.mrb[143].mxu0  ;;  %v11100_v18 = vpop.f32.mrb[142].mxu1  ;;  %v8618_v11 = vld [vmem:[%s8686_s25 + $0x3f0] sm:$0xff]  }
 0x210   : > { %14600 = vst [vmem:[#allocation30_spill] sm:$0xff] %v11086_v43  ;;  %14601 = vst [vmem:[#allocation57_spill] sm:$0xff] %v11088_v28  ;;  %v5271_v48 = vmax.f32 %v4371_v31, 0.0  ;;  %v14603_v9 = vld [vmem:[#allocation21_spill] sm:$0xff]  ;;  %v8619_v1 = vld [vmem:[%s8686_s25 + $0x7f0] sm:$0xff]   ;;  %v14607_v28 = vmax.f32 %v10827_v35, 0.0  ;;  %8341 = vmatmul.mubr.msk.bf16.gmra.mrb[248].mxu1 %vm2032_vm2, %v8617_v59  ;;  %8088 = vmatprep.mubr.msk.bf16.mxu0 %vm2032_vm2, %v8618_v11 }
 0x211   : > { %v11096_v7 = vmax.f32 %v14603_v9, %v14602_v22  ;;  %14605 = vst [vmem:[#allocation81_spill] sm:$0xff] %v11098_v38  ;;  %14606 = vst [vmem:[#allocation31_spill] sm:$0xff] %v11100_v18  ;;  %v6331_v14 = vadd.f32 %v6330_v29, %v6329_v12  ;;  %v6720_v4 = vadd.f32 %v6719_v44, %v6718_v10  ;;  %v5013_v39 = vmax.f32 %v3339_v2, 0.0  ;;  %v11108_v31 = vpop.f32.mrb[143].mxu1 }
 0x212   : > { %v11106_v43 = vmax.f32 %v14607_v28, %v5015_v5  ;;  %v6334_v45 = vsel %vm5785_vm3, %v10717_v62, 0.0  ;;  %v6721_v9 = vsel %vm5785_vm3, %v6579_v36, 0.0  ;;  %v14608_v22 = vmax.f32 %v10902_v51, 0.0  ;;  %8344 = vmatprep.mubr.msk.bf16.mxu1 %vm2032_vm2, %v8619_v1 }
 0x213   : > { %14604 = vst [vmem:[#allocation74_spill] sm:$0xff] %v11096_v7  ;;  %v5269_v18 = vmax.f32 %v4363_v21, 0.0  ;;  %5981 = vrot.lane.b32.xlu0 %v11096_v7, %s8637_s10  ;;  %v6333_v35 = vadd.f32 %v6332_v42, %v6331_v14  ;;  %v6722_v28 = vadd.f32 %v6721_v9, %v6720_v4  ;;  %v14609_v29 = vmax.f32 %v10850_v47, 0.0  ;;  %v14614_v4 = vld [vmem:[#allocation25_spill] sm:$0xff] }
 0x214   : > { %v11115_v38 = vmax.f32 %v14608_v22, %v5271_v48  ;;  %v3350_v62 = vadd.f32 %v10804_v46, %v10708_v58  ;;  %v6725_v51 = vsel %vm5785_vm3, %v6581_v25, 0.0  ;;  %v14610_v48 = vmax.f32 %v10919_v6, 0.0  ;;  %v11140_v25 = vpop.f32.mrb[144].mxu0 }
 0x215   : > { %v11122_v12 = vmax.f32 %v14609_v29, %v5013_v39  ;;  %v4374_v42 = vadd.f32 %v10804_v46, %v10725_v3  ;;  %v3342_v47 = vadd.f32 %v10804_v46, %v10727_v40  ;;  %v6335_v58 = vadd.f32 %v6334_v45, %v6333_v35  ;;  %v14611_v3 = vld [vmem:[#allocation6_spill] sm:$0xff]  ;;  %v14612_v40 = vld [vmem:[#allocation3_spill] sm:$0xff]  ;;  %v11146_v44 = vpop.f32.mrb[145].mxu0 }
 0x216   : > { %v11130_v21 = vmax.f32 %v14610_v48, %v5269_v18  ;;  %v6724_v36 = vadd.f32 %v6723_v17, %v6722_v28  ;;  %v5016_v59 = vmax.f32 %v3350_v62, 0.0  ;;  %v4366_v6 = vadd.f32 %v10804_v46, %v10739_v27  ;;  %v11148_v18 = vpop.f32.mrb[144].mxu1  ;;  %v8620_v17 = vld [vmem:[%s8686_s25 + $0x3f8] sm:$0xff]   ;;  %v11159_v45 = vpop.f32.mrb[146].mxu0 }
 0x217   : > { %v5272_v20 = vmax.f32 %v4374_v42, 0.0  ;;  %v5014_v10 = vmax.f32 %v3342_v47, 0.0  ;;  %v5676_v5 = vmax.f32 %v14611_v3, %v10674_v23  ;;  %v5675_v2 = vmax.f32 %v14612_v40, %v10618_v0  ;;  %v11161_v23 = vpop.f32.mrb[145].mxu1  ;;  %v8621_v0 = vld [vmem:[%s8686_s25 + $0x7f8] sm:$0xff]   ;;  %8089 = vmatmul.mubr.msk.bf16.gmra.mrb[252].mxu0 %vm2032_vm2, %v8620_v17  ;;  %v14622_v17 = vld [vmem:[#allocation88_spill] sm:$0xff] }
 0x218   : > { %v6726_v11 = vadd.f32 %v6725_v51, %v6724_v36  ;;  %v14613_v1 = vmax.f32 %v10915_v34, 0.0  ;;  %v5270_v27 = vmax.f32 %v4366_v6, 0.0  ;;  %v11157_v39 = vmax.f32 %v14614_v4, %v10690_v30  ;;  %v11174_v34 = vpop.f32.mrb[147].mxu0  ;;  %v11176_v30 = vpop.f32.mrb[146].mxu1  ;;  %8345 = vmatmul.mubr.msk.bf16.gmra.mrb[252].mxu1 %vm2032_vm2, %v8621_v0 }
 0x219   : > { %v14616_v9 = vmax.f32 %v10971_v53, 0.0  ;;  %v14617_v35 = vmax.f32 %v10955_v19, 0.0  ;;  %6063 = vrot.lane.b32.xlu1 %v5676_v5, %s8635_s8  ;;  %6061 = vrot.lane.b32.xlu0 %v5675_v2, %s8635_s8  ;;  %v14618_v29 = vmax.f32 %v10995_v49, 0.0  ;;  %v6583_v51 = vmul.f32 %v5676_v5, %v5676_v5  ;;  %v11183_v42 = vpop.f32.mrb[147].mxu1 }
 0x21a   : > { %v11153_v14 = vmax.f32 %v14613_v1, %v5016_v59  ;;  %14615 = vst [vmem:[#allocation16_spill] sm:$0xff] %v11157_v39  ;;  %v6336_v53 = vsel %vm5785_vm3, %v5675_v2, 0.0  ;;  %v6582_v48 = vmul.f32 %v5675_v2, %v5675_v2  ;;  %v6338_v47 = vsel %vm5785_vm3, %v5676_v5, 0.0  ;;  %v14619_v59 = vld [vmem:[#allocation23_spill] sm:$0xff]  ;;  %v14621_v5 = vld [vmem:[#allocation44_spill] sm:$0xff]  ;;  %v11204_v2 = vpop.f32.mrb[148].mxu1 }
 0x21b   : > { %v11166_v22 = vmax.f32 %v14616_v9, %v5272_v20  ;;  %v11170_v28 = vmax.f32 %v14617_v35, %v5014_v10  ;;  %v11180_v62 = vmax.f32 %v14618_v29, %v5270_v27  ;;  %v6337_v19 = vadd.f32 %v6336_v53, %v6335_v58  ;;  %v11198_v58 = vpop.f32.mrb[148].mxu0  ;;  %v11210_v4 = vpop.f32.mrb[149].mxu1 }
 0x21c   : > { %v6727_v36 = vsel %vm5785_vm3, %v6582_v48, 0.0  ;;  %v11190_v6 = vmax.f32 %v14619_v59, %v10622_v15  ;;  %v6729_v10 = vsel %vm5785_vm3, %v6583_v51, 0.0  ;;  %v5680_v40 = vmax.f32 %v14621_v5, %v10854_v52  ;;  %v11202_v15 = vpop.f32.mrb[149].mxu0  ;;  %v11215_v9 = vpop.f32.mrb[150].mxu1  ;;  %v14625_v51 = vld [vmem:[#allocation10_spill] sm:$0xff]  ;;  %v14627_v48 = vld [vmem:[#allocation27_spill] sm:$0xff] }
 0x21d   : > { %v6339_v49 = vadd.f32 %v6338_v47, %v6337_v19  ;;  %v6728_v20 = vadd.f32 %v6727_v36, %v6726_v11  ;;  %6071 = vrot.lane.b32.xlu1 %v11157_v39, %s8635_s8  ;;  %v14623_v11 = vld [vmem:[#allocation8_spill] sm:$0xff]  ;;  %v11208_v27 = vpop.f32.mrb[150].mxu0  ;;  %v11218_v52 = vpop.f32.mrb[151].mxu1  ;;  %v6588_v35 = vmul.f32 %v10980_v50, %v10980_v50  ;;  %v6589_v29 = vmul.f32 %v11026_v61, %v11026_v61  ;;  %v14631_v59 = vld [vmem:[#allocation86_spill] sm:$0xff] }
 0x21e   : > { %14620 = vst [vmem:[#allocation60_spill] sm:$0xff] %v11190_v6  ;;  %6069 = vrot.lane.b32.xlu0 %v11190_v6, %s8635_s8  ;;  %v5679_v1 = vmax.f32 %v14623_v11, %v14622_v17  ;;  %v11213_v0 = vpop.f32.mrb[151].mxu0  ;;  %14624 = vst [vmem:[#allocation14_spill] sm:$0xff] %v11218_v52  ;;  %v11226_v53 = vmax.f32 %v14625_v51, %v10862_v32  ;;  %v11230_v19 = vadd.f32 %v10804_v46, %v14627_v48  ;;  %v14629_v47 = vld [vmem:[#allocation32_spill] sm:$0xff]  ;;  %v14635_v17 = vld [vmem:[#allocation89_spill] sm:$0xff] }
 0x21f   : > { %v6730_v3 = vadd.f32 %v6729_v10, %v6728_v20  ;;  %v11234_v36 = vadd.f32 %v10804_v46, %v14629_v47  ;;  %v11238_v20 = vadd.f32 %v10804_v46, %v14631_v59  ;;  %v14633_v10 = vld [vmem:[#allocation9_spill] sm:$0xff]  ;;  %v11246_v32 = vadd.f32 %v10804_v46, %v14635_v17  ;;  %v14637_v51 = vld [vmem:[#allocation28_spill] sm:$0xff]  ;;  %v14643_v6 = vld [vmem:[#allocation42_spill] sm:$0xff] }
 0x220   : > { %14626 = vst [vmem:[#allocation2_spill] sm:$0xff] %v11226_v53  ;;  %14628 = vst [vmem:[#allocation26_spill] sm:$0xff] %v11230_v19  ;;  %v11242_v5 = vmax.f32 %v14633_v10, %v10837_v26  ;;  %v11252_v11 = vsel %vm5785_vm3, %v10980_v50, 0.0  ;;  %v11256_v48 = vadd.f32 %v10804_v46, %v14637_v51  ;;  %v11260_v26 = vpop.f32.mrb[152].mxu0  ;;  %v11263_v47 = vsel %vm5785_vm3, %v6588_v35, 0.0  ;;  %v14640_v50 = vld [vmem:[#allocation45_spill] sm:$0xff] }
 0x221   : > { %6143 = vrot.lane.b32.xlu1 %v5680_v40, %s8636_s9  ;;  %14630 = vst [vmem:[#allocation75_spill] sm:$0xff] %v11234_v36  ;;  %14632 = vst [vmem:[#allocation76_spill] sm:$0xff] %v11238_v20  ;;  %v11267_v59 = vsel %vm5785_vm3, %v11026_v61, 0.0  ;;  %v11270_v10 = vsel %vm5785_vm3, %v6589_v29, 0.0  ;;  %v5678_v17 = vmax.f32 %v14640_v50, %v10879_v57  ;;  %v11274_v51 = vpop.f32.mrb[153].mxu0  ;;  %v5677_v61 = vmax.f32 %v14643_v6, %v10841_v63  ;;  %v14646_v57 = vld [vmem:[#allocation90_spill] sm:$0xff] }
 0x222   : > { %6141 = vrot.lane.b32.xlu0 %v5679_v1, %s8636_s9  ;;  %14634 = vst [vmem:[#allocation77_spill] sm:$0xff] %v11242_v5  ;;  %14636 = vst [vmem:[#allocation82_spill] sm:$0xff] %v11246_v32  ;;  %v11283_v7 = vpop.f32.mrb[154].mxu0  ;;  %v11290_v50 = vadd.f32 %v10804_v46, %v14646_v57  ;;  %v6587_v36 = vmul.f32 %v5680_v40, %v5680_v40 }
 0x223   : > { %14638 = vst [vmem:[#allocation17_spill] sm:$0xff] %v11256_v48  ;;  %14639 = vst [vmem:[#allocation79_spill] sm:$0xff] %v11260_v26  ;;  %v6585_v39 = vmul.f32 %v5678_v17, %v5678_v17  ;;  %v11297_v35 = vpop.f32.mrb[155].mxu0  ;;  %v6342_v20 = vsel %vm5785_vm3, %v5678_v17, 0.0  ;;  %v6340_v26 = vsel %vm5785_vm3, %v5677_v61, 0.0  ;;  %v6584_v32 = vmul.f32 %v5677_v61, %v5677_v61  ;;  %v14654_v48 = vld [vmem:[#allocation43_spill] sm:$0xff] }
 0x224   : > { %14641 = vst [vmem:[#allocation80_spill] sm:$0xff] %v11274_v51  ;;  %14644 = vst [vmem:[#allocation18_spill] sm:$0xff] %v11283_v7  ;;  %v6341_v19 = vadd.f32 %v6340_v26, %v6339_v49  ;;  %v11316_v7 = vmax.f32 %v14654_v48, %v10845_v16  ;;  %v14660_v26 = vld [vmem:[#allocation65_spill] sm:$0xff] }
 0x225   : > { %6151 = vrot.lane.b32.xlu1 %v11226_v53, %s8636_s9  ;;  %v11276_v53 = vpop.f32.mrb[152].mxu1  ;;  %14647 = vst [vmem:[#allocation19_spill] sm:$0xff] %v11290_v50  ;;  %14649 = vst [vmem:[#allocation78_spill] sm:$0xff] %v11297_v35  ;;  %v6733_v6 = vsel %vm5785_vm3, %v6585_v39, 0.0  ;;  %v14658_v39 = vld [vmem:[#allocation5_spill] sm:$0xff]  ;;  %v11332_v16 = vadd.f32 %v10804_v46, %v14660_v26  ;;  %v14673_v50 = vld [vmem:[#allocation7_spill] sm:$0xff] }
 0x226   : > { %6149 = vrot.lane.b32.xlu0 %v11242_v5, %s8636_s9  ;;  %14642 = vst [vmem:[#allocation22_spill] sm:$0xff] %v11276_v53  ;;  %v11285_v29 = vpop.f32.mrb[153].mxu1  ;;  %v14648_v53 = vld [vmem:[#allocation33_spill] sm:$0xff]  ;;  %14655 = vst [vmem:[#allocation20_spill] sm:$0xff] %v11316_v7  ;;  %v6343_v51 = vadd.f32 %v6342_v20, %v6341_v19  ;;  %v14665_v19 = vld [vmem:[#allocation67_spill] sm:$0xff] }
 0x227   : > { %14645 = vst [vmem:[#allocation85_spill] sm:$0xff] %v11285_v29  ;;  %v11294_v5 = vadd.f32 %v10804_v46, %v14648_v53  ;;  %v11299_v63 = vpop.f32.mrb[154].mxu1  ;;  %v6346_v53 = vsel %vm5785_vm3, %v5680_v40, 0.0  ;;  %v14652_v29 = vld [vmem:[#allocation11_spill] sm:$0xff]  ;;  %14661 = vst [vmem:[#allocation6_spill] sm:$0xff] %v11332_v16  ;;  %v14662_v48 = vld [vmem:[#allocation37_spill] sm:$0xff]  ;;  %v11344_v20 = vadd.f32 %v10804_v46, %v14665_v19  ;;  %v11361_v19 = vadd.f32 %v10804_v46, %v14673_v50 }
 0x228   : > { %14650 = vst [vmem:[#allocation15_spill] sm:$0xff] %v11299_v63  ;;  %v11305_v57 = vpop.f32.mrb[155].mxu1  ;;  %v11310_v35 = vmax.f32 %v14652_v29, %v10906_v41  ;;  %v6586_v63 = vmul.f32 %v5679_v1, %v5679_v1  ;;  %v14656_v41 = vld [vmem:[#allocation29_spill] sm:$0xff]  ;;  %v14667_v29 = vld [vmem:[#allocation66_spill] sm:$0xff] }
 0x229   : > { %6103 = vrot.lane.b32.xlu1 %v5678_v17, %s8637_s10  ;;  %14651 = vst [vmem:[#allocation48_spill] sm:$0xff] %v11305_v57  ;;  %v6731_v17 = vsel %vm5785_vm3, %v6584_v32, 0.0  ;;  %v6344_v57 = vsel %vm5785_vm3, %v5679_v1, 0.0  ;;  %v11324_v49 = vadd.f32 %v10804_v46, %v14656_v41  ;;  %v11328_v32 = vadd.f32 %v10804_v46, %v14658_v39  ;;  %14666 = vst [vmem:[#allocation23_spill] sm:$0xff] %v11344_v20 }
 0x22a   : > { %6101 = vrot.lane.b32.xlu0 %v5677_v61, %s8637_s10  ;;  %14653 = vst [vmem:[#allocation49_spill] sm:$0xff] %v11310_v35  ;;  %v6732_v40 = vadd.f32 %v6731_v17, %v6730_v3  ;;  %v11336_v1 = vadd.f32 %v10804_v46, %v14662_v48  ;;  %v11340_v3 = vpop.f32.mrb[156].mxu0  ;;  %v11348_v17 = vadd.f32 %v10804_v46, %v14667_v29  ;;  %v11352_v61 = vpop.f32.mrb[156].mxu1  ;;  %v6735_v48 = vsel %vm5785_vm3, %v6586_v63, 0.0 }
 0x22b   : > { %14657 = vst [vmem:[#allocation61_spill] sm:$0xff] %v11324_v49  ;;  %14659 = vst [vmem:[#allocation21_spill] sm:$0xff] %v11328_v32  ;;  %v6345_v41 = vadd.f32 %v6344_v57, %v6343_v51  ;;  %v11350_v26 = vpop.f32.mrb[157].mxu0  ;;  %v11367_v51 = vpop.f32.mrb[157].mxu1  ;;  %v11531_v32 = vadd.f32 %v10804_v46, %v11140_v25 }
 0x22c   : > { %14663 = vst [vmem:[#allocation3_spill] sm:$0xff] %v11336_v1  ;;  %14664 = vst [vmem:[#allocation25_spill] sm:$0xff] %v11340_v3  ;;  %v6734_v39 = vadd.f32 %v6733_v6, %v6732_v40  ;;  %v14675_v3 = vld [vmem:[#allocation46_spill] sm:$0xff]  ;;  %v11365_v52 = vpop.f32.mrb[158].mxu0  ;;  %v6737_v6 = vsel %vm5785_vm3, %v6587_v36, 0.0 }
 0x22d   : > { %6111 = vrot.lane.b32.xlu1 %v11310_v35, %s8637_s10  ;;  %14668 = vst [vmem:[#allocation44_spill] sm:$0xff] %v11348_v17  ;;  %14669 = vst [vmem:[#allocation88_spill] sm:$0xff] %v11350_v26  ;;  %v14671_v35 = vld [vmem:[#allocation34_spill] sm:$0xff]  ;;  %v5684_v29 = vmax.f32 %v14675_v3, %v10984_v37  ;;  %v6347_v63 = vadd.f32 %v6346_v53, %v6345_v41  ;;  %v11378_v3 = vpop.f32.mrb[158].mxu1  ;;  %v14676_v26 = vld [vmem:[#allocation12_spill] sm:$0xff]  ;;  %v11527_v17 = vadd.f32 %v10804_v46, %v11108_v31 }
 0x22e   : > { %6109 = vrot.lane.b32.xlu0 %v11316_v7, %s8637_s10  ;;  %14670 = vst [vmem:[#allocation8_spill] sm:$0xff] %v11352_v61  ;;  %v11357_v7 = vadd.f32 %v10804_v46, %v14671_v35  ;;  %14674 = vst [vmem:[#allocation27_spill] sm:$0xff] %v11361_v19  ;;  %v6736_v40 = vadd.f32 %v6735_v48, %v6734_v39  ;;  %v11371_v61 = vpop.f32.mrb[159].mxu0  ;;  %v11383_v39 = vpop.f32.mrb[159].mxu1  ;;  %v5683_v37 = vmax.f32 %v14676_v26, %v10932_v24  ;;  %v14677_v35 = vld [vmem:[#allocation47_spill] sm:$0xff] }
 0x22f   : > { %v6349_v53 = vadd.f32 %v11252_v11, %v6347_v63  ;;  %v11391_v1 = vmax.f32 %v14677_v35, %v10986_v60  ;;  %v11397_v11 = vadd.f32 %v10804_v46, %v10940_v8  ;;  %v11403_v63 = vpop.permute.xlu0 %5802  ;;  %v11407_v24 = vadd.f32 %v10804_v46, %v10988_v55  ;;  %v11413_v8 = vpop.f32.mrb[160].mxu0  ;;  %14712 = vst [vmem:[#allocation46_spill] sm:$0xff] %v11527_v17 }
 0x230   : > { %14672 = vst [vmem:[#allocation10_spill] sm:$0xff] %v11357_v7  ;;  %v6738_v41 = vadd.f32 %v6737_v6, %v6736_v40  ;;  %v11401_v6 = vadd.f32 %v10804_v46, %v10977_v33  ;;  %v6591_v60 = vmul.f32 %v5684_v29, %v5684_v29  ;;  %v6352_v26 = vsel %vm5785_vm3, %v5683_v37, 0.0  ;;  %v11424_v35 = vpop.f32.mrb[160].mxu1  ;;  %v14691_v7 = vld [vmem:[#allocation71_spill] sm:$0xff]  ;;  %14713 = vst [vmem:[#allocation12_spill] sm:$0xff] %v11531_v32 }
 0x231   : > { %6191 = vrot.lane.b32.xlu1 %v5684_v29, %s8635_s8  ;;  %14678 = vst [vmem:[#allocation32_spill] sm:$0xff] %v11391_v1  ;;  %v6351_v36 = vadd.f32 %v11267_v59, %v6349_v53  ;;  %14679 = vst [vmem:[#allocation86_spill] sm:$0xff] %v11397_v11  ;;  %v6590_v59 = vmul.f32 %v5683_v37, %v5683_v37  ;;  %v11422_v55 = vadd.f32 %v10804_v46, %v11014_v56  ;;  %v11426_v53 = vpop.f32.mrb[161].mxu0 }
 0x232   : > { %v6740_v57 = vadd.f32 %v11263_v47, %v6738_v41  ;;  %14680 = vst [vmem:[#allocation9_spill] sm:$0xff] %v11401_v6  ;;  %14681 = vst [vmem:[#allocation89_spill] sm:$0xff] %v11407_v24  ;;  %6189 = vrot.lane.b32.xlu0 %v5683_v37, %s8635_s8  ;;  %v11418_v47 = vadd.f32 %v10804_v46, %v11003_v13  ;;  %v14684_v37 = vld [vmem:[#allocation69_spill] sm:$0xff]  ;;  %v6354_v50 = vsel %vm5785_vm3, %v5684_v29, 0.0  ;;  %v11440_v56 = vpop.f32.mrb[162].mxu0  ;;  %v14714_v6 = vld [vmem:[#allocation50_spill] sm:$0xff] }
 0x233   : > { %14683 = vst [vmem:[#allocation45_spill] sm:$0xff] %v11422_v55  ;;  %v6353_v40 = vadd.f32 %v6352_v26, %v6351_v36  ;;  %v11430_v41 = vadd.f32 %v10804_v46, %v14684_v37  ;;  %v14687_v13 = vld [vmem:[#allocation13_spill] sm:$0xff]  ;;  %v11448_v29 = vpop.f32.mrb[163].mxu0  ;;  %v11458_v36 = vadd.f32 %v10804_v46, %v14691_v7  ;;  %v14704_v26 = vld [vmem:[#allocation36_spill] sm:$0xff]  ;;  %5827 = vst.msk [vmem:[%s10174_s7] sm:$0xff] %vm5826_vm4, %v11403_v63 }
 0x234   : > { %v6742_v33 = vadd.f32 %v11270_v10, %v6740_v57  ;;  %14682 = vst [vmem:[#allocation28_spill] sm:$0xff] %v11418_v47  ;;  %v6743_v10 = vsel %vm5785_vm3, %v6590_v59, 0.0  ;;  %v14686_v57 = vld [vmem:[#allocation68_spill] sm:$0xff]  ;;  %v11473_v59 = vpop.permute.xlu0 %5810  ;;  %v14700_v47 = vld [vmem:[#allocation30_spill] sm:$0xff]  ;;  %v11497_v55 = vadd.f32 %v10804_v46, %v14704_v26 }
 0x235   : > { %6199 = vrot.lane.b32.xlu1 %v11391_v1, %s8635_s8  ;;  %14685 = vst [vmem:[#allocation42_spill] sm:$0xff] %v11430_v41  ;;  %v11436_v48 = vmax.f32 %v14687_v13, %v14686_v57  ;;  %v11438_v1 = vpop.f32.mrb[161].mxu1  ;;  %v11444_v20 = vadd.f32 %v6354_v50, %v6353_v40  ;;  %v6745_v57 = vsel %vm5785_vm3, %v6591_v60, 0.0  ;;  %v14689_v13 = vld [vmem:[#allocation41_spill] sm:$0xff]  ;;  %14692 = vst [vmem:[#allocation11_spill] sm:$0xff] %v11458_v36 }
 0x236   : > { %v6744_v37 = vadd.f32 %v6743_v10, %v6742_v33  ;;  %v11446_v19 = vpop.f32.mrb[162].mxu1  ;;  %v11454_v16 = vadd.f32 %v10804_v46, %v14689_v13  ;;  %v11469_v60 = vadd.f32 %v10804_v46, %v11028_v54  ;;  %v14694_v10 = vld [vmem:[#allocation53_spill] sm:$0xff]  ;;  %v14698_v33 = vld [vmem:[#allocation40_spill] sm:$0xff]  ;;  %v11513_v26 = vpop.f32.mrb[164].mxu0  ;;  %5831 = vst.msk [vmem:[%s10174_s7 + $0x80] sm:$0xff] %vm5826_vm4, %v11473_v59 }
 0x237   : > { %14688 = vst [vmem:[#allocation90_spill] sm:$0xff] %v11436_v48  ;;  %6197 = vrot.lane.b32.xlu0 %v11436_v48, %s8635_s8  ;;  %v11462_v50 = vpop.f32.mrb[163].mxu1  ;;  %v5688_v13 = vmax.f32 %v14694_v10, %v11153_v14  ;;  %v14695_v48 = vld [vmem:[#allocation73_spill] sm:$0xff]  ;;  %v11485_v54 = vadd.f32 %v10804_v46, %v14698_v33  ;;  %v11489_v14 = vadd.f32 %v10804_v46, %v14700_v47  ;;  %v14707_v47 = vld [vmem:[#allocation31_spill] sm:$0xff] }
 0x238   : > { %14690 = vst [vmem:[#allocation33_spill] sm:$0xff] %v11454_v16  ;;  %v11465_v40 = vadd.f32 %v6745_v57, %v6744_v37  ;;  %14693 = vst [vmem:[#allocation43_spill] sm:$0xff] %v11469_v60  ;;  %v11479_v24 = vadd.f32 %v10804_v46, %v14695_v48  ;;  %v14697_v37 = vld [vmem:[#allocation24_spill] sm:$0xff]  ;;  %v14702_v10 = vld [vmem:[#allocation81_spill] sm:$0xff]  ;;  %v11508_v41 = vadd.f32 %v10804_v46, %v14707_v47  ;;  %v11522_v16 = vpop.f32.mrb[165].mxu0  ;;  %v11547_v25 = vpop.permute.xlu0 %5804 }
 0x239   : > { %v5687_v57 = vmax.f32 %v14697_v37, %v11106_v43  ;;  %14699 = vst [vmem:[#allocation5_spill] sm:$0xff] %v11485_v54  ;;  %14701 = vst [vmem:[#allocation65_spill] sm:$0xff] %v11489_v14  ;;  %v11493_v7 = vadd.f32 %v10804_v46, %v14702_v10  ;;  %6271 = vrot.lane.b32.xlu1 %v5688_v13, %s8636_s9  ;;  %v14705_v33 = vld [vmem:[#allocation57_spill] sm:$0xff]  ;;  %v11511_v10 = vpop.permute.xlu1 %5812  ;;  %v6595_v11 = vmul.f32 %v5688_v13, %v5688_v13  ;;  %v14709_v48 = vld [vmem:[#allocation54_spill] sm:$0xff] }
 0x23a   : > { %14696 = vst [vmem:[#allocation29_spill] sm:$0xff] %v11479_v24  ;;  %v11504_v37 = vadd.f32 %v10804_v46, %v14705_v33  ;;  %14708 = vst [vmem:[#allocation66_spill] sm:$0xff] %v11508_v41  ;;  %v11518_v36 = vmax.f32 %v14709_v48, %v11166_v22  ;;  %v11520_v33 = vpop.f32.mrb[164].mxu1  ;;  %v11535_v60 = vmax.f32 %v14714_v6, %v11115_v38  ;;  %v11539_v48 = vpop.f32.mrb[166].mxu0  ;;  %v6362_v38 = vsel %vm5785_vm3, %v5688_v13, 0.0 }
 0x23b   : > { %14703 = vst [vmem:[#allocation37_spill] sm:$0xff] %v11493_v7  ;;  %6269 = vrot.lane.b32.xlu0 %v5687_v57, %s8636_s9  ;;  %v6594_v43 = vmul.f32 %v5687_v57, %v5687_v57  ;;  %14711 = vst [vmem:[#allocation7_spill] sm:$0xff] %v11522_v16  ;;  %v11537_v22 = vpop.f32.mrb[165].mxu1  ;;  %v6360_v16 = vsel %vm5785_vm3, %v5687_v57, 0.0  ;;  %v11559_v47 = vpop.f32.mrb[167].mxu0  ;;  %v11562_v31 = vsel %vm5785_vm3, %v6595_v11, 0.0  ;;  %v11567_v13 = vadd.f32 %v10804_v46, %v11146_v44 }
 0x23c   : > { %14706 = vst [vmem:[#allocation67_spill] sm:$0xff] %v11504_v37  ;;  %14710 = vst [vmem:[#allocation34_spill] sm:$0xff] %v11518_v36  ;;  %v11549_v49 = vpop.f32.mrb[166].mxu1  ;;  %v11575_v7 = vadd.f32 %v10804_v46, %v11159_v45  ;;  %v14720_v11 = vld [vmem:[#allocation51_spill] sm:$0xff]  ;;  %v11585_v44 = vadd.f32 %v10804_v46, %v11148_v18  ;;  %v11621_v57 = vadd.f32 %v10804_v46, %v11198_v58 }
 0x23d   : > { %14715 = vst [vmem:[#allocation47_spill] sm:$0xff] %v11535_v60  ;;  %14716 = vst [vmem:[#allocation69_spill] sm:$0xff] %v11539_v48  ;;  %6279 = vrot.lane.b32.xlu1 %v11518_v36, %s8636_s9  ;;  %v11557_v24 = vpop.f32.mrb[167].mxu1  ;;  %v6751_v36 = vsel %vm5785_vm3, %v6594_v43, 0.0  ;;  %v14718_v48 = vld [vmem:[#allocation55_spill] sm:$0xff]  ;;  %v5685_v41 = vmax.f32 %v14720_v11, %v11122_v12  ;;  %v11581_v43 = vadd.f32 %v10804_v46, %v11174_v34 }
 0x23e   : > { %14717 = vst [vmem:[#allocation68_spill] sm:$0xff] %v11567_v13  ;;  %v5686_v6 = vmax.f32 %v14718_v48, %v11170_v28  ;;  %14719 = vst [vmem:[#allocation13_spill] sm:$0xff] %v11575_v7  ;;  %v11590_v48 = vadd.f32 %v10804_v46, %v11161_v23  ;;  %v11595_v12 = vadd.f32 %v10804_v46, %v11176_v30  ;;  %v14724_v30 = vld [vmem:[#allocation56_spill] sm:$0xff] }
 0x23f   : > { %6277 = vrot.lane.b32.xlu0 %v11535_v60, %s8636_s9  ;;  %14721 = vst [vmem:[#allocation41_spill] sm:$0xff] %v11581_v43  ;;  %v6356_v34 = vsel %vm5785_vm3, %v5685_v41, 0.0  ;;  %v6592_v11 = vmul.f32 %v5685_v41, %v5685_v41  ;;  %v11599_v18 = vpop.permute.xlu1 %5886  ;;  %v11601_v60 = vpop.f32.mrb[168].mxu0  ;;  %v11611_v32 = vmax.f32 %v14724_v30, %v11180_v62  ;;  %14726 = vst [vmem:[#allocation24_spill] sm:$0xff] %v11621_v57 }
 0x240   : > { %v6593_v28 = vmul.f32 %v5686_v6, %v5686_v6  ;;  %v6358_v45 = vsel %vm5785_vm3, %v5686_v6, 0.0  ;;  %14722 = vst [vmem:[#allocation71_spill] sm:$0xff] %v11595_v12  ;;  %v6357_v23 = vadd.f32 %v6356_v34, %v11444_v20  ;;  %v11613_v17 = vpop.permute.xlu0 %5884  ;;  %v11615_v14 = vpop.f32.mrb[168].mxu1  ;;  %v14727_v20 = vld [vmem:[#allocation52_spill] sm:$0xff]  ;;  %v11637_v58 = vadd.f32 %v10804_v46, %v11202_v15  ;;  %5832 = vst.msk [vmem:[%s10174_s7 + $0xa0] sm:$0xff] %vm5826_vm4, %v11511_v10 }
 0x241   : > { %6231 = vrot.lane.b32.xlu1 %v5686_v6, %s8637_s10  ;;  %v11607_v6 = vadd.f32 %v10804_v46, %v11183_v42  ;;  %14725 = vst [vmem:[#allocation73_spill] sm:$0xff] %v11611_v32  ;;  %v6747_v37 = vsel %vm5785_vm3, %v6592_v11, 0.0  ;;  %v11625_v42 = vmax.f32 %v14727_v20, %v11130_v21  ;;  %v11627_v34 = vpop.f32.mrb[169].mxu0  ;;  %v11629_v62 = vpop.f32.mrb[169].mxu1  ;;  %v11656_v11 = vadd.f32 %v10804_v46, %v11208_v27 }
 0x242   : > { %v6359_v13 = vadd.f32 %v6358_v45, %v6357_v23  ;;  %v6748_v54 = vadd.f32 %v6747_v37, %v11465_v40  ;;  %14729 = vst [vmem:[#allocation30_spill] sm:$0xff] %v11637_v58  ;;  %v11641_v21 = vpop.f32.mrb[170].mxu1  ;;  %v11661_v45 = vadd.f32 %v10804_v46, %v11213_v0  ;;  %v11665_v30 = vadd.f32 %v10804_v46, %v11204_v2 }
 0x243   : > { %6229 = vrot.lane.b32.xlu0 %v5685_v41, %s8637_s10  ;;  %14723 = vst [vmem:[#allocation53_spill] sm:$0xff] %v11607_v6  ;;  %v6749_v41 = vsel %vm5785_vm3, %v6593_v28, 0.0  ;;  %14728 = vst [vmem:[#allocation40_spill] sm:$0xff] %v11625_v42  ;;  %v11639_v28 = vpop.f32.mrb[170].mxu0  ;;  %v11651_v37 = vpop.f32.mrb[171].mxu1  ;;  %v11680_v2 = vadd.f32 %v10804_v46, %v11215_v9 }
 0x244   : > { %v11649_v40 = vpop.f32.mrb[171].mxu0  ;;  %v6361_v15 = vadd.f32 %v6360_v16, %v6359_v13  ;;  %v6750_v23 = vadd.f32 %v6749_v41, %v6748_v54  ;;  %14730 = vst [vmem:[#allocation81_spill] sm:$0xff] %v11656_v11  ;;  %14731 = vst [vmem:[#allocation36_spill] sm:$0xff] %v11661_v45  ;;  %v11669_v16 = vadd.f32 %v10804_v46, %v11210_v4  ;;  %v14741_v41 = vld [vmem:[#allocation80_spill] sm:$0xff]  ;;  %v14751_v11 = vld [vmem:[#allocation15_spill] sm:$0xff] }
 0x245   : > { %6239 = vrot.lane.b32.xlu1 %v11611_v32, %s8637_s10  ;;  %14732 = vst [vmem:[#allocation57_spill] sm:$0xff] %v11665_v30  ;;  %14735 = vst [vmem:[#allocation50_spill] sm:$0xff] %v11680_v2  ;;  %v11699_v32 = vadd.f32 %v10804_v46, %v14741_v41  ;;  %v11738_v0 = vadd.f32 %v10804_v46, %v14751_v11  ;;  %v14755_v30 = vld [vmem:[#allocation25_spill] sm:$0xff] }
 0x246   : > { %14733 = vst [vmem:[#allocation31_spill] sm:$0xff] %v11669_v16  ;;  %v11671_v54 = vadd.f32 %v6362_v38, %v6361_v15  ;;  %v6752_v13 = vadd.f32 %v6751_v36, %v6750_v23  ;;  %v11684_v4 = vpop.f32.mrb[172].mxu0  ;;  %v14737_v38 = vld [vmem:[#allocation14_spill] sm:$0xff]  ;;  %v14739_v23 = vld [vmem:[#allocation79_spill] sm:$0xff]  ;;  %v11751_v57 = vadd.f32 %v10804_v46, %v14755_v30  ;;  %5828 = vst.msk [vmem:[%s10174_s7 + $0x20] sm:$0xff] %vm5826_vm4, %v11547_v25 }
 0x247   : > { %6237 = vrot.lane.b32.xlu0 %v11625_v42, %s8637_s10  ;;  %v11682_v42 = vpop.permute.xlu1 %5894  ;;  %v11691_v15 = vadd.f32 %v10804_v46, %v14737_v38  ;;  %v11695_v20 = vadd.f32 %v10804_v46, %v14739_v23  ;;  %14742 = vst [vmem:[#allocation52_spill] sm:$0xff] %v11699_v32  ;;  %v11703_v27 = vpop.f32.mrb[173].mxu0  ;;  %v14745_v38 = vld [vmem:[#allocation78_spill] sm:$0xff]  ;;  %v14760_v32 = vld [vmem:[#allocation8_spill] sm:$0xff] }
 0x248   : > { %14734 = vst [vmem:[#allocation54_spill] sm:$0xff] %v11671_v54  ;;  %v11687_v36 = vadd.f32 %v11562_v31, %v6752_v13  ;;  %v11701_v9 = vpop.f32.mrb[172].mxu1  ;;  %v14743_v31 = vld [vmem:[#allocation18_spill] sm:$0xff]  ;;  %14752 = vst [vmem:[#allocation78_spill] sm:$0xff] %v11738_v0 }
 0x249   : > { %14738 = vst [vmem:[#allocation51_spill] sm:$0xff] %v11691_v15  ;;  %14740 = vst [vmem:[#allocation56_spill] sm:$0xff] %v11695_v20  ;;  %v11708_v13 = vadd.f32 %v10804_v46, %v14743_v31  ;;  %v14747_v23 = vld [vmem:[#allocation22_spill] sm:$0xff]  ;;  %v11720_v45 = vpop.f32.mrb[173].mxu1  ;;  %v14749_v31 = vld [vmem:[#allocation85_spill] sm:$0xff] }
 0x24a   : > { %14736 = vst [vmem:[#allocation55_spill] sm:$0xff] %v11687_v36  ;;  %v11712_v36 = vadd.f32 %v10804_v46, %v14745_v38  ;;  %v11716_v54 = vadd.f32 %v10804_v46, %v14747_v23  ;;  %v11718_v41 = vpop.permute.xlu0 %5892  ;;  %v11727_v16 = vadd.f32 %v10804_v46, %v14749_v31  ;;  %v11729_v38 = vpop.f32.mrb[174].mxu0  ;;  %v14753_v20 = vld [vmem:[#allocation48_spill] sm:$0xff]  ;;  %14756 = vst [vmem:[#allocation85_spill] sm:$0xff] %v11751_v57 }
 0x24b   : > { %14744 = vst [vmem:[#allocation14_spill] sm:$0xff] %v11708_v13  ;;  %v11731_v58 = vpop.f32.mrb[174].mxu1  ;;  %v11740_v2 = vpop.f32.mrb[175].mxu0  ;;  %v11747_v23 = vadd.f32 %v10804_v46, %v14753_v20 }
 0x24c   : > { %14746 = vst [vmem:[#allocation79_spill] sm:$0xff] %v11712_v36  ;;  %14748 = vst [vmem:[#allocation80_spill] sm:$0xff] %v11716_v54  ;;  %v11742_v31 = vpop.f32.mrb[175].mxu1  ;;  %v14757_v36 = vld [vmem:[#allocation88_spill] sm:$0xff]  ;;  %v11760_v54 = vadd.f32 %v10804_v46, %v11365_v52 }
 0x24d   : > { %14750 = vst [vmem:[#allocation18_spill] sm:$0xff] %v11727_v16  ;;  %14754 = vst [vmem:[#allocation22_spill] sm:$0xff] %v11747_v23  ;;  %v11755_v11 = vadd.f32 %v10804_v46, %v14757_v36  ;;  %v11764_v16 = vadd.f32 %v10804_v46, %v14760_v32  ;;  %v11775_v36 = vld [vmem:[%s14035_s2] ss:$0 sm:$0xff]  ;;  %v11800_v15 = vpop.permute.xlu1 %5845 }
 0x24e   : > { %14759 = vst [vmem:[#allocation48_spill] sm:$0xff] %v11760_v54  ;;  %v11779_v52 = vadd.f32 %v11775_v36, %v11371_v61  ;;  %v11794_v63 = vadd.f32 %v11775_v36, %v11367_v51  ;;  %v11798_v61 = vadd.f32 %v11775_v36, %v11378_v3  ;;  %v11802_v10 = vpop.f32.mrb[176].mxu0  ;;  %v11807_v25 = vadd.f32 %v11775_v36, %v11383_v39  ;;  %v11813_v32 = vpop.permute.xlu0 %5843 }
 0x24f   : > { %14758 = vst [vmem:[#allocation15_spill] sm:$0xff] %v11755_v11  ;;  %14761 = vst [vmem:[#allocation25_spill] sm:$0xff] %v11764_v16  ;;  %v3491_v46 = vadd.f32 %v11775_v36, %v11413_v8  ;;  %v4515_v51 = vadd.f32 %v11775_v36, %v11424_v35  ;;  %v3483_v59 = vadd.f32 %v11775_v36, %v11426_v53  ;;  %v11823_v13 = vpop.f32.mrb[177].mxu0 }
 0x250   : > { %14762 = vst [vmem:[#allocation88_spill] sm:$0xff] %v11779_v52  ;;  %14763 = vst [vmem:[#allocation8_spill] sm:$0xff] %v11794_v63  ;;  %v11815_v3 = vpop.f32.mrb[176].mxu1  ;;  %v4507_v39 = vadd.f32 %v11775_v36, %v11438_v1  ;;  %v3494_v11 = vadd.f32 %v11775_v36, %v11440_v56  ;;  %v11830_v30 = vpop.f32.mrb[178].mxu0  ;;  %v4518_v1 = vadd.f32 %v11775_v36, %v11446_v19  ;;  %v14769_v56 = vld [vmem:[#allocation17_spill] sm:$0xff]  ;;  %v14771_v19 = vld [vmem:[#allocation75_spill] sm:$0xff] }
 0x251   : > { %14764 = vst [vmem:[#allocation96_spill] sm:$0xff] %v11798_v61  ;;  %14765 = vst [vmem:[#allocation97_spill] sm:$0xff] %v11807_v25  ;;  %v11825_v8 = vpop.f32.mrb[177].mxu1  ;;  %v5051_v52 = vmax.f32 %v3491_v46, 0.0  ;;  %v5307_v54 = vmax.f32 %v4515_v51, 0.0  ;;  %v5049_v61 = vmax.f32 %v3483_v59, 0.0  ;;  %v4510_v63 = vadd.f32 %v11775_v36, %v11462_v50 }
 0x252   : > { %v11832_v20 = vpop.f32.mrb[178].mxu1  ;;  %v5305_v53 = vmax.f32 %v4507_v39, 0.0  ;;  %v11838_v16 = vpop.f32.mrb[179].mxu0  ;;  %v14766_v46 = vld [vmem:[#allocation26_spill] sm:$0xff]  ;;  %v14770_v57 = vmax.f32 %v14769_v56, 0.0  ;;  %v5052_v59 = vmax.f32 %v3494_v11, 0.0  ;;  %v3486_v39 = vadd.f32 %v11775_v36, %v11448_v29 }
 0x253   : > { %v11840_v35 = vpop.f32.mrb[179].mxu1  ;;  %v14767_v51 = vmax.f32 %v14766_v46, 0.0  ;;  %v14772_v0 = vmax.f32 %v14771_v19, 0.0  ;;  %v14773_v50 = vld [vmem:[#allocation19_spill] sm:$0xff]  ;;  %v5308_v7 = vmax.f32 %v4518_v1, 0.0  ;;  %v5306_v46 = vmax.f32 %v4510_v63, 0.0  ;;  %v5854_v11 = vpop.permute.xlu1 %5853 }
 0x254   : > { %v11848_v23 = vmax.f32 %v14770_v57, %v5307_v54  ;;  %v14774_v43 = vmax.f32 %v14773_v50, 0.0  ;;  %v5050_v57 = vmax.f32 %v3486_v39, 0.0  ;;  %v3507_v54 = vadd.f32 %v11775_v36, %v11513_v26  ;;  %v14784_v56 = vld [vmem:[#allocation7_spill] sm:$0xff]  ;;  %v14785_v19 = vld [vmem:[#allocation82_spill] sm:$0xff]  ;;  %5869 = vst.msk [vmem:[%s10174_s7 + $0x20] sm:$0xff] %vm5867_vm5, %v11800_v15  ;;  %5868 = vst.msk [vmem:[%s10174_s7] sm:$0xff] %vm5867_vm5, %v11813_v32 }
 0x255   : > { %v11844_v25 = vmax.f32 %v14767_v51, %v5051_v52  ;;  %v11854_v6 = vmax.f32 %v14772_v0, %v5049_v61  ;;  %v14776_v52 = vld [vmem:[#allocation76_spill] sm:$0xff]  ;;  %v4531_v29 = vadd.f32 %v11775_v36, %v11520_v33  ;;  %v14779_v0 = vmax.f32 %v11294_v5, 0.0  ;;  %5873 = vst.msk [vmem:[%s10174_s7 + $0xa0] sm:$0xff] %vm5867_vm5, %v5854_v11 }
 0x256   : > { %v11858_v12 = vmax.f32 %v14774_v43, %v5305_v53  ;;  %v14777_v51 = vmax.f32 %v14776_v52, 0.0  ;;  %v14781_v43 = vld [vmem:[#allocation61_spill] sm:$0xff]  ;;  %v4523_v63 = vadd.f32 %v11775_v36, %v11537_v22  ;;  %v11880_v26 = vpop.f32.mrb[180].mxu0  ;;  %v14786_v33 = vmax.f32 %v14785_v19, 0.0  ;;  %5910 = vst.msk [vmem:[%s10174_s7 + $0x20] sm:$0xff] %vm5908_vm6, %v11599_v18  ;;  %5909 = vst.msk [vmem:[%s10174_s7] sm:$0xff] %vm5908_vm6, %v11613_v17 }
 0x257   : > { %14768 = vst [vmem:[#allocation26_spill] sm:$0xff] %v11844_v25  ;;  %v11870_v61 = vmax.f32 %v14779_v0, %v5308_v7  ;;  %v14782_v53 = vmax.f32 %v14781_v43, 0.0  ;;  %v5852_v39 = vpop.permute.xlu0 %5851  ;;  %v5055_v5 = vmax.f32 %v3507_v54, 0.0  ;;  %v5311_v7 = vmax.f32 %v4531_v29, 0.0  ;;  %v14788_v52 = vld [vmem:[#allocation69_spill] sm:$0xff]  ;;  %v11890_v0 = vpop.f32.mrb[181].mxu0 }
 0x258   : > { %14775 = vst [vmem:[#allocation17_spill] sm:$0xff] %v11858_v12  ;;  %v11862_v25 = vmax.f32 %v14777_v51, %v5052_v59  ;;  %v3499_v59 = vadd.f32 %v11775_v36, %v14784_v56  ;;  %v11884_v50 = vmax.f32 %v14786_v33, %v5050_v57  ;;  %v3510_v51 = vadd.f32 %v11775_v36, %v14788_v52  ;;  %v11898_v57 = vpop.f32.mrb[182].mxu0  ;;  %v14789_v54 = vld [vmem:[#allocation21_spill] sm:$0xff]  ;;  %v14792_v52 = vld [vmem:[#allocation44_spill] sm:$0xff] }
 0x259   : > { %14780 = vst [vmem:[#allocation19_spill] sm:$0xff] %v11870_v61  ;;  %v11874_v1 = vmax.f32 %v14782_v53, %v5306_v46  ;;  %v11888_v46 = vpop.f32.mrb[180].mxu1  ;;  %v5309_v22 = vmax.f32 %v4523_v63, 0.0  ;;  %v4534_v53 = vadd.f32 %v11775_v36, %v11549_v49  ;;  %v4526_v56 = vadd.f32 %v11775_v36, %v11557_v24  ;;  %v11912_v24 = vpop.f32.mrb[183].mxu0  ;;  %5872 = vst.msk [vmem:[%s10174_s7 + $0x80] sm:$0xff] %vm5867_vm5, %v5852_v39 }
 0x25a   : > { %14778 = vst [vmem:[#allocation75_spill] sm:$0xff] %v11862_v25  ;;  %14787 = vst [vmem:[#allocation61_spill] sm:$0xff] %v11884_v50  ;;  %v5053_v43 = vmax.f32 %v3499_v59, 0.0  ;;  %v11896_v19 = vpop.f32.mrb[181].mxu1  ;;  %v14790_v29 = vmax.f32 %v14789_v54, 0.0  ;;  %v14793_v61 = vmax.f32 %v14792_v52, 0.0  ;;  %v3502_v49 = vadd.f32 %v11775_v36, %v11559_v47 }
 0x25b   : > { %14783 = vst [vmem:[#allocation76_spill] sm:$0xff] %v11874_v1  ;;  %v5056_v63 = vmax.f32 %v3510_v51, 0.0  ;;  %v11910_v59 = vpop.f32.mrb[182].mxu1  ;;  %v14795_v1 = vld [vmem:[#allocation10_spill] sm:$0xff]  ;;  %v5310_v51 = vmax.f32 %v4526_v56, 0.0  ;;  %v4547_v56 = vadd.f32 %v11775_v36, %v11615_v14  ;;  %v4539_v14 = vadd.f32 %v11775_v36, %v11629_v62  ;;  %5914 = vst.msk [vmem:[%s10174_s7 + $0xa0] sm:$0xff] %vm5908_vm6, %v11682_v42 }
 0x25c   : > { %v11902_v33 = vmax.f32 %v14790_v29, %v5055_v5  ;;  %v11906_v25 = vmax.f32 %v14793_v61, %v5311_v7  ;;  %v14796_v50 = vmax.f32 %v14795_v1, 0.0  ;;  %v14798_v5 = vld [vmem:[#allocation6_spill] sm:$0xff]  ;;  %v5312_v7 = vmax.f32 %v4534_v53, 0.0  ;;  %v11922_v52 = vpop.f32.mrb[183].mxu1  ;;  %v14803_v1 = vld [vmem:[#allocation27_spill] sm:$0xff]  ;;  %5913 = vst.msk [vmem:[%s10174_s7 + $0x80] sm:$0xff] %vm5908_vm6, %v11718_v41 }
 0x25d   : > { %v14799_v29 = vmax.f32 %v14798_v5, 0.0  ;;  %v5054_v12 = vmax.f32 %v3502_v49, 0.0  ;;  %v3526_v32 = vadd.f32 %v11775_v36, %v11639_v28  ;;  %v4550_v18 = vadd.f32 %v11775_v36, %v11641_v21  ;;  %v14815_v21 = vld [vmem:[#allocation42_spill] sm:$0xff] }
 0x25e   : > { %14791 = vst [vmem:[#allocation7_spill] sm:$0xff] %v11902_v33  ;;  %14794 = vst [vmem:[#allocation82_spill] sm:$0xff] %v11906_v25  ;;  %v11916_v54 = vmax.f32 %v14796_v50, %v5309_v22  ;;  %v14801_v25 = vld [vmem:[#allocation3_spill] sm:$0xff]  ;;  %v14804_v50 = vmax.f32 %v14803_v1, 0.0  ;;  %v11980_v62 = vpop.f32.mrb[184].mxu0  ;;  %v5313_v28 = vmax.f32 %v4539_v14, 0.0  ;;  %v4542_v41 = vadd.f32 %v11775_v36, %v11651_v37 }
 0x25f   : > { %v11920_v61 = vmax.f32 %v14799_v29, %v5053_v43  ;;  %v14802_v47 = vmax.f32 %v14801_v25, 0.0  ;;  %v14806_v43 = vld [vmem:[#allocation86_spill] sm:$0xff]  ;;  %v3523_v25 = vadd.f32 %v11775_v36, %v11601_v60  ;;  %v14809_v29 = vld [vmem:[#allocation23_spill] sm:$0xff]  ;;  %v3515_v60 = vadd.f32 %v11775_v36, %v11627_v34 }
 0x260   : > { %14797 = vst [vmem:[#allocation69_spill] sm:$0xff] %v11916_v54  ;;  %v11930_v22 = vmax.f32 %v14804_v50, %v5312_v7  ;;  %v14807_v5 = vmax.f32 %v14806_v43, 0.0  ;;  %v5934_v49 = vpop.permute.xlu0 %5933  ;;  %v14810_v7 = vmax.f32 %v14809_v29, 0.0  ;;  %v3518_v34 = vadd.f32 %v11775_v36, %v11649_v40  ;;  %v11984_v39 = vpop.f32.mrb[184].mxu1 }
 0x261   : > { %14800 = vst [vmem:[#allocation21_spill] sm:$0xff] %v11920_v61  ;;  %v11926_v33 = vmax.f32 %v14802_v47, %v5056_v63  ;;  %v5936_v63 = vpop.permute.xlu1 %5935  ;;  %5957 = vst.msk [vmem:[%s10174_s7 + $0x8] sm:$0xff] %vm5826_vm4, %v5934_v49  ;;  %v5059_v17 = vmax.f32 %v3523_v25, 0.0  ;;  %v5057_v42 = vmax.f32 %v3515_v60, 0.0  ;;  %v5060_v11 = vmax.f32 %v3526_v32, 0.0  ;;  %v14812_v47 = vld [vmem:[#allocation9_spill] sm:$0xff] }
 0x262   : > { %14805 = vst [vmem:[#allocation44_spill] sm:$0xff] %v11930_v22  ;;  %v11934_v53 = vmax.f32 %v14807_v5, %v5310_v51  ;;  %v11952_v15 = vmax.f32 %v14810_v7, %v5054_v12  ;;  %5958 = vst.msk [vmem:[%s10174_s7 + $0x28] sm:$0xff] %vm5826_vm4, %v5936_v63  ;;  %v5315_v12 = vmax.f32 %v4547_v56, 0.0  ;;  %v11986_v51 = vpop.f32.mrb[185].mxu0  ;;  %v14813_v1 = vmax.f32 %v14812_v47, 0.0  ;;  %v11996_v63 = vpop.f32.mrb[185].mxu1 }
 0x263   : > { %v14816_v43 = vmax.f32 %v14815_v21, 0.0  ;;  %v5316_v5 = vmax.f32 %v4550_v18, 0.0  ;;  %v5058_v25 = vmax.f32 %v3518_v34, 0.0  ;;  %v14818_v49 = vld [vmem:[#allocation89_spill] sm:$0xff]  ;;  %v14822_v32 = vld [vmem:[#allocation28_spill] sm:$0xff]  ;;  %v12014_v18 = vpop.f32.mrb[186].mxu1 }
 0x264   : > { %14808 = vst [vmem:[#allocation10_spill] sm:$0xff] %v11934_v53  ;;  %14811 = vst [vmem:[#allocation6_spill] sm:$0xff] %v11952_v15  ;;  %v11990_v50 = vmax.f32 %v14813_v1, %v5059_v17  ;;  %v14819_v29 = vmax.f32 %v14818_v49, 0.0  ;;  %v14820_v7 = vld [vmem:[#allocation33_spill] sm:$0xff]  ;;  %v14823_v17 = vmax.f32 %v14822_v32, 0.0  ;;  %v5314_v1 = vmax.f32 %v4542_v41, 0.0 }
 0x265   : > { %v11994_v40 = vmax.f32 %v14816_v43, %v5315_v12  ;;  %v5944_v56 = vpop.permute.xlu1 %5943  ;;  %v14821_v60 = vmax.f32 %v14820_v7, 0.0  ;;  %v12012_v12 = vpop.f32.mrb[186].mxu0  ;;  %v14825_v34 = vld [vmem:[#allocation11_spill] sm:$0xff] }
 0x266   : > { %14814 = vst [vmem:[#allocation3_spill] sm:$0xff] %v11990_v50  ;;  %v12000_v37 = vmax.f32 %v14819_v29, %v5057_v42  ;;  %v12008_v47 = vmax.f32 %v14823_v17, %v5060_v11  ;;  %5962 = vst.msk [vmem:[%s10174_s7 + $0xa8] sm:$0xff] %vm5826_vm4, %v5944_v56  ;;  %v14826_v21 = vmax.f32 %v14825_v34, 0.0  ;;  %v14828_v42 = vld [vmem:[#allocation45_spill] sm:$0xff]  ;;  %v4563_v11 = vadd.f32 %v11775_v36, %v11701_v9  ;;  %v12028_v41 = vpop.f32.mrb[187].mxu0  ;;  %v12030_v56 = vpop.f32.mrb[187].mxu1 }
 0x267   : > { %14817 = vst [vmem:[#allocation27_spill] sm:$0xff] %v11994_v40  ;;  %v12004_v14 = vmax.f32 %v14821_v60, %v5313_v28  ;;  %v14829_v49 = vmax.f32 %v14828_v42, 0.0  ;;  %v3539_v28 = vadd.f32 %v11775_v36, %v11684_v4  ;;  %v14831_v7 = vld [vmem:[#allocation43_spill] sm:$0xff]  ;;  %v3542_v4 = vadd.f32 %v11775_v36, %v11729_v38 }
 0x268   : > { %14824 = vst [vmem:[#allocation86_spill] sm:$0xff] %v12008_v47  ;;  %v12018_v43 = vmax.f32 %v14826_v21, %v5316_v5  ;;  %v14832_v60 = vmax.f32 %v14831_v7, 0.0  ;;  %v3531_v5 = vadd.f32 %v11775_v36, %v11703_v27  ;;  %v5319_v9 = vmax.f32 %v4563_v11, 0.0  ;;  %v14842_v40 = vld [vmem:[#allocation67_spill] sm:$0xff] }
 0x269   : > { %v12022_v29 = vmax.f32 %v14829_v49, %v5058_v25  ;;  %v4555_v25 = vadd.f32 %v11775_v36, %v11720_v45  ;;  %v5063_v17 = vmax.f32 %v3539_v28, 0.0  ;;  %v4566_v34 = vadd.f32 %v11775_v36, %v11731_v58  ;;  %v5942_v42 = vpop.permute.xlu0 %5941  ;;  %v14834_v45 = vld [vmem:[#allocation29_spill] sm:$0xff] }
 0x26a   : > { %14827 = vst [vmem:[#allocation23_spill] sm:$0xff] %v12018_v43  ;;  %v12034_v32 = vmax.f32 %v14832_v60, %v5314_v1  ;;  %v3534_v21 = vadd.f32 %v11775_v36, %v11740_v2  ;;  %v5061_v1 = vmax.f32 %v3531_v5, 0.0  ;;  %v5064_v7 = vmax.f32 %v3542_v4, 0.0  ;;  %5961 = vst.msk [vmem:[%s10174_s7 + $0x88] sm:$0xff] %vm5826_vm4, %v5942_v42  ;;  %v12058_v2 = vpop.f32.mrb[188].mxu0  ;;  %v14839_v5 = vld [vmem:[#allocation5_spill] sm:$0xff] }
 0x26b   : > { %14830 = vst [vmem:[#allocation9_spill] sm:$0xff] %v12022_v29  ;;  %v5317_v49 = vmax.f32 %v4555_v25, 0.0  ;;  %v4558_v27 = vadd.f32 %v11775_v36, %v11742_v31  ;;  %v14835_v60 = vmax.f32 %v14834_v45, 0.0  ;;  %v14837_v28 = vmax.f32 %v11497_v55, 0.0  ;;  %v14845_v42 = vld [vmem:[#allocation65_spill] sm:$0xff]  ;;  %v12072_v55 = vpop.f32.mrb[188].mxu1 }
 0x26c   : > { %14833 = vst [vmem:[#allocation42_spill] sm:$0xff] %v12034_v32  ;;  %v5320_v58 = vmax.f32 %v4566_v34, 0.0  ;;  %v5062_v43 = vmax.f32 %v3534_v21, 0.0  ;;  %v14840_v25 = vmax.f32 %v14839_v5, 0.0  ;;  %v14843_v31 = vmax.f32 %v14842_v40, 0.0  ;;  %v14848_v34 = vld [vmem:[#allocation66_spill] sm:$0xff] }
 0x26d   : > { %v12052_v38 = vmax.f32 %v14835_v60, %v5063_v17  ;;  %v12056_v11 = vmax.f32 %v14837_v28, %v5319_v9  ;;  %v14846_v45 = vmax.f32 %v14845_v42, 0.0  ;;  %v5318_v60 = vmax.f32 %v4558_v27, 0.0  ;;  %v12074_v9 = vpop.f32.mrb[189].mxu0  ;;  %v14851_v5 = vld [vmem:[#allocation37_spill] sm:$0xff] }
 0x26e   : > { %v12062_v4 = vmax.f32 %v14840_v25, %v5061_v1  ;;  %v12066_v47 = vmax.f32 %v14843_v31, %v5317_v49  ;;  %v14849_v21 = vmax.f32 %v14848_v34, 0.0  ;;  %v14852_v1 = vmax.f32 %v14851_v5, 0.0  ;;  %v12090_v27 = vpop.f32.mrb[190].mxu0  ;;  %v14854_v31 = vld [vmem:[#allocation46_spill] sm:$0xff] }
 0x26f   : > { %14836 = vst [vmem:[#allocation89_spill] sm:$0xff] %v12052_v38  ;;  %14838 = vst [vmem:[#allocation33_spill] sm:$0xff] %v12056_v11  ;;  %v12070_v17 = vmax.f32 %v14846_v45, %v5064_v7  ;;  %v3555_v40 = vadd.f32 %v11775_v36, %v11802_v10  ;;  %v4579_v49 = vadd.f32 %v11775_v36, %v11815_v3  ;;  %v12088_v7 = vpop.f32.mrb[189].mxu1  ;;  %v14855_v42 = vmax.f32 %v14854_v31, 0.0  ;;  %v14862_v11 = vld [vmem:[#allocation68_spill] sm:$0xff]  ;;  %v14867_v38 = vld [vmem:[#allocation13_spill] sm:$0xff] }
 0x270   : > { %14841 = vst [vmem:[#allocation28_spill] sm:$0xff] %v12062_v4  ;;  %14844 = vst [vmem:[#allocation11_spill] sm:$0xff] %v12066_v47  ;;  %v12078_v28 = vmax.f32 %v14849_v21, %v5320_v58  ;;  %v12082_v25 = vmax.f32 %v14852_v1, %v5062_v43  ;;  %v6016_v58 = vpop.permute.xlu1 %6015  ;;  %v12096_v34 = vpop.permute.xlu0 %6013  ;;  %v3547_v43 = vadd.f32 %v11775_v36, %v11823_v13 }
 0x271   : > { %14847 = vst [vmem:[#allocation45_spill] sm:$0xff] %v12070_v17  ;;  %v12094_v45 = vmax.f32 %v14855_v42, %v5318_v60  ;;  %v4571_v10 = vadd.f32 %v11775_v36, %v11825_v8  ;;  %v3558_v3 = vadd.f32 %v11775_v36, %v11830_v30  ;;  %v5067_v21 = vmax.f32 %v3555_v40, 0.0  ;;  %v12108_v31 = vpop.f32.mrb[190].mxu1  ;;  %v12110_v42 = vpop.f32.mrb[191].mxu0  ;;  %v14857_v30 = vld [vmem:[#allocation12_spill] sm:$0xff] }
 0x272   : > { %14850 = vst [vmem:[#allocation43_spill] sm:$0xff] %v12078_v28  ;;  %14853 = vst [vmem:[#allocation29_spill] sm:$0xff] %v12082_v25  ;;  %v5323_v5 = vmax.f32 %v4579_v49, 0.0  ;;  %v4582_v1 = vadd.f32 %v11775_v36, %v11832_v20  ;;  %v3550_v60 = vadd.f32 %v11775_v36, %v11838_v16  ;;  %v4574_v8 = vadd.f32 %v11775_v36, %v11840_v35  ;;  %v12114_v25 = vpop.f32.mrb[191].mxu1 }
 0x273   : > { %14856 = vst [vmem:[#allocation5_spill] sm:$0xff] %v12094_v45  ;;  %v5065_v45 = vmax.f32 %v3547_v43, 0.0  ;;  %v5321_v13 = vmax.f32 %v4571_v10, 0.0  ;;  %v5068_v47 = vmax.f32 %v3558_v3, 0.0  ;;  %v14858_v40 = vmax.f32 %v14857_v30, 0.0 }
 0x274   : > { %v14860_v20 = vmax.f32 %v11585_v44, 0.0  ;;  %v5324_v16 = vmax.f32 %v4582_v1, 0.0  ;;  %v5066_v28 = vmax.f32 %v3550_v60, 0.0  ;;  %v14863_v17 = vmax.f32 %v14862_v11, 0.0  ;;  %v12132_v35 = vpop.permute.xlu1 %6023  ;;  %v14870_v44 = vld [vmem:[#allocation71_spill] sm:$0xff]  ;;  %v14873_v1 = vld [vmem:[#allocation41_spill] sm:$0xff] }
 0x275   : > { %v12118_v49 = vmax.f32 %v14858_v40, %v5067_v21  ;;  %v14865_v10 = vmax.f32 %v11590_v48, 0.0  ;;  %v14868_v30 = vmax.f32 %v14867_v38, 0.0  ;;  %v5322_v40 = vmax.f32 %v4574_v8, 0.0  ;;  %v12152_v38 = vpop.f32.mrb[192].mxu0 }
 0x276   : > { %v12122_v4 = vmax.f32 %v14860_v20, %v5323_v5  ;;  %v12126_v43 = vmax.f32 %v14863_v17, %v5065_v45  ;;  %v14871_v5 = vmax.f32 %v14870_v44, 0.0  ;;  %v14874_v60 = vmax.f32 %v14873_v1, 0.0  ;;  %v12146_v17 = vpop.permute.xlu0 %6021 }
 0x277   : > { %14859 = vst [vmem:[#allocation67_spill] sm:$0xff] %v12118_v49  ;;  %v12130_v3 = vmax.f32 %v14865_v10, %v5321_v13  ;;  %v12136_v21 = vmax.f32 %v14868_v30, %v5068_v47  ;;  %v3571_v48 = vadd.f32 %v11775_v36, %v11880_v26  ;;  %v4595_v45 = vadd.f32 %v11775_v36, %v11888_v46  ;;  %v14876_v47 = vld [vmem:[#allocation53_spill] sm:$0xff]  ;;  %v12164_v30 = vpop.f32.mrb[193].mxu0  ;;  %v12166_v26 = vpop.f32.mrb[192].mxu1 }
 0x278   : > { %14861 = vst [vmem:[#allocation65_spill] sm:$0xff] %v12122_v4  ;;  %14864 = vst [vmem:[#allocation66_spill] sm:$0xff] %v12126_v43  ;;  %v12140_v20 = vmax.f32 %v14871_v5, %v5324_v16  ;;  %v12144_v11 = vmax.f32 %v14874_v60, %v5066_v28  ;;  %v14877_v13 = vmax.f32 %v14876_v47, 0.0  ;;  %v3563_v16 = vadd.f32 %v11775_v36, %v11890_v0  ;;  %v12172_v0 = vpop.f32.mrb[194].mxu0  ;;  %v12174_v1 = vpop.f32.mrb[193].mxu1 }
 0x279   : > { %14866 = vst [vmem:[#allocation37_spill] sm:$0xff] %v12130_v3  ;;  %14869 = vst [vmem:[#allocation46_spill] sm:$0xff] %v12136_v21  ;;  %v4587_v28 = vadd.f32 %v11775_v36, %v11896_v19  ;;  %v3574_v10 = vadd.f32 %v11775_v36, %v11898_v57  ;;  %v5071_v46 = vmax.f32 %v3571_v48, 0.0  ;;  %v5327_v44 = vmax.f32 %v4595_v45, 0.0  ;;  %v12178_v48 = vpop.f32.mrb[195].mxu0  ;;  %v12180_v45 = vpop.f32.mrb[194].mxu1 }
 0x27a   : > { %14872 = vst [vmem:[#allocation12_spill] sm:$0xff] %v12140_v20  ;;  %14875 = vst [vmem:[#allocation68_spill] sm:$0xff] %v12144_v11  ;;  %v12156_v8 = vmax.f32 %v14877_v13, %v5322_v40  ;;  %v4598_v5 = vadd.f32 %v11775_v36, %v11910_v59  ;;  %v3566_v40 = vadd.f32 %v11775_v36, %v11912_v24  ;;  %v5069_v19 = vmax.f32 %v3563_v16, 0.0  ;;  %v5976_v59 = vpop.permute.xlu1 %5975  ;;  %v14879_v13 = vld [vmem:[#allocation24_spill] sm:$0xff]  ;;  %v14882_v24 = vld [vmem:[#allocation57_spill] sm:$0xff] }
 0x27b   : > { %v5325_v60 = vmax.f32 %v4587_v28, 0.0  ;;  %v5072_v57 = vmax.f32 %v3574_v10, 0.0  ;;  %v4590_v47 = vadd.f32 %v11775_v36, %v11922_v52  ;;  %v14880_v20 = vmax.f32 %v14879_v13, 0.0  ;;  %5998 = vst.msk [vmem:[%s10174_s7 + $0x28] sm:$0xff] %vm5867_vm5, %v5976_v59  ;;  %v14885_v52 = vld [vmem:[#allocation30_spill] sm:$0xff]  ;;  %v14888_v3 = vld [vmem:[#allocation31_spill] sm:$0xff] }
 0x27c   : > { %14878 = vst [vmem:[#allocation13_spill] sm:$0xff] %v12156_v8  ;;  %v14883_v21 = vmax.f32 %v14882_v24, 0.0  ;;  %v5328_v16 = vmax.f32 %v4598_v5, 0.0  ;;  %v5070_v28 = vmax.f32 %v3566_v40, 0.0  ;;  %v12190_v8 = vpop.f32.mrb[195].mxu1  ;;  %v14886_v10 = vmax.f32 %v14885_v52, 0.0 }
 0x27d   : > { %v12184_v4 = vmax.f32 %v14880_v20, %v5071_v46  ;;  %v14889_v43 = vmax.f32 %v14888_v3, 0.0  ;;  %v14891_v20 = vld [vmem:[#allocation81_spill] sm:$0xff]  ;;  %6038 = vst.msk [vmem:[%s10174_s7 + $0x28] sm:$0xff] %vm5908_vm6, %v6016_v58  ;;  %v14897_v59 = vld [vmem:[#allocation36_spill] sm:$0xff]  ;;  %v4611_v3 = vadd.f32 %v11775_v36, %v11984_v39  ;;  %v3579_v58 = vadd.f32 %v11775_v36, %v11986_v51 }
 0x27e   : > { %v12188_v49 = vmax.f32 %v14883_v21, %v5327_v44  ;;  %v12196_v11 = vmax.f32 %v14886_v10, %v5069_v19  ;;  %v14892_v46 = vmax.f32 %v14891_v20, 0.0  ;;  %v5326_v21 = vmax.f32 %v4590_v47, 0.0  ;;  %v14894_v44 = vld [vmem:[#allocation50_spill] sm:$0xff] }
 0x27f   : > { %14881 = vst [vmem:[#allocation71_spill] sm:$0xff] %v12184_v4  ;;  %v12200_v13 = vmax.f32 %v14889_v43, %v5325_v60  ;;  %v14895_v5 = vmax.f32 %v14894_v44, 0.0  ;;  %v14898_v52 = vmax.f32 %v14897_v59, 0.0  ;;  %v3587_v43 = vadd.f32 %v11775_v36, %v11980_v62  ;;  %v5974_v60 = vpop.permute.xlu0 %5973  ;;  %v12245_v59 = vpop.f32.mrb[196].mxu1 }
 0x280   : > { %14884 = vst [vmem:[#allocation41_spill] sm:$0xff] %v12188_v49  ;;  %14887 = vst [vmem:[#allocation53_spill] sm:$0xff] %v12196_v11  ;;  %v12204_v24 = vmax.f32 %v14892_v46, %v5072_v57  ;;  %v14900_v57 = vld [vmem:[#allocation51_spill] sm:$0xff]  ;;  %v5331_v20 = vmax.f32 %v4611_v3, 0.0  ;;  %v4614_v39 = vadd.f32 %v11775_v36, %v12014_v18  ;;  %v3582_v46 = vadd.f32 %v11775_v36, %v12028_v41  ;;  %v14903_v18 = vld [vmem:[#allocation56_spill] sm:$0xff] }
 0x281   : > { %14890 = vst [vmem:[#allocation24_spill] sm:$0xff] %v12200_v13  ;;  %v12210_v40 = vmax.f32 %v14895_v5, %v5328_v16  ;;  %v12214_v19 = vmax.f32 %v14898_v52, %v5070_v28  ;;  %v14901_v47 = vmax.f32 %v14900_v57, 0.0  ;;  %v4603_v16 = vadd.f32 %v11775_v36, %v11996_v63  ;;  %5997 = vst.msk [vmem:[%s10174_s7 + $0x8] sm:$0xff] %vm5867_vm5, %v5974_v60  ;;  %v14906_v41 = vld [vmem:[#allocation80_spill] sm:$0xff]  ;;  %v14912_v13 = vld [vmem:[#allocation18_spill] sm:$0xff] }
 0x282   : > { %14893 = vst [vmem:[#allocation57_spill] sm:$0xff] %v12204_v24  ;;  %v3590_v28 = vadd.f32 %v11775_v36, %v12012_v12  ;;  %v5075_v62 = vmax.f32 %v3587_v43, 0.0  ;;  %6037 = vst.msk [vmem:[%s10174_s7 + $0x8] sm:$0xff] %vm5908_vm6, %v12096_v34  ;;  %v5073_v51 = vmax.f32 %v3579_v58, 0.0  ;;  %v4606_v12 = vadd.f32 %v11775_v36, %v12030_v56  ;;  %v12257_v58 = vpop.f32.mrb[197].mxu1  ;;  %v5984_v56 = vpop.permute.xlu1 %5983 }
 0x283   : > { %14896 = vst [vmem:[#allocation30_spill] sm:$0xff] %v12210_v40  ;;  %14899 = vst [vmem:[#allocation31_spill] sm:$0xff] %v12214_v19  ;;  %v12222_v10 = vmax.f32 %v14901_v47, %v5326_v21  ;;  %v12236_v21 = vpop.f32.mrb[196].mxu0  ;;  %v5329_v63 = vmax.f32 %v4603_v16, 0.0  ;;  %v14904_v52 = vmax.f32 %v14903_v18, 0.0  ;;  %v14907_v3 = vmax.f32 %v14906_v41, 0.0 }
 0x284   : > { %v5076_v44 = vmax.f32 %v3590_v28, 0.0  ;;  %v12243_v5 = vpop.f32.mrb[197].mxu0  ;;  %v5332_v34 = vmax.f32 %v4614_v39, 0.0  ;;  %v5074_v57 = vmax.f32 %v3582_v46, 0.0  ;;  %v14909_v16 = vld [vmem:[#allocation52_spill] sm:$0xff]  ;;  %v14913_v18 = vmax.f32 %v14912_v13, 0.0 }
 0x285   : > { %14902 = vst [vmem:[#allocation81_spill] sm:$0xff] %v12222_v10  ;;  %v12249_v43 = vmax.f32 %v14904_v52, %v5075_v62  ;;  %v12253_v60 = vmax.f32 %v14907_v3, %v5331_v20  ;;  %v12255_v47 = vpop.f32.mrb[198].mxu0  ;;  %v14910_v28 = vmax.f32 %v14909_v16, 0.0  ;;  %v14915_v52 = vld [vmem:[#allocation14_spill] sm:$0xff]  ;;  %v5330_v39 = vmax.f32 %v4606_v12, 0.0  ;;  %6002 = vst.msk [vmem:[%s10174_s7 + $0xa8] sm:$0xff] %vm5867_vm5, %v5984_v56 }
 0x286   : > { %v12265_v62 = vmax.f32 %v14913_v18, %v5329_v63  ;;  %v14916_v41 = vmax.f32 %v14915_v52, 0.0  ;;  %v12271_v3 = vpop.f32.mrb[199].mxu0  ;;  %v14918_v46 = vld [vmem:[#allocation78_spill] sm:$0xff]  ;;  %v14921_v16 = vld [vmem:[#allocation79_spill] sm:$0xff]  ;;  %v3603_v13 = vadd.f32 %v11775_v36, %v12058_v2  ;;  %v4627_v63 = vadd.f32 %v11775_v36, %v12072_v55  ;;  %6042 = vst.msk [vmem:[%s10174_s7 + $0xa8] sm:$0xff] %vm5908_vm6, %v12132_v35 }
 0x287   : > { %14905 = vst [vmem:[#allocation50_spill] sm:$0xff] %v12249_v43  ;;  %14908 = vst [vmem:[#allocation36_spill] sm:$0xff] %v12253_v60  ;;  %v12261_v10 = vmax.f32 %v14910_v28, %v5073_v51  ;;  %v14919_v60 = vmax.f32 %v14918_v46, 0.0  ;;  %v14922_v51 = vmax.f32 %v14921_v16, 0.0  ;;  %v14924_v12 = vld [vmem:[#allocation22_spill] sm:$0xff]  ;;  %v3606_v2 = vadd.f32 %v11775_v36, %v12090_v27  ;;  %v14927_v27 = vld [vmem:[#allocation85_spill] sm:$0xff] }
 0x288   : > { %14914 = vst [vmem:[#allocation56_spill] sm:$0xff] %v12265_v62  ;;  %v12269_v20 = vmax.f32 %v14916_v41, %v5076_v44  ;;  %v12287_v44 = vpop.f32.mrb[198].mxu1  ;;  %v14925_v56 = vmax.f32 %v14924_v12, 0.0  ;;  %v5079_v18 = vmax.f32 %v3603_v13, 0.0  ;;  %v5335_v52 = vmax.f32 %v4627_v63, 0.0  ;;  %v14930_v13 = vld [vmem:[#allocation25_spill] sm:$0xff] }
 0x289   : > { %14911 = vst [vmem:[#allocation51_spill] sm:$0xff] %v12261_v10  ;;  %v12277_v43 = vmax.f32 %v14919_v60, %v5332_v34  ;;  %v12281_v28 = vmax.f32 %v14922_v51, %v5074_v57  ;;  %v3595_v34 = vadd.f32 %v11775_v36, %v12074_v9  ;;  %v4619_v57 = vadd.f32 %v11775_v36, %v12088_v7  ;;  %v12302_v55 = vpop.f32.mrb[199].mxu1 }
 0x28a   : > { %14917 = vst [vmem:[#allocation80_spill] sm:$0xff] %v12269_v20  ;;  %v12294_v60 = vmax.f32 %v14925_v56, %v5330_v39  ;;  %v4630_v35 = vadd.f32 %v11775_v36, %v12108_v31  ;;  %v3598_v41 = vadd.f32 %v11775_v36, %v12110_v42  ;;  %v5982_v39 = vpop.permute.xlu0 %5981  ;;  %v5080_v16 = vmax.f32 %v3606_v2, 0.0  ;;  %v12320_v42 = vpop.f32.mrb[200].mxu0  ;;  %v14936_v2 = vld [vmem:[#allocation8_spill] sm:$0xff] }
 0x28b   : > { %14920 = vst [vmem:[#allocation52_spill] sm:$0xff] %v12277_v43  ;;  %14923 = vst [vmem:[#allocation18_spill] sm:$0xff] %v12281_v28  ;;  %v5077_v46 = vmax.f32 %v3595_v34, 0.0  ;;  %v5333_v9 = vmax.f32 %v4619_v57, 0.0  ;;  %v4622_v7 = vadd.f32 %v11775_v36, %v12114_v25  ;;  %v14928_v51 = vmax.f32 %v14927_v27, 0.0  ;;  %v14933_v34 = vld [vmem:[#allocation15_spill] sm:$0xff] }
 0x28c   : > { %14926 = vst [vmem:[#allocation14_spill] sm:$0xff] %v12294_v60  ;;  %6001 = vst.msk [vmem:[%s10174_s7 + $0x88] sm:$0xff] %vm5867_vm5, %v5982_v39  ;;  %v14931_v63 = vmax.f32 %v14930_v13, 0.0  ;;  %v5336_v31 = vmax.f32 %v4630_v35, 0.0  ;;  %v5078_v43 = vmax.f32 %v3598_v41, 0.0  ;;  %v14934_v57 = vmax.f32 %v14933_v34, 0.0 }
 0x28d   : > { %v12314_v12 = vmax.f32 %v14928_v51, %v5079_v18  ;;  %6041 = vst.msk [vmem:[%s10174_s7 + $0x88] sm:$0xff] %vm5908_vm6, %v12146_v17  ;;  %v14937_v39 = vmax.f32 %v14936_v2, 0.0  ;;  %v14939_v27 = vld [vmem:[#allocation48_spill] sm:$0xff]  ;;  %v5334_v35 = vmax.f32 %v4622_v7, 0.0  ;;  %v12337_v41 = vpop.f32.mrb[201].mxu0  ;;  %v12339_v13 = vpop.f32.mrb[200].mxu1  ;;  %v12445_v15 = vadd.f32 %v11775_v36, %v12152_v38 }
 0x28e   : > { %v12318_v56 = vmax.f32 %v14931_v63, %v5335_v52  ;;  %v12327_v25 = vmax.f32 %v14934_v57, %v5077_v46  ;;  %v14940_v51 = vmax.f32 %v14939_v27, 0.0  ;;  %v14942_v17 = vld [vmem:[#allocation96_spill] sm:$0xff]  ;;  %v12449_v22 = vadd.f32 %v11775_v36, %v12164_v30 }
 0x28f   : > { %14929 = vst [vmem:[#allocation78_spill] sm:$0xff] %v12314_v12  ;;  %v12331_v18 = vmax.f32 %v14937_v39, %v5333_v9  ;;  %v14943_v63 = vmax.f32 %v14942_v17, 0.0  ;;  %v14945_v34 = vld [vmem:[#allocation88_spill] sm:$0xff]  ;;  %v12349_v9 = vpop.f32.mrb[202].mxu0  ;;  %v12351_v39 = vpop.f32.mrb[201].mxu1  ;;  %v12469_v30 = vadd.f32 %v11775_v36, %v12166_v26  ;;  %v12489_v26 = vadd.f32 %v11775_v36, %v12236_v21 }
 0x290   : > { %14932 = vst [vmem:[#allocation79_spill] sm:$0xff] %v12318_v56  ;;  %14935 = vst [vmem:[#allocation22_spill] sm:$0xff] %v12327_v25  ;;  %v12335_v52 = vmax.f32 %v14940_v51, %v5080_v16  ;;  %v14946_v57 = vmax.f32 %v14945_v34, 0.0  ;;  %v14948_v16 = vld [vmem:[#allocation97_spill] sm:$0xff]  ;;  %v12357_v51 = vpop.f32.mrb[203].mxu0  ;;  %v12359_v56 = vpop.f32.mrb[202].mxu1 }
 0x291   : > { %14938 = vst [vmem:[#allocation85_spill] sm:$0xff] %v12331_v18  ;;  %v12343_v46 = vmax.f32 %v14943_v63, %v5336_v31  ;;  %v14949_v7 = vmax.f32 %v14948_v16, 0.0  ;;  %v12361_v17 = vpop.f32.mrb[203].mxu1  ;;  %v6064_v31 = vpop.permute.xlu1 %6063 }
 0x292   : > { %14941 = vst [vmem:[#allocation25_spill] sm:$0xff] %v12335_v52  ;;  %v12347_v2 = vmax.f32 %v14946_v57, %v5078_v43  ;;  %v6062_v63 = vpop.permute.xlu0 %6061  ;;  %6086 = vst.msk [vmem:[%s10174_s7 + $0x30] sm:$0xff] %vm5826_vm4, %v6064_v31  ;;  %v12367_v43 = vpop.f32.mrb[204].mxu0 }
 0x293   : > { %14944 = vst [vmem:[#allocation15_spill] sm:$0xff] %v12343_v46  ;;  %v12355_v27 = vmax.f32 %v14949_v7, %v5334_v35  ;;  %6085 = vst.msk [vmem:[%s10174_s7 + $0x10] sm:$0xff] %vm5826_vm4, %v6062_v63  ;;  %v12369_v57 = vpop.f32.mrb[205].mxu0  ;;  %v12379_v46 = vpop.f32.mrb[204].mxu1 }
 0x294   : > { %14947 = vst [vmem:[#allocation8_spill] sm:$0xff] %v12347_v2  ;;  %v12373_v16 = vpop.f32.mrb[206].mxu0  ;;  %v12381_v31 = vpop.f32.mrb[205].mxu1 }
 0x295   : > { %14950 = vst [vmem:[#allocation48_spill] sm:$0xff] %v12355_v27  ;;  %v6072_v34 = vpop.permute.xlu1 %6071  ;;  %v12377_v7 = vpop.f32.mrb[207].mxu0 }
 0x296   : > { %6090 = vst.msk [vmem:[%s10174_s7 + $0xb0] sm:$0xff] %vm5826_vm4, %v6072_v34  ;;  %v6070_v35 = vpop.permute.xlu0 %6069  ;;  %v12383_v27 = vpop.f32.mrb[206].mxu1 }
 0x297   : > { %6089 = vst.msk [vmem:[%s10174_s7 + $0x90] sm:$0xff] %vm5826_vm4, %v6070_v35  ;;  %v12385_v2 = vpop.f32.mrb[207].mxu1  ;;  %v12387_v34 = vpop.f32.mrb[208].mxu0 }
 0x298   : > { %v12389_v35 = vpop.f32.mrb[209].mxu0  ;;  %v12395_v19 = vpop.f32.mrb[208].mxu1 }
 0x299   : > { %v6144_v63 = vpop.permute.xlu1 %6143  ;;  %v12391_v12 = vpop.f32.mrb[210].mxu0 }
 0x29a   : > { %v6142_v18 = vpop.permute.xlu0 %6141  ;;  %v12393_v20 = vpop.f32.mrb[211].mxu0 }
 0x29b   : > { %v12397_v11 = vpop.f32.mrb[209].mxu1  ;;  %v12411_v60 = vpop.f32.mrb[212].mxu0 }
 0x29c   : > { %v12399_v49 = vpop.f32.mrb[210].mxu1  ;;  %v12413_v62 = vpop.f32.mrb[213].mxu0 }
 0x29d   : > { %v6152_v25 = vpop.permute.xlu1 %6151  ;;  %v12403_v4 = vpop.f32.mrb[211].mxu1 }
 0x29e   : > { %v6150_v52 = vpop.permute.xlu0 %6149 }
 0x2a1   : > { %v6104_v40 = vpop.permute.xlu1 %6103 }
 0x2a2   : > { %6126 = vst.msk [vmem:[%s10174_s7 + $0x30] sm:$0xff] %vm5867_vm5, %v6104_v40  ;;  %v6102_v24 = vpop.permute.xlu0 %6101  ;;  %v12417_v40 = vpop.f32.mrb[214].mxu0 }
 0x2a3   : > { %6166 = vst.msk [vmem:[%s10174_s7 + $0x30] sm:$0xff] %vm5908_vm6, %v6144_v63  ;;  %v12423_v63 = vpop.f32.mrb[215].mxu0 }
 0x2a4   : > { %6125 = vst.msk [vmem:[%s10174_s7 + $0x10] sm:$0xff] %vm5867_vm5, %v6102_v24  ;;  %v12425_v24 = vpop.f32.mrb[212].mxu1 }
 0x2a5   : > { %6165 = vst.msk [vmem:[%s10174_s7 + $0x10] sm:$0xff] %vm5908_vm6, %v6142_v18  ;;  %v6112_v28 = vpop.permute.xlu1 %6111  ;;  %14951 = vst [vmem:[#allocation96_spill] sm:$0xff] %v12425_v24  ;;  %v12429_v18 = vpop.f32.mrb[213].mxu1 }
 0x2a6   : > { %6130 = vst.msk [vmem:[%s10174_s7 + $0xb0] sm:$0xff] %vm5867_vm5, %v6112_v28  ;;  %v6110_v10 = vpop.permute.xlu0 %6109  ;;  %14952 = vst [vmem:[#allocation88_spill] sm:$0xff] %v12429_v18  ;;  %v12431_v50 = vpop.f32.mrb[214].mxu1  ;;  %v12596_v18 = vadd.f32 %v11775_v36, %v12373_v16 }
 0x2a7   : > { %6170 = vst.msk [vmem:[%s10174_s7 + $0xb0] sm:$0xff] %vm5908_vm6, %v6152_v25  ;;  %14953 = vst [vmem:[#allocation97_spill] sm:$0xff] %v12431_v50  ;;  %v12433_v53 = vpop.f32.mrb[215].mxu1  ;;  %v12437_v25 = vpop.f32.mrb[216].mxu0 }
 0x2a8   : > { %6129 = vst.msk [vmem:[%s10174_s7 + $0x90] sm:$0xff] %vm5867_vm5, %v6110_v10  ;;  %14954 = vst [vmem:[#allocation98_spill] sm:$0xff] %v12433_v53  ;;  %v12439_v10 = vpop.f32.mrb[217].mxu0  ;;  %v12441_v54 = vpop.f32.mrb[216].mxu1  ;;  %v12453_v53 = vadd.f32 %v11775_v36, %v12172_v0  ;;  %v12473_v0 = vadd.f32 %v11775_v36, %v12174_v1  ;;  %v12493_v1 = vadd.f32 %v11775_v36, %v12243_v5 }
 0x2a9   : > { %6169 = vst.msk [vmem:[%s10174_s7 + $0x90] sm:$0xff] %vm5908_vm6, %v6150_v52  ;;  %v6192_v28 = vpop.permute.xlu1 %6191  ;;  %14955 = vst [vmem:[#allocation99_spill] sm:$0xff] %v12437_v25  ;;  %v12463_v38 = vpop.f32.mrb[218].mxu0  ;;  %v12520_v25 = vadd.f32 %v11775_v36, %v12257_v58  ;;  %v12552_v58 = vadd.f32 %v11775_v36, %v12349_v9  ;;  %v12573_v9 = vadd.f32 %v11775_v36, %v12359_v56 }
 0x2aa   : > { %6214 = vst.msk [vmem:[%s10174_s7 + $0x38] sm:$0xff] %vm5826_vm4, %v6192_v28  ;;  %14956 = vst [vmem:[#allocation100_spill] sm:$0xff] %v12439_v10  ;;  %v6190_v52 = vpop.permute.xlu0 %6189  ;;  %v12457_v28 = vadd.f32 %v11775_v36, %v12178_v48  ;;  %v12477_v48 = vadd.f32 %v11775_v36, %v12180_v45  ;;  %v12541_v10 = vadd.f32 %v11775_v36, %v12320_v42 }
 0x2ab   : > { %14957 = vst [vmem:[#allocation101_spill] sm:$0xff] %v12441_v54  ;;  %6213 = vst.msk [vmem:[%s10174_s7 + $0x18] sm:$0xff] %vm5826_vm4, %v6190_v52  ;;  %v12465_v54 = vpop.f32.mrb[217].mxu1  ;;  %v12479_v52 = vpop.f32.mrb[219].mxu0 }
 0x2ac   : > { %14958 = vst [vmem:[#allocation102_spill] sm:$0xff] %v12463_v38  ;;  %14959 = vst [vmem:[#allocation103_spill] sm:$0xff] %v12465_v54  ;;  %v12485_v54 = vadd.f32 %v11775_v36, %v12190_v8  ;;  %v12504_v8 = vadd.f32 %v11775_v36, %v12271_v3  ;;  %v12522_v21 = vpop.f32.mrb[220].mxu0 }
 0x2ad   : > { %v6200_v61 = vpop.permute.xlu1 %6199  ;;  %14960 = vst [vmem:[#allocation104_spill] sm:$0xff] %v12479_v52  ;;  %v12500_v52 = vadd.f32 %v11775_v36, %v12255_v47  ;;  %14963 = vst [vmem:[#allocation107_spill] sm:$0xff] %v12522_v21  ;;  %v12531_v45 = vpop.f32.mrb[221].mxu0  ;;  %v12537_v21 = vadd.f32 %v11775_v36, %v12302_v55  ;;  %v12556_v55 = vadd.f32 %v11775_v36, %v12357_v51 }
 0x2ae   : > { %6218 = vst.msk [vmem:[%s10174_s7 + $0xb8] sm:$0xff] %vm5826_vm4, %v6200_v61  ;;  %v12481_v61 = vpop.f32.mrb[218].mxu1  ;;  %14964 = vst [vmem:[#allocation108_spill] sm:$0xff] %v12531_v45  ;;  %v12548_v45 = vadd.f32 %v11775_v36, %v12337_v41  ;;  %v12569_v41 = vadd.f32 %v11775_v36, %v12351_v39  ;;  %v12588_v39 = vadd.f32 %v11775_v36, %v12369_v57 }
 0x2af   : > { %14961 = vst [vmem:[#allocation105_spill] sm:$0xff] %v12481_v61  ;;  %v12495_v38 = vpop.f32.mrb[219].mxu1  ;;  %v6198_v61 = vpop.permute.xlu0 %6197  ;;  %14966 = vst [vmem:[#allocation110_spill] sm:$0xff] %v12556_v55  ;;  %v12628_v55 = vadd.f32 %v11775_v36, %v12383_v27 }
 0x2b0   : > { %14962 = vst [vmem:[#allocation106_spill] sm:$0xff] %v12495_v38  ;;  %v12511_v38 = vadd.f32 %v11775_v36, %v12245_v59  ;;  %6217 = vst.msk [vmem:[%s10174_s7 + $0x98] sm:$0xff] %vm5826_vm4, %v6198_v61  ;;  %v12529_v61 = vadd.f32 %v11775_v36, %v12287_v44  ;;  %v12543_v59 = vpop.f32.mrb[222].mxu0  ;;  %v12560_v42 = vpop.f32.mrb[220].mxu1  ;;  %v12565_v44 = vadd.f32 %v11775_v36, %v12339_v13 }
 0x2b1   : > { %v6272_v47 = vpop.permute.xlu1 %6271  ;;  %14965 = vst [vmem:[#allocation109_spill] sm:$0xff] %v12543_v59  ;;  %v12558_v3 = vpop.f32.mrb[223].mxu0  ;;  %14968 = vst [vmem:[#allocation112_spill] sm:$0xff] %v12560_v42  ;;  %v12580_v59 = vadd.f32 %v11775_v36, %v12361_v17  ;;  %v12584_v13 = vadd.f32 %v11775_v36, %v12367_v43  ;;  %v12600_v17 = vadd.f32 %v11775_v36, %v12377_v7 }
 0x2b2   : > { %14967 = vst [vmem:[#allocation111_spill] sm:$0xff] %v12558_v3  ;;  %v12575_v51 = vpop.f32.mrb[221].mxu1  ;;  %14972 = vst [vmem:[#allocation116_spill] sm:$0xff] %v12588_v39  ;;  %v8062_v57 = vpop.f32.mrb[224].mxu0 }
 0x2b3   : > { %v6270_v5 = vpop.permute.xlu0 %6269  ;;  %14969 = vst [vmem:[#allocation113_spill] sm:$0xff] %v12575_v51  ;;  %14970 = vst [vmem:[#allocation114_spill] sm:$0xff] %v12580_v59  ;;  %v12590_v42 = vpop.f32.mrb[222].mxu1  ;;  %v12609_v51 = vadd.f32 %v11775_v36, %v12379_v46  ;;  %v3747_v16 = vadd.f32 %v11775_v36, %v8062_v57 }
 0x2b4   : > { %14971 = vst [vmem:[#allocation115_spill] sm:$0xff] %v12584_v13  ;;  %14973 = vst [vmem:[#allocation117_spill] sm:$0xff] %v12590_v42  ;;  %v12602_v43 = vpop.f32.mrb[223].mxu1  ;;  %v3738_v29 = vpop.f32.mrb[225].mxu0 }
 0x2b5   : > { %v6280_v50 = vpop.permute.xlu1 %6279  ;;  %14974 = vst [vmem:[#allocation118_spill] sm:$0xff] %v12596_v18  ;;  %14975 = vst [vmem:[#allocation119_spill] sm:$0xff] %v12600_v17  ;;  %v8318_v24 = vpop.f32.mrb[224].mxu1  ;;  %v5115_v32 = vmax.f32 %v3747_v16, 0.0  ;;  %v14979_v16 = vmax.f32 %v12445_v15, 0.0  ;;  %v14981_v15 = vmax.f32 %v12449_v22, 0.0 }
 0x2b6   : > { %14976 = vst [vmem:[#allocation120_spill] sm:$0xff] %v12602_v43  ;;  %14977 = vst [vmem:[#allocation121_spill] sm:$0xff] %v12609_v51  ;;  %v12616_v43 = vadd.f32 %v11775_v36, %v12381_v31  ;;  %v4771_v56 = vadd.f32 %v11775_v36, %v8318_v24  ;;  %v3739_v31 = vadd.f32 %v11775_v36, %v3738_v29  ;;  %v4762_v46 = vpop.f32.mrb[225].mxu1  ;;  %v8063_v27 = vpop.f32.mrb[226].mxu0 }
 0x2b7   : > { %v6278_v3 = vpop.permute.xlu0 %6277  ;;  %v8319_v57 = vpop.f32.mrb[226].mxu1  ;;  %v5563_v29 = vmax.f32 %v14979_v16, %v5115_v32 }
 0x2b8   : > { %14978 = vst [vmem:[#allocation122_spill] sm:$0xff] %v12616_v43  ;;  %v5371_v17 = vmax.f32 %v4771_v56, 0.0  ;;  %v5113_v39 = vmax.f32 %v3739_v31, 0.0  ;;  %v4774_v51 = vadd.f32 %v11775_v36, %v8319_v57  ;;  %v4765_v24 = vpop.f32.mrb[227].mxu1 }
 0x2b9   : > { %v6232_v42 = vpop.permute.xlu1 %6231  ;;  %v4766_v59 = vadd.f32 %v11775_v36, %v4765_v24 }
 0x2ba   : > { %6254 = vst.msk [vmem:[%s10174_s7 + $0x38] sm:$0xff] %vm5867_vm5, %v6232_v42  ;;  %v12638_v42 = vadd.f32 %v11775_v36, %v12385_v2  ;;  %v3741_v2 = vpop.f32.mrb[227].mxu0  ;;  %v5561_v32 = vmax.f32 %v14981_v15, %v5113_v39  ;;  %v5372_v31 = vmax.f32 %v4774_v51, 0.0  ;;  %v14986_v51 = vmax.f32 %v12477_v48, 0.0  ;;  %v14991_v15 = vld [vmem:[#allocation61_spill] sm:$0xff] }
 0x2bb   : > { %v6230_v7 = vpop.permute.xlu0 %6229  ;;  %6294 = vst.msk [vmem:[%s10174_s7 + $0x38] sm:$0xff] %vm5908_vm6, %v6272_v47  ;;  %v4763_v47 = vadd.f32 %v11775_v36, %v4762_v46  ;;  %v14980_v46 = vmax.f32 %v12469_v30, 0.0  ;;  %v5370_v24 = vmax.f32 %v4766_v59, 0.0  ;;  %v14988_v59 = vld [vmem:[#allocation17_spill] sm:$0xff] }
 0x2bc   : > { %6253 = vst.msk [vmem:[%s10174_s7 + $0x18] sm:$0xff] %vm5867_vm5, %v6230_v7  ;;  %v3750_v7 = vadd.f32 %v11775_v36, %v8063_v27  ;;  %v5689_v22 = vmax.f32 %v11854_v6, %v5561_v32  ;;  %v12676_v39 = vmax.f32 %v14986_v51, %v5372_v31 }
 0x2bd   : > { %6293 = vst.msk [vmem:[%s10174_s7 + $0x18] sm:$0xff] %vm5908_vm6, %v6270_v5  ;;  %v6240_v18 = vpop.permute.xlu1 %6239  ;;  %v3742_v5 = vadd.f32 %v11775_v36, %v3741_v2  ;;  %v5627_v27 = vmax.f32 %v14980_v46, %v5371_v17  ;;  %v5369_v43 = vmax.f32 %v4763_v47, 0.0  ;;  %v14982_v2 = vld [vmem:[#allocation26_spill] sm:$0xff]  ;;  %v14984_v17 = vmax.f32 %v12453_v53, 0.0  ;;  %v8322_v53 = vpop.f32.mrb[228].mxu1 }
 0x2be   : > { %6258 = vst.msk [vmem:[%s10174_s7 + $0xb8] sm:$0xff] %vm5867_vm5, %v6240_v18  ;;  %v5116_v13 = vmax.f32 %v3750_v7, 0.0  ;;  %v5691_v16 = vmax.f32 %v14982_v2, %v5563_v29  ;;  %v14983_v18 = vmax.f32 %v12473_v0, 0.0  ;;  %v4787_v48 = vadd.f32 %v11775_v36, %v8322_v53  ;;  %v12719_v53 = vld [vmem:[%s14035_s2] ss:$0 sm:$0xff] }
 0x2bf   : > { %v6238_v56 = vpop.permute.xlu0 %6237  ;;  %6298 = vst.msk [vmem:[%s10174_s7 + $0xb8] sm:$0xff] %vm5908_vm6, %v6280_v50  ;;  %v5114_v57 = vmax.f32 %v3742_v5, 0.0  ;;  %v8066_v50 = vpop.f32.mrb[228].mxu0  ;;  %v12671_v7 = vmax.f32 %v11848_v23, %v5627_v27  ;;  %v14990_v23 = vmax.f32 %v12485_v54, 0.0  ;;  %v6364_v46 = vsel %vm5785_vm3, %v5689_v22, 0.0 }
 0x2c0   : > { %6257 = vst.msk [vmem:[%s10174_s7 + $0x98] sm:$0xff] %vm5867_vm5, %v6238_v56  ;;  %v5625_v30 = vmax.f32 %v14983_v18, %v5369_v43  ;;  %v12668_v47 = vmax.f32 %v14984_v17, %v5116_v13  ;;  %v3763_v43 = vadd.f32 %v11775_v36, %v8066_v50  ;;  %v3754_v13 = vpop.f32.mrb[229].mxu0  ;;  %5806 = vrot.lane.b32.xlu1 %v5691_v16, %s8635_s8  ;;  %v4778_v56 = vpop.f32.mrb[229].mxu1 }
 0x2c1   : > { %6297 = vst.msk [vmem:[%s10174_s7 + $0x98] sm:$0xff] %vm5908_vm6, %v6278_v3  ;;  %14985 = vst [vmem:[#allocation26_spill] sm:$0xff] %v12671_v7  ;;  %v14987_v3 = vmax.f32 %v12457_v28, 0.0  ;;  %v5626_v6 = vmax.f32 %v14990_v23, %v5370_v24  ;;  %v3755_v5 = vadd.f32 %v11775_v36, %v3754_v13  ;;  %5814 = vrot.lane.b32.xlu0 %v12671_v7, %s8635_s8  ;;  %v8067_v28 = vpop.f32.mrb[230].mxu0  ;;  %v8323_v31 = vpop.f32.mrb[230].mxu1  ;;  %v14993_v24 = vld [vmem:[#allocation76_spill] sm:$0xff] }
 0x2c2   : > { %v12683_v29 = vmax.f32 %v14988_v59, %v5625_v30  ;;  %v6596_v27 = vmul.f32 %v5689_v22, %v5689_v22  ;;  %5788 = vst.msk [vmem:[%s10174_s7 + $0x40] sm:$0xff] %vm5785_vm3, %v5689_v22  ;;  %v5119_v54 = vmax.f32 %v3763_v43, 0.0  ;;  %v12698_v18 = vadd.f32 %v11775_v36, %v12387_v34  ;;  %v14992_v30 = vld [vmem:[#allocation54_spill] sm:$0xff]  ;;  %v4781_v22 = vpop.f32.mrb[231].mxu1  ;;  %v14996_v59 = vld [vmem:[#allocation55_spill] sm:$0xff] }
 0x2c3   : > { %v5562_v0 = vmax.f32 %v14987_v3, %v5114_v57  ;;  %v3757_v57 = vpop.f32.mrb[231].mxu0  ;;  %v6365_v17 = vadd.f32 %v6364_v46, %v14992_v30  ;;  %v12705_v50 = vmax.f32 %v14993_v24, %v5626_v6  ;;  %v14995_v43 = vmax.f32 %v12489_v26, 0.0 }
 0x2c4   : > { %14989 = vst [vmem:[#allocation17_spill] sm:$0xff] %v12683_v29  ;;  %5792 = vst.msk [vmem:[%s10174_s7 + $0xc0] sm:$0xff] %vm5785_vm3, %v12683_v29  ;;  %v6755_v51 = vsel %vm5785_vm3, %v6596_v27, 0.0  ;;  %v12723_v13 = vadd.f32 %v12719_v53, %v12389_v35  ;;  %v12731_v26 = vadd.f32 %v12719_v53, %v12391_v12  ;;  %v5375_v27 = vmax.f32 %v4787_v48, 0.0  ;;  %v8070_v24 = vpop.f32.mrb[232].mxu0  ;;  %v8326_v48 = vpop.f32.mrb[232].mxu1 }
 0x2c5   : > { %v5690_v32 = vmax.f32 %v14991_v15, %v5562_v0  ;;  %14994 = vst [vmem:[#allocation61_spill] sm:$0xff] %v12705_v50  ;;  %v12713_v36 = vmax.f32 %v14995_v43, %v5119_v54  ;;  %v6756_v23 = vadd.f32 %v6755_v51, %v14996_v59  ;;  %5793 = vst.msk [vmem:[%s10174_s7 + $0xe0] sm:$0xff] %vm5785_vm3, %v12705_v50  ;;  %v5117_v15 = vmax.f32 %v3755_v5, 0.0  ;;  %v3770_v5 = vpop.f32.mrb[233].mxu0  ;;  %v15035_v50 = vld [vmem:[#allocation21_spill] sm:$0xff] }
 0x2c6   : > { %v4779_v54 = vadd.f32 %v12719_v53, %v4778_v56  ;;  %v6368_v35 = vsel %vm5785_vm3, %v5691_v16, 0.0  ;;  %v6598_v30 = vmul.f32 %v5691_v16, %v5691_v16  ;;  %v14997_v51 = vmax.f32 %v12511_v38, 0.0  ;;  %v8071_v38 = vpop.f32.mrb[234].mxu0 }
 0x2c7   : > { %v6366_v3 = vsel %vm5785_vm3, %v5690_v32, 0.0  ;;  %v6597_v0 = vmul.f32 %v5690_v32, %v5690_v32  ;;  %5789 = vst.msk [vmem:[%s10174_s7 + $0x60] sm:$0xff] %vm5785_vm3, %v5690_v32  ;;  %v14998_v12 = vmax.f32 %v12493_v1, 0.0  ;;  %v12748_v56 = vadd.f32 %v12719_v53, %v12393_v20 }
 0x2c8   : > { %v6367_v6 = vadd.f32 %v6366_v3, %v6365_v17  ;;  %v12739_v3 = vmax.f32 %v14997_v51, %v5375_v27  ;;  %v5373_v16 = vmax.f32 %v4779_v54, 0.0  ;;  %v3766_v51 = vadd.f32 %v12719_v53, %v8067_v28 }
 0x2c9   : > { %v6757_v46 = vsel %vm5785_vm3, %v6597_v0, 0.0  ;;  %v12743_v43 = vmax.f32 %v14998_v12, %v5117_v15  ;;  %v4790_v1 = vadd.f32 %v12719_v53, %v8323_v31  ;;  %v12756_v12 = vadd.f32 %v12719_v53, %v12395_v19 }
 0x2ca   : > { %v6758_v32 = vadd.f32 %v6757_v46, %v6756_v23  ;;  %v6369_v0 = vadd.f32 %v6368_v35, %v6367_v6  ;;  %v6759_v23 = vsel %vm5785_vm3, %v6598_v30, 0.0  ;;  %v4794_v46 = vpop.f32.mrb[233].mxu1  ;;  %v3758_v6 = vadd.f32 %v12719_v53, %v3757_v57  ;;  %v3773_v35 = vpop.f32.mrb[235].mxu0 }
 0x2cb   : > { %v8327_v15 = vpop.f32.mrb[234].mxu1  ;;  %v14999_v20 = vmax.f32 %v12520_v25, 0.0  ;;  %v4782_v30 = vadd.f32 %v12719_v53, %v4781_v22  ;;  %v5120_v59 = vmax.f32 %v3766_v51, 0.0  ;;  %v5376_v31 = vmax.f32 %v4790_v1, 0.0 }
 0x2cc   : > { %v6760_v27 = vadd.f32 %v6759_v23, %v6758_v32  ;;  %v15000_v32 = vld [vmem:[#allocation75_spill] sm:$0xff]  ;;  %v4797_v28 = vpop.f32.mrb[235].mxu1  ;;  %v5118_v17 = vmax.f32 %v3758_v6, 0.0  ;;  %v3779_v57 = vadd.f32 %v12719_v53, %v8070_v24  ;;  %v4803_v25 = vadd.f32 %v12719_v53, %v8326_v48 }
 0x2cd   : > { %v12760_v54 = vmax.f32 %v14999_v20, %v5373_v16  ;;  %v5692_v23 = vmax.f32 %v15000_v32, %v12668_v47  ;;  %v5374_v34 = vmax.f32 %v4782_v30, 0.0  ;;  %v15001_v16 = vmax.f32 %v12500_v52, 0.0  ;;  %v8074_v52 = vpop.f32.mrb[236].mxu0 }
 0x2ce   : > { %v15002_v20 = vmax.f32 %v12529_v61, 0.0  ;;  %v15003_v51 = vmax.f32 %v12504_v8, 0.0  ;;  %v15004_v6 = vmax.f32 %v12537_v21, 0.0  ;;  %v5123_v48 = vmax.f32 %v3779_v57, 0.0  ;;  %v15005_v8 = vld [vmem:[#allocation19_spill] sm:$0xff]  ;;  %v12796_v21 = vpop.f32.mrb[237].mxu0 }
 0x2cf   : > { %v6370_v2 = vsel %vm5785_vm3, %v5692_v23, 0.0  ;;  %v6599_v19 = vmul.f32 %v5692_v23, %v5692_v23  ;;  %5808 = vrot.lane.b32.xlu1 %v5692_v23, %s8635_s8  ;;  %v5568_v22 = vmax.f32 %v15001_v16, %v5120_v59  ;;  %v5379_v23 = vmax.f32 %v4803_v25, 0.0  ;;  %v12811_v25 = vpop.f32.mrb[238].mxu0 }
 0x2d0   : > { %v12773_v47 = vmax.f32 %v15002_v20, %v5376_v31  ;;  %v12777_v1 = vmax.f32 %v15003_v51, %v5118_v17  ;;  %v12779_v24 = vadd.f32 %v6370_v2, %v6369_v0  ;;  %v12783_v30 = vmax.f32 %v15004_v6, %v5374_v34  ;;  %v12794_v2 = vpop.f32.mrb[236].mxu1 }
 0x2d1   : > { %v6761_v32 = vsel %vm5785_vm3, %v6599_v19, 0.0  ;;  %v3771_v61 = vadd.f32 %v12719_v53, %v3770_v5  ;;  %v4795_v31 = vadd.f32 %v12719_v53, %v4794_v46  ;;  %v12792_v17 = vmax.f32 %v15005_v8, %v12676_v39  ;;  %v15009_v5 = vld [vmem:[#allocation7_spill] sm:$0xff]  ;;  %v4810_v39 = vpop.f32.mrb[237].mxu1 }
 0x2d2   : > { %v12786_v59 = vadd.f32 %v6761_v32, %v6760_v27  ;;  %v15007_v34 = vmax.f32 %v12541_v10, 0.0  ;;  %v15008_v57 = vmax.f32 %v12565_v44, 0.0  ;;  %v12808_v19 = vmax.f32 %v15009_v5, %v12713_v36  ;;  %v12820_v44 = vpop.f32.mrb[238].mxu1  ;;  %v12822_v36 = vpop.f32.mrb[239].mxu0 }
 0x2d3   : > { %15006 = vst [vmem:[#allocation54_spill] sm:$0xff] %v12792_v17  ;;  %v3782_v46 = vadd.f32 %v12719_v53, %v8071_v38  ;;  %v12816_v10 = vadd.f32 %v12719_v53, %v12397_v11  ;;  %v5121_v20 = vmax.f32 %v3771_v61, 0.0  ;;  %v5377_v51 = vmax.f32 %v4795_v31, 0.0  ;;  %5816 = vrot.lane.b32.xlu1 %v12792_v17, %s8635_s8 }
 0x2d4   : > { %v12800_v0 = vmax.f32 %v15007_v34, %v5123_v48  ;;  %v12804_v27 = vmax.f32 %v15008_v57, %v5379_v23  ;;  %v12826_v38 = vadd.f32 %v12719_v53, %v12399_v49  ;;  %v12830_v6 = vadd.f32 %v12719_v53, %v12403_v4  ;;  %5888 = vrot.lane.b32.xlu0 %v12808_v19, %s8636_s9  ;;  %v12835_v48 = vpop.f32.mrb[239].mxu1 }
 0x2d5   : > { %v5124_v11 = vmax.f32 %v3782_v46, 0.0  ;;  %v4806_v32 = vadd.f32 %v12719_v53, %v8327_v15  ;;  %v12839_v23 = vadd.f32 %v12719_v53, %v12411_v60  ;;  %v15010_v61 = vmax.f32 %v12548_v45, 0.0 }
 0x2d6   : > { %v15011_v31 = vmax.f32 %v12569_v41, 0.0  ;;  %v3774_v4 = vadd.f32 %v12719_v53, %v3773_v35  ;;  %v12848_v34 = vadd.f32 %v12719_v53, %v12413_v62  ;;  %v15013_v15 = vmax.f32 %v12552_v58, 0.0 }
 0x2d7   : > { %v5569_v49 = vmax.f32 %v15010_v61, %v5121_v20  ;;  %v5380_v5 = vmax.f32 %v4806_v32, 0.0  ;;  %v4798_v60 = vadd.f32 %v12719_v53, %v4797_v28  ;;  %v12860_v35 = vmax.f32 %v11926_v33, %v5568_v22  ;;  %v12871_v32 = vpop.f32.mrb[240].mxu0 }
 0x2d8   : > { %v5633_v8 = vmax.f32 %v15011_v31, %v5377_v51  ;;  %15012 = vst [vmem:[#allocation76_spill] sm:$0xff] %v12848_v34  ;;  %v12852_v57 = vmax.f32 %v15013_v15, %v5124_v11  ;;  %v5122_v46 = vmax.f32 %v3774_v4, 0.0  ;;  %v15015_v62 = vmax.f32 %v12573_v9, 0.0  ;;  %v15016_v51 = vld [vmem:[#allocation82_spill] sm:$0xff]  ;;  %v12889_v22 = vpop.f32.mrb[241].mxu0 }
 0x2d9   : > { %v5697_v45 = vmax.f32 %v12000_v37, %v5569_v49  ;;  %v5378_v58 = vmax.f32 %v4798_v60, 0.0  ;;  %v12868_v11 = vmax.f32 %v15016_v51, %v12739_v3  ;;  %v3795_v28 = vadd.f32 %v12719_v53, %v8074_v52  ;;  %5890 = vrot.lane.b32.xlu1 %v12860_v35, %s8636_s9  ;;  %v12887_v3 = vpop.f32.mrb[240].mxu1  ;;  %v12904_v60 = vpop.f32.mrb[242].mxu0  ;;  %v15024_v37 = vld [vmem:[#allocation96_spill] sm:$0xff] }
 0x2da   : > { %v12857_v41 = vmax.f32 %v12004_v14, %v5633_v8  ;;  %v12864_v20 = vmax.f32 %v15015_v62, %v5380_v5  ;;  %v12878_v9 = vadd.f32 %v12719_v53, %v12417_v40  ;;  %v12894_v61 = vadd.f32 %v12719_v53, %v12423_v63  ;;  %v15020_v40 = vld [vmem:[#allocation110_spill] sm:$0xff]  ;;  %v12902_v5 = vpop.f32.mrb[241].mxu1 }
 0x2db   : > { %15017 = vst [vmem:[#allocation75_spill] sm:$0xff] %v12868_v11  ;;  %5919 = vst.msk [vmem:[%s10174_s7 + $0x48] sm:$0xff] %vm5785_vm3, %v5697_v45  ;;  %v15021_v49 = vmax.f32 %v15020_v40, 0.0  ;;  %v15022_v8 = vld [vmem:[#allocation114_spill] sm:$0xff]  ;;  %5896 = vrot.lane.b32.xlu0 %v12868_v11, %s8636_s9  ;;  %v12911_v40 = vadd.f32 %v12719_v53, %v15024_v37  ;;  %v5127_v63 = vmax.f32 %v3795_v28, 0.0  ;;  %v4819_v16 = vadd.f32 %v12719_v53, %v12794_v2  ;;  %v15031_v2 = vld [vmem:[#allocation115_spill] sm:$0xff] }
 0x2dc   : > { %15014 = vst [vmem:[#allocation55_spill] sm:$0xff] %v12857_v41  ;;  %15018 = vst [vmem:[#allocation19_spill] sm:$0xff] %v12878_v9  ;;  %v15023_v4 = vmax.f32 %v15022_v8, 0.0  ;;  %v15025_v8 = vld [vmem:[#allocation9_spill] sm:$0xff]  ;;  %v15026_v62 = vld [vmem:[#allocation42_spill] sm:$0xff]  ;;  %v3787_v33 = vadd.f32 %v12719_v53, %v12796_v21  ;;  %v4811_v14 = vadd.f32 %v12719_v53, %v4810_v39  ;;  %v15032_v21 = vmax.f32 %v15031_v2, 0.0 }
 0x2dd   : > { %5923 = vst.msk [vmem:[%s10174_s7 + $0xc8] sm:$0xff] %vm5785_vm3, %v12857_v41  ;;  %15019 = vst [vmem:[#allocation7_spill] sm:$0xff] %v12894_v61  ;;  %v5570_v31 = vmax.f32 %v15021_v49, %v5122_v46  ;;  %v12913_v46 = vpop.f32.mrb[242].mxu1  ;;  %v6602_v49 = vmul.f32 %v12808_v19, %v12808_v19  ;;  %v5693_v29 = vmax.f32 %v15035_v50, %v12743_v43  ;;  %v15036_v2 = vld [vmem:[#allocation121_spill] sm:$0xff]  ;;  %v12986_v43 = vsel %vm5785_vm3, %v5697_v45, 0.0 }
 0x2de   : > { %v5634_v15 = vmax.f32 %v15023_v4, %v5378_v58  ;;  %v12915_v58 = vpop.f32.mrb[243].mxu0  ;;  %v12925_v52 = vpop.f32.mrb[243].mxu1  ;;  %v12954_v39 = vmax.f32 %v15032_v21, %v5127_v63  ;;  %v5125_v41 = vmax.f32 %v3787_v33, 0.0  ;;  %v5381_v11 = vmax.f32 %v4811_v14, 0.0 }
 0x2df   : > { %v12920_v4 = vmax.f32 %v15025_v8, %v5570_v31  ;;  %v15028_v31 = vld [vmem:[#allocation88_spill] sm:$0xff]  ;;  %v6767_v17 = vsel %vm5785_vm3, %v6602_v49, 0.0  ;;  %v15037_v63 = vmax.f32 %v15036_v2, 0.0  ;;  %v6600_v2 = vmul.f32 %v5693_v29, %v5693_v29  ;;  %5847 = vrot.lane.b32.xlu0 %v5693_v29, %s8637_s10 }
 0x2e0   : > { %v12923_v51 = vmax.f32 %v15026_v62, %v5634_v15  ;;  %v12936_v8 = vadd.f32 %v12719_v53, %v15028_v31  ;;  %v15029_v15 = vld [vmem:[#allocation97_spill] sm:$0xff]  ;;  %v15030_v62 = vld [vmem:[#allocation98_spill] sm:$0xff]  ;;  %v5383_v31 = vmax.f32 %v4819_v16, 0.0  ;;  %v15039_v16 = vld [vmem:[#allocation116_spill] sm:$0xff] }
 0x2e1   : > { %v12940_v28 = vadd.f32 %v12719_v53, %v15029_v15  ;;  %v12944_v37 = vadd.f32 %v12719_v53, %v15030_v62  ;;  %5920 = vst.msk [vmem:[%s10174_s7 + $0x68] sm:$0xff] %vm5785_vm3, %v12920_v4  ;;  %v6376_v15 = vsel %vm5785_vm3, %v12808_v19, 0.0  ;;  %v15033_v62 = vld [vmem:[#allocation44_spill] sm:$0xff]  ;;  %v15040_v14 = vmax.f32 %v15039_v16, 0.0  ;;  %v15042_v19 = vld [vmem:[#allocation122_spill] sm:$0xff] }
 0x2e2   : > { %15027 = vst [vmem:[#allocation82_spill] sm:$0xff] %v12923_v51  ;;  %5924 = vst.msk [vmem:[%s10174_s7 + $0xe8] sm:$0xff] %vm5785_vm3, %v12923_v51  ;;  %v12961_v7 = vmax.f32 %v15033_v62, %v12773_v47  ;;  %v12965_v51 = vpop.f32.mrb[244].mxu0  ;;  %v12969_v21 = vmax.f32 %v15037_v63, %v5383_v31  ;;  %v15043_v61 = vmax.f32 %v15042_v19, 0.0  ;;  %v3798_v47 = vadd.f32 %v12719_v53, %v12811_v25  ;;  %v12981_v62 = vpop.f32.mrb[244].mxu1 }
 0x2e3   : > { %v12973_v33 = vmax.f32 %v15040_v14, %v5125_v41  ;;  %v12983_v50 = vpop.f32.mrb[245].mxu0  ;;  %v6604_v31 = vmul.f32 %v5697_v45, %v5697_v45  ;;  %v6372_v41 = vsel %vm5785_vm3, %v5693_v29, 0.0  ;;  %v4822_v16 = vadd.f32 %v12719_v53, %v12820_v44 }
 0x2e4   : > { %15034 = vst [vmem:[#allocation110_spill] sm:$0xff] %v12961_v7  ;;  %15038 = vst [vmem:[#allocation114_spill] sm:$0xff] %v12969_v21  ;;  %v12977_v49 = vmax.f32 %v15043_v61, %v5381_v11  ;;  %5898 = vrot.lane.b32.xlu1 %v12961_v7, %s8636_s9  ;;  %v12992_v11 = vpop.f32.mrb[245].mxu1  ;;  %v12994_v61 = vpop.f32.mrb[246].mxu0  ;;  %v6373_v25 = vadd.f32 %v6372_v41, %v12779_v24  ;;  %v5128_v63 = vmax.f32 %v3798_v47, 0.0  ;;  %v6378_v29 = vsel %vm5785_vm3, %v12860_v35, 0.0 }
 0x2e5   : > { %15041 = vst [vmem:[#allocation96_spill] sm:$0xff] %v12973_v33  ;;  %15045 = vst [vmem:[#allocation42_spill] sm:$0xff] %v12994_v61  ;;  %v3790_v45 = vadd.f32 %v12719_v53, %v12822_v36  ;;  %v13001_v14 = vpop.f32.mrb[246].mxu1  ;;  %v13003_v19 = vpop.f32.mrb[247].mxu0  ;;  %v6763_v7 = vsel %vm5785_vm3, %v6600_v2, 0.0  ;;  %v15048_v24 = vld [vmem:[#allocation6_spill] sm:$0xff] }
 0x2e6   : > { %15044 = vst [vmem:[#allocation9_spill] sm:$0xff] %v12977_v49  ;;  %15046 = vst [vmem:[#allocation88_spill] sm:$0xff] %v13001_v14  ;;  %v4814_v49 = vadd.f32 %v12719_v53, %v12835_v48  ;;  %v5694_v47 = vmax.f32 %v15048_v24, %v12777_v1  ;;  %v13012_v41 = vpop.f32.mrb[247].mxu1  ;;  %v6764_v44 = vadd.f32 %v6763_v7, %v12786_v59  ;;  %v15049_v36 = vld [vmem:[#allocation118_spill] sm:$0xff]  ;;  %v5384_v9 = vmax.f32 %v4822_v16, 0.0  ;;  %v15051_v48 = vld [vmem:[#allocation69_spill] sm:$0xff] }
 0x2e7   : > { %15047 = vst [vmem:[#allocation97_spill] sm:$0xff] %v13003_v19  ;;  %v15050_v33 = vmax.f32 %v15049_v36, 0.0  ;;  %v5126_v19 = vmax.f32 %v3790_v45, 0.0  ;;  %v13023_v61 = vmax.f32 %v15051_v48, %v12760_v54  ;;  %v15052_v1 = vmax.f32 %v12628_v55, 0.0  ;;  %v15053_v7 = vld [vmem:[#allocation119_spill] sm:$0xff] }
 0x2e8   : > { %v5382_v14 = vmax.f32 %v4814_v49, 0.0  ;;  %v6374_v34 = vsel %vm5785_vm3, %v5694_v47, 0.0  ;;  %v6601_v2 = vmul.f32 %v5694_v47, %v5694_v47  ;;  %5849 = vrot.lane.b32.xlu1 %v5694_v47, %s8637_s10  ;;  %v15054_v59 = vmax.f32 %v15053_v7, 0.0 }
 0x2e9   : > { %v13017_v21 = vmax.f32 %v15050_v33, %v5128_v63  ;;  %v13027_v24 = vmax.f32 %v15052_v1, %v5384_v9  ;;  %v6375_v63 = vadd.f32 %v6374_v34, %v6373_v25  ;;  %v3811_v49 = vadd.f32 %v12719_v53, %v12871_v32  ;;  %5855 = vrot.lane.b32.xlu0 %v13023_v61, %s8637_s10  ;;  %v13045_v9 = vpop.f32.mrb[248].mxu0 }
 0x2ea   : > { %v13031_v33 = vmax.f32 %v15054_v59, %v5126_v19  ;;  %v6771_v16 = vsel %vm5785_vm3, %v6604_v31, 0.0  ;;  %v6603_v45 = vmul.f32 %v12860_v35, %v12860_v35  ;;  %v15055_v54 = vmax.f32 %v12638_v42, 0.0  ;;  %v13049_v31 = vpop.f32.mrb[248].mxu1  ;;  %v13051_v35 = vpop.f32.mrb[249].mxu0 }
 0x2eb   : > { %v6765_v55 = vsel %vm5785_vm3, %v6601_v2, 0.0  ;;  %v6377_v34 = vadd.f32 %v6376_v15, %v6375_v63  ;;  %v5131_v19 = vmax.f32 %v3811_v49, 0.0  ;;  %v4835_v32 = vadd.f32 %v12719_v53, %v12887_v3  ;;  %v15056_v15 = vld [vmem:[#allocation10_spill] sm:$0xff]  ;;  %v13063_v2 = vpop.f32.mrb[249].mxu1  ;;  %v13065_v3 = vpop.f32.mrb[250].mxu0 }
 0x2ec   : > { %v13040_v47 = vmax.f32 %v15055_v54, %v5382_v14  ;;  %v6766_v25 = vadd.f32 %v6765_v55, %v6764_v44  ;;  %v6605_v42 = vmul.f32 %v12920_v4, %v12920_v4  ;;  %v3803_v14 = vadd.f32 %v12719_v53, %v12889_v22  ;;  %v13071_v49 = vpop.f32.mrb[250].mxu1  ;;  %v13073_v22 = vpop.f32.mrb[251].mxu0 }
 0x2ed   : > { %v4827_v36 = vadd.f32 %v12719_v53, %v12902_v5  ;;  %v13061_v44 = vmax.f32 %v15056_v15, %v12783_v30  ;;  %v6379_v48 = vadd.f32 %v6378_v29, %v6377_v34  ;;  %v15058_v7 = vmax.f32 %v12698_v18, 0.0 }
 0x2ee   : > { %v6768_v1 = vadd.f32 %v6767_v17, %v6766_v25  ;;  %v5387_v63 = vmax.f32 %v4835_v32, 0.0  ;;  %v6382_v5 = vsel %vm5785_vm3, %v12920_v4, 0.0  ;;  %v6769_v30 = vsel %vm5785_vm3, %v6603_v45, 0.0  ;;  %v13080_v17 = vpop.f32.mrb[251].mxu1  ;;  %v15060_v25 = vld [vmem:[#allocation3_spill] sm:$0xff] }
 0x2ef   : > { %15057 = vst [vmem:[#allocation98_spill] sm:$0xff] %v13061_v44  ;;  %v13069_v59 = vmax.f32 %v15058_v7, %v5131_v19  ;;  %v5129_v54 = vmax.f32 %v3803_v14, 0.0  ;;  %v5385_v55 = vmax.f32 %v4827_v36, 0.0  ;;  %5857 = vrot.lane.b32.xlu1 %v13061_v44, %s8637_s10  ;;  %v15059_v29 = vmax.f32 %v12756_v12, 0.0 }
 0x2f0   : > { %v6770_v18 = vadd.f32 %v6769_v30, %v6768_v1  ;;  %v5699_v19 = vmax.f32 %v15060_v25, %v12800_v0  ;;  %v6381_v32 = vadd.f32 %v12986_v43, %v6379_v48  ;;  %v6773_v4 = vsel %vm5785_vm3, %v6605_v42, 0.0  ;;  %v15063_v43 = vld [vmem:[#allocation66_spill] sm:$0xff] }
 0x2f1   : > { %v13084_v34 = vmax.f32 %v15059_v29, %v5387_v63  ;;  %v15061_v45 = vmax.f32 %v12723_v13, 0.0  ;;  %v15062_v36 = vmax.f32 %v12816_v10, 0.0  ;;  %v3814_v1 = vadd.f32 %v12719_v53, %v12904_v60  ;;  %v15064_v13 = vld [vmem:[#allocation37_spill] sm:$0xff]  ;;  %v13106_v60 = vpop.f32.mrb[252].mxu0 }
 0x2f2   : > { %v6384_v12 = vsel %vm5785_vm3, %v5699_v19, 0.0  ;;  %v6606_v7 = vmul.f32 %v5699_v19, %v5699_v19  ;;  %5937 = vrot.lane.b32.xlu0 %v5699_v19, %s8635_s8  ;;  %v6383_v63 = vadd.f32 %v6382_v5, %v6381_v32  ;;  %v6772_v0 = vadd.f32 %v6771_v16, %v6770_v18  ;;  %v13111_v5 = vpop.f32.mrb[252].mxu1  ;;  %v13113_v18 = vpop.f32.mrb[253].mxu0  ;;  %v15066_v32 = vld [vmem:[#allocation99_spill] sm:$0xff] }
 0x2f3   : > { %v5577_v14 = vmax.f32 %v15061_v45, %v5129_v54  ;;  %v5641_v15 = vmax.f32 %v15062_v36, %v5385_v55  ;;  %v5132_v10 = vmax.f32 %v3814_v1, 0.0  ;;  %v4838_v30 = vadd.f32 %v12719_v53, %v12913_v46 }
 0x2f4   : > { %v5359_v54 = vmax.f32 %v12911_v40, 0.0  ;;  %v6385_v55 = vadd.f32 %v6384_v12, %v6383_v63  ;;  %v6774_v29 = vadd.f32 %v6773_v4, %v6772_v0  ;;  %v3806_v16 = vadd.f32 %v12719_v53, %v12915_v58  ;;  %v13128_v58 = vpop.f32.mrb[253].mxu1  ;;  %v13130_v4 = vpop.f32.mrb[254].mxu0 }
 0x2f5   : > { %v13099_v42 = vmax.f32 %v15063_v43, %v5577_v14  ;;  %v13102_v48 = vmax.f32 %v15064_v13, %v5641_v15  ;;  %v5357_v25 = vmax.f32 %v12936_v8, 0.0  ;;  %v13119_v46 = vadd.f32 %v12719_v53, %v15066_v32  ;;  %v13136_v12 = vpop.f32.mrb[254].mxu1  ;;  %v13138_v63 = vpop.f32.mrb[255].mxu0  ;;  %v15068_v43 = vld [vmem:[#allocation100_spill] sm:$0xff] }
 0x2f6   : > { %v6775_v40 = vsel %vm5785_vm3, %v6606_v7, 0.0  ;;  %v15067_v14 = vmax.f32 %v12731_v26, 0.0  ;;  %v5388_v15 = vmax.f32 %v4838_v30, 0.0  ;;  %v5130_v1 = vmax.f32 %v3806_v16, 0.0 }
 0x2f7   : > { %15065 = vst [vmem:[#allocation115_spill] sm:$0xff] %v13102_v48  ;;  %6047 = vst.msk [vmem:[%s10174_s7 + $0x50] sm:$0xff] %vm5785_vm3, %v13099_v42  ;;  %v6776_v45 = vadd.f32 %v6775_v40, %v6774_v29  ;;  %v13143_v7 = vadd.f32 %v12719_v53, %v15068_v43  ;;  %v4830_v13 = vadd.f32 %v12719_v53, %v12925_v52  ;;  %v15069_v29 = vld [vmem:[#allocation86_spill] sm:$0xff]  ;;  %v15070_v30 = vmax.f32 %v12826_v38, 0.0 }
 0x2f8   : > { %6051 = vst.msk [vmem:[%s10174_s7 + $0xd0] sm:$0xff] %vm5785_vm3, %v13102_v48  ;;  %v13134_v36 = vmax.f32 %v15067_v14, %v5132_v10  ;;  %v5700_v26 = vmax.f32 %v15069_v29, %v12852_v57  ;;  %v13149_v10 = vpop.f32.mrb[255].mxu1  ;;  %v15071_v32 = vmax.f32 %v12748_v56, 0.0  ;;  %v15072_v14 = vld [vmem:[#allocation27_spill] sm:$0xff]  ;;  %v3827_v43 = vadd.f32 %v12719_v53, %v12965_v51  ;;  %v15078_v56 = vld [vmem:[#allocation104_spill] sm:$0xff]  ;;  %v15094_v48 = vld [vmem:[#allocation97_spill] sm:$0xff] }
 0x2f9   : > { %v13153_v16 = vmax.f32 %v15070_v30, %v5388_v15  ;;  %v13159_v0 = vmax.f32 %v15072_v14, %v12804_v27  ;;  %v5386_v52 = vmax.f32 %v4830_v13, 0.0  ;;  %v4851_v38 = vadd.f32 %v12719_v53, %v12981_v62  ;;  %v15074_v15 = vld [vmem:[#allocation101_spill] sm:$0xff]  ;;  %v15075_v27 = vld [vmem:[#allocation68_spill] sm:$0xff]  ;;  %v15077_v14 = vld [vmem:[#allocation102_spill] sm:$0xff] }
 0x2fa   : > { %v5578_v40 = vmax.f32 %v15071_v32, %v5130_v1  ;;  %v6386_v19 = vsel %vm5785_vm3, %v5700_v26, 0.0  ;;  %v6607_v57 = vmul.f32 %v5700_v26, %v5700_v26  ;;  %5939 = vrot.lane.b32.xlu1 %v5700_v26, %s8635_s8  ;;  %v13170_v1 = vadd.f32 %v12719_v53, %v15074_v15 }
 0x2fb   : > { %15073 = vst [vmem:[#allocation44_spill] sm:$0xff] %v13159_v0  ;;  %v13175_v51 = vadd.f32 %v6386_v19, %v6385_v55  ;;  %5945 = vrot.lane.b32.xlu0 %v13159_v0, %s8635_s8  ;;  %v15076_v13 = vmax.f32 %v12830_v6, 0.0  ;;  %v5135_v62 = vmax.f32 %v3827_v43, 0.0  ;;  %v5391_v32 = vmax.f32 %v4851_v38, 0.0  ;;  %v15079_v55 = vld [vmem:[#allocation103_spill] sm:$0xff]  ;;  %v15080_v43 = vld [vmem:[#allocation13_spill] sm:$0xff] }
 0x2fc   : > { %v13173_v29 = vmax.f32 %v15075_v27, %v5578_v40  ;;  %v6777_v30 = vsel %vm5785_vm3, %v6607_v57, 0.0  ;;  %v13184_v15 = vadd.f32 %v12719_v53, %v15077_v14  ;;  %v13188_v40 = vadd.f32 %v12719_v53, %v15078_v56  ;;  %v15098_v0 = vld [vmem:[#allocation114_spill] sm:$0xff] }
 0x2fd   : > { %v5642_v26 = vmax.f32 %v15076_v13, %v5386_v52  ;;  %v13192_v19 = vadd.f32 %v12719_v53, %v15079_v55  ;;  %v13197_v6 = vadd.f32 %v6777_v30, %v6776_v45  ;;  %v15082_v57 = vmax.f32 %v12839_v23, 0.0  ;;  %v15083_v45 = vld [vmem:[#allocation23_spill] sm:$0xff] }
 0x2fe   : > { %6048 = vst.msk [vmem:[%s10174_s7 + $0x70] sm:$0xff] %vm5785_vm3, %v13173_v29  ;;  %v13206_v27 = vmax.f32 %v5359_v54, %v5391_v32  ;;  %v3819_v56 = vadd.f32 %v12719_v53, %v12983_v50  ;;  %v4843_v14 = vadd.f32 %v12719_v53, %v12992_v11  ;;  %v13215_v30 = vmax.f32 %v15083_v45, %v12864_v20  ;;  %v15086_v54 = vld [vmem:[#allocation105_spill] sm:$0xff]  ;;  %v15087_v32 = vld [vmem:[#allocation42_spill] sm:$0xff]  ;;  %v15089_v45 = vld [vmem:[#allocation107_spill] sm:$0xff] }
 0x2ff   : > { %v13200_v52 = vmax.f32 %v15080_v43, %v5642_v26  ;;  %v13204_v38 = vmax.f32 %v15082_v57, %v5135_v62  ;;  %v15085_v26 = vld [vmem:[#allocation89_spill] sm:$0xff]  ;;  %v5363_v23 = vmax.f32 %v13170_v1, 0.0  ;;  %v13224_v62 = vadd.f32 %v12719_v53, %v15086_v54  ;;  %v15088_v57 = vld [vmem:[#allocation106_spill] sm:$0xff] }
 0x300   : > { %15084 = vst [vmem:[#allocation121_spill] sm:$0xff] %v13215_v30  ;;  %v13219_v55 = vmax.f32 %v15085_v26, %v12954_v39  ;;  %v5133_v50 = vmax.f32 %v3819_v56, 0.0  ;;  %v3830_v11 = vadd.f32 %v12719_v53, %v15087_v32  ;;  %v5108_v20 = vmax.f32 %v13184_v15, 0.0  ;;  %5947 = vrot.lane.b32.xlu1 %v13215_v30, %s8635_s8  ;;  %v15090_v15 = vld [vmem:[#allocation76_spill] sm:$0xff] }
 0x301   : > { %15081 = vst [vmem:[#allocation21_spill] sm:$0xff] %v13200_v52  ;;  %6052 = vst.msk [vmem:[%s10174_s7 + $0xf0] sm:$0xff] %vm5785_vm3, %v13200_v52  ;;  %v5361_v43 = vmax.f32 %v13192_v19, 0.0  ;;  %v13235_v39 = vadd.f32 %v12719_v53, %v15088_v57  ;;  %v5389_v1 = vmax.f32 %v4843_v14, 0.0  ;;  %v13244_v26 = vadd.f32 %v12719_v53, %v15089_v45  ;;  %v15092_v57 = vld [vmem:[#allocation108_spill] sm:$0xff] }
 0x302   : > { %6017 = vrot.lane.b32.xlu0 %v13219_v55, %s8636_s9  ;;  %v15091_v54 = vmax.f32 %v15090_v15, 0.0  ;;  %v5136_v32 = vmax.f32 %v3830_v11, 0.0  ;;  %v13252_v14 = vadd.f32 %v12719_v53, %v15092_v57  ;;  %v15093_v52 = vld [vmem:[#allocation88_spill] sm:$0xff]  ;;  %v3822_v45 = vadd.f32 %v12719_v53, %v15094_v48  ;;  %v15095_v15 = vld [vmem:[#allocation19_spill] sm:$0xff]  ;;  %v15097_v57 = vld [vmem:[#allocation45_spill] sm:$0xff] }
 0x303   : > { %v13256_v13 = vmax.f32 %v5357_v25, %v5389_v1  ;;  %v4854_v56 = vadd.f32 %v12719_v53, %v15093_v52  ;;  %v5364_v30 = vmax.f32 %v13224_v62, 0.0  ;;  %v4846_v11 = vadd.f32 %v12719_v53, %v13012_v41  ;;  %v15099_v52 = vld [vmem:[#allocation33_spill] sm:$0xff] }
 0x304   : > { %v13248_v19 = vmax.f32 %v15091_v54, %v5133_v50  ;;  %v15096_v50 = vmax.f32 %v15095_v15, 0.0  ;;  %v13271_v8 = vmax.f32 %v15097_v57, %v13017_v21  ;;  %v5134_v1 = vmax.f32 %v3822_v45, 0.0 }
 0x305   : > { %v5392_v25 = vmax.f32 %v4854_v56, 0.0  ;;  %v13275_v44 = vmax.f32 %v15099_v52, %v15098_v0  ;;  %v3843_v48 = vadd.f32 %v12719_v53, %v13045_v9  ;;  %v5390_v15 = vmax.f32 %v4846_v11, 0.0  ;;  %v15101_v56 = vld [vmem:[#allocation109_spill] sm:$0xff]  ;;  %v15105_v11 = vld [vmem:[#allocation111_spill] sm:$0xff] }
 0x306   : > { %v13265_v54 = vmax.f32 %v15096_v50, %v5136_v32  ;;  %6019 = vrot.lane.b32.xlu1 %v13271_v8, %s8636_s9  ;;  %v4867_v21 = vadd.f32 %v12719_v53, %v13049_v31  ;;  %v13288_v0 = vadd.f32 %v12719_v53, %v15101_v56  ;;  %v15102_v45 = vmax.f32 %v12940_v28, 0.0  ;;  %v15103_v50 = vld [vmem:[#allocation7_spill] sm:$0xff]  ;;  %v15107_v28 = vld [vmem:[#allocation112_spill] sm:$0xff] }
 0x307   : > { %15100 = vst [vmem:[#allocation116_spill] sm:$0xff] %v13275_v44  ;;  %v15104_v57 = vmax.f32 %v15103_v50, 0.0  ;;  %6025 = vrot.lane.b32.xlu0 %v13275_v44, %s8636_s9  ;;  %v13302_v31 = vadd.f32 %v12719_v53, %v15105_v11  ;;  %v15106_v41 = vmax.f32 %v12944_v37, 0.0  ;;  %v5139_v56 = vmax.f32 %v3843_v48, 0.0  ;;  %v15108_v50 = vld [vmem:[#allocation43_spill] sm:$0xff]  ;;  %v15113_v44 = vld [vmem:[#allocation113_spill] sm:$0xff] }
 0x308   : > { %v13292_v9 = vmax.f32 %v15102_v45, %v5392_v25  ;;  %v5395_v62 = vmax.f32 %v4867_v21, 0.0  ;;  %v13310_v25 = vadd.f32 %v12719_v53, %v15107_v28  ;;  %v4859_v45 = vadd.f32 %v12719_v53, %v13063_v2  ;;  %v15111_v21 = vld [vmem:[#allocation96_spill] sm:$0xff] }
 0x309   : > { %v13296_v52 = vmax.f32 %v15104_v57, %v5134_v1  ;;  %v13306_v32 = vmax.f32 %v15106_v41, %v5390_v15  ;;  %v3835_v1 = vadd.f32 %v12719_v53, %v13051_v35  ;;  %v13318_v57 = vmax.f32 %v15108_v50, %v13027_v24  ;;  %v15112_v41 = vld [vmem:[#allocation28_spill] sm:$0xff] }
 0x30a   : > { %v15110_v37 = vmax.f32 %v13119_v46, 0.0  ;;  %v13324_v48 = vmax.f32 %v5363_v23, %v5395_v62  ;;  %v5701_v11 = vmax.f32 %v15112_v41, %v15111_v21  ;;  %v3846_v28 = vadd.f32 %v12719_v53, %v13065_v3 }
 0x30b   : > { %15109 = vst [vmem:[#allocation122_spill] sm:$0xff] %v13318_v57  ;;  %v13333_v2 = vadd.f32 %v12719_v53, %v15113_v44  ;;  %v5137_v24 = vmax.f32 %v3835_v1, 0.0  ;;  %v5393_v50 = vmax.f32 %v4859_v45, 0.0  ;;  %6027 = vrot.lane.b32.xlu1 %v13318_v57, %s8636_s9  ;;  %v4870_v3 = vadd.f32 %v12719_v53, %v13071_v49 }
 0x30c   : > { %v13322_v15 = vmax.f32 %v15110_v37, %v5139_v56  ;;  %v6388_v46 = vsel %vm5785_vm3, %v5701_v11, 0.0  ;;  %v6608_v23 = vmul.f32 %v5701_v11, %v5701_v11  ;;  %5977 = vrot.lane.b32.xlu0 %v5701_v11, %s8637_s10  ;;  %v5140_v62 = vmax.f32 %v3846_v28, 0.0  ;;  %v15115_v28 = vld [vmem:[#allocation51_spill] sm:$0xff] }
 0x30d   : > { %v5367_v56 = vmax.f32 %v13310_v25, 0.0  ;;  %v15114_v37 = vmax.f32 %v13143_v7, 0.0  ;;  %v5649_v21 = vmax.f32 %v5361_v43, %v5393_v50  ;;  %v6389_v1 = vadd.f32 %v6388_v46, %v13175_v51  ;;  %v15116_v25 = vld [vmem:[#allocation56_spill] sm:$0xff]  ;;  %v15118_v46 = vld [vmem:[#allocation9_spill] sm:$0xff] }
 0x30e   : > { %v6779_v45 = vsel %vm5785_vm3, %v6608_v23, 0.0  ;;  %v13346_v41 = vmax.f32 %v5108_v20, %v5140_v62  ;;  %v5396_v35 = vmax.f32 %v4870_v3, 0.0  ;;  %v3838_v11 = vadd.f32 %v12719_v53, %v13073_v22  ;;  %v15119_v23 = vld [vmem:[#allocation11_spill] sm:$0xff]  ;;  %v15120_v3 = vld [vmem:[#allocation117_spill] sm:$0xff] }
 0x30f   : > { %v5585_v44 = vmax.f32 %v15114_v37, %v5137_v24  ;;  %v13354_v57 = vmax.f32 %v15116_v25, %v5649_v21  ;;  %v6780_v7 = vadd.f32 %v6779_v45, %v13197_v6  ;;  %v4862_v51 = vadd.f32 %v12719_v53, %v13080_v17  ;;  %v15117_v24 = vld [vmem:[#allocation29_spill] sm:$0xff]  ;;  %v15121_v6 = vld [vmem:[#allocation120_spill] sm:$0xff] }
 0x310   : > { %v13359_v43 = vmax.f32 %v5364_v30, %v5396_v35  ;;  %v5138_v20 = vmax.f32 %v3838_v11, 0.0  ;;  %v5702_v50 = vmax.f32 %v15117_v24, %v13031_v33  ;;  %v13365_v22 = vmax.f32 %v15119_v23, %v15118_v46 }
 0x311   : > { %v13351_v49 = vmax.f32 %v15115_v28, %v5585_v44  ;;  %v5365_v62 = vmax.f32 %v13333_v2, 0.0  ;;  %v13370_v37 = vadd.f32 %v12719_v53, %v15120_v3  ;;  %v13374_v44 = vadd.f32 %v12719_v53, %v15121_v6  ;;  %6179 = vst.msk [vmem:[%s10174_s7 + $0xd8] sm:$0xff] %vm5785_vm3, %v13354_v57 }
 0x312   : > { %v6610_v17 = vmul.f32 %v13219_v55, %v13219_v55  ;;  %v15122_v33 = vmax.f32 %v13188_v40, 0.0  ;;  %v5394_v35 = vmax.f32 %v4862_v51, 0.0  ;;  %v6390_v2 = vsel %vm5785_vm3, %v5702_v50, 0.0  ;;  %5979 = vrot.lane.b32.xlu1 %v5702_v50, %s8637_s10  ;;  %5985 = vrot.lane.b32.xlu0 %v13365_v22, %s8637_s10  ;;  %v15123_v51 = vld [vmem:[#allocation18_spill] sm:$0xff] }
 0x313   : > { %6175 = vst.msk [vmem:[%s10174_s7 + $0x58] sm:$0xff] %vm5785_vm3, %v13351_v49  ;;  %v6609_v21 = vmul.f32 %v5702_v50, %v5702_v50  ;;  %v6396_v45 = vsel %vm5785_vm3, %v13099_v42, 0.0  ;;  %v6612_v11 = vmul.f32 %v13099_v42, %v13099_v42  ;;  %v6392_v40 = vsel %vm5785_vm3, %v13219_v55, 0.0 }
 0x314   : > { %v5586_v30 = vmax.f32 %v15122_v33, %v5138_v20  ;;  %v6391_v28 = vadd.f32 %v6390_v2, %v6389_v1  ;;  %v6611_v25 = vmul.f32 %v13271_v8, %v13271_v8  ;;  %v15124_v24 = vmax.f32 %v13235_v39, 0.0  ;;  %v15125_v33 = vld [vmem:[#allocation14_spill] sm:$0xff] }
 0x315   : > { %v6781_v46 = vsel %vm5785_vm3, %v6609_v21, 0.0  ;;  %v3859_v42 = vadd.f32 %v12719_v53, %v13106_v60  ;;  %v4883_v55 = vadd.f32 %v12719_v53, %v13111_v5  ;;  %v6613_v1 = vmul.f32 %v13173_v29, %v13173_v29 }
 0x316   : > { %v13399_v20 = vmax.f32 %v15123_v51, %v5586_v30  ;;  %v5650_v50 = vmax.f32 %v15124_v24, %v5394_v35  ;;  %v6393_v23 = vadd.f32 %v6392_v40, %v6391_v28  ;;  %v6782_v3 = vadd.f32 %v6781_v46, %v6780_v7 }
 0x317   : > { %v6783_v6 = vsel %vm5785_vm3, %v6610_v17, 0.0  ;;  %v6394_v39 = vsel %vm5785_vm3, %v13271_v8, 0.0  ;;  %v5143_v60 = vmax.f32 %v3859_v42, 0.0  ;;  %v5399_v2 = vmax.f32 %v4883_v55, 0.0 }
 0x318   : > { %6176 = vst.msk [vmem:[%s10174_s7 + $0x78] sm:$0xff] %vm5785_vm3, %v13399_v20  ;;  %v13417_v30 = vmax.f32 %v15125_v33, %v5650_v50  ;;  %v6395_v7 = vadd.f32 %v6394_v39, %v6393_v23  ;;  %v6784_v35 = vadd.f32 %v6783_v6, %v6782_v3  ;;  %v6787_v5 = vsel %vm5785_vm3, %v6612_v11, 0.0  ;;  %v15128_v23 = vld [vmem:[#allocation67_spill] sm:$0xff] }
 0x319   : > { %v6398_v21 = vsel %vm5785_vm3, %v13173_v29, 0.0  ;;  %v6785_v17 = vsel %vm5785_vm3, %v6611_v25, 0.0  ;;  %v3851_v8 = vadd.f32 %v12719_v53, %v13113_v18  ;;  %v15126_v28 = vmax.f32 %v13244_v26, 0.0  ;;  %v15127_v25 = vld [vmem:[#allocation5_spill] sm:$0xff] }
 0x31a   : > { %6180 = vst.msk [vmem:[%s10174_s7 + $0xf8] sm:$0xff] %vm5785_vm3, %v13417_v30  ;;  %v6786_v40 = vadd.f32 %v6785_v17, %v6784_v35  ;;  %v13432_v24 = vmax.f32 %v5367_v56, %v5399_v2  ;;  %v4875_v11 = vadd.f32 %v12719_v53, %v13128_v58  ;;  %v6789_v29 = vsel %vm5785_vm3, %v6613_v1, 0.0 }
 0x31b   : > { %v13430_v51 = vmax.f32 %v15126_v28, %v5143_v60  ;;  %v5141_v50 = vmax.f32 %v3851_v8, 0.0  ;;  %v13439_v46 = vmax.f32 %v15127_v25, %v13040_v47  ;;  %v5707_v18 = vmax.f32 %v15128_v23, %v13069_v59 }
 0x31c   : > { %v5397_v3 = vmax.f32 %v4875_v11, 0.0  ;;  %v6397_v42 = vadd.f32 %v6396_v45, %v6395_v7  ;;  %v6788_v26 = vadd.f32 %v6787_v5, %v6786_v40  ;;  %v3862_v56 = vadd.f32 %v12719_v53, %v13130_v4 }
 0x31d   : > { %v5110_v55 = vmax.f32 %v13302_v31, 0.0  ;;  %v5368_v58 = vmax.f32 %v13370_v37, 0.0  ;;  %v5366_v1 = vmax.f32 %v13374_v44, 0.0  ;;  %v15129_v6 = vmax.f32 %v13252_v14, 0.0  ;;  %5987 = vrot.lane.b32.xlu1 %v13439_v46, %s8637_s10  ;;  %6065 = vrot.lane.b32.xlu0 %v5707_v18, %s8635_s8 }
 0x31e   : > { %v13455_v47 = vmax.f32 %v5365_v62, %v5397_v3  ;;  %v6614_v59 = vmul.f32 %v5707_v18, %v5707_v18  ;;  %v6399_v45 = vadd.f32 %v6398_v21, %v6397_v42  ;;  %v6790_v4 = vadd.f32 %v6789_v29, %v6788_v26  ;;  %v15130_v62 = vld [vmem:[#allocation46_spill] sm:$0xff]  ;;  %v15135_v3 = vld [vmem:[#allocation57_spill] sm:$0xff] }
 0x31f   : > { %v13450_v39 = vmax.f32 %v15129_v6, %v5141_v50  ;;  %v6400_v31 = vsel %vm5785_vm3, %v5707_v18, 0.0  ;;  %v5144_v33 = vmax.f32 %v3862_v56, 0.0  ;;  %v4886_v37 = vadd.f32 %v12719_v53, %v13136_v12  ;;  %v15137_v56 = vld [vmem:[#allocation30_spill] sm:$0xff] }
 0x320   : > { %v3854_v14 = vadd.f32 %v12719_v53, %v13138_v63  ;;  %v6791_v44 = vsel %vm5785_vm3, %v6614_v59, 0.0  ;;  %v6401_v7 = vadd.f32 %v6400_v31, %v6399_v45  ;;  %v4878_v35 = vadd.f32 %v12719_v53, %v13149_v10  ;;  %v15132_v63 = vld [vmem:[#allocation65_spill] sm:$0xff] }
 0x321   : > { %v5708_v60 = vmax.f32 %v15130_v62, %v13134_v36  ;;  %v6792_v2 = vadd.f32 %v6791_v44, %v6790_v4  ;;  %v15131_v5 = vmax.f32 %v13288_v0, 0.0  ;;  %v5400_v17 = vmax.f32 %v4886_v37, 0.0  ;;  %v15133_v0 = vld [vmem:[#allocation12_spill] sm:$0xff]  ;;  %v15142_v37 = vld [vmem:[#allocation50_spill] sm:$0xff] }
 0x322   : > { %v5142_v8 = vmax.f32 %v3854_v14, 0.0  ;;  %v5398_v40 = vmax.f32 %v4878_v35, 0.0  ;;  %v13473_v11 = vmax.f32 %v15132_v63, %v13084_v34  ;;  %v13481_v29 = vmax.f32 %v15133_v0, %v13153_v16  ;;  %v15134_v34 = vld [vmem:[#allocation71_spill] sm:$0xff]  ;;  %v15136_v16 = vld [vmem:[#allocation41_spill] sm:$0xff]  ;;  %v15143_v44 = vld [vmem:[#allocation80_spill] sm:$0xff] }
 0x323   : > { %v5592_v21 = vmax.f32 %v15131_v5, %v5144_v33  ;;  %v6402_v12 = vsel %vm5785_vm3, %v5708_v60, 0.0  ;;  %v6615_v28 = vmul.f32 %v5708_v60, %v5708_v60  ;;  %6067 = vrot.lane.b32.xlu1 %v5708_v60, %s8635_s8  ;;  %v13475_v53 = vmax.f32 %v5368_v58, %v5400_v17  ;;  %v15138_v58 = vld [vmem:[#allocation53_spill] sm:$0xff] }
 0x324   : > { %v13477_v10 = vmax.f32 %v5110_v55, %v5142_v8  ;;  %v6403_v36 = vadd.f32 %v6402_v12, %v6401_v7  ;;  %v13483_v50 = vmax.f32 %v5366_v1, %v5398_v40  ;;  %6073 = vrot.lane.b32.xlu0 %v13473_v11, %s8635_s8  ;;  %v5711_v18 = vmax.f32 %v15134_v34, %v13204_v38 }
 0x325   : > { %v6793_v25 = vsel %vm5785_vm3, %v6615_v28, 0.0  ;;  %v5712_v42 = vmax.f32 %v15135_v3, %v13265_v54  ;;  %v13496_v26 = vmax.f32 %v15136_v16, %v13206_v27  ;;  %v13500_v55 = vmax.f32 %v15137_v56, %v13292_v9  ;;  %v15139_v27 = vld [vmem:[#allocation31_spill] sm:$0xff]  ;;  %v15140_v9 = vld [vmem:[#allocation24_spill] sm:$0xff]  ;;  %v15147_v16 = vld [vmem:[#allocation25_spill] sm:$0xff] }
 0x326   : > { %v6794_v23 = vadd.f32 %v6793_v25, %v6792_v2  ;;  %v5709_v1 = vmax.f32 %v15138_v58, %v13248_v19  ;;  %v6620_v54 = vmul.f32 %v13351_v49, %v13351_v49  ;;  %v5710_v45 = vmax.f32 %v15139_v27, %v13296_v52  ;;  %v15141_v19 = vld [vmem:[#allocation81_spill] sm:$0xff]  ;;  %v15144_v52 = vld [vmem:[#allocation36_spill] sm:$0xff] }
 0x327   : > { %6075 = vrot.lane.b32.xlu1 %v13481_v29, %s8635_s8  ;;  %v13513_v4 = vmax.f32 %v15140_v9, %v13256_v13  ;;  %v13517_v31 = vmax.f32 %v15141_v19, %v13306_v32  ;;  %v5715_v14 = vmax.f32 %v15142_v37, %v13322_v15  ;;  %v5716_v7 = vmax.f32 %v15143_v44, %v13346_v41  ;;  %v15145_v25 = vld [vmem:[#allocation52_spill] sm:$0xff] }
 0x328   : > { %6145 = vrot.lane.b32.xlu0 %v5711_v18, %s8636_s9  ;;  %v6404_v38 = vsel %vm5785_vm3, %v5709_v1, 0.0  ;;  %v6616_v6 = vmul.f32 %v5709_v1, %v5709_v1  ;;  %v13528_v35 = vmax.f32 %v15144_v52, %v13324_v48  ;;  %v6618_v13 = vmul.f32 %v5711_v18, %v5711_v18  ;;  %v15149_v27 = vld [vmem:[#allocation8_spill] sm:$0xff] }
 0x329   : > { %v6405_v59 = vadd.f32 %v6404_v38, %v6403_v36  ;;  %v6406_v32 = vsel %vm5785_vm3, %v5710_v45, 0.0  ;;  %v6617_v60 = vmul.f32 %v5710_v45, %v5710_v45  ;;  %v6408_v5 = vsel %vm5785_vm3, %v5711_v18, 0.0  ;;  %v15151_v44 = vld [vmem:[#allocation48_spill] sm:$0xff] }
 0x32a   : > { %v6795_v33 = vsel %vm5785_vm3, %v6616_v6, 0.0  ;;  %v6619_v17 = vmul.f32 %v5712_v42, %v5712_v42  ;;  %v6412_v41 = vsel %vm5785_vm3, %v13351_v49, 0.0  ;;  %v6803_v40 = vsel %vm5785_vm3, %v6620_v54, 0.0 }
 0x32b   : > { %6147 = vrot.lane.b32.xlu1 %v5712_v42, %s8636_s9  ;;  %v6796_v62 = vadd.f32 %v6795_v33, %v6794_v23  ;;  %v6407_v2 = vadd.f32 %v6406_v32, %v6405_v59  ;;  %v6797_v15 = vsel %vm5785_vm3, %v6617_v60, 0.0  ;;  %v6621_v12 = vmul.f32 %v13399_v20, %v13399_v20  ;;  %v15146_v23 = vld [vmem:[#allocation78_spill] sm:$0xff]  ;;  %v15150_v33 = vld [vmem:[#allocation85_spill] sm:$0xff] }
 0x32c   : > { %6153 = vrot.lane.b32.xlu0 %v13496_v26, %s8636_s9  ;;  %v6799_v28 = vsel %vm5785_vm3, %v6618_v13, 0.0  ;;  %v6410_v63 = vsel %vm5785_vm3, %v5712_v42, 0.0  ;;  %v13546_v49 = vmax.f32 %v15145_v25, %v13359_v43  ;;  %v5719_v34 = vmax.f32 %v15146_v23, %v13430_v51  ;;  %v15148_v42 = vld [vmem:[#allocation22_spill] sm:$0xff]  ;;  %v15154_v23 = vld [vmem:[#allocation92_spill] sm:$0xff] }
 0x32d   : > { %v6409_v48 = vadd.f32 %v6408_v5, %v6407_v2  ;;  %v6798_v8 = vadd.f32 %v6797_v15, %v6796_v62  ;;  %v6414_v18 = vsel %vm5785_vm3, %v13399_v20, 0.0  ;;  %v6801_v3 = vsel %vm5785_vm3, %v6619_v17, 0.0 }
 0x32e   : > { %v5720_v56 = vmax.f32 %v15147_v16, %v5592_v21  ;;  %v5717_v58 = vmax.f32 %v15148_v42, %v13450_v39  ;;  %v6805_v43 = vsel %vm5785_vm3, %v6621_v12, 0.0  ;;  %v6622_v6 = vmul.f32 %v5715_v14, %v5715_v14 }
 0x32f   : > { %6155 = vrot.lane.b32.xlu1 %v13500_v55, %s8636_s9  ;;  %v6411_v36 = vadd.f32 %v6410_v63, %v6409_v48  ;;  %v6800_v0 = vadd.f32 %v6799_v28, %v6798_v8  ;;  %v6416_v20 = vsel %vm5785_vm3, %v5715_v14, 0.0  ;;  %v6418_v21 = vsel %vm5785_vm3, %v5716_v7, 0.0 }
 0x330   : > { %6105 = vrot.lane.b32.xlu0 %v5709_v1, %s8637_s10  ;;  %v6623_v54 = vmul.f32 %v5716_v7, %v5716_v7  ;;  %v6624_v39 = vmul.f32 %v5717_v58, %v5717_v58  ;;  %v13568_v37 = vmax.f32 %v15150_v33, %v13455_v47  ;;  %v13572_v52 = vmax.f32 %v15151_v44, %v13483_v50 }
 0x331   : > { %v6802_v1 = vadd.f32 %v6801_v3, %v6800_v0  ;;  %v6413_v38 = vadd.f32 %v6412_v41, %v6411_v36  ;;  %v6807_v62 = vsel %vm5785_vm3, %v6622_v6, 0.0  ;;  %v6420_v32 = vsel %vm5785_vm3, %v5717_v58, 0.0 }
 0x332   : > { %v5807_v13 = vpop.permute.xlu1 %5806  ;;  %v6809_v50 = vsel %vm5785_vm3, %v6623_v54, 0.0  ;;  %v6811_v17 = vsel %vm5785_vm3, %v6624_v39, 0.0  ;;  %v6626_v48 = vmul.f32 %v5719_v34, %v5719_v34  ;;  %v6424_v63 = vsel %vm5785_vm3, %v5719_v34, 0.0 }
 0x333   : > { %6107 = vrot.lane.b32.xlu1 %v5710_v45, %s8637_s10  ;;  %v6415_v51 = vadd.f32 %v6414_v18, %v6413_v38  ;;  %v6804_v59 = vadd.f32 %v6803_v40, %v6802_v1  ;;  %v5718_v45 = vmax.f32 %v15149_v27, %v13477_v10  ;;  %v15152_v10 = vld [vmem:[#allocation79_spill] sm:$0xff]  ;;  %5829 = vst.msk [vmem:[%s10174_s7 + $0x40] sm:$0xff] %vm5826_vm4, %v5807_v13  ;;  %v6428_v1 = vsel %vm5785_vm3, %v15154_v23, 0.0  ;;  %v15155_v38 = vld [vmem:[#allocation93_spill] sm:$0xff] }
 0x334   : > { %6113 = vrot.lane.b32.xlu0 %v13513_v4, %s8637_s10  ;;  %v13578_v2 = vmax.f32 %v15152_v10, %v13432_v24  ;;  %v15153_v40 = vld [vmem:[#allocation15_spill] sm:$0xff]  ;;  %v6627_v36 = vmul.f32 %v5720_v56, %v5720_v56  ;;  %v6628_v18 = vmul.f32 %v15154_v23, %v15154_v23  ;;  %v6815_v3 = vsel %vm5785_vm3, %v6626_v48, 0.0  ;;  %v15160_v48 = vld [vmem:[#allocation62_spill] sm:$0xff] }
 0x335   : > { %v6417_v9 = vadd.f32 %v6416_v20, %v6415_v51  ;;  %v6806_v19 = vadd.f32 %v6805_v43, %v6804_v59  ;;  %v6625_v60 = vmul.f32 %v5718_v45, %v5718_v45  ;;  %v6422_v15 = vsel %vm5785_vm3, %v5718_v45, 0.0  ;;  %v15156_v59 = vld [vmem:[#allocation91_spill] sm:$0xff] }
 0x336   : > { %v6817_v43 = vsel %vm5785_vm3, %v6627_v36, 0.0  ;;  %v6819_v51 = vsel %vm5785_vm3, %v6628_v18, 0.0  ;;  %v6432_v33 = vsel %vm5785_vm3, %v15156_v59, 0.0  ;;  %v6440_v23 = vsel %vm5785_vm3, %v15160_v48, 0.0 }
 0x337   : > { %6115 = vrot.lane.b32.xlu1 %v13517_v31, %s8637_s10  ;;  %v6808_v5 = vadd.f32 %v6807_v62, %v6806_v19  ;;  %v6419_v47 = vadd.f32 %v6418_v21, %v6417_v9  ;;  %v6813_v8 = vsel %vm5785_vm3, %v6625_v60, 0.0  ;;  %v6630_v21 = vmul.f32 %v15156_v59, %v15156_v59 }
 0x338   : > { %6193 = vrot.lane.b32.xlu0 %v5715_v14, %s8635_s8  ;;  %v5815_v14 = vpop.permute.xlu0 %5814 }
 0x339   : > { %5833 = vst.msk [vmem:[%s10174_s7 + $0xc0] sm:$0xff] %vm5826_vm4, %v5815_v14  ;;  %v6810_v41 = vadd.f32 %v6809_v50, %v6808_v5  ;;  %v6421_v24 = vadd.f32 %v6420_v32, %v6419_v47  ;;  %v6823_v62 = vsel %vm5785_vm3, %v6630_v21, 0.0  ;;  %v15158_v32 = vld [vmem:[#allocation63_spill] sm:$0xff] }
 0x33a   : > { %v6632_v60 = vmul.f32 %v15158_v32, %v15158_v32  ;;  %v15159_v50 = vld [vmem:[#allocation39_spill] sm:$0xff] }
 0x33b   : > { %6195 = vrot.lane.b32.xlu1 %v5716_v7, %s8635_s8  ;;  %v13593_v7 = vmax.f32 %v15153_v40, %v13475_v53  ;;  %v6812_v12 = vadd.f32 %v6811_v17, %v6810_v41  ;;  %v6423_v28 = vadd.f32 %v6422_v15, %v6421_v24  ;;  %v6426_v53 = vsel %vm5785_vm3, %v5720_v56, 0.0 }
 0x33c   : > { %6201 = vrot.lane.b32.xlu0 %v13528_v35, %s8635_s8  ;;  %v6633_v17 = vmul.f32 %v15159_v50, %v15159_v50  ;;  %v6436_v15 = vsel %vm5785_vm3, %v15158_v32, 0.0  ;;  %v6438_v40 = vsel %vm5785_vm3, %v15159_v50, 0.0 }
 0x33d   : > { %v6425_v0 = vadd.f32 %v6424_v63, %v6423_v28  ;;  %v6814_v25 = vadd.f32 %v6813_v8, %v6812_v12  ;;  %v6634_v8 = vmul.f32 %v15160_v48, %v15160_v48  ;;  %v6827_v12 = vsel %vm5785_vm3, %v6632_v60, 0.0 }
 0x33e   : > { %v6829_v18 = vsel %vm5785_vm3, %v6633_v17, 0.0 }
 0x33f   : > { %6203 = vrot.lane.b32.xlu1 %v13546_v49, %s8635_s8  ;;  %v6427_v16 = vadd.f32 %v6426_v53, %v6425_v0  ;;  %v6816_v42 = vadd.f32 %v6815_v3, %v6814_v25  ;;  %v15161_v0 = vld [vmem:[#allocation58_spill] sm:$0xff] }
 0x340   : > { %6273 = vrot.lane.b32.xlu0 %v5719_v34, %s8636_s9  ;;  %v6629_v34 = vmul.f32 %v15155_v38, %v15155_v38  ;;  %v6635_v25 = vmul.f32 %v15161_v0, %v15161_v0 }
 0x341   : > { %v6429_v6 = vadd.f32 %v6428_v1, %v6427_v16  ;;  %v6818_v20 = vadd.f32 %v6817_v43, %v6816_v42  ;;  %v5809_v54 = vpop.permute.xlu1 %5808  ;;  %v15162_v16 = vld [vmem:[#allocation95_spill] sm:$0xff]  ;;  %v6442_v1 = vsel %vm5785_vm3, %v15161_v0, 0.0  ;;  %v15168_v0 = vld [vmem:[#allocation38_spill] sm:$0xff] }
 0x342   : > { %5830 = vst.msk [vmem:[%s10174_s7 + $0x60] sm:$0xff] %vm5826_vm4, %v5809_v54  ;;  %v6821_v9 = vsel %vm5785_vm3, %v6629_v34, 0.0  ;;  %v6636_v42 = vmul.f32 %v15162_v16, %v15162_v16 }
 0x343   : > { %6275 = vrot.lane.b32.xlu1 %v5720_v56, %s8636_s9  ;;  %v6430_v56 = vsel %vm5785_vm3, %v15155_v38, 0.0  ;;  %v6820_v27 = vadd.f32 %v6819_v51, %v6818_v20  ;;  %v6831_v38 = vsel %vm5785_vm3, %v6634_v8, 0.0  ;;  %v15163_v20 = vld [vmem:[#allocation59_spill] sm:$0xff]  ;;  %v15167_v8 = vld [vmem:[#allocation72_spill] sm:$0xff] }
 0x344   : > { %6233 = vrot.lane.b32.xlu0 %v5717_v58, %s8637_s10  ;;  %v6431_v39 = vadd.f32 %v6430_v56, %v6429_v6  ;;  %v15157_v58 = vld [vmem:[#allocation94_spill] sm:$0xff]  ;;  %v6444_v6 = vsel %vm5785_vm3, %v15162_v16, 0.0  ;;  %v6637_v51 = vmul.f32 %v15163_v20, %v15163_v20  ;;  %v6833_v56 = vsel %vm5785_vm3, %v6635_v25, 0.0 }
 0x345   : > { %v6631_v19 = vmul.f32 %v15157_v58, %v15157_v58  ;;  %v6822_v13 = vadd.f32 %v6821_v9, %v6820_v27  ;;  %v5817_v5 = vpop.permute.xlu1 %5816  ;;  %v6835_v27 = vsel %vm5785_vm3, %v6636_v42, 0.0  ;;  %v6446_v9 = vsel %vm5785_vm3, %v15163_v20, 0.0  ;;  %v15169_v42 = vld [vmem:[#allocation4_spill] sm:$0xff] }
 0x346   : > { %v6433_v44 = vadd.f32 %v6432_v33, %v6431_v39  ;;  %5834 = vst.msk [vmem:[%s10174_s7 + $0xe0] sm:$0xff] %vm5826_vm4, %v5817_v5  ;;  %v5889_v28 = vpop.permute.xlu0 %5888  ;;  %v6642_v25 = vmul.f32 %v15168_v0, %v15168_v0  ;;  %v15170_v20 = vld [vmem:[#allocation64_spill] sm:$0xff] }
 0x347   : > { %6235 = vrot.lane.b32.xlu1 %v5718_v45, %s8637_s10  ;;  %v6434_v45 = vsel %vm5785_vm3, %v15157_v58, 0.0  ;;  %v6824_v14 = vadd.f32 %v6823_v62, %v6822_v13  ;;  %v6825_v47 = vsel %vm5785_vm3, %v6631_v19, 0.0  ;;  %v15164_v58 = vld [vmem:[#allocation84_spill] sm:$0xff]  ;;  %v6837_v13 = vsel %vm5785_vm3, %v6637_v51, 0.0 }
 0x348   : > { %6241 = vrot.lane.b32.xlu0 %v13568_v37, %s8637_s10  ;;  %v6435_v10 = vadd.f32 %v6434_v45, %v6433_v44  ;;  %v6638_v19 = vmul.f32 %v15164_v58, %v15164_v58  ;;  %v15165_v45 = vld [vmem:[#allocation83_spill] sm:$0xff]  ;;  %v6448_v32 = vsel %vm5785_vm3, %v15164_v58, 0.0  ;;  %v6644_v51 = vmul.f32 %v15170_v20, %v15170_v20 }
 0x349   : > { %v6826_v24 = vadd.f32 %v6825_v47, %v6824_v14  ;;  %v6639_v62 = vmul.f32 %v15165_v45, %v15165_v45  ;;  %v6450_v14 = vsel %vm5785_vm3, %v15165_v45, 0.0  ;;  %v15166_v47 = vld [vmem:[#allocation74_spill] sm:$0xff] }
 0x34a   : > { %v6437_v41 = vadd.f32 %v6436_v15, %v6435_v10  ;;  %v6839_v5 = vsel %vm5785_vm3, %v6638_v19, 0.0  ;;  %v6640_v50 = vmul.f32 %v15166_v47, %v15166_v47  ;;  %v6851_v45 = vsel %vm5785_vm3, %v6644_v51, 0.0 }
 0x34b   : > { %6243 = vrot.lane.b32.xlu1 %v13572_v52, %s8637_s10  ;;  %v6828_v36 = vadd.f32 %v6827_v12, %v6826_v24  ;;  %v5891_v59 = vpop.permute.xlu1 %5890  ;;  %v6841_v48 = vsel %vm5785_vm3, %v6639_v62, 0.0  ;;  %v6452_v12 = vsel %vm5785_vm3, %v15166_v47, 0.0  ;;  %v15172_v62 = vld [vmem:[#allocation60_spill] sm:$0xff] }
 0x34c   : > { %6281 = vrot.lane.b32.xlu0 %v13578_v2, %s8636_s9  ;;  %v6439_v63 = vadd.f32 %v6438_v40, %v6437_v41  ;;  %v6641_v40 = vmul.f32 %v15167_v8, %v15167_v8  ;;  %v15173_v47 = vld [vmem:[#allocation16_spill] sm:$0xff] }
 0x34d   : > { %v6830_v53 = vadd.f32 %v6829_v18, %v6828_v36  ;;  %v5897_v21 = vpop.permute.xlu0 %5896  ;;  %v6843_v18 = vsel %vm5785_vm3, %v6640_v50, 0.0  ;;  %v6647_v50 = vmul.f32 %v15173_v47, %v15173_v47 }
 0x34e   : > { %v6441_v3 = vadd.f32 %v6440_v23, %v6439_v63  ;;  %v6454_v23 = vsel %vm5785_vm3, %v15167_v8, 0.0  ;;  %v15174_v8 = vld [vmem:[#allocation20_spill] sm:$0xff] }
 0x34f   : > { %6283 = vrot.lane.b32.xlu1 %v13593_v7, %s8636_s9  ;;  %v6832_v43 = vadd.f32 %v6831_v38, %v6830_v53  ;;  %v6845_v38 = vsel %vm5785_vm3, %v6641_v40, 0.0  ;;  %v6648_v40 = vmul.f32 %v15174_v8, %v15174_v8 }
 0x350   : > { %v6443_v34 = vadd.f32 %v6442_v1, %v6441_v3  ;;  %v6456_v1 = vsel %vm5785_vm3, %v15168_v0, 0.0  ;;  %v15175_v0 = vld [vmem:[#allocation49_spill] sm:$0xff] }
 0x351   : > { %v6834_v39 = vadd.f32 %v6833_v56, %v6832_v43  ;;  %v5848_v15 = vpop.permute.xlu0 %5847  ;;  %v6458_v56 = vsel %vm5785_vm3, %v15169_v42, 0.0 }
 0x352   : > { %v6445_v54 = vadd.f32 %v6444_v6, %v6443_v34  ;;  %5870 = vst.msk [vmem:[%s10174_s7 + $0x40] sm:$0xff] %vm5867_vm5, %v5848_v15  ;;  %v6464_v15 = vsel %vm5785_vm3, %v15172_v62, 0.0 }
 0x353   : > { %v6836_v44 = vadd.f32 %v6835_v27, %v6834_v39  ;;  %5911 = vst.msk [vmem:[%s10174_s7 + $0x40] sm:$0xff] %vm5908_vm6, %v5889_v28  ;;  %v6643_v28 = vmul.f32 %v15169_v42, %v15169_v42  ;;  %v6470_v42 = vsel %vm5785_vm3, %v15175_v0, 0.0 }
 0x354   : > { %v6447_v33 = vadd.f32 %v6446_v9, %v6445_v54  ;;  %v6847_v54 = vsel %vm5785_vm3, %v6642_v25, 0.0  ;;  %v15171_v9 = vld [vmem:[#allocation87_spill] sm:$0xff]  ;;  %v6649_v25 = vmul.f32 %v15175_v0, %v15175_v0  ;;  %v15182_v0 = vld [vmem:[#allocation40_spill] sm:$0xff] }
 0x355   : > { %v6838_v10 = vadd.f32 %v6837_v13, %v6836_v44  ;;  %v6645_v58 = vmul.f32 %v15171_v9, %v15171_v9  ;;  %v6849_v19 = vsel %vm5785_vm3, %v6643_v28, 0.0  ;;  %v6859_v28 = vsel %vm5785_vm3, %v6648_v40, 0.0 }
 0x356   : > { %v6449_v60 = vadd.f32 %v6448_v32, %v6447_v33  ;;  %v5899_v17 = vpop.permute.xlu1 %5898  ;;  %v6646_v32 = vmul.f32 %v15172_v62, %v15172_v62 }
 0x357   : > { %v6840_v24 = vadd.f32 %v6839_v5, %v6838_v10  ;;  %v6853_v5 = vsel %vm5785_vm3, %v6645_v58, 0.0 }
 0x358   : > { %v6451_v41 = vadd.f32 %v6450_v14, %v6449_v60 }
 0x359   : > { %v6842_v36 = vadd.f32 %v6841_v48, %v6840_v24  ;;  %v6466_v48 = vsel %vm5785_vm3, %v15173_v47, 0.0  ;;  %v15180_v47 = vld [vmem:[#allocation90_spill] sm:$0xff] }
 0x35a   : > { %v6453_v63 = vadd.f32 %v6452_v12, %v6451_v41  ;;  %v5850_v3 = vpop.permute.xlu1 %5849 }
 0x35b   : > { %v6844_v16 = vadd.f32 %v6843_v18, %v6842_v36  ;;  %5871 = vst.msk [vmem:[%s10174_s7 + $0x60] sm:$0xff] %vm5867_vm5, %v5850_v3  ;;  %v5856_v34 = vpop.permute.xlu0 %5855  ;;  %v6857_v36 = vsel %vm5785_vm3, %v6647_v50, 0.0  ;;  %v6654_v50 = vmul.f32 %v15180_v47, %v15180_v47 }
 0x35c   : > { %v6455_v53 = vadd.f32 %v6454_v23, %v6453_v63  ;;  %5912 = vst.msk [vmem:[%s10174_s7 + $0x60] sm:$0xff] %vm5908_vm6, %v5891_v59  ;;  %v6460_v59 = vsel %vm5785_vm3, %v15170_v20, 0.0  ;;  %v6468_v23 = vsel %vm5785_vm3, %v15174_v8, 0.0  ;;  %v6480_v8 = vsel %vm5785_vm3, %v15180_v47, 0.0  ;;  %v15187_v47 = vld [vmem:[#allocation61_spill] sm:$0xff] }
 0x35d   : > { %v6846_v6 = vadd.f32 %v6845_v38, %v6844_v16  ;;  %5874 = vst.msk [vmem:[%s10174_s7 + $0xc0] sm:$0xff] %vm5867_vm5, %v5856_v34 }
 0x35e   : > { %v6457_v43 = vadd.f32 %v6456_v1, %v6455_v53  ;;  %5915 = vst.msk [vmem:[%s10174_s7 + $0xc0] sm:$0xff] %vm5908_vm6, %v5897_v21  ;;  %v6462_v21 = vsel %vm5785_vm3, %v15171_v9, 0.0  ;;  %v15176_v53 = vld [vmem:[#allocation77_spill] sm:$0xff] }
 0x35f   : > { %v6848_v27 = vadd.f32 %v6847_v54, %v6846_v6  ;;  %v6650_v16 = vmul.f32 %v15176_v53, %v15176_v53  ;;  %v15177_v6 = vld [vmem:[#allocation2_spill] sm:$0xff]  ;;  %v6472_v51 = vsel %vm5785_vm3, %v15176_v53, 0.0 }
 0x360   : > { %v6459_v39 = vadd.f32 %v6458_v56, %v6457_v43  ;;  %v6651_v20 = vmul.f32 %v15177_v6, %v15177_v6  ;;  %v6861_v56 = vsel %vm5785_vm3, %v6649_v25, 0.0  ;;  %v6474_v9 = vsel %vm5785_vm3, %v15177_v6, 0.0 }
 0x361   : > { %v5858_v33 = vpop.permute.xlu1 %5857  ;;  %v6850_v13 = vadd.f32 %v6849_v19, %v6848_v27  ;;  %v15178_v27 = vld [vmem:[#allocation70_spill] sm:$0xff]  ;;  %v6863_v58 = vsel %vm5785_vm3, %v6650_v16, 0.0  ;;  %v6656_v25 = vmul.f32 %v15182_v0, %v15182_v0 }
 0x362   : > { %v6461_v44 = vadd.f32 %v6460_v59, %v6459_v39  ;;  %5875 = vst.msk [vmem:[%s10174_s7 + $0xe0] sm:$0xff] %vm5867_vm5, %v5858_v33  ;;  %v6652_v59 = vmul.f32 %v15178_v27, %v15178_v27 }
 0x363   : > { %5916 = vst.msk [vmem:[%s10174_s7 + $0xe0] sm:$0xff] %vm5908_vm6, %v5899_v17  ;;  %v6852_v10 = vadd.f32 %v6851_v45, %v6850_v13  ;;  %v6855_v17 = vsel %vm5785_vm3, %v6646_v32, 0.0  ;;  %v15179_v13 = vld [vmem:[#allocation35_spill] sm:$0xff] }
 0x364   : > { %v6463_v60 = vadd.f32 %v6462_v21, %v6461_v44  ;;  %v5938_v14 = vpop.permute.xlu0 %5937  ;;  %v6476_v44 = vsel %vm5785_vm3, %v15178_v27, 0.0  ;;  %v6653_v45 = vmul.f32 %v15179_v13, %v15179_v13  ;;  %v6865_v21 = vsel %vm5785_vm3, %v6651_v20, 0.0 }
 0x365   : > { %5959 = vst.msk [vmem:[%s10174_s7 + $0x48] sm:$0xff] %vm5826_vm4, %v5938_v14  ;;  %v6854_v24 = vadd.f32 %v6853_v5, %v6852_v10  ;;  %v6867_v14 = vsel %vm5785_vm3, %v6652_v59, 0.0  ;;  %v6478_v5 = vsel %vm5785_vm3, %v15179_v13, 0.0 }
 0x366   : > { %v6465_v41 = vadd.f32 %v6464_v15, %v6463_v60 }
 0x367   : > { %v6856_v63 = vadd.f32 %v6855_v17, %v6854_v24  ;;  %v6869_v24 = vsel %vm5785_vm3, %v6653_v45, 0.0 }
 0x368   : > { %v6467_v12 = vadd.f32 %v6466_v48, %v6465_v41  ;;  %v15181_v48 = vld [vmem:[#allocation32_spill] sm:$0xff] }
 0x369   : > { %v6858_v3 = vadd.f32 %v6857_v36, %v6856_v63  ;;  %v6655_v17 = vmul.f32 %v15181_v48, %v15181_v48  ;;  %v6482_v63 = vsel %vm5785_vm3, %v15181_v48, 0.0  ;;  %v6871_v36 = vsel %vm5785_vm3, %v6654_v50, 0.0  ;;  %v15188_v48 = vld [vmem:[#allocation26_spill] sm:$0xff] }
 0x36a   : > { %v6469_v18 = vadd.f32 %v6468_v23, %v6467_v12  ;;  %v6661_v50 = vmul.f32 %v15187_v47, %v15187_v47 }
 0x36b   : > { %v6860_v34 = vadd.f32 %v6859_v28, %v6858_v3  ;;  %v6873_v16 = vsel %vm5785_vm3, %v6655_v17, 0.0  ;;  %v6662_v17 = vmul.f32 %v15188_v48, %v15188_v48 }
 0x36c   : > { %v5940_v1 = vpop.permute.xlu1 %5939  ;;  %v6471_v38 = vadd.f32 %v6470_v42, %v6469_v18  ;;  %v15183_v42 = vld [vmem:[#allocation73_spill] sm:$0xff] }
 0x36d   : > { %5960 = vst.msk [vmem:[%s10174_s7 + $0x68] sm:$0xff] %vm5826_vm4, %v5940_v1  ;;  %v5946_v43 = vpop.permute.xlu0 %5945  ;;  %v6862_v39 = vadd.f32 %v6861_v56, %v6860_v34  ;;  %v6657_v28 = vmul.f32 %v15183_v42, %v15183_v42  ;;  %v6484_v1 = vsel %vm5785_vm3, %v15182_v0, 0.0  ;;  %v6486_v20 = vsel %vm5785_vm3, %v15183_v42, 0.0 }
 0x36e   : > { %5963 = vst.msk [vmem:[%s10174_s7 + $0xc8] sm:$0xff] %vm5826_vm4, %v5946_v43  ;;  %v6473_v54 = vadd.f32 %v6472_v51, %v6471_v38  ;;  %v15184_v43 = vld [vmem:[#allocation47_spill] sm:$0xff]  ;;  %v6875_v51 = vsel %vm5785_vm3, %v6656_v25, 0.0  ;;  %v6496_v0 = vsel %vm5785_vm3, %v15188_v48, 0.0  ;;  %v15189_v25 = vld [vmem:[#allocation54_spill] sm:$0xff]  ;;  %v6887_v42 = vsel %vm5785_vm3, %v6662_v17, 0.0 }
 0x36f   : > { %v6864_v33 = vadd.f32 %v6863_v58, %v6862_v39  ;;  %v6658_v6 = vmul.f32 %v15184_v43, %v15184_v43  ;;  %v15185_v39 = vld [vmem:[#allocation34_spill] sm:$0xff]  ;;  %v6488_v59 = vsel %vm5785_vm3, %v15184_v43, 0.0 }
 0x370   : > { %v6475_v19 = vadd.f32 %v6474_v9, %v6473_v54  ;;  %v6659_v27 = vmul.f32 %v15185_v39, %v15185_v39  ;;  %v6877_v9 = vsel %vm5785_vm3, %v6657_v28, 0.0  ;;  %v6490_v13 = vsel %vm5785_vm3, %v15185_v39, 0.0 }
 0x371   : > { %v6866_v32 = vadd.f32 %v6865_v21, %v6864_v33  ;;  %v6879_v45 = vsel %vm5785_vm3, %v6658_v6, 0.0  ;;  %v15186_v21 = vld [vmem:[#allocation17_spill] sm:$0xff]  ;;  %v6498_v28 = vsel %vm5785_vm3, %v15189_v25, 0.0  ;;  %v6500_v6 = vsel %vm5785_vm3, %v13023_v61, 0.0 }
 0x372   : > { %v6477_v62 = vadd.f32 %v6476_v44, %v6475_v19  ;;  %v5948_v60 = vpop.permute.xlu1 %5947 }
 0x373   : > { %5964 = vst.msk [vmem:[%s10174_s7 + $0xe8] sm:$0xff] %vm5826_vm4, %v5948_v60  ;;  %v6868_v41 = vadd.f32 %v6867_v14, %v6866_v32  ;;  %v6881_v14 = vsel %vm5785_vm3, %v6659_v27, 0.0 }
 0x374   : > { %v6018_v10 = vpop.permute.xlu0 %6017  ;;  %v6479_v15 = vadd.f32 %v6478_v5, %v6477_v62  ;;  %v6660_v62 = vmul.f32 %v15186_v21, %v15186_v21  ;;  %v6492_v5 = vsel %vm5785_vm3, %v15186_v21, 0.0 }
 0x375   : > { %v6870_v12 = vadd.f32 %v6869_v24, %v6868_v41 }
 0x376   : > { %v6481_v40 = vadd.f32 %v6480_v8, %v6479_v15  ;;  %v6883_v24 = vsel %vm5785_vm3, %v6660_v62, 0.0 }
 0x377   : > { %v6872_v3 = vadd.f32 %v6871_v36, %v6870_v12  ;;  %v6885_v36 = vsel %vm5785_vm3, %v6661_v50, 0.0 }
 0x378   : > { %v6020_v23 = vpop.permute.xlu1 %6019  ;;  %v6483_v18 = vadd.f32 %v6482_v63, %v6481_v40 }
 0x379   : > { %v6026_v53 = vpop.permute.xlu0 %6025  ;;  %v6874_v34 = vadd.f32 %v6873_v16, %v6872_v3 }
 0x37a   : > { %v6485_v38 = vadd.f32 %v6484_v1, %v6483_v18  ;;  %v6663_v18 = vmul.f32 %v15189_v25, %v15189_v25  ;;  %v6664_v1 = vmul.f32 %v13023_v61, %v13023_v61 }
 0x37b   : > { %v6876_v56 = vadd.f32 %v6875_v51, %v6874_v34 }
 0x37c   : > { %v6487_v54 = vadd.f32 %v6486_v20, %v6485_v38  ;;  %v6889_v43 = vsel %vm5785_vm3, %v6663_v18, 0.0  ;;  %v6891_v39 = vsel %vm5785_vm3, %v6664_v1, 0.0 }
 0x37d   : > { %v6028_v58 = vpop.permute.xlu1 %6027  ;;  %v6878_v44 = vadd.f32 %v6877_v9, %v6876_v56  ;;  %v15191_v56 = vld [vmem:[#allocation75_spill] sm:$0xff] }
 0x37e   : > { %v5978_v19 = vpop.permute.xlu0 %5977  ;;  %v6489_v33 = vadd.f32 %v6488_v59, %v6487_v54  ;;  %v6666_v54 = vmul.f32 %v15191_v56, %v15191_v56  ;;  %v6504_v61 = vsel %vm5785_vm3, %v15191_v56, 0.0  ;;  %v6516_v56 = vsel %vm5785_vm3, %v13365_v22, 0.0 }
 0x37f   : > { %5999 = vst.msk [vmem:[%s10174_s7 + $0x48] sm:$0xff] %vm5867_vm5, %v5978_v19  ;;  %v6880_v60 = vadd.f32 %v6879_v45, %v6878_v44  ;;  %v15192_v19 = vld [vmem:[#allocation110_spill] sm:$0xff] }
 0x380   : > { %6039 = vst.msk [vmem:[%s10174_s7 + $0x48] sm:$0xff] %vm5908_vm6, %v6018_v10  ;;  %v6491_v32 = vadd.f32 %v6490_v13, %v6489_v33  ;;  %v6494_v10 = vsel %vm5785_vm3, %v15187_v47, 0.0  ;;  %v6667_v33 = vmul.f32 %v15192_v19, %v15192_v19 }
 0x381   : > { %v6882_v41 = vadd.f32 %v6881_v14, %v6880_v60  ;;  %v6895_v14 = vsel %vm5785_vm3, %v6666_v54, 0.0  ;;  %v6673_v54 = vmul.f32 %v13439_v46, %v13439_v46 }
 0x382   : > { %v6493_v15 = vadd.f32 %v6492_v5, %v6491_v32  ;;  %v15193_v32 = vld [vmem:[#allocation55_spill] sm:$0xff]  ;;  %v6506_v5 = vsel %vm5785_vm3, %v15192_v19, 0.0 }
 0x383   : > { %v6884_v63 = vadd.f32 %v6883_v24, %v6882_v41  ;;  %v6668_v60 = vmul.f32 %v15193_v32, %v15193_v32  ;;  %v15194_v41 = vld [vmem:[#allocation82_spill] sm:$0xff] }
 0x384   : > { %v5980_v8 = vpop.permute.xlu1 %5979  ;;  %v5986_v40 = vpop.permute.xlu0 %5985  ;;  %v6495_v12 = vadd.f32 %v6494_v10, %v6493_v15  ;;  %v6508_v15 = vsel %vm5785_vm3, %v15193_v32, 0.0  ;;  %v6669_v24 = vmul.f32 %v15194_v41, %v15194_v41  ;;  %v6897_v10 = vsel %vm5785_vm3, %v6667_v33, 0.0 }
 0x385   : > { %6000 = vst.msk [vmem:[%s10174_s7 + $0x68] sm:$0xff] %vm5867_vm5, %v5980_v8  ;;  %6003 = vst.msk [vmem:[%s10174_s7 + $0xc8] sm:$0xff] %vm5867_vm5, %v5986_v40  ;;  %v6886_v16 = vadd.f32 %v6885_v36, %v6884_v63  ;;  %v6899_v40 = vsel %vm5785_vm3, %v6668_v60, 0.0  ;;  %v6518_v33 = vsel %vm5785_vm3, %v13439_v46, 0.0  ;;  %v6909_v32 = vsel %vm5785_vm3, %v6673_v54, 0.0 }
 0x386   : > { %6040 = vst.msk [vmem:[%s10174_s7 + $0x68] sm:$0xff] %vm5908_vm6, %v6020_v23  ;;  %6043 = vst.msk [vmem:[%s10174_s7 + $0xc8] sm:$0xff] %vm5908_vm6, %v6026_v53  ;;  %v6497_v3 = vadd.f32 %v6496_v0, %v6495_v12  ;;  %v15190_v23 = vld [vmem:[#allocation98_spill] sm:$0xff]  ;;  %v6510_v12 = vsel %vm5785_vm3, %v15194_v41, 0.0  ;;  %v6901_v18 = vsel %vm5785_vm3, %v6669_v24, 0.0  ;;  %v6532_v54 = vsel %vm5785_vm3, %v13513_v4, 0.0 }
 0x387   : > { %v6888_v34 = vadd.f32 %v6887_v42, %v6886_v16  ;;  %v6665_v53 = vmul.f32 %v15190_v23, %v15190_v23  ;;  %v6502_v27 = vsel %vm5785_vm3, %v15190_v23, 0.0  ;;  %v15196_v16 = vld [vmem:[#allocation121_spill] sm:$0xff] }
 0x388   : > { %v6499_v38 = vadd.f32 %v6498_v28, %v6497_v3  ;;  %v6671_v42 = vmul.f32 %v15196_v16, %v15196_v16 }
 0x389   : > { %v6890_v51 = vadd.f32 %v6889_v43, %v6888_v34  ;;  %v6893_v44 = vsel %vm5785_vm3, %v6665_v53, 0.0  ;;  %v6514_v43 = vsel %vm5785_vm3, %v15196_v16, 0.0 }
 0x38a   : > { %v6501_v20 = vadd.f32 %v6500_v6, %v6499_v38  ;;  %v6672_v6 = vmul.f32 %v13365_v22, %v13365_v22 }
 0x38b   : > { %v6892_v9 = vadd.f32 %v6891_v39, %v6890_v51  ;;  %v6905_v51 = vsel %vm5785_vm3, %v6671_v42, 0.0 }
 0x38c   : > { %v6503_v59 = vadd.f32 %v6502_v27, %v6501_v20  ;;  %v6907_v19 = vsel %vm5785_vm3, %v6672_v6, 0.0 }
 0x38d   : > { %v6894_v62 = vadd.f32 %v6893_v44, %v6892_v9  ;;  %v15197_v9 = vld [vmem:[#allocation116_spill] sm:$0xff] }
 0x38e   : > { %v6505_v21 = vadd.f32 %v6504_v61, %v6503_v59  ;;  %v6674_v61 = vmul.f32 %v15197_v9, %v15197_v9  ;;  %v6520_v22 = vsel %vm5785_vm3, %v15197_v9, 0.0  ;;  %v6682_v9 = vmul.f32 %v13496_v26, %v13496_v26 }
 0x38f   : > { %v5988_v13 = vpop.permute.xlu1 %5987  ;;  %v6066_v45 = vpop.permute.xlu0 %6065  ;;  %v6896_v50 = vadd.f32 %v6895_v14, %v6894_v62 }
 0x390   : > { %6004 = vst.msk [vmem:[%s10174_s7 + $0xe8] sm:$0xff] %vm5867_vm5, %v5988_v13  ;;  %v6507_v47 = vadd.f32 %v6506_v5, %v6505_v21  ;;  %v15198_v21 = vld [vmem:[#allocation122_spill] sm:$0xff]  ;;  %v6911_v46 = vsel %vm5785_vm3, %v6674_v61, 0.0 }
 0x391   : > { %6087 = vst.msk [vmem:[%s10174_s7 + $0x50] sm:$0xff] %vm5826_vm4, %v6066_v45  ;;  %v6898_v17 = vadd.f32 %v6897_v10, %v6896_v50  ;;  %v6675_v62 = vmul.f32 %v15198_v21, %v15198_v21 }
 0x392   : > { %6044 = vst.msk [vmem:[%s10174_s7 + $0xe8] sm:$0xff] %vm5908_vm6, %v6028_v58  ;;  %v6509_v48 = vadd.f32 %v6508_v15, %v6507_v47  ;;  %v15195_v58 = vld [vmem:[#allocation44_spill] sm:$0xff]  ;;  %v15199_v47 = vld [vmem:[#allocation115_spill] sm:$0xff]  ;;  %v6522_v15 = vsel %vm5785_vm3, %v15198_v21, 0.0 }
 0x393   : > { %v6670_v63 = vmul.f32 %v15195_v58, %v15195_v58  ;;  %v6900_v0 = vadd.f32 %v6899_v40, %v6898_v17  ;;  %v6512_v3 = vsel %vm5785_vm3, %v15195_v58, 0.0  ;;  %v6676_v50 = vmul.f32 %v15199_v47, %v15199_v47  ;;  %v15200_v17 = vld [vmem:[#allocation21_spill] sm:$0xff] }
 0x394   : > { %v6511_v36 = vadd.f32 %v6510_v12, %v6509_v48  ;;  %v6524_v48 = vsel %vm5785_vm3, %v15199_v47, 0.0  ;;  %v6913_v40 = vsel %vm5785_vm3, %v6675_v62, 0.0 }
 0x395   : > { %v6068_v8 = vpop.permute.xlu1 %6067  ;;  %v6902_v1 = vadd.f32 %v6901_v18, %v6900_v0  ;;  %v6903_v34 = vsel %vm5785_vm3, %v6670_v63, 0.0  ;;  %v6526_v0 = vsel %vm5785_vm3, %v15200_v17, 0.0 }
 0x396   : > { %6088 = vst.msk [vmem:[%s10174_s7 + $0x70] sm:$0xff] %vm5826_vm4, %v6068_v8  ;;  %v6074_v25 = vpop.permute.xlu0 %6073  ;;  %v6513_v28 = vadd.f32 %v6512_v3, %v6511_v36  ;;  %v6677_v8 = vmul.f32 %v15200_v17, %v15200_v17  ;;  %v6915_v36 = vsel %vm5785_vm3, %v6676_v50, 0.0  ;;  %v6540_v50 = vsel %vm5785_vm3, %v13354_v57, 0.0 }
 0x397   : > { %6091 = vst.msk [vmem:[%s10174_s7 + $0xd0] sm:$0xff] %vm5826_vm4, %v6074_v25  ;;  %v6904_v53 = vadd.f32 %v6903_v34, %v6902_v1  ;;  %v6678_v25 = vmul.f32 %v13473_v11, %v13473_v11  ;;  %v6679_v1 = vmul.f32 %v13481_v29, %v13481_v29  ;;  %v6686_v17 = vmul.f32 %v13528_v35, %v13528_v35 }
 0x398   : > { %v6515_v23 = vadd.f32 %v6514_v43, %v6513_v28  ;;  %v6917_v42 = vsel %vm5785_vm3, %v6677_v8, 0.0  ;;  %v6528_v28 = vsel %vm5785_vm3, %v13473_v11, 0.0 }
 0x399   : > { %v6076_v38 = vpop.permute.xlu1 %6075  ;;  %v6906_v27 = vadd.f32 %v6905_v51, %v6904_v53  ;;  %v6919_v6 = vsel %vm5785_vm3, %v6678_v25, 0.0  ;;  %v6680_v53 = vmul.f32 %v13513_v4, %v13513_v4  ;;  %v6935_v25 = vsel %vm5785_vm3, %v6686_v17, 0.0 }
 0x39a   : > { %6092 = vst.msk [vmem:[%s10174_s7 + $0xf0] sm:$0xff] %vm5826_vm4, %v6076_v38  ;;  %v6146_v20 = vpop.permute.xlu0 %6145  ;;  %v6517_v39 = vadd.f32 %v6516_v56, %v6515_v23  ;;  %v6530_v23 = vsel %vm5785_vm3, %v13481_v29, 0.0  ;;  %v6921_v56 = vsel %vm5785_vm3, %v6679_v1, 0.0  ;;  %v6681_v29 = vmul.f32 %v13517_v31, %v13517_v31 }
 0x39b   : > { %v6908_v13 = vadd.f32 %v6907_v19, %v6906_v27  ;;  %v6923_v61 = vsel %vm5785_vm3, %v6680_v53, 0.0  ;;  %v6534_v19 = vsel %vm5785_vm3, %v13517_v31, 0.0  ;;  %v6684_v31 = vmul.f32 %v13354_v57, %v13354_v57 }
 0x39c   : > { %v6519_v44 = vadd.f32 %v6518_v33, %v6517_v39  ;;  %v6548_v1 = vsel %vm5785_vm3, %v13568_v37, 0.0  ;;  %v6690_v53 = vmul.f32 %v13578_v2, %v13578_v2 }
 0x39d   : > { %v6148_v59 = vpop.permute.xlu1 %6147  ;;  %v6910_v14 = vadd.f32 %v6909_v32, %v6908_v13  ;;  %v6536_v13 = vsel %vm5785_vm3, %v13496_v26, 0.0 }
 0x39e   : > { %v6154_v45 = vpop.permute.xlu0 %6153  ;;  %v6521_v60 = vadd.f32 %v6520_v22, %v6519_v44  ;;  %v6925_v22 = vsel %vm5785_vm3, %v6681_v29, 0.0 }
 0x39f   : > { %v6912_v24 = vadd.f32 %v6911_v46, %v6910_v14  ;;  %v6538_v14 = vsel %vm5785_vm3, %v13500_v55, 0.0  ;;  %v6685_v46 = vmul.f32 %v13417_v30, %v13417_v30 }
 0x3a0   : > { %v6523_v41 = vadd.f32 %v6522_v15, %v6521_v60  ;;  %v6927_v60 = vsel %vm5785_vm3, %v6682_v9, 0.0 }
 0x3a1   : > { %v6156_v5 = vpop.permute.xlu1 %6155  ;;  %v6914_v58 = vadd.f32 %v6913_v40, %v6912_v24 }
 0x3a2   : > { %v6106_v10 = vpop.permute.xlu0 %6105  ;;  %v6525_v12 = vadd.f32 %v6524_v48, %v6523_v41  ;;  %v6542_v48 = vsel %vm5785_vm3, %v13417_v30, 0.0 }
 0x3a3   : > { %6127 = vst.msk [vmem:[%s10174_s7 + $0x50] sm:$0xff] %vm5867_vm5, %v6106_v10  ;;  %v6916_v3 = vadd.f32 %v6915_v36, %v6914_v58  ;;  %v6544_v58 = vsel %vm5785_vm3, %v13528_v35, 0.0 }
 0x3a4   : > { %6167 = vst.msk [vmem:[%s10174_s7 + $0x50] sm:$0xff] %vm5908_vm6, %v6146_v20  ;;  %v6527_v18 = vadd.f32 %v6526_v0, %v6525_v12  ;;  %v6933_v12 = vsel %vm5785_vm3, %v6685_v46, 0.0 }
 0x3a5   : > { %v6108_v63 = vpop.permute.xlu1 %6107  ;;  %v6918_v34 = vadd.f32 %v6917_v42, %v6916_v3  ;;  %v6688_v3 = vmul.f32 %v13568_v37, %v13568_v37 }
 0x3a6   : > { %6128 = vst.msk [vmem:[%s10174_s7 + $0x70] sm:$0xff] %vm5867_vm5, %v6108_v63  ;;  %v6114_v16 = vpop.permute.xlu0 %6113  ;;  %v6529_v38 = vadd.f32 %v6528_v28, %v6527_v18  ;;  %v6687_v63 = vmul.f32 %v13546_v49, %v13546_v49  ;;  %v6546_v18 = vsel %vm5785_vm3, %v13546_v49, 0.0  ;;  %v6689_v49 = vmul.f32 %v13572_v52, %v13572_v52 }
 0x3a7   : > { %6168 = vst.msk [vmem:[%s10174_s7 + $0x70] sm:$0xff] %vm5908_vm6, %v6148_v59  ;;  %v6920_v20 = vadd.f32 %v6919_v6, %v6918_v34  ;;  %v6939_v6 = vsel %vm5785_vm3, %v6688_v3, 0.0 }
 0x3a8   : > { %6131 = vst.msk [vmem:[%s10174_s7 + $0xd0] sm:$0xff] %vm5867_vm5, %v6114_v16  ;;  %v6531_v11 = vadd.f32 %v6530_v23, %v6529_v38  ;;  %v6937_v28 = vsel %vm5785_vm3, %v6687_v63, 0.0  ;;  %v6550_v23 = vsel %vm5785_vm3, %v13572_v52, 0.0 }
 0x3a9   : > { %6171 = vst.msk [vmem:[%s10174_s7 + $0xd0] sm:$0xff] %vm5908_vm6, %v6154_v45  ;;  %v6116_v43 = vpop.permute.xlu1 %6115  ;;  %v6922_v27 = vadd.f32 %v6921_v56, %v6920_v20  ;;  %v6683_v45 = vmul.f32 %v13500_v55, %v13500_v55  ;;  %v6931_v55 = vsel %vm5785_vm3, %v6684_v31, 0.0  ;;  %v6552_v56 = vsel %vm5785_vm3, %v13578_v2, 0.0 }
 0x3aa   : > { %6132 = vst.msk [vmem:[%s10174_s7 + $0xf0] sm:$0xff] %vm5867_vm5, %v6116_v43  ;;  %v6194_v51 = vpop.permute.xlu0 %6193  ;;  %v6533_v39 = vadd.f32 %v6532_v54, %v6531_v11  ;;  %v6691_v54 = vmul.f32 %v13593_v7, %v13593_v7 }
 0x3ab   : > { %6172 = vst.msk [vmem:[%s10174_s7 + $0xf0] sm:$0xff] %vm5908_vm6, %v6156_v5  ;;  %v6924_v33 = vadd.f32 %v6923_v61, %v6922_v27  ;;  %v6929_v15 = vsel %vm5785_vm3, %v6683_v45, 0.0  ;;  %v6943_v27 = vsel %vm5785_vm3, %v6690_v53, 0.0 }
 0x3ac   : > { %6215 = vst.msk [vmem:[%s10174_s7 + $0x58] sm:$0xff] %vm5826_vm4, %v6194_v51  ;;  %v6535_v4 = vadd.f32 %v6534_v19, %v6533_v39  ;;  %v6941_v51 = vsel %vm5785_vm3, %v6689_v49, 0.0  ;;  %v6945_v2 = vsel %vm5785_vm3, %v6691_v54, 0.0 }
 0x3ad   : > { %v6196_v59 = vpop.permute.xlu1 %6195  ;;  %v6926_v62 = vadd.f32 %v6925_v22, %v6924_v33 }
 0x3ae   : > { %6216 = vst.msk [vmem:[%s10174_s7 + $0x78] sm:$0xff] %vm5826_vm4, %v6196_v59  ;;  %v6202_v44 = vpop.permute.xlu0 %6201  ;;  %v6537_v21 = vadd.f32 %v6536_v13, %v6535_v4  ;;  %v6554_v59 = vsel %vm5785_vm3, %v13593_v7, 0.0 }
 0x3af   : > { %6219 = vst.msk [vmem:[%s10174_s7 + $0xd8] sm:$0xff] %vm5826_vm4, %v6202_v44  ;;  %v6928_v5 = vadd.f32 %v6927_v60, %v6926_v62 }
 0x3b0   : > { %v6539_v26 = vadd.f32 %v6538_v14, %v6537_v21 }
 0x3b1   : > { %v6204_v32 = vpop.permute.xlu1 %6203  ;;  %v6930_v24 = vadd.f32 %v6929_v15, %v6928_v5 }
 0x3b2   : > { %6220 = vst.msk [vmem:[%s10174_s7 + $0xf8] sm:$0xff] %vm5826_vm4, %v6204_v32  ;;  %v6274_v47 = vpop.permute.xlu0 %6273  ;;  %v6541_v41 = vadd.f32 %v6540_v50, %v6539_v26 }
 0x3b3   : > { %v6932_v57 = vadd.f32 %v6931_v55, %v6930_v24 }
 0x3b4   : > { %v6543_v8 = vadd.f32 %v6542_v48, %v6541_v41 }
 0x3b5   : > { %v6276_v10 = vpop.permute.xlu1 %6275  ;;  %v6934_v36 = vadd.f32 %v6933_v12, %v6932_v57 }
 0x3b6   : > { %v6234_v40 = vpop.permute.xlu0 %6233  ;;  %v6545_v30 = vadd.f32 %v6544_v58, %v6543_v8 }
 0x3b7   : > { %6255 = vst.msk [vmem:[%s10174_s7 + $0x58] sm:$0xff] %vm5867_vm5, %v6234_v40  ;;  %v6936_v16 = vadd.f32 %v6935_v25, %v6934_v36 }
 0x3b8   : > { %6295 = vst.msk [vmem:[%s10174_s7 + $0x58] sm:$0xff] %vm5908_vm6, %v6274_v47  ;;  %v6547_v35 = vadd.f32 %v6546_v18, %v6545_v30 }
 0x3b9   : > { %v6236_v0 = vpop.permute.xlu1 %6235  ;;  %v6938_v34 = vadd.f32 %v6937_v28, %v6936_v16 }
 0x3ba   : > { %6256 = vst.msk [vmem:[%s10174_s7 + $0x78] sm:$0xff] %vm5867_vm5, %v6236_v0  ;;  %v6242_v42 = vpop.permute.xlu0 %6241  ;;  %v6549_v38 = vadd.f32 %v6548_v1, %v6547_v35 }
 0x3bb   : > { %6296 = vst.msk [vmem:[%s10174_s7 + $0x78] sm:$0xff] %vm5908_vm6, %v6276_v10  ;;  %v6940_v37 = vadd.f32 %v6939_v6, %v6938_v34 }
 0x3bc   : > { %6259 = vst.msk [vmem:[%s10174_s7 + $0xd8] sm:$0xff] %vm5867_vm5, %v6242_v42  ;;  %v6551_v11 = vadd.f32 %v6550_v23, %v6549_v38 }
 0x3bd   : > { %v6244_v43 = vpop.permute.xlu1 %6243  ;;  %v6942_v52 = vadd.f32 %v6941_v51, %v6940_v37 }
 0x3be   : > { %6260 = vst.msk [vmem:[%s10174_s7 + $0xf8] sm:$0xff] %vm5867_vm5, %v6244_v43  ;;  %v6282_v20 = vpop.permute.xlu0 %6281  ;;  %v6553_v29 = vadd.f32 %v6552_v56, %v6551_v11 }
 0x3bf   : > { %6299 = vst.msk [vmem:[%s10174_s7 + $0xd8] sm:$0xff] %vm5908_vm6, %v6282_v20  ;;  %v6944_v9 = vadd.f32 %v6943_v27, %v6942_v52 }
 0x3c0   : > { %v6555_v61 = vadd.f32 %v6554_v59, %v6553_v29 }
 0x3c1   : > { %v6284_v39 = vpop.permute.xlu1 %6283  ;;  %v6946_v4 = vadd.f32 %v6945_v2, %v6944_v9 }
 0x3c2   : > { %6300 = vst.msk [vmem:[%s10174_s7 + $0xf8] sm:$0xff] %vm5908_vm6, %v6284_v39  ;;  %v6556_v19 = vrot.slane %v6555_v61, 4 }
 0x3c3   : > { %v6947_v44 = vrot.slane %v6946_v4, 4 }
 0x3c4   : > { %v6557_v33 = vadd.f32 %v6556_v19, %v6555_v61 }
 0x3c5   : > { %v6948_v45 = vadd.f32 %v6947_v44, %v6946_v4 }
 0x3c6   : > { %v6558_v13 = vrot.slane %v6557_v33, 2 }
 0x3c7   : > { %v6949_v21 = vrot.slane %v6948_v45, 2 }
 0x3c8   : > { %v6559_v22 = vadd.f32 %v6558_v13, %v6557_v33 }
 0x3c9   : > { %v6950_v32 = vadd.f32 %v6949_v21, %v6948_v45 }
 0x3ca   : > { %v6560_v62 = vrot.slane %v6559_v22, 1 }
 0x3cb   : > { %v6951_v31 = vrot.slane %v6950_v32, 1 }
 0x3cc   : > { %v6561_v7 = vadd.f32 %v6560_v62, %v6559_v22 }
 0x3cd   : > { %v6952_v60 = vadd.f32 %v6951_v31, %v6950_v32 }
 0x3ce   : > { %6563 = vst.msk [vmem:[%s216_s22] sm:$0x1] %vm6562_vm7, %v6561_v7 }
 0x3cf   : > { %6953 = vst.msk [vmem:[%s216_s22 + $0x1] sm:$0x1] %vm6562_vm7, %v6952_v60 }
 0x3d0 PF: > { %s15_s15 = sadd.s32 1, %s8632_s15  }
 0x3d1   : > { %p12_p5 = scmp.ge.s32.totalorder %s15_s15, 5  }
 0x3d3   :  { %14 = sbr.rel (!%p12_p5) target bundleno = 1 (0x1), region = 74 }

// kernel: primary_conv3d.3
= control target key start
LH: loop header
LB: loop body
LE: loop exit
PB: predicated region body
PF: predicated region fallthrough
CT: control target
= control target key end

     0   :  { %s4292_s15 = smov 0   ;;  %s5566_s0 = inlined_call_operand.vmem [shape: bf16[16,4,64,288], index: 0, kind: input, shape index: {}]   ;;  %s5567_s1 = inlined_call_operand.vmem [shape: bf16[288,64], index: 1, kind: input, shape index: {}]   ;;  %s5568_s2 = inlined_call_operand.vmem [shape: f32[1,64], index: 2, kind: input, shape index: {}]   ;;  %s5569_s3 = inlined_call_operand.vmem [shape: f32[16,8,512], index: 3, kind: output, shape index: {0}]   ;;  %s5570_s4 = inlined_call_operand.vmem [shape: f32[4,2,64], index: 4, kind: output, shape index: {1}]  }
   0x1 LB: > { %s4298_s16 = sadd.s32 4294967295, %s4263_s15   ;;  %p3456_p0 = scmp.ge.s32.totalorder %s4263_s15, 1  ;;  %s4263_s15 = sphi %s4292_s15, %s15_s15  }
   0x2   : > { %p167_p1 = scmp.lt.s32.totalorder %s4263_s15, 5 }
   0x4   : > { %p168_p2 = pnand %p3456_p0, %p167_p1 }
   0x6   : > { %171 = sbr.rel (%p168_p2) target bundleno = 803 (0x323), region = 32 }
   0xd   : > { %v3982_v0 = vld [vmem:[%s5567_s1] sm:$0xff]   ;;  %v4265_v1 = vmov 0   ;;  %s3457_s19 = sshll.u32 %s4298_s16, 2  ;;  %v3983_v2 = vld [vmem:[%s5567_s1 + $0x8] sm:$0xff]   ;;  %v3984_v3 = vld [vmem:[%s5567_s1 + $0x10] sm:$0xff]   ;;  %vm1585_vm0 = vcmask 261120  }
   0xe   : > { %1778 = vmatprep.subr.bf16.mxu0 %v4265_v1  ;;  %3939 = vmatprep.subr.bf16.mxu1 %v4265_v1  ;;  %p200_p3 = scmp.lt.s32.totalorder %s3457_s19, 15  ;;  %v3985_v4 = vld [vmem:[%s5567_s1 + $0x18] sm:$0xff]   ;;  %v3986_v5 = vld [vmem:[%s5567_s1 + $0x20] sm:$0xff]   ;;  %v3987_v7 = vld [vmem:[%s5567_s1 + $0x28] sm:$0xff]   ;;  %vm3092_vm1 = vcmask 523264   ;;  %vm3113_vm2 = vcmask 1048064  }
   0xf   : > { %1779 = vmatpush1.bf16.msra.mxu0 %v3982_v0  ;;  %3955 = vmatpush1.bf16.msra.mxu1 %v3982_v0  ;;  %v3988_v9 = vld [vmem:[%s5567_s1 + $0x30] sm:$0xff]   ;;  %v3989_v10 = vld [vmem:[%s5567_s1 + $0x38] sm:$0xff]   ;;  %v3990_v11 = vld [vmem:[%s5567_s1 + $0x40] sm:$0xff]   ;;  %p213_p4 = scmp.lt.s32.totalorder %s4298_s16, 3  ;;  %vm3259_vm3 = vcmask 516096  }
  0x10   : > { %1780 = vmatprep.subr.bf16.mxu0 %v4265_v1  ;;  %3940 = vmatprep.subr.bf16.mxu1 %v4265_v1  ;;  %s5622_s19 = smov (!%p200_p3, %s3457_s19), 15  ;;  %v3991_v12 = vld [vmem:[%s5567_s1 + $0x48] sm:$0xff]   ;;  %v3992_v13 = vld [vmem:[%s5567_s1 + $0x50] sm:$0xff]   ;;  %v3993_v14 = vld [vmem:[%s5567_s1 + $0x58] sm:$0xff]  }
  0x11   : > { %s3971_s26 = smul.u32 384, %s5622_s19  ;;  %v3994_v15 = vld [vmem:[%s5567_s1 + $0x60] sm:$0xff]   ;;  %v3995_v16 = vld [vmem:[%s5567_s1 + $0x68] sm:$0xff]   ;;  %v3996_v17 = vld [vmem:[%s5567_s1 + $0x70] sm:$0xff]   ;;  %s5624_s16 = smov (!%p213_p4, %s4298_s16), 3 }
  0x12   : > { %v3997_v18 = vld [vmem:[%s5567_s1 + $0x78] sm:$0xff]   ;;  %v4004_v19 = vld [vmem:[%s5567_s1 + $0x80] sm:$0xff]   ;;  %v4053_v24 = vld [vmem:[%s5567_s1 + $0x88] sm:$0xff]   ;;  %s3462_s20 = sshll.u32 %s5624_s16, 1 }
  0x13   : > { %1781 = vmatpush1.bf16.msra.mxu0 %v3983_v2  ;;  %3956 = vmatpush1.bf16.msra.mxu1 %v3983_v2  ;;  %s4332_s5 = scalar_lea.vmem %s5566_s0, %s3971_s26  ;;  %s216_s23 = scalar_lea.vmem %s5570_s4, %s3462_s20 }
  0x14   : > { %1782 = vmatprep.subr.bf16.mxu0 %v4265_v1  ;;  %3941 = vmatprep.subr.bf16.mxu1 %v4265_v1  ;;  %v4000_v6 = vld [vmem:[%s4332_s5 + $0x4] ss:$12 sps:$4 sm:$0xff]   ;;  %v3998_v20 = vld [vmem:[%s4332_s5] ss:$12 sps:$4 sm:$0xff]   ;;  %v4005_v22 = vld [vmem:[%s4332_s5 + $0x1c] ss:$12 sps:$4 sm:$0xff]  }
  0x15   : > { %v4003_v8 = vld [vmem:[%s4332_s5 + $0x484] ss:$12 sps:$4 sm:$0xff]   ;;  %1810 = vmatprep.mubr.bf16.mxu0 %v4000_v6  ;;  %v4001_v21 = vld [vmem:[%s4332_s5 + $0x480] ss:$12 sps:$4 sm:$0xff]   ;;  %v4007_v23 = vld [vmem:[%s4332_s5 + $0x49c] ss:$12 sps:$4 sm:$0xff]  }
  0x16   : > { %2194 = vmatprep.mubr.bf16.mxu1 %v4003_v8  ;;  %v4009_v25 = vld [vmem:[%s4332_s5 + $0x18] ss:$12 sps:$4 sm:$0xff]   ;;  %v4011_v27 = vld [vmem:[%s4332_s5 + $0x34] ss:$12 sps:$4 sm:$0xff]   ;;  %v4015_v29 = vld [vmem:[%s4332_s5 + $0x30] ss:$12 sps:$4 sm:$0xff]  }
  0x17   : > { %1783 = vmatpush1.bf16.msra.mxu0 %v3984_v3  ;;  %3957 = vmatpush1.bf16.msra.mxu1 %v3984_v3  ;;  %v4010_v26 = vld [vmem:[%s4332_s5 + $0x498] ss:$12 sps:$4 sm:$0xff]   ;;  %v4013_v28 = vld [vmem:[%s4332_s5 + $0x4b4] ss:$12 sps:$4 sm:$0xff]   ;;  %v4016_v30 = vld [vmem:[%s4332_s5 + $0x4b0] ss:$12 sps:$4 sm:$0xff]  }
  0x18   : > { %1784 = vmatprep.subr.bf16.mxu0 %v4265_v1  ;;  %3942 = vmatprep.subr.bf16.mxu1 %v4265_v1  ;;  %v4017_v31 = vld [vmem:[%s4332_s5 + $0x4c] ss:$12 sps:$4 sm:$0xff]   ;;  %v4021_v33 = vld [vmem:[%s4332_s5 + $0x48] ss:$12 sps:$4 sm:$0xff]   ;;  %v4023_v35 = vld [vmem:[%s4332_s5 + $0x64] ss:$12 sps:$4 sm:$0xff]  }
  0x19   : > { %v4019_v32 = vld [vmem:[%s4332_s5 + $0x4cc] ss:$12 sps:$4 sm:$0xff]   ;;  %v4022_v34 = vld [vmem:[%s4332_s5 + $0x4c8] ss:$12 sps:$4 sm:$0xff]   ;;  %v4025_v36 = vld [vmem:[%s4332_s5 + $0x4e4] ss:$12 sps:$4 sm:$0xff]  }
  0x1a   : > { %v4027_v37 = vld [vmem:[%s4332_s5 + $0x60] ss:$12 sps:$4 sm:$0xff]   ;;  %v4029_v39 = vld [vmem:[%s4332_s5 + $0x7c] ss:$12 sps:$4 sm:$0xff]   ;;  %v4033_v41 = vld [vmem:[%s4332_s5 + $0x78] ss:$12 sps:$4 sm:$0xff]  }
  0x1b   : > { %1785 = vmatpush1.bf16.msra.mxu0 %v3985_v4  ;;  %3958 = vmatpush1.bf16.msra.mxu1 %v3985_v4  ;;  %v4028_v38 = vld [vmem:[%s4332_s5 + $0x4e0] ss:$12 sps:$4 sm:$0xff]   ;;  %v4031_v40 = vld [vmem:[%s4332_s5 + $0x4fc] ss:$12 sps:$4 sm:$0xff]   ;;  %v4034_v42 = vld [vmem:[%s4332_s5 + $0x4f8] ss:$12 sps:$4 sm:$0xff]  }
  0x1c   : > { %1786 = vmatprep.subr.bf16.mxu0 %v4265_v1  ;;  %3943 = vmatprep.subr.bf16.mxu1 %v4265_v1  ;;  %v4035_v43 = vld [vmem:[%s4332_s5 + $0x94] ss:$12 sps:$4 sm:$0xff]   ;;  %v4039_v45 = vld [vmem:[%s4332_s5 + $0x90] ss:$12 sps:$4 sm:$0xff]   ;;  %v4041_v47 = vld [vmem:[%s4332_s5 + $0xac] ss:$12 sps:$4 sm:$0xff]  }
  0x1d   : > { %v4037_v44 = vld [vmem:[%s4332_s5 + $0x514] ss:$12 sps:$4 sm:$0xff]   ;;  %v4040_v46 = vld [vmem:[%s4332_s5 + $0x510] ss:$12 sps:$4 sm:$0xff]   ;;  %v4043_v48 = vld [vmem:[%s4332_s5 + $0x52c] ss:$12 sps:$4 sm:$0xff]  }
  0x1e   : > { %v4045_v49 = vld [vmem:[%s4332_s5 + $0xa8] ss:$12 sps:$4 sm:$0xff]   ;;  %v4047_v51 = vld [vmem:[%s4332_s5 + $0xc4] ss:$12 sps:$4 sm:$0xff]   ;;  %v4051_v53 = vld [vmem:[%s4332_s5 + $0xc0] ss:$12 sps:$4 sm:$0xff]  }
  0x1f   : > { %1787 = vmatpush1.bf16.msra.mxu0 %v3986_v5  ;;  %3959 = vmatpush1.bf16.msra.mxu1 %v3986_v5  ;;  %v4046_v50 = vld [vmem:[%s4332_s5 + $0x528] ss:$12 sps:$4 sm:$0xff]   ;;  %v4049_v52 = vld [vmem:[%s4332_s5 + $0x544] ss:$12 sps:$4 sm:$0xff]   ;;  %v4052_v54 = vld [vmem:[%s4332_s5 + $0x540] ss:$12 sps:$4 sm:$0xff]  }
  0x20   : > { %1788 = vmatprep.subr.bf16.mxu0 %v4265_v1  ;;  %3944 = vmatprep.subr.bf16.mxu1 %v4265_v1  ;;  %v4054_v55 = vld [vmem:[%s4332_s5 + $0xdc] ss:$12 sps:$4 sm:$0xff]   ;;  %v4058_v57 = vld [vmem:[%s4332_s5 + $0xd8] ss:$12 sps:$4 sm:$0xff]   ;;  %v4060_v59 = vld [vmem:[%s4332_s5 + $0xf4] ss:$12 sps:$4 sm:$0xff]  }
  0x21   : > { %v4056_v56 = vld [vmem:[%s4332_s5 + $0x55c] ss:$12 sps:$4 sm:$0xff]   ;;  %v4059_v58 = vld [vmem:[%s4332_s5 + $0x558] ss:$12 sps:$4 sm:$0xff]   ;;  %v4062_v60 = vld [vmem:[%s4332_s5 + $0x574] ss:$12 sps:$4 sm:$0xff]  }
  0x22   : > { %v4064_v61 = vld [vmem:[%s4332_s5 + $0xf0] ss:$12 sps:$4 sm:$0xff]   ;;  %v4066_v63 = vld [vmem:[%s4332_s5 + $0x10c] ss:$12 sps:$4 sm:$0xff]   ;;  %v4071_v2 = vld [vmem:[%s4332_s5 + $0x588] ss:$12 sps:$4 sm:$0xff]  }
  0x23   : > { %1789 = vmatpush1.bf16.msra.mxu0 %v3987_v7  ;;  %3960 = vmatpush1.bf16.msra.mxu1 %v3987_v7  ;;  %v4065_v62 = vld [vmem:[%s4332_s5 + $0x570] ss:$12 sps:$4 sm:$0xff]   ;;  %v4068_v0 = vld [vmem:[%s4332_s5 + $0x58c] ss:$12 sps:$4 sm:$0xff]  }
  0x24   : > { %1790 = vmatprep.subr.bf16.mxu0 %v4265_v1  ;;  %3945 = vmatprep.subr.bf16.mxu1 %v4265_v1  ;;  %v4072_v3 = vld [vmem:[%s4332_s5 + $0x124] ss:$12 sps:$4 sm:$0xff]   ;;  %v4076_v5 = vld [vmem:[%s4332_s5 + $0x120] ss:$12 sps:$4 sm:$0xff]   ;;  %v4078_v7 = vld [vmem:[%s4332_s5 + $0x13c] ss:$12 sps:$4 sm:$0xff]  }
  0x25   : > { %v4074_v4 = vld [vmem:[%s4332_s5 + $0x5a4] ss:$12 sps:$4 sm:$0xff]   ;;  %v4077_v6 = vld [vmem:[%s4332_s5 + $0x5a0] ss:$12 sps:$4 sm:$0xff]   ;;  %v4080_v8 = vld [vmem:[%s4332_s5 + $0x5bc] ss:$12 sps:$4 sm:$0xff]  }
  0x27   : > { %1791 = vmatpush1.bf16.msra.mxu0 %v3988_v9  ;;  %3961 = vmatpush1.bf16.msra.mxu1 %v3988_v9  ;;  %v4082_v9 = vld [vmem:[%s4332_s5 + $0x138] ss:$12 sps:$4 sm:$0xff]  }
  0x28   : > { %1792 = vmatprep.subr.bf16.mxu0 %v4265_v1  ;;  %3946 = vmatprep.subr.bf16.mxu1 %v4265_v1 }
  0x2b   : > { %1793 = vmatpush1.bf16.msra.mxu0 %v3989_v10  ;;  %3962 = vmatpush1.bf16.msra.mxu1 %v3989_v10  ;;  %v4083_v10 = vld [vmem:[%s4332_s5 + $0x5b8] ss:$12 sps:$4 sm:$0xff]  }
  0x2c   : > { %1794 = vmatprep.subr.bf16.mxu0 %v4265_v1  ;;  %3947 = vmatprep.subr.bf16.mxu1 %v4265_v1 }
  0x2f   : > { %1795 = vmatpush1.bf16.msra.mxu0 %v3990_v11  ;;  %3963 = vmatpush1.bf16.msra.mxu1 %v3990_v11  ;;  %v4084_v11 = vld [vmem:[%s4332_s5 + $0x154] ss:$12 sps:$4 sm:$0xff]  }
  0x30   : > { %1796 = vmatprep.subr.bf16.mxu0 %v4265_v1  ;;  %3948 = vmatprep.subr.bf16.mxu1 %v4265_v1 }
  0x33   : > { %1797 = vmatpush1.bf16.msra.mxu0 %v3991_v12  ;;  %3964 = vmatpush1.bf16.msra.mxu1 %v3991_v12  ;;  %v4086_v12 = vld [vmem:[%s4332_s5 + $0x5d4] ss:$12 sps:$4 sm:$0xff]  }
  0x34   : > { %1798 = vmatprep.subr.bf16.mxu0 %v4265_v1  ;;  %3949 = vmatprep.subr.bf16.mxu1 %v4265_v1 }
  0x37   : > { %1799 = vmatpush1.bf16.msra.mxu0 %v3992_v13  ;;  %3965 = vmatpush1.bf16.msra.mxu1 %v3992_v13  ;;  %v4088_v13 = vld [vmem:[%s4332_s5 + $0x150] ss:$12 sps:$4 sm:$0xff]  }
  0x38   : > { %1800 = vmatprep.subr.bf16.mxu0 %v4265_v1  ;;  %3950 = vmatprep.subr.bf16.mxu1 %v4265_v1 }
  0x3b   : > { %1801 = vmatpush1.bf16.msra.mxu0 %v3993_v14  ;;  %3966 = vmatpush1.bf16.msra.mxu1 %v3993_v14  ;;  %v4089_v14 = vld [vmem:[%s4332_s5 + $0x5d0] ss:$12 sps:$4 sm:$0xff]  }
  0x3c   : > { %1802 = vmatprep.subr.bf16.mxu0 %v4265_v1  ;;  %3951 = vmatprep.subr.bf16.mxu1 %v4265_v1 }
  0x3f   : > { %1803 = vmatpush1.bf16.msra.mxu0 %v3994_v15  ;;  %3967 = vmatpush1.bf16.msra.mxu1 %v3994_v15  ;;  %v4090_v15 = vld [vmem:[%s4332_s5 + $0x16c] ss:$12 sps:$4 sm:$0xff]  }
  0x40   : > { %1804 = vmatprep.subr.bf16.mxu0 %v4265_v1  ;;  %3952 = vmatprep.subr.bf16.mxu1 %v4265_v1 }
  0x43   : > { %1805 = vmatpush1.bf16.msra.mxu0 %v3995_v16  ;;  %3968 = vmatpush1.bf16.msra.mxu1 %v3995_v16  ;;  %v4092_v16 = vld [vmem:[%s4332_s5 + $0x5ec] ss:$12 sps:$4 sm:$0xff]  }
  0x44   : > { %1806 = vmatprep.subr.bf16.mxu0 %v4265_v1  ;;  %3953 = vmatprep.subr.bf16.mxu1 %v4265_v1 }
  0x47   : > { %1807 = vmatpush1.bf16.msra.mxu0 %v3996_v17  ;;  %3969 = vmatpush1.bf16.msra.mxu1 %v3996_v17  ;;  %v4094_v17 = vld [vmem:[%s4332_s5 + $0x168] ss:$12 sps:$4 sm:$0xff]  }
  0x48   : > { %1808 = vmatprep.subr.bf16.mxu0 %v4265_v1  ;;  %3954 = vmatprep.subr.bf16.mxu1 %v4265_v1  ;;  %v4070_v1 = vld [vmem:[%s4332_s5 + $0x108] ss:$12 sps:$4 sm:$0xff]  }
  0x4b   : > { %1809 = vmatpush1.bf16.msra.mxu0 %v3997_v18  ;;  %3970 = vmatpush1.bf16.msra.mxu1 %v3997_v18  ;;  %v4095_v18 = vld [vmem:[%s4332_s5 + $0x5e8] ss:$12 sps:$4 sm:$0xff]  }
  0x4c   : > { %3807 = vmatprep.subr.bf16.mxu1 %v4004_v19 }
  0x4e   : > { %1811 = vmatmul.mubr.bf16.vlgmr.msra.gmra.mrb[0].mxu0 %v3998_v20  ;;  %2195 = vmatmul.mubr.bf16.vlgmr.msra.gmra.mrb[0].mxu1 %v4001_v21  ;;  %v4098_v20 = vld [vmem:[%s4332_s5 + $0x8] ss:$12 sps:$4 sm:$0xff]   ;;  %v4099_v21 = vld [vmem:[%s4332_s5 + $0x180] ss:$12 sps:$4 sm:$0xff]  }
  0x4f   : > { %3808 = vmatpush3.bf16.msra.mxu1 %v4004_v19  ;;  %1818 = vmatprep.mubr.bf16.mxu0 %v4005_v22  ;;  %v4096_v19 = vld [vmem:[%s4332_s5 + $0x184] ss:$12 sps:$4 sm:$0xff]   ;;  %v4100_v22 = vld [vmem:[%s4332_s5 + $0x20] ss:$12 sps:$4 sm:$0xff]  }
  0x50   : > { %2202 = vmatprep.mubr.bf16.mxu1 %v4007_v23  ;;  %3809 = vmatprep.subr.bf16.mxu1 %v4053_v24  ;;  %v4101_v23 = vld [vmem:[%s4332_s5 + $0x19c] ss:$12 sps:$4 sm:$0xff]  }
  0x53   : > { %3810 = vmatpush3.bf16.msra.mxu1 %v4053_v24  ;;  %v4103_v24 = vld [vmem:[%s4332_s5 + $0x38] ss:$12 sps:$4 sm:$0xff]  }
  0x56   : > { %1819 = vmatmul.mubr.bf16.gmra.mrb[4].mxu0 %v4009_v25  ;;  %2203 = vmatmul.mubr.bf16.gmra.mrb[4].mxu1 %v4010_v26  ;;  %v4104_v25 = vld [vmem:[%s4332_s5 + $0x198] ss:$12 sps:$4 sm:$0xff]   ;;  %v4105_v26 = vld [vmem:[%s4332_s5 + $0x50] ss:$12 sps:$4 sm:$0xff]  }
  0x57   : > { %1826 = vmatprep.mubr.bf16.mxu0 %v4011_v27  ;;  %2210 = vmatprep.mubr.bf16.mxu1 %v4013_v28  ;;  %v4106_v27 = vld [vmem:[%s4332_s5 + $0x1b4] ss:$12 sps:$4 sm:$0xff]  }
  0x58   : > { %v4108_v28 = vld [vmem:[%s4332_s5 + $0x68] ss:$12 sps:$4 sm:$0xff]  }
  0x5e   : > { %1827 = vmatmul.mubr.bf16.gmra.mrb[8].mxu0 %v4015_v29  ;;  %2211 = vmatmul.mubr.bf16.gmra.mrb[8].mxu1 %v4016_v30  ;;  %v4109_v29 = vld [vmem:[%s4332_s5 + $0x1b0] ss:$12 sps:$4 sm:$0xff]   ;;  %v4110_v30 = vld [vmem:[%s4332_s5 + $0x80] ss:$12 sps:$4 sm:$0xff]  }
  0x5f   : > { %1834 = vmatprep.mubr.bf16.mxu0 %v4017_v31  ;;  %2218 = vmatprep.mubr.bf16.mxu1 %v4019_v32  ;;  %v4111_v31 = vld [vmem:[%s4332_s5 + $0x1cc] ss:$12 sps:$4 sm:$0xff]  }
  0x60   : > { %v4113_v32 = vld [vmem:[%s4332_s5 + $0x98] ss:$12 sps:$4 sm:$0xff]  }
  0x66   : > { %1835 = vmatmul.mubr.bf16.gmra.mrb[12].mxu0 %v4021_v33  ;;  %2219 = vmatmul.mubr.bf16.gmra.mrb[12].mxu1 %v4022_v34  ;;  %v4114_v33 = vld [vmem:[%s4332_s5 + $0x1c8] ss:$12 sps:$4 sm:$0xff]   ;;  %v4115_v34 = vld [vmem:[%s4332_s5 + $0xb0] ss:$12 sps:$4 sm:$0xff]  }
  0x67   : > { %1842 = vmatprep.mubr.bf16.mxu0 %v4023_v35  ;;  %2226 = vmatprep.mubr.bf16.mxu1 %v4025_v36  ;;  %v4116_v35 = vld [vmem:[%s4332_s5 + $0x1e4] ss:$12 sps:$4 sm:$0xff]   ;;  %v4118_v36 = vld [vmem:[%s4332_s5 + $0xc8] ss:$12 sps:$4 sm:$0xff]  }
  0x6e   : > { %1843 = vmatmul.mubr.bf16.gmra.mrb[16].mxu0 %v4027_v37  ;;  %2227 = vmatmul.mubr.bf16.gmra.mrb[16].mxu1 %v4028_v38  ;;  %v4119_v37 = vld [vmem:[%s4332_s5 + $0x1e0] ss:$12 sps:$4 sm:$0xff]  }
  0x6f   : > { %1850 = vmatprep.mubr.bf16.mxu0 %v4029_v39  ;;  %2234 = vmatprep.mubr.bf16.mxu1 %v4031_v40  ;;  %v4120_v38 = vld [vmem:[%s4332_s5 + $0xe0] ss:$12 sps:$4 sm:$0xff]   ;;  %v4121_v39 = vld [vmem:[%s4332_s5 + $0x1fc] ss:$12 sps:$4 sm:$0xff]   ;;  %v4123_v40 = vld [vmem:[%s4332_s5 + $0xf8] ss:$12 sps:$4 sm:$0xff]  }
  0x76   : > { %1851 = vmatmul.mubr.bf16.gmra.mrb[20].mxu0 %v4033_v41  ;;  %2235 = vmatmul.mubr.bf16.gmra.mrb[20].mxu1 %v4034_v42  ;;  %v4124_v41 = vld [vmem:[%s4332_s5 + $0x1f8] ss:$12 sps:$4 sm:$0xff]   ;;  %v4125_v42 = vld [vmem:[%s4332_s5 + $0x110] ss:$12 sps:$4 sm:$0xff]  }
  0x77   : > { %1858 = vmatprep.mubr.bf16.mxu0 %v4035_v43  ;;  %2242 = vmatprep.mubr.bf16.mxu1 %v4037_v44  ;;  %v4126_v43 = vld [vmem:[%s4332_s5 + $0x214] ss:$12 sps:$4 sm:$0xff]  }
  0x78   : > { %v4128_v44 = vld [vmem:[%s4332_s5 + $0x128] ss:$12 sps:$4 sm:$0xff]  }
  0x7e   : > { %1859 = vmatmul.mubr.bf16.gmra.mrb[24].mxu0 %v4039_v45  ;;  %2243 = vmatmul.mubr.bf16.gmra.mrb[24].mxu1 %v4040_v46  ;;  %v4129_v45 = vld [vmem:[%s4332_s5 + $0x210] ss:$12 sps:$4 sm:$0xff]   ;;  %v4130_v46 = vld [vmem:[%s4332_s5 + $0x140] ss:$12 sps:$4 sm:$0xff]  }
  0x7f   : > { %1866 = vmatprep.mubr.bf16.mxu0 %v4041_v47  ;;  %2250 = vmatprep.mubr.bf16.mxu1 %v4043_v48  ;;  %v4131_v47 = vld [vmem:[%s4332_s5 + $0x22c] ss:$12 sps:$4 sm:$0xff]  }
  0x80   : > { %v4133_v48 = vld [vmem:[%s4332_s5 + $0x158] ss:$12 sps:$4 sm:$0xff]  }
  0x86   : > { %1867 = vmatmul.mubr.bf16.gmra.mrb[28].mxu0 %v4045_v49  ;;  %2251 = vmatmul.mubr.bf16.gmra.mrb[28].mxu1 %v4046_v50  ;;  %v4134_v49 = vld [vmem:[%s4332_s5 + $0x228] ss:$12 sps:$4 sm:$0xff]   ;;  %v4135_v50 = vld [vmem:[%s4332_s5 + $0x170] ss:$12 sps:$4 sm:$0xff]  }
  0x87   : > { %1874 = vmatprep.mubr.bf16.mxu0 %v4047_v51  ;;  %2258 = vmatprep.mubr.bf16.mxu1 %v4049_v52  ;;  %v4136_v51 = vld [vmem:[%s4332_s5 + $0x244] ss:$12 sps:$4 sm:$0xff]   ;;  %v4138_v52 = vld [vmem:[%s4332_s5 + $0x188] ss:$12 sps:$4 sm:$0xff]  }
  0x8e   : > { %1875 = vmatmul.mubr.bf16.gmra.mrb[32].mxu0 %v4051_v53  ;;  %2259 = vmatmul.mubr.bf16.gmra.mrb[32].mxu1 %v4052_v54  ;;  %v4139_v53 = vld [vmem:[%s4332_s5 + $0x240] ss:$12 sps:$4 sm:$0xff]  }
  0x8f   : > { %1882 = vmatprep.mubr.bf16.mxu0 %v4054_v55  ;;  %2266 = vmatprep.mubr.bf16.mxu1 %v4056_v56  ;;  %v4140_v54 = vld [vmem:[%s4332_s5 + $0x1a0] ss:$12 sps:$4 sm:$0xff]   ;;  %v4141_v55 = vld [vmem:[%s4332_s5 + $0x25c] ss:$12 sps:$4 sm:$0xff]   ;;  %v4143_v56 = vld [vmem:[%s4332_s5 + $0x1b8] ss:$12 sps:$4 sm:$0xff]  }
  0x96   : > { %1883 = vmatmul.mubr.bf16.gmra.mrb[36].mxu0 %v4058_v57  ;;  %2267 = vmatmul.mubr.bf16.gmra.mrb[36].mxu1 %v4059_v58  ;;  %v4144_v57 = vld [vmem:[%s4332_s5 + $0x258] ss:$12 sps:$4 sm:$0xff]   ;;  %v4145_v58 = vld [vmem:[%s4332_s5 + $0x1d0] ss:$12 sps:$4 sm:$0xff]  }
  0x97   : > { %1890 = vmatprep.mubr.bf16.mxu0 %v4060_v59  ;;  %2274 = vmatprep.mubr.bf16.mxu1 %v4062_v60  ;;  %v4146_v59 = vld [vmem:[%s4332_s5 + $0x274] ss:$12 sps:$4 sm:$0xff]  }
  0x98   : > { %v4148_v60 = vld [vmem:[%s4332_s5 + $0x1e8] ss:$12 sps:$4 sm:$0xff]  }
  0x9e   : > { %1891 = vmatmul.mubr.bf16.gmra.mrb[40].mxu0 %v4064_v61  ;;  %2275 = vmatmul.mubr.bf16.gmra.mrb[40].mxu1 %v4065_v62  ;;  %v4149_v61 = vld [vmem:[%s4332_s5 + $0x270] ss:$12 sps:$4 sm:$0xff]   ;;  %v4150_v62 = vld [vmem:[%s4332_s5 + $0x200] ss:$12 sps:$4 sm:$0xff]  }
  0x9f   : > { %1898 = vmatprep.mubr.bf16.mxu0 %v4066_v63  ;;  %2282 = vmatprep.mubr.bf16.mxu1 %v4068_v0  ;;  %v4151_v63 = vld [vmem:[%s4332_s5 + $0x28c] ss:$12 sps:$4 sm:$0xff]  }
  0xa0   : > { %v4153_v0 = vld [vmem:[%s4332_s5 + $0x218] ss:$12 sps:$4 sm:$0xff]  }
  0xa6   : > { %1899 = vmatmul.mubr.bf16.gmra.mrb[44].mxu0 %v4070_v1  ;;  %2283 = vmatmul.mubr.bf16.gmra.mrb[44].mxu1 %v4071_v2 }
  0xa7   : > { %1906 = vmatprep.mubr.bf16.mxu0 %v4072_v3  ;;  %2290 = vmatprep.mubr.bf16.mxu1 %v4074_v4 }
  0xae   : > { %1907 = vmatmul.mubr.bf16.gmra.mrb[48].mxu0 %v4076_v5  ;;  %2291 = vmatmul.mubr.bf16.gmra.mrb[48].mxu1 %v4077_v6  ;;  %v4154_v5 = vld [vmem:[%s4332_s5 + $0x288] ss:$12 sps:$4 sm:$0xff]   ;;  %v4155_v6 = vld [vmem:[%s4332_s5 + $0x230] ss:$12 sps:$4 sm:$0xff]  }
  0xaf   : > { %1914 = vmatprep.mubr.bf16.mxu0 %v4078_v7  ;;  %2298 = vmatprep.mubr.bf16.mxu1 %v4080_v8 }
  0xb6   : > { %1915 = vmatmul.mubr.bf16.gmra.mrb[52].mxu0 %v4082_v9  ;;  %2299 = vmatmul.mubr.bf16.gmra.mrb[52].mxu1 %v4083_v10  ;;  %v4156_v9 = vld [vmem:[%s4332_s5 + $0x2a4] ss:$12 sps:$4 sm:$0xff]   ;;  %v4158_v10 = vld [vmem:[%s4332_s5 + $0x248] ss:$12 sps:$4 sm:$0xff]  }
  0xb7   : > { %1922 = vmatprep.mubr.bf16.mxu0 %v4084_v11  ;;  %2306 = vmatprep.mubr.bf16.mxu1 %v4086_v12 }
  0xbe   : > { %1923 = vmatmul.mubr.bf16.gmra.mrb[56].mxu0 %v4088_v13  ;;  %2307 = vmatmul.mubr.bf16.gmra.mrb[56].mxu1 %v4089_v14 }
  0xbf   : > { %1930 = vmatprep.mubr.bf16.mxu0 %v4090_v15  ;;  %2314 = vmatprep.mubr.bf16.mxu1 %v4092_v16 }
  0xc6   : > { %1931 = vmatmul.mubr.bf16.gmra.mrb[60].mxu0 %v4094_v17  ;;  %2315 = vmatmul.mubr.bf16.gmra.mrb[60].mxu1 %v4095_v18  ;;  %v4159_v17 = vld [vmem:[%s4332_s5 + $0x2a0] ss:$12 sps:$4 sm:$0xff]  }
  0xc7   : > { %1938 = vmatprep.mubr.bf16.mxu0 %v4096_v19  ;;  %3811 = vmatprep.mubr.msk.bf16.mxu1 %vm1585_vm0, %v4098_v20  ;;  %v4160_v18 = vld [vmem:[%s4332_s5 + $0x260] ss:$12 sps:$4 sm:$0xff]  }
  0xce   : > { %1939 = vmatmul.mubr.bf16.gmra.mrb[64].mxu0 %v4099_v21  ;;  %3812 = vmatmul.mubr.msk.bf16.vlgmr.msra.gmra.mrb[64].mxu1 %vm1585_vm0, %v4100_v22  ;;  %v4161_v21 = vld [vmem:[%s4332_s5 + $0x2bc] ss:$12 sps:$4 sm:$0xff]   ;;  %v4163_v22 = vld [vmem:[%s4332_s5 + $0x278] ss:$12 sps:$4 sm:$0xff]  }
  0xcf   : > { %1946 = vmatprep.mubr.bf16.mxu0 %v4101_v23  ;;  %3815 = vmatprep.mubr.msk.bf16.mxu1 %vm1585_vm0, %v4103_v24 }
  0xd6   : > { %1947 = vmatmul.mubr.bf16.gmra.mrb[68].mxu0 %v4104_v25  ;;  %3816 = vmatmul.mubr.msk.bf16.gmra.mrb[68].mxu1 %vm1585_vm0, %v4105_v26 }
  0xd7   : > { %1954 = vmatprep.mubr.bf16.mxu0 %v4106_v27  ;;  %3819 = vmatprep.mubr.msk.bf16.mxu1 %vm1585_vm0, %v4108_v28 }
  0xde   : > { %1955 = vmatmul.mubr.bf16.gmra.mrb[72].mxu0 %v4109_v29  ;;  %3820 = vmatmul.mubr.msk.bf16.gmra.mrb[72].mxu1 %vm1585_vm0, %v4110_v30  ;;  %v4164_v29 = vld [vmem:[%s4332_s5 + $0x2b8] ss:$12 sps:$4 sm:$0xff]   ;;  %v4165_v30 = vld [vmem:[%s4332_s5 + $0x290] ss:$12 sps:$4 sm:$0xff]  }
  0xdf   : > { %1962 = vmatprep.mubr.bf16.mxu0 %v4111_v31  ;;  %3823 = vmatprep.mubr.msk.bf16.mxu1 %vm1585_vm0, %v4113_v32 }
  0xe6   : > { %1963 = vmatmul.mubr.bf16.gmra.mrb[76].mxu0 %v4114_v33  ;;  %3824 = vmatmul.mubr.msk.bf16.gmra.mrb[76].mxu1 %vm1585_vm0, %v4115_v34  ;;  %v4166_v33 = vld [vmem:[%s4332_s5 + $0x2d4] ss:$12 sps:$4 sm:$0xff]  }
  0xe7   : > { %1970 = vmatprep.mubr.bf16.mxu0 %v4116_v35  ;;  %3827 = vmatprep.mubr.msk.bf16.mxu1 %vm1585_vm0, %v4118_v36  ;;  %v4168_v34 = vld [vmem:[%s4332_s5 + $0x2a8] ss:$12 sps:$4 sm:$0xff]  }
  0xee   : > { %1971 = vmatmul.mubr.bf16.gmra.mrb[80].mxu0 %v4119_v37  ;;  %3828 = vmatmul.mubr.msk.bf16.gmra.mrb[80].mxu1 %vm1585_vm0, %v4120_v38 }
  0xef   : > { %1978 = vmatprep.mubr.bf16.mxu0 %v4121_v39  ;;  %3831 = vmatprep.mubr.msk.bf16.mxu1 %vm1585_vm0, %v4123_v40 }
  0xf6   : > { %1979 = vmatmul.mubr.bf16.gmra.mrb[84].mxu0 %v4124_v41  ;;  %3832 = vmatmul.mubr.msk.bf16.gmra.mrb[84].mxu1 %vm1585_vm0, %v4125_v42  ;;  %v4169_v41 = vld [vmem:[%s4332_s5 + $0x2d0] ss:$12 sps:$4 sm:$0xff]   ;;  %v4170_v42 = vld [vmem:[%s4332_s5 + $0x2c0] ss:$12 sps:$4 sm:$0xff]  }
  0xf7   : > { %1986 = vmatprep.mubr.bf16.mxu0 %v4126_v43  ;;  %3835 = vmatprep.mubr.msk.bf16.mxu1 %vm1585_vm0, %v4128_v44 }
  0xfe   : > { %1987 = vmatmul.mubr.bf16.gmra.mrb[88].mxu0 %v4129_v45  ;;  %3836 = vmatmul.mubr.msk.bf16.gmra.mrb[88].mxu1 %vm1585_vm0, %v4130_v46  ;;  %v4171_v45 = vld [vmem:[%s4332_s5 + $0x2ec] ss:$12 sps:$4 sm:$0xff]  }
  0xff   : > { %1994 = vmatprep.mubr.bf16.mxu0 %v4131_v47  ;;  %3839 = vmatprep.mubr.msk.bf16.mxu1 %vm1585_vm0, %v4133_v48  ;;  %v4173_v46 = vld [vmem:[%s4332_s5 + $0x2d8] ss:$12 sps:$4 sm:$0xff]  }
 0x106   : > { %1995 = vmatmul.mubr.bf16.gmra.mrb[92].mxu0 %v4134_v49  ;;  %3840 = vmatmul.mubr.msk.bf16.gmra.mrb[92].mxu1 %vm1585_vm0, %v4135_v50 }
 0x107   : > { %2002 = vmatprep.mubr.bf16.mxu0 %v4136_v51  ;;  %3843 = vmatprep.mubr.msk.bf16.mxu1 %vm1585_vm0, %v4138_v52 }
 0x10e   : > { %2003 = vmatmul.mubr.bf16.gmra.mrb[96].mxu0 %v4139_v53  ;;  %3844 = vmatmul.mubr.msk.bf16.gmra.mrb[96].mxu1 %vm1585_vm0, %v4140_v54  ;;  %v4174_v53 = vld [vmem:[%s4332_s5 + $0x2e8] ss:$12 sps:$4 sm:$0xff]   ;;  %v4175_v54 = vld [vmem:[%s4332_s5 + $0x2f0] ss:$12 sps:$4 sm:$0xff]  }
 0x10f   : > { %2010 = vmatprep.mubr.bf16.mxu0 %v4141_v55  ;;  %3847 = vmatprep.mubr.msk.bf16.mxu1 %vm1585_vm0, %v4143_v56 }
 0x116   : > { %2011 = vmatmul.mubr.bf16.gmra.mrb[100].mxu0 %v4144_v57  ;;  %3848 = vmatmul.mubr.msk.bf16.gmra.mrb[100].mxu1 %vm1585_vm0, %v4145_v58  ;;  %v4176_v57 = vld [vmem:[%s4332_s5 + $0x304] ss:$12 sps:$4 sm:$0xff]   ;;  %v4178_v58 = vld [vmem:[%s4332_s5 + $0x308] ss:$12 sps:$4 sm:$0xff]  }
 0x117   : > { %2018 = vmatprep.mubr.bf16.mxu0 %v4146_v59  ;;  %3851 = vmatprep.mubr.msk.bf16.mxu1 %vm1585_vm0, %v4148_v60 }
 0x11e   : > { %2019 = vmatmul.mubr.bf16.gmra.mrb[104].mxu0 %v4149_v61  ;;  %3852 = vmatmul.mubr.msk.bf16.gmra.mrb[104].mxu1 %vm1585_vm0, %v4150_v62 }
 0x11f   : > { %2026 = vmatprep.mubr.bf16.mxu0 %v4151_v63  ;;  %3855 = vmatprep.mubr.msk.bf16.mxu1 %vm1585_vm0, %v4153_v0 }
 0x121   : > { %v4530_v1 = vpop.f32.mrb[0].mxu1  ;;  %v4532_v2 = vpop.f32.mrb[0].mxu0 }
 0x122   : > { %v2198_v3 = vpop.f32.mrb[1].mxu1  ;;  %v1814_v4 = vpop.f32.mrb[1].mxu0 }
 0x123   : > { %v4536_v7 = vpop.f32.mrb[2].mxu1  ;;  %v4538_v8 = vpop.f32.mrb[2].mxu0  ;;  %v4179_v3 = vld [vmem:[%s4332_s5 + $0x300] ss:$12 sps:$4 sm:$0xff]  }
 0x124   : > { %v2201_v11 = vpop.f32.mrb[3].mxu1  ;;  %v1817_v12 = vpop.f32.mrb[3].mxu0  ;;  %v4180_v4 = vld [vmem:[%s4332_s5 + $0x320] ss:$12 sps:$4 sm:$0xff]  }
 0x126   : > { %2027 = vmatmul.mubr.bf16.gmra.mrb[108].mxu0 %v4154_v5  ;;  %3856 = vmatmul.mubr.msk.bf16.gmra.mrb[108].mxu1 %vm1585_vm0, %v4155_v6 }
 0x127   : > { %2034 = vmatprep.mubr.bf16.mxu0 %v4156_v9  ;;  %3859 = vmatprep.mubr.msk.bf16.mxu1 %vm1585_vm0, %v4158_v10  ;;  %v4181_v9 = vld [vmem:[%s4332_s5 + $0x31c] ss:$12 sps:$4 sm:$0xff]   ;;  %v4183_v10 = vld [vmem:[%s4332_s5 + $0x338] ss:$12 sps:$4 sm:$0xff]  }
 0x129   : > { %v4544_v13 = vpop.f32.mrb[4].mxu1  ;;  %v4546_v14 = vpop.f32.mrb[4].mxu0 }
 0x12a   : > { %v2206_v15 = vpop.f32.mrb[5].mxu1  ;;  %v1822_v16 = vpop.f32.mrb[5].mxu0 }
 0x12b   : > { %v4550_v19 = vpop.f32.mrb[6].mxu1  ;;  %v4552_v20 = vpop.f32.mrb[6].mxu0 }
 0x12c   : > { %v2209_v23 = vpop.f32.mrb[7].mxu1  ;;  %v1825_v24 = vpop.f32.mrb[7].mxu0 }
 0x12e   : > { %2035 = vmatmul.mubr.bf16.gmra.mrb[112].mxu0 %v4159_v17  ;;  %3860 = vmatmul.mubr.msk.bf16.gmra.mrb[112].mxu1 %vm1585_vm0, %v4160_v18 }
 0x12f   : > { %2042 = vmatprep.mubr.bf16.mxu0 %v4161_v21  ;;  %3863 = vmatprep.mubr.msk.bf16.mxu1 %vm1585_vm0, %v4163_v22  ;;  %v4184_v21 = vld [vmem:[%s4332_s5 + $0x318] ss:$12 sps:$4 sm:$0xff]   ;;  %v4185_v22 = vld [vmem:[%s4332_s5 + $0x350] ss:$12 sps:$4 sm:$0xff]  }
 0x131   : > { %v4558_v25 = vpop.f32.mrb[8].mxu1  ;;  %v4560_v26 = vpop.f32.mrb[8].mxu0 }
 0x132   : > { %v2214_v27 = vpop.f32.mrb[9].mxu1  ;;  %v1830_v28 = vpop.f32.mrb[9].mxu0 }
 0x133   : > { %v4564_v31 = vpop.f32.mrb[10].mxu1  ;;  %v4566_v32 = vpop.f32.mrb[10].mxu0  ;;  %v4186_v27 = vld [vmem:[%s4332_s5 + $0x334] ss:$12 sps:$4 sm:$0xff]  }
 0x134   : > { %5571 = vst [vmem:[#allocation2_spill] sm:$0xff] %v4564_v31  ;;  %v2217_v35 = vpop.f32.mrb[11].mxu1  ;;  %v1833_v36 = vpop.f32.mrb[11].mxu0  ;;  %v4188_v28 = vld [vmem:[%s4332_s5 + $0x368] ss:$12 sps:$4 sm:$0xff]  }
 0x136   : > { %2043 = vmatmul.mubr.bf16.gmra.mrb[116].mxu0 %v4164_v29  ;;  %3864 = vmatmul.mubr.msk.bf16.gmra.mrb[116].mxu1 %vm1585_vm0, %v4165_v30 }
 0x137   : > { %2050 = vmatprep.mubr.bf16.mxu0 %v4166_v33  ;;  %3867 = vmatprep.mubr.msk.bf16.mxu1 %vm1585_vm0, %v4168_v34 }
 0x139   : > { %v4572_v37 = vpop.f32.mrb[12].mxu1  ;;  %v4574_v38 = vpop.f32.mrb[12].mxu0 }
 0x13a   : > { %v2222_v39 = vpop.f32.mrb[13].mxu1  ;;  %v1838_v40 = vpop.f32.mrb[13].mxu0 }
 0x13b   : > { %v4578_v43 = vpop.f32.mrb[14].mxu1  ;;  %v4580_v44 = vpop.f32.mrb[14].mxu0  ;;  %v4189_v39 = vld [vmem:[%s4332_s5 + $0x330] ss:$12 sps:$4 sm:$0xff]   ;;  %v4190_v40 = vld [vmem:[%s4332_s5 + $0x380] ss:$12 sps:$4 sm:$0xff]  }
 0x13c   : > { %v2225_v47 = vpop.f32.mrb[15].mxu1  ;;  %v1841_v48 = vpop.f32.mrb[15].mxu0 }
 0x13e   : > { %2051 = vmatmul.mubr.bf16.gmra.mrb[120].mxu0 %v4169_v41  ;;  %3868 = vmatmul.mubr.msk.bf16.gmra.mrb[120].mxu1 %vm1585_vm0, %v4170_v42 }
 0x13f   : > { %2058 = vmatprep.mubr.bf16.mxu0 %v4171_v45  ;;  %3871 = vmatprep.mubr.msk.bf16.mxu1 %vm1585_vm0, %v4173_v46  ;;  %v4191_v45 = vld [vmem:[%s4332_s5 + $0x34c] ss:$12 sps:$4 sm:$0xff]  }
 0x140   : > { %v4193_v46 = vld [vmem:[%s4332_s5 + $0x398] ss:$12 sps:$4 sm:$0xff]  }
 0x141   : > { %v4586_v49 = vpop.f32.mrb[16].mxu1  ;;  %v4588_v50 = vpop.f32.mrb[16].mxu0 }
 0x142   : > { %5572 = vst [vmem:[#allocation3_spill] sm:$0xff] %v4586_v49  ;;  %v2230_v51 = vpop.f32.mrb[17].mxu1  ;;  %v1846_v52 = vpop.f32.mrb[17].mxu0 }
 0x143   : > { %v4592_v55 = vpop.f32.mrb[18].mxu1  ;;  %v4594_v56 = vpop.f32.mrb[18].mxu0 }
 0x144   : > { %5573 = vst [vmem:[#allocation4_spill] sm:$0xff] %v4592_v55  ;;  %v2233_v59 = vpop.f32.mrb[19].mxu1  ;;  %v1849_v60 = vpop.f32.mrb[19].mxu0 }
 0x146   : > { %2059 = vmatmul.mubr.bf16.gmra.mrb[124].mxu0 %v4174_v53  ;;  %3872 = vmatmul.mubr.msk.bf16.gmra.mrb[124].mxu1 %vm1585_vm0, %v4175_v54 }
 0x147   : > { %2066 = vmatprep.mubr.bf16.mxu0 %v4176_v57  ;;  %3875 = vmatprep.mubr.msk.bf16.mxu1 %vm1585_vm0, %v4178_v58  ;;  %v4194_v57 = vld [vmem:[%s4332_s5 + $0x348] ss:$12 sps:$4 sm:$0xff]   ;;  %v4195_v58 = vld [vmem:[%s4332_s5 + $0x3b0] ss:$12 sps:$4 sm:$0xff]  }
 0x149   : > { %v4600_v61 = vpop.f32.mrb[20].mxu1  ;;  %v4602_v62 = vpop.f32.mrb[20].mxu0 }
 0x14a   : > { %5574 = vst [vmem:[#allocation5_spill] sm:$0xff] %v4600_v61  ;;  %v2238_v63 = vpop.f32.mrb[21].mxu1  ;;  %v1854_v0 = vpop.f32.mrb[21].mxu0 }
 0x14b   : > { %v4606_v5 = vpop.f32.mrb[22].mxu1  ;;  %v4608_v6 = vpop.f32.mrb[22].mxu0  ;;  %v4196_v63 = vld [vmem:[%s4332_s5 + $0x364] ss:$12 sps:$4 sm:$0xff]   ;;  %v4198_v0 = vld [vmem:[%s4332_s5 + $0x3c8] ss:$12 sps:$4 sm:$0xff]  }
 0x14c   : > { %5575 = vst [vmem:[#allocation6_spill] sm:$0xff] %v4606_v5  ;;  %v2241_v11 = vpop.f32.mrb[23].mxu1  ;;  %v1857_v12 = vpop.f32.mrb[23].mxu0 }
 0x14e   : > { %2067 = vmatmul.mubr.bf16.gmra.mrb[128].mxu0 %v4179_v3  ;;  %3876 = vmatmul.mubr.msk.bf16.gmra.mrb[128].mxu1 %vm1585_vm0, %v4180_v4 }
 0x14f   : > { %2074 = vmatprep.mubr.bf16.mxu0 %v4181_v9  ;;  %3879 = vmatprep.mubr.msk.bf16.mxu1 %vm1585_vm0, %v4183_v10 }
 0x151   : > { %v4614_v15 = vpop.f32.mrb[24].mxu1  ;;  %v4616_v16 = vpop.f32.mrb[24].mxu0 }
 0x152   : > { %5576 = vst [vmem:[#allocation7_spill] sm:$0xff] %v4614_v15  ;;  %v2246_v17 = vpop.f32.mrb[25].mxu1  ;;  %v1862_v18 = vpop.f32.mrb[25].mxu0  ;;  %v4246_v15 = vld [vmem:[%s4332_s5 + $0x454] ss:$12 sps:$4 sm:$0xff]  }
 0x153   : > { %v4620_v23 = vpop.f32.mrb[26].mxu1  ;;  %v4622_v24 = vpop.f32.mrb[26].mxu0  ;;  %v4199_v17 = vld [vmem:[%s4332_s5 + $0x360] ss:$12 sps:$4 sm:$0xff]  }
 0x154   : > { %5577 = vst [vmem:[#allocation8_spill] sm:$0xff] %v4620_v23  ;;  %v2249_v29 = vpop.f32.mrb[27].mxu1  ;;  %v1865_v30 = vpop.f32.mrb[27].mxu0  ;;  %v4200_v18 = vld [vmem:[%s4332_s5 + $0x3e0] ss:$12 sps:$4 sm:$0xff]  }
 0x155   : > { %v4243_v23 = vld [vmem:[%s4332_s5 + $0x578] ss:$12 sps:$4 sm:$0xff]  }
 0x156   : > { %2075 = vmatmul.mubr.bf16.gmra.mrb[132].mxu0 %v4184_v21  ;;  %3880 = vmatmul.mubr.msk.bf16.gmra.mrb[132].mxu1 %vm1585_vm0, %v4185_v22 }
 0x157   : > { %2082 = vmatprep.mubr.bf16.mxu0 %v4186_v27  ;;  %3883 = vmatprep.mubr.msk.bf16.mxu1 %vm1585_vm0, %v4188_v28  ;;  %v4201_v27 = vld [vmem:[%s4332_s5 + $0x37c] ss:$12 sps:$4 sm:$0xff]   ;;  %v4203_v28 = vld [vmem:[%s4332_s5 + $0x3f8] ss:$12 sps:$4 sm:$0xff]  }
 0x159   : > { %v4628_v33 = vpop.f32.mrb[28].mxu1  ;;  %v4630_v34 = vpop.f32.mrb[28].mxu0 }
 0x15a   : > { %5578 = vst [vmem:[#allocation9_spill] sm:$0xff] %v4628_v33  ;;  %v2254_v35 = vpop.f32.mrb[29].mxu1  ;;  %v1870_v36 = vpop.f32.mrb[29].mxu0 }
 0x15b   : > { %v4634_v41 = vpop.f32.mrb[30].mxu1  ;;  %v4636_v42 = vpop.f32.mrb[30].mxu0 }
 0x15c   : > { %5579 = vst [vmem:[#allocation10_spill] sm:$0xff] %v4634_v41  ;;  %v2257_v47 = vpop.f32.mrb[31].mxu1  ;;  %v1873_v48 = vpop.f32.mrb[31].mxu0 }
 0x15e   : > { %2083 = vmatmul.mubr.bf16.gmra.mrb[136].mxu0 %v4189_v39  ;;  %3884 = vmatmul.mubr.msk.bf16.gmra.mrb[136].mxu1 %vm1585_vm0, %v4190_v40 }
 0x15f   : > { %2090 = vmatprep.mubr.bf16.mxu0 %v4191_v45  ;;  %3887 = vmatprep.mubr.msk.bf16.mxu1 %vm1585_vm0, %v4193_v46  ;;  %v4204_v45 = vld [vmem:[%s4332_s5 + $0x378] ss:$12 sps:$4 sm:$0xff]   ;;  %v4205_v46 = vld [vmem:[%s4332_s5 + $0x410] ss:$12 sps:$4 sm:$0xff]  }
 0x161   : > { %v4642_v51 = vpop.f32.mrb[32].mxu1  ;;  %v4644_v52 = vpop.f32.mrb[32].mxu0 }
 0x162   : > { %5580 = vst [vmem:[#allocation11_spill] sm:$0xff] %v4642_v51  ;;  %v2262_v53 = vpop.f32.mrb[33].mxu1  ;;  %v1878_v54 = vpop.f32.mrb[33].mxu0  ;;  %v4238_v51 = vld [vmem:[%s4332_s5 + $0x548] ss:$12 sps:$4 sm:$0xff]  }
 0x163   : > { %v4648_v59 = vpop.f32.mrb[34].mxu1  ;;  %v4650_v60 = vpop.f32.mrb[34].mxu0  ;;  %v4206_v53 = vld [vmem:[%s4332_s5 + $0x394] ss:$12 sps:$4 sm:$0xff]  }
 0x164   : > { %5581 = vst [vmem:[#allocation12_spill] sm:$0xff] %v4648_v59  ;;  %v2265_v3 = vpop.f32.mrb[35].mxu1  ;;  %v1881_v4 = vpop.f32.mrb[35].mxu0  ;;  %v4208_v54 = vld [vmem:[%s4332_s5 + $0x428] ss:$12 sps:$4 sm:$0xff]  }
 0x166   : > { %2091 = vmatmul.mubr.bf16.gmra.mrb[140].mxu0 %v4194_v57  ;;  %3888 = vmatmul.mubr.msk.bf16.gmra.mrb[140].mxu1 %vm1585_vm0, %v4195_v58 }
 0x167   : > { %2098 = vmatprep.mubr.bf16.mxu0 %v4196_v63  ;;  %3891 = vmatprep.mubr.msk.bf16.mxu1 %vm1585_vm0, %v4198_v0 }
 0x169   : > { %v4656_v9 = vpop.f32.mrb[36].mxu1  ;;  %v4658_v10 = vpop.f32.mrb[36].mxu0 }
 0x16a   : > { %5582 = vst [vmem:[#allocation13_spill] sm:$0xff] %v4656_v9  ;;  %v2270_v11 = vpop.f32.mrb[37].mxu1  ;;  %v1886_v12 = vpop.f32.mrb[37].mxu0 }
 0x16b   : > { %v4662_v21 = vpop.f32.mrb[38].mxu1  ;;  %v4664_v22 = vpop.f32.mrb[38].mxu0  ;;  %v4209_v11 = vld [vmem:[%s4332_s5 + $0x390] ss:$12 sps:$4 sm:$0xff]   ;;  %v4210_v12 = vld [vmem:[%s4332_s5 + $0x440] ss:$12 sps:$4 sm:$0xff]  }
 0x16c   : > { %5583 = vst [vmem:[#allocation14_spill] sm:$0xff] %v4662_v21  ;;  %v2273_v29 = vpop.f32.mrb[39].mxu1  ;;  %v1889_v30 = vpop.f32.mrb[39].mxu0 }
 0x16e   : > { %2099 = vmatmul.mubr.bf16.gmra.mrb[144].mxu0 %v4199_v17  ;;  %3892 = vmatmul.mubr.msk.bf16.gmra.mrb[144].mxu1 %vm1585_vm0, %v4200_v18 }
 0x16f   : > { %2106 = vmatprep.mubr.bf16.mxu0 %v4201_v27  ;;  %3895 = vmatprep.mubr.msk.bf16.mxu1 %vm1585_vm0, %v4203_v28  ;;  %v4211_v27 = vld [vmem:[%s4332_s5 + $0x3ac] ss:$12 sps:$4 sm:$0xff]  }
 0x170   : > { %v4213_v28 = vld [vmem:[%s4332_s5 + $0x458] ss:$12 sps:$4 sm:$0xff]  }
 0x171   : > { %v4670_v35 = vpop.f32.mrb[40].mxu1  ;;  %v4672_v36 = vpop.f32.mrb[40].mxu0 }
 0x172   : > { %5584 = vst [vmem:[#allocation15_spill] sm:$0xff] %v4670_v35  ;;  %v2278_v39 = vpop.f32.mrb[41].mxu1  ;;  %v1894_v40 = vpop.f32.mrb[41].mxu0 }
 0x173   : > { %v4676_v47 = vpop.f32.mrb[42].mxu1  ;;  %v4678_v48 = vpop.f32.mrb[42].mxu0 }
 0x174   : > { %5585 = vst [vmem:[#allocation16_spill] sm:$0xff] %v4676_v47  ;;  %v2281_v57 = vpop.f32.mrb[43].mxu1  ;;  %v1897_v58 = vpop.f32.mrb[43].mxu0 }
 0x176   : > { %2107 = vmatmul.mubr.bf16.gmra.mrb[148].mxu0 %v4204_v45  ;;  %3896 = vmatmul.mubr.msk.bf16.gmra.mrb[148].mxu1 %vm1585_vm0, %v4205_v46 }
 0x177   : > { %2114 = vmatprep.mubr.bf16.mxu0 %v4206_v53  ;;  %3899 = vmatprep.mubr.msk.bf16.mxu1 %vm1585_vm0, %v4208_v54  ;;  %v4214_v53 = vld [vmem:[%s4332_s5 + $0x3a8] ss:$12 sps:$4 sm:$0xff]   ;;  %v4215_v54 = vld [vmem:[%s4332_s5 + $0x470] ss:$12 sps:$4 sm:$0xff]  }
 0x179   : > { %v4684_v63 = vpop.f32.mrb[44].mxu1  ;;  %v4686_v0 = vpop.f32.mrb[44].mxu0 }
 0x17a   : > { %5586 = vst [vmem:[#allocation17_spill] sm:$0xff] %v4684_v63  ;;  %v2286_v3 = vpop.f32.mrb[45].mxu1  ;;  %v1902_v4 = vpop.f32.mrb[45].mxu0  ;;  %v4230_v63 = vld [vmem:[%s4332_s5 + $0x500] ss:$12 sps:$4 sm:$0xff]  }
 0x17b   : > { %v4690_v17 = vpop.f32.mrb[46].mxu1  ;;  %v4692_v18 = vpop.f32.mrb[46].mxu0  ;;  %v4216_v3 = vld [vmem:[%s4332_s5 + $0x3c4] ss:$12 sps:$4 sm:$0xff]   ;;  %v4218_v4 = vld [vmem:[%s4332_s5 + $0x488] ss:$12 sps:$4 sm:$0xff]  }
 0x17c   : > { %5587 = vst [vmem:[#allocation18_spill] sm:$0xff] %v4690_v17  ;;  %v2289_v29 = vpop.f32.mrb[47].mxu1  ;;  %v1905_v30 = vpop.f32.mrb[47].mxu0 }
 0x17e   : > { %2115 = vmatmul.mubr.bf16.gmra.mrb[152].mxu0 %v4209_v11  ;;  %3900 = vmatmul.mubr.msk.bf16.gmra.mrb[152].mxu1 %vm1585_vm0, %v4210_v12 }
 0x17f   : > { %2122 = vmatprep.mubr.bf16.mxu0 %v4211_v27  ;;  %3903 = vmatprep.mubr.msk.bf16.mxu1 %vm1585_vm0, %v4213_v28 }
 0x181   : > { %v4698_v39 = vpop.f32.mrb[48].mxu1  ;;  %v4700_v40 = vpop.f32.mrb[48].mxu0 }
 0x182   : > { %5588 = vst [vmem:[#allocation19_spill] sm:$0xff] %v4698_v39  ;;  %v2294_v45 = vpop.f32.mrb[49].mxu1  ;;  %v1910_v46 = vpop.f32.mrb[49].mxu0  ;;  %v4225_v39 = vld [vmem:[%s4332_s5 + $0x4d0] ss:$12 sps:$4 sm:$0xff]  }
 0x183   : > { %v4704_v57 = vpop.f32.mrb[50].mxu1  ;;  %v4706_v58 = vpop.f32.mrb[50].mxu0  ;;  %v4219_v45 = vld [vmem:[%s4332_s5 + $0x3c0] ss:$12 sps:$4 sm:$0xff]  }
 0x184   : > { %5589 = vst [vmem:[#allocation20_spill] sm:$0xff] %v4704_v57  ;;  %v2297_v11 = vpop.f32.mrb[51].mxu1  ;;  %v1913_v12 = vpop.f32.mrb[51].mxu0  ;;  %v4220_v46 = vld [vmem:[%s4332_s5 + $0x4a0] ss:$12 sps:$4 sm:$0xff]  }
 0x186   : > { %2123 = vmatmul.mubr.bf16.gmra.mrb[156].mxu0 %v4214_v53  ;;  %3904 = vmatmul.mubr.msk.bf16.gmra.mrb[156].mxu1 %vm1585_vm0, %v4215_v54  ;;  %v4221_v53 = vld [vmem:[%s4332_s5 + $0x3dc] ss:$12 sps:$4 sm:$0xff]   ;;  %v4223_v54 = vld [vmem:[%s4332_s5 + $0x4b8] ss:$12 sps:$4 sm:$0xff]  }
 0x187   : > { %2130 = vmatprep.mubr.bf16.mxu0 %v4216_v3  ;;  %3907 = vmatprep.mubr.msk.bf16.mxu1 %vm1585_vm0, %v4218_v4 }
 0x189   : > { %v4712_v27 = vpop.f32.mrb[52].mxu1  ;;  %v4714_v28 = vpop.f32.mrb[52].mxu0 }
 0x18a   : > { %5590 = vst [vmem:[#allocation21_spill] sm:$0xff] %v4712_v27  ;;  %v2302_v29 = vpop.f32.mrb[53].mxu1  ;;  %v1918_v30 = vpop.f32.mrb[53].mxu0  ;;  %v4224_v27 = vld [vmem:[%s4332_s5 + $0x3d8] ss:$12 sps:$4 sm:$0xff]  }
 0x18b   : > { %v4718_v57 = vpop.f32.mrb[54].mxu1  ;;  %v4720_v11 = vpop.f32.mrb[54].mxu0 }
 0x18c   : > { %5591 = vst [vmem:[#allocation22_spill] sm:$0xff] %v4718_v57  ;;  %v2305_v3 = vpop.f32.mrb[55].mxu1  ;;  %v1921_v4 = vpop.f32.mrb[55].mxu0 }
 0x18e   : > { %2131 = vmatmul.mubr.bf16.gmra.mrb[160].mxu0 %v4219_v45  ;;  %3908 = vmatmul.mubr.msk.bf16.gmra.mrb[160].mxu1 %vm1585_vm0, %v4220_v46  ;;  %v4226_v45 = vld [vmem:[%s4332_s5 + $0x3f4] ss:$12 sps:$4 sm:$0xff]  }
 0x18f   : > { %2138 = vmatprep.mubr.bf16.mxu0 %v4221_v53  ;;  %3911 = vmatprep.mubr.msk.bf16.mxu1 %vm1585_vm0, %v4223_v54  ;;  %v4228_v46 = vld [vmem:[%s4332_s5 + $0x4e8] ss:$12 sps:$4 sm:$0xff]  }
 0x191   : > { %v4726_v12 = vpop.f32.mrb[56].mxu1  ;;  %v4728_v29 = vpop.f32.mrb[56].mxu0 }
 0x192   : > { %5592 = vst [vmem:[#allocation23_spill] sm:$0xff] %v4726_v12  ;;  %v2310_v30 = vpop.f32.mrb[57].mxu1  ;;  %v1926_v57 = vpop.f32.mrb[57].mxu0  ;;  %v4229_v12 = vld [vmem:[%s4332_s5 + $0x3f0] ss:$12 sps:$4 sm:$0xff]  }
 0x193   : > { %v4732_v17 = vpop.f32.mrb[58].mxu1  ;;  %v4734_v3 = vpop.f32.mrb[58].mxu0 }
 0x194   : > { %5593 = vst [vmem:[#allocation24_spill] sm:$0xff] %v4732_v17  ;;  %v2313_v53 = vpop.f32.mrb[59].mxu1  ;;  %v1929_v54 = vpop.f32.mrb[59].mxu0 }
 0x195   : > { %v4231_v53 = vld [vmem:[%s4332_s5 + $0x40c] ss:$12 sps:$4 sm:$0xff]  }
 0x196   : > { %2139 = vmatmul.mubr.bf16.gmra.mrb[164].mxu0 %v4224_v27  ;;  %3912 = vmatmul.mubr.msk.bf16.gmra.mrb[164].mxu1 %vm1585_vm0, %v4225_v39  ;;  %v4233_v54 = vld [vmem:[%s4332_s5 + $0x518] ss:$12 sps:$4 sm:$0xff]  }
 0x197   : > { %2146 = vmatprep.mubr.bf16.mxu0 %v4226_v45  ;;  %3915 = vmatprep.mubr.msk.bf16.mxu1 %vm1585_vm0, %v4228_v46  ;;  %v4756_v45 = vld [vmem:[%s5568_s2] ss:$0 sm:$0xff] }
 0x198   : > { %v1813_v46 = vadd.f32 %v4756_v45, %v4532_v2  ;;  %v4236_v2 = vld [vmem:[%s4332_s5 + $0x424] ss:$12 sps:$4 sm:$0xff]  }
 0x199   : > { %v4740_v57 = vpop.f32.mrb[60].mxu1  ;;  %v4742_v4 = vpop.f32.mrb[60].mxu0 }
 0x19a   : > { %5594 = vst [vmem:[#allocation25_spill] sm:$0xff] %v4740_v57  ;;  %v2318_v30 = vpop.f32.mrb[61].mxu1  ;;  %v1934_v17 = vpop.f32.mrb[61].mxu0  ;;  %v4235_v57 = vld [vmem:[%s4332_s5 + $0x530] ss:$12 sps:$4 sm:$0xff]  }
 0x19b   : > { %v4746_v47 = vpop.f32.mrb[62].mxu1  ;;  %v4748_v35 = vpop.f32.mrb[62].mxu0  ;;  %v1821_v17 = vadd.f32 %v4756_v45, %v4546_v14 }
 0x19c   : > { %5595 = vst [vmem:[#allocation26_spill] sm:$0xff] %v4746_v47  ;;  %v2321_v27 = vpop.f32.mrb[63].mxu1  ;;  %v1937_v39 = vpop.f32.mrb[63].mxu0  ;;  %v4234_v47 = vld [vmem:[%s4332_s5 + $0x408] ss:$12 sps:$4 sm:$0xff]  }
 0x19e   : > { %2147 = vmatmul.mubr.bf16.gmra.mrb[168].mxu0 %v4229_v12  ;;  %3916 = vmatmul.mubr.msk.bf16.gmra.mrb[168].mxu1 %vm1585_vm0, %v4230_v63  ;;  %v1824_v63 = vadd.f32 %v4756_v45, %v4552_v20 }
 0x19f   : > { %2154 = vmatprep.mubr.bf16.mxu0 %v4231_v53  ;;  %3919 = vmatprep.mubr.msk.bf16.mxu1 %vm1585_vm0, %v4233_v54  ;;  %v1816_v54 = vadd.f32 %v4756_v45, %v4538_v8  ;;  %v1837_v8 = vadd.f32 %v4756_v45, %v4574_v38 }
 0x1a1   : > { %v3813_v30 = vpop.f32.mrb[64].mxu1  ;;  %v4763_v12 = vpop.f32.mrb[64].mxu0 }
 0x1a2   : > { %v4767_v27 = vadd.f32 %v3813_v30, %v1821_v17  ;;  %v2357_v39 = vpop.f32.mrb[65].mxu1  ;;  %v1942_v53 = vpop.f32.mrb[65].mxu0 }
 0x1a3   : > { %v4773_v59 = vadd.f32 %v2357_v39, %v1813_v46  ;;  %v3814_v14 = vpop.f32.mrb[66].mxu1  ;;  %v4775_v21 = vpop.f32.mrb[66].mxu0  ;;  %v1829_v46 = vadd.f32 %v4756_v45, %v4560_v26  ;;  %v1840_v53 = vadd.f32 %v4756_v45, %v4580_v44  ;;  %v4241_v26 = vld [vmem:[%s4332_s5 + $0x43c] ss:$12 sps:$4 sm:$0xff]  }
 0x1a4   : > { %v4779_v9 = vadd.f32 %v3814_v14, %v1824_v63  ;;  %v2360_v20 = vpop.f32.mrb[67].mxu1  ;;  %v1945_v17 = vpop.f32.mrb[67].mxu0  ;;  %v4239_v14 = vld [vmem:[%s4332_s5 + $0x420] ss:$12 sps:$4 sm:$0xff]   ;;  %v2870_v33 = vmax.f32 %v4767_v27, 0.0 }
 0x1a5   : > { %v4781_v30 = vadd.f32 %v2360_v20, %v1816_v54 }
 0x1a6   : > { %2155 = vmatmul.mubr.bf16.gmra.mrb[172].mxu0 %v4234_v47  ;;  %3920 = vmatmul.mubr.msk.bf16.gmra.mrb[172].mxu1 %vm1585_vm0, %v4235_v57  ;;  %v2871_v61 = vmax.f32 %v4779_v9, 0.0 }
 0x1a7   : > { %2162 = vmatprep.mubr.bf16.mxu0 %v4236_v2  ;;  %3923 = vmatprep.mubr.msk.bf16.mxu1 %vm1585_vm0, %v4238_v51  ;;  %v4240_v2 = vld [vmem:[%s4332_s5 + $0x560] ss:$12 sps:$4 sm:$0xff]   ;;  %v1832_v51 = vadd.f32 %v4756_v45, %v4566_v32  ;;  %v1853_v32 = vadd.f32 %v4756_v45, %v4602_v62 }
 0x1a9   : > { %v3817_v63 = vpop.f32.mrb[68].mxu1  ;;  %v4789_v39 = vpop.f32.mrb[68].mxu0 }
 0x1aa   : > { %v4793_v47 = vadd.f32 %v3817_v63, %v1837_v8  ;;  %v2373_v57 = vpop.f32.mrb[69].mxu1  ;;  %v1950_v54 = vpop.f32.mrb[69].mxu0 }
 0x1ab   : > { %v4799_v20 = vadd.f32 %v2373_v57, %v1829_v46  ;;  %v3818_v38 = vpop.f32.mrb[70].mxu1  ;;  %v4801_v17 = vpop.f32.mrb[70].mxu0  ;;  %v1845_v46 = vadd.f32 %v4756_v45, %v4588_v50  ;;  %v1856_v54 = vadd.f32 %v4756_v45, %v4608_v6  ;;  %v4248_v50 = vld [vmem:[%s4332_s5 + $0x5a8] ss:$12 sps:$4 sm:$0xff]  }
 0x1ac   : > { %v4805_v41 = vadd.f32 %v3818_v38, %v1840_v53  ;;  %v2376_v44 = vpop.f32.mrb[71].mxu1  ;;  %v1953_v8 = vpop.f32.mrb[71].mxu0  ;;  %v4244_v38 = vld [vmem:[%s4332_s5 + $0x438] ss:$12 sps:$4 sm:$0xff]  }
 0x1ad   : > { %v4807_v63 = vadd.f32 %v2376_v44, %v1832_v51 }
 0x1ae   : > { %2163 = vmatmul.mubr.bf16.gmra.mrb[176].mxu0 %v4239_v14  ;;  %3924 = vmatmul.mubr.msk.bf16.gmra.mrb[176].mxu1 %vm1585_vm0, %v4240_v2 }
 0x1af   : > { %2170 = vmatprep.mubr.bf16.mxu0 %v4241_v26  ;;  %3927 = vmatprep.mubr.msk.bf16.mxu1 %vm1585_vm0, %v4243_v23  ;;  %v4245_v26 = vld [vmem:[%s4332_s5 + $0x590] ss:$12 sps:$4 sm:$0xff]   ;;  %v1848_v23 = vadd.f32 %v4756_v45, %v4594_v56 }
 0x1b1   : > { %v3821_v53 = vpop.f32.mrb[72].mxu1  ;;  %v4815_v57 = vpop.f32.mrb[72].mxu0 }
 0x1b2   : > { %v2398_v14 = vadd.f32 %v3821_v53, %v1853_v32  ;;  %v2389_v51 = vpop.f32.mrb[73].mxu1  ;;  %v1958_v2 = vpop.f32.mrb[73].mxu0  ;;  %v2868_v32 = vmax.f32 %v4773_v59, 0.0 }
 0x1b3   : > { %v2390_v44 = vadd.f32 %v2389_v51, %v1845_v46  ;;  %v3822_v8 = vpop.f32.mrb[74].mxu1  ;;  %v4823_v62 = vpop.f32.mrb[74].mxu0  ;;  %v2869_v46 = vmax.f32 %v4781_v30, 0.0 }
 0x1b4   : > { %v2878_v55 = vmax.f32 %v2398_v14, 0.0  ;;  %v2401_v5 = vadd.f32 %v3822_v8, %v1856_v54  ;;  %v2392_v49 = vpop.f32.mrb[75].mxu1  ;;  %v1961_v6 = vpop.f32.mrb[75].mxu0  ;;  %v4253_v8 = vld [vmem:[%s4332_s5 + $0x5d8] ss:$12 sps:$4 sm:$0xff]  }
 0x1b5   : > { %v2876_v53 = vmax.f32 %v2390_v44, 0.0  ;;  %v2393_v2 = vadd.f32 %v2392_v49, %v1848_v23  ;;  %v1869_v49 = vadd.f32 %v4756_v45, %v4630_v34  ;;  %v4250_v34 = vld [vmem:[%s4332_s5 + $0x5c0] ss:$12 sps:$4 sm:$0xff]  }
 0x1b6   : > { %v4830_v31 = vmax.f32 %v2870_v33, %v2878_v55  ;;  %v2879_v56 = vmax.f32 %v2401_v5, 0.0  ;;  %2171 = vmatmul.mubr.bf16.gmra.mrb[180].mxu0 %v4244_v38  ;;  %3928 = vmatmul.mubr.msk.bf16.gmra.mrb[180].mxu1 %vm1585_vm0, %v4245_v26  ;;  %v1861_v5 = vadd.f32 %v4756_v45, %v4616_v16  ;;  %v4249_v38 = vld [vmem:[%s4332_s5 + $0x450] ss:$12 sps:$4 sm:$0xff]   ;;  %v4251_v16 = vld [vmem:[%s4332_s5 + $0x46c] ss:$12 sps:$4 sm:$0xff]  }
 0x1b7   : > { %v4834_v27 = vmax.f32 %v2868_v32, %v2876_v53  ;;  %v2877_v54 = vmax.f32 %v2393_v2, 0.0  ;;  %2178 = vmatprep.mubr.bf16.mxu0 %v4246_v15  ;;  %3931 = vmatprep.mubr.msk.bf16.mxu1 %vm1585_vm0, %v4248_v50  ;;  %v1872_v15 = vadd.f32 %v4756_v45, %v4636_v42  ;;  %v2874_v50 = vmax.f32 %v4793_v47, 0.0 }
 0x1b8   : > { %v4839_v55 = vmax.f32 %v2871_v61, %v2879_v56  ;;  %v1864_v61 = vadd.f32 %v4756_v45, %v4622_v24  ;;  %v2872_v2 = vmax.f32 %v4799_v20, 0.0  ;;  %v1885_v20 = vadd.f32 %v4756_v45, %v4658_v10 }
 0x1b9   : > { %v4843_v33 = vmax.f32 %v2869_v46, %v2877_v54  ;;  %v3825_v59 = vpop.f32.mrb[76].mxu1  ;;  %v4845_v9 = vpop.f32.mrb[76].mxu0  ;;  %v2875_v54 = vmax.f32 %v4805_v41, 0.0  ;;  %v1880_v10 = vadd.f32 %v4756_v45, %v4650_v60  ;;  %v1904_v60 = vadd.f32 %v4756_v45, %v4692_v18 }
 0x1ba   : > { %v2414_v30 = vadd.f32 %v3825_v59, %v1869_v49  ;;  %v2405_v14 = vpop.f32.mrb[77].mxu1  ;;  %v1966_v51 = vpop.f32.mrb[77].mxu0  ;;  %v1917_v18 = vadd.f32 %v4756_v45, %v4714_v28 }
 0x1bb   : > { %v2406_v26 = vadd.f32 %v2405_v14, %v1861_v5  ;;  %v3826_v23 = vpop.f32.mrb[78].mxu1  ;;  %v4853_v44 = vpop.f32.mrb[78].mxu0  ;;  %v2873_v5 = vmax.f32 %v4807_v63, 0.0  ;;  %v1888_v63 = vadd.f32 %v4756_v45, %v4664_v22  ;;  %v1901_v22 = vadd.f32 %v4756_v45, %v4686_v0 }
 0x1bc   : > { %v2882_v6 = vmax.f32 %v2414_v30, 0.0  ;;  %v2417_v32 = vadd.f32 %v3826_v23, %v1872_v15  ;;  %v2408_v53 = vpop.f32.mrb[79].mxu1  ;;  %v1969_v42 = vpop.f32.mrb[79].mxu0  ;;  %v1877_v15 = vadd.f32 %v4756_v45, %v4644_v52  ;;  %v4255_v23 = vld [vmem:[%s4332_s5 + $0x5f0] ss:$12 sps:$4 sm:$0xff]  }
 0x1bd   : > { %v2880_v56 = vmax.f32 %v2406_v26, 0.0  ;;  %v2409_v46 = vadd.f32 %v2408_v53, %v1864_v61  ;;  %v4254_v26 = vld [vmem:[%s4332_s5 + $0x468] ss:$12 sps:$4 sm:$0xff]   ;;  %v1893_v42 = vadd.f32 %v4756_v45, %v4672_v36  ;;  %s3740_s5 = sshll.u32 %s5622_s19, 5  ;;  %s4266_s19 = smov 64  }
 0x1be   : > { %v4860_v49 = vmax.f32 %v2874_v50, %v2882_v6  ;;  %v2883_v24 = vmax.f32 %v2417_v32, 0.0  ;;  %2179 = vmatmul.mubr.bf16.gmra.mrb[184].mxu0 %v4249_v38  ;;  %3932 = vmatmul.mubr.msk.bf16.gmra.mrb[184].mxu1 %vm1585_vm0, %v4250_v34  ;;  %s4922_s14 = scalar_lea.vmem %s5569_s3, %s3740_s5 }
 0x1bf   : > { %v4864_v47 = vmax.f32 %v2872_v2, %v2880_v56  ;;  %v2881_v59 = vmax.f32 %v2409_v46, 0.0  ;;  %2186 = vmatprep.mubr.bf16.mxu0 %v4251_v16  ;;  %3935 = vmatprep.mubr.msk.bf16.mxu1 %vm1585_vm0, %v4253_v8 }
 0x1c0   : > { %v4869_v41 = vmax.f32 %v2875_v54, %v2883_v24 }
 0x1c1   : > { %v4873_v30 = vmax.f32 %v2873_v5, %v2881_v59  ;;  %v3829_v14 = vpop.f32.mrb[80].mxu1  ;;  %v4875_v51 = vpop.f32.mrb[80].mxu0  ;;  %v1896_v5 = vadd.f32 %v4756_v45, %v4678_v48 }
 0x1c2   : > { %v2430_v38 = vadd.f32 %v3829_v14, %v1885_v20  ;;  %v2421_v34 = vpop.f32.mrb[81].mxu1  ;;  %v1974_v61 = vpop.f32.mrb[81].mxu0 }
 0x1c3   : > { %v2422_v16 = vadd.f32 %v2421_v34, %v1877_v15  ;;  %v3830_v8 = vpop.f32.mrb[82].mxu1  ;;  %v4883_v50 = vpop.f32.mrb[82].mxu0  ;;  %v1909_v34 = vadd.f32 %v4756_v45, %v4700_v40 }
 0x1c4   : > { %v2433_v52 = vadd.f32 %v3830_v8, %v1888_v63  ;;  %v2424_v6 = vpop.f32.mrb[83].mxu1  ;;  %v1977_v32 = vpop.f32.mrb[83].mxu0  ;;  %v2886_v28 = vmax.f32 %v2430_v38, 0.0  ;;  %v1933_v38 = vadd.f32 %v4756_v45, %v4742_v4 }
 0x1c5   : > { %v2425_v53 = vadd.f32 %v2424_v6, %v1880_v10  ;;  %v1912_v6 = vadd.f32 %v4756_v45, %v4706_v58 }
 0x1c6   : > { %2187 = vmatmul.mubr.bf16.gmra.mrb[188].mxu0 %v4254_v26  ;;  %3936 = vmatmul.mubr.msk.bf16.gmra.mrb[188].mxu1 %vm1585_vm0, %v4255_v23  ;;  %v1920_v26 = vadd.f32 %v4756_v45, %v4720_v11  ;;  %v2887_v11 = vmax.f32 %v2433_v52, 0.0  ;;  %v1925_v52 = vadd.f32 %v4756_v45, %v4728_v29 }
 0x1c9   : > { %v3833_v2 = vpop.f32.mrb[84].mxu1  ;;  %v4890_v56 = vpop.f32.mrb[84].mxu0 }
 0x1ca   : > { %v4894_v46 = vadd.f32 %v3833_v2, %v1901_v22  ;;  %v2437_v54 = vpop.f32.mrb[85].mxu1  ;;  %v1982_v24 = vpop.f32.mrb[85].mxu0 }
 0x1cb   : > { %v4898_v59 = vadd.f32 %v2437_v54, %v1893_v42  ;;  %v3834_v20 = vpop.f32.mrb[86].mxu1  ;;  %v4900_v0 = vpop.f32.mrb[86].mxu0  ;;  %v2884_v24 = vmax.f32 %v2422_v16, 0.0 }
 0x1cc   : > { %v4902_v15 = vadd.f32 %v3834_v20, %v1904_v60  ;;  %v2440_v36 = vpop.f32.mrb[87].mxu1  ;;  %v1985_v14 = vpop.f32.mrb[87].mxu0 }
 0x1cd   : > { %v4904_v63 = vadd.f32 %v2440_v36, %v1896_v5 }
 0x1d1   : > { %v3837_v61 = vpop.f32.mrb[88].mxu1  ;;  %v4910_v48 = vpop.f32.mrb[88].mxu0 }
 0x1d2   : > { %v2462_v23 = vadd.f32 %v3837_v61, %v1917_v18  ;;  %v2453_v10 = vpop.f32.mrb[89].mxu1  ;;  %v1990_v8 = vpop.f32.mrb[89].mxu0  ;;  %v2885_v18 = vmax.f32 %v2425_v53, 0.0 }
 0x1d3   : > { %v2454_v32 = vadd.f32 %v2453_v10, %v1909_v34  ;;  %v3838_v22 = vpop.f32.mrb[90].mxu1  ;;  %v4916_v42 = vpop.f32.mrb[90].mxu0  ;;  %v1936_v8 = vadd.f32 %v4756_v45, %v4748_v35  ;;  %v2890_v35 = vmax.f32 %v4894_v46, 0.0 }
 0x1d4   : > { %v2894_v2 = vmax.f32 %v2462_v23, 0.0  ;;  %v2465_v40 = vadd.f32 %v3838_v22, %v1920_v26  ;;  %v2456_v60 = vpop.f32.mrb[91].mxu1  ;;  %v1993_v54 = vpop.f32.mrb[91].mxu0 }
 0x1d5   : > { %v2892_v5 = vmax.f32 %v2454_v32, 0.0  ;;  %v2457_v20 = vadd.f32 %v2456_v60, %v1912_v6 }
 0x1d6   : > { %v3030_v36 = vmax.f32 %v2886_v28, %v2894_v2  ;;  %v2895_v14 = vmax.f32 %v2465_v40, 0.0  ;;  %v1949_v2 = vadd.f32 %v4756_v45, %v4789_v39 }
 0x1d7   : > { %v3028_v61 = vmax.f32 %v2884_v24, %v2892_v5  ;;  %v2893_v58 = vmax.f32 %v2457_v20, 0.0  ;;  %v2888_v5 = vmax.f32 %v4898_v59, 0.0 }
 0x1d8   : > { %v3062_v16 = vmax.f32 %v4830_v31, %v3030_v36  ;;  %v3031_v34 = vmax.f32 %v2887_v11, %v2895_v14  ;;  %v1928_v31 = vadd.f32 %v4756_v45, %v4734_v3  ;;  %v2891_v3 = vmax.f32 %v4902_v15, 0.0 }
 0x1d9   : > { %v3060_v53 = vmax.f32 %v4834_v27, %v3028_v61  ;;  %v3029_v26 = vmax.f32 %v2885_v18, %v2893_v58  ;;  %v3841_v23 = vpop.f32.mrb[92].mxu1  ;;  %v4930_v10 = vpop.f32.mrb[92].mxu0 }
 0x1da   : > { %v2478_v6 = vadd.f32 %v3841_v23, %v1933_v38  ;;  %v2469_v32 = vpop.f32.mrb[93].mxu1  ;;  %v1998_v22 = vpop.f32.mrb[93].mxu0  ;;  %3118 = vst.msk [vmem:[%s4922_s14 + $0x8] sm:$0xff] %vm3092_vm1, %v3062_v16  ;;  %v3063_v27 = vmax.f32 %v4839_v55, %v3031_v34  ;;  %v2889_v55 = vmax.f32 %v4904_v63, 0.0  ;;  %v3263_v46 = vmul.f32 %v3062_v16, %v3062_v16 }
 0x1db   : > { %v2470_v4 = vadd.f32 %v2469_v32, %v1925_v52  ;;  %v3842_v28 = vpop.f32.mrb[94].mxu1  ;;  %v4938_v29 = vpop.f32.mrb[94].mxu0  ;;  %3093 = vst.msk [vmem:[%s4922_s14] sm:$0xff] %vm3092_vm1, %v3060_v53  ;;  %v3061_v39 = vmax.f32 %v4843_v33, %v3029_v26  ;;  %v3261_v18 = vmul.f32 %v3060_v53, %v3060_v53  ;;  %v3190_v38 = vsel %vm3092_vm1, %v3060_v53, 0.0 }
 0x1dc   : > { %v2898_v40 = vmax.f32 %v2478_v6, 0.0  ;;  %v2481_v60 = vadd.f32 %v3842_v28, %v1936_v8  ;;  %v2472_v54 = vpop.f32.mrb[95].mxu1  ;;  %v2001_v24 = vpop.f32.mrb[95].mxu0  ;;  %3126 = vrot.lane.b32.xlu0 %v3063_v27, %s4266_s19  ;;  %v1941_v53 = vadd.f32 %v4756_v45, %v4763_v12  ;;  %v3193_v6 = vsel %vm3092_vm1, %v3062_v16, 0.0 }
 0x1dd   : > { %v2896_v20 = vmax.f32 %v2470_v4, 0.0  ;;  %v2473_v11 = vadd.f32 %v2472_v54, %v1928_v31  ;;  %v3191_v34 = vsel %vm3092_vm1, %v3061_v39, 0.0  ;;  %v3262_v8 = vmul.f32 %v3061_v39, %v3061_v39 }
 0x1de   : > { %v3034_v36 = vmax.f32 %v2890_v35, %v2898_v40  ;;  %v2899_v14 = vmax.f32 %v2481_v60, 0.0  ;;  %v3192_v63 = vadd.f32 %v3191_v34, %v3190_v38  ;;  %v1952_v31 = vadd.f32 %v4756_v45, %v4801_v17 }
 0x1df   : > { %v3032_v61 = vmax.f32 %v2888_v5, %v2896_v20  ;;  %v2897_v58 = vmax.f32 %v2473_v11, 0.0  ;;  %v3293_v4 = vsel %vm3092_vm1, %v3261_v18, 0.0  ;;  %v3294_v35 = vsel %vm3092_vm1, %v3262_v8, 0.0 }
 0x1e0   : > { %v3066_v59 = vmax.f32 %v4860_v49, %v3034_v36  ;;  %v3035_v15 = vmax.f32 %v2891_v3, %v2899_v14  ;;  %3101 = vrot.lane.b32.xlu0 %v3061_v39, %s4266_s19  ;;  %v1944_v49 = vadd.f32 %v4756_v45, %v4775_v21  ;;  %v3194_v28 = vadd.f32 %v3193_v6, %v3192_v63 }
 0x1e1   : > { %v3064_v52 = vmax.f32 %v4864_v47, %v3032_v61  ;;  %v3033_v23 = vmax.f32 %v2889_v55, %v2897_v58  ;;  %v3845_v33 = vpop.f32.mrb[96].mxu1  ;;  %v4956_v26 = vpop.f32.mrb[96].mxu0  ;;  %v3264_v16 = vmul.f32 %v3063_v27, %v3063_v27  ;;  %v3296_v5 = vsel %vm3092_vm1, %v3263_v46, 0.0 }
 0x1e2   : > { %v4963_v32 = vadd.f32 %v3845_v33, %v1949_v2  ;;  %v2485_v47 = vpop.f32.mrb[97].mxu1  ;;  %v2006_v22 = vpop.f32.mrb[97].mxu0  ;;  %3166 = vst.msk [vmem:[%s4922_s14 + $0x18] sm:$0xff] %vm3092_vm1, %v3066_v59  ;;  %v3295_v2 = vadd.f32 %v3294_v35, %v3293_v4  ;;  %v3195_v17 = vsel %vm3092_vm1, %v3063_v27, 0.0  ;;  %v3067_v36 = vmax.f32 %v4869_v41, %v3035_v15 }
 0x1e3   : > { %v3846_v12 = vpop.f32.mrb[98].mxu1  ;;  %v4971_v40 = vpop.f32.mrb[98].mxu0  ;;  %3142 = vst.msk [vmem:[%s4922_s14 + $0x10] sm:$0xff] %vm3092_vm1, %v3064_v52  ;;  %v3265_v21 = vmul.f32 %v3064_v52, %v3064_v52  ;;  %v4975_v60 = vadd.f32 %v2485_v47, %v1941_v53  ;;  %v3197_v11 = vsel %vm3092_vm1, %v3064_v52, 0.0  ;;  %v3065_v14 = vmax.f32 %v4873_v30, %v3033_v23 }
 0x1e4   : > { %v2488_v54 = vpop.f32.mrb[99].mxu1  ;;  %v2009_v24 = vpop.f32.mrb[99].mxu0  ;;  %v4979_v3 = vadd.f32 %v3846_v12, %v1952_v31  ;;  %v3297_v55 = vadd.f32 %v3296_v5, %v3295_v2  ;;  %v1965_v39 = vadd.f32 %v4756_v45, %v4845_v9  ;;  %v3196_v18 = vadd.f32 %v3195_v17, %v3194_v28  ;;  %3174 = vrot.lane.b32.xlu0 %v3067_v36, %s4266_s19 }
 0x1e5   : > { %v4981_v20 = vadd.f32 %v2488_v54, %v1944_v49  ;;  %v3300_v61 = vsel %vm3092_vm1, %v3265_v21, 0.0  ;;  %v3298_v46 = vsel %vm3092_vm1, %v3264_v16, 0.0  ;;  %v3199_v27 = vsel %vm3092_vm1, %v3065_v14, 0.0 }
 0x1e6   : > { %v3266_v58 = vmul.f32 %v3065_v14, %v3065_v14  ;;  %v1957_v38 = vadd.f32 %v4756_v45, %v4815_v57  ;;  %v3198_v34 = vadd.f32 %v3197_v11, %v3196_v18  ;;  %v3299_v41 = vadd.f32 %v3298_v46, %v3297_v55 }
 0x1e7   : > { %v1968_v9 = vadd.f32 %v4756_v45, %v4853_v44  ;;  %v3267_v52 = vmul.f32 %v3066_v59, %v3066_v59  ;;  %v1960_v53 = vadd.f32 %v4756_v45, %v4823_v62  ;;  %v3201_v31 = vsel %vm3092_vm1, %v3066_v59, 0.0 }
 0x1e8   : > { %v3302_v23 = vsel %vm3092_vm1, %v3266_v58, 0.0  ;;  %v3200_v49 = vadd.f32 %v3199_v27, %v3198_v34  ;;  %v3301_v57 = vadd.f32 %v3300_v61, %v3299_v41  ;;  %v3268_v44 = vmul.f32 %v3067_v36, %v3067_v36  ;;  %3150 = vrot.lane.b32.xlu0 %v3065_v14, %s4266_s19 }
 0x1e9   : > { %v3849_v15 = vpop.f32.mrb[100].mxu1  ;;  %v4994_v30 = vpop.f32.mrb[100].mxu0  ;;  %v3304_v62 = vsel %vm3092_vm1, %v3267_v52, 0.0  ;;  %v3203_v2 = vsel %vm3092_vm1, %v3067_v36, 0.0  ;;  %v1981_v59 = vadd.f32 %v4756_v45, %v4890_v56  ;;  %v1973_v17 = vadd.f32 %v4756_v45, %v4875_v51 }
 0x1ea   : > { %v4999_v63 = vadd.f32 %v3849_v15, %v1965_v39  ;;  %v2501_v8 = vpop.f32.mrb[101].mxu1  ;;  %v2014_v33 = vpop.f32.mrb[101].mxu0  ;;  %v3202_v12 = vadd.f32 %v3201_v31, %v3200_v49  ;;  %v3303_v21 = vadd.f32 %v3302_v23, %v3301_v57  ;;  %v3306_v5 = vsel %vm3092_vm1, %v3268_v44, 0.0 }
 0x1eb   : > { %v5003_v6 = vadd.f32 %v2501_v8, %v1957_v38  ;;  %v3850_v47 = vpop.f32.mrb[102].mxu1  ;;  %v5005_v22 = vpop.f32.mrb[102].mxu0  ;;  %v1984_v39 = vadd.f32 %v4756_v45, %v4900_v0  ;;  %v1976_v46 = vadd.f32 %v4756_v45, %v4883_v50  ;;  %v2902_v51 = vmax.f32 %v4963_v32, 0.0 }
 0x1ec   : > { %v5009_v4 = vadd.f32 %v3850_v47, %v1968_v9  ;;  %v2504_v28 = vpop.f32.mrb[103].mxu1  ;;  %v2017_v35 = vpop.f32.mrb[103].mxu0  ;;  %v3305_v54 = vadd.f32 %v3304_v62, %v3303_v21  ;;  %v5015_v24 = vadd.f32 %v3203_v2, %v3202_v12  ;;  %v2900_v9 = vmax.f32 %v4975_v60, 0.0 }
 0x1ed   : > { %v5011_v16 = vadd.f32 %v2504_v28, %v1960_v53  ;;  %v2903_v23 = vmax.f32 %v4979_v3, 0.0  ;;  %v2901_v50 = vmax.f32 %v4981_v20, 0.0  ;;  %v1997_v32 = vadd.f32 %v4756_v45, %v4930_v10 }
 0x1ee   : > { %v5024_v14 = vadd.f32 %v3306_v5, %v3305_v54  ;;  %v1989_v60 = vadd.f32 %v4756_v45, %v4910_v48  ;;  %v2000_v44 = vadd.f32 %v4756_v45, %v4938_v29  ;;  %v1992_v12 = vadd.f32 %v4756_v45, %v4916_v42 }
 0x1ef   : > { %v2906_v2 = vmax.f32 %v4999_v63, 0.0  ;;  %v2907_v29 = vmax.f32 %v5009_v4, 0.0  ;;  %v2905_v42 = vmax.f32 %v5011_v16, 0.0  ;;  %v2013_v63 = vadd.f32 %v4756_v45, %v4994_v30 }
 0x1f1   : > { %v3853_v11 = vpop.f32.mrb[104].mxu1  ;;  %v5022_v55 = vpop.f32.mrb[104].mxu0 }
 0x1f2   : > { %v2526_v36 = vadd.f32 %v3853_v11, %v1981_v59  ;;  %v2517_v18 = vpop.f32.mrb[105].mxu1  ;;  %v2022_v61 = vpop.f32.mrb[105].mxu0 }
 0x1f3   : > { %v2518_v56 = vadd.f32 %v2517_v18, %v1973_v17  ;;  %v3854_v27 = vpop.f32.mrb[106].mxu1  ;;  %v5030_v58 = vpop.f32.mrb[106].mxu0  ;;  %v2904_v17 = vmax.f32 %v5003_v6, 0.0  ;;  %v2005_v6 = vadd.f32 %v4756_v45, %v4956_v26 }
 0x1f4   : > { %v2910_v38 = vmax.f32 %v2526_v36, 0.0  ;;  %v2529_v34 = vadd.f32 %v3854_v27, %v1984_v39  ;;  %v2520_v41 = vpop.f32.mrb[107].mxu1  ;;  %v2025_v15 = vpop.f32.mrb[107].mxu0 }
 0x1f5   : > { %v2908_v52 = vmax.f32 %v2518_v56, 0.0  ;;  %v2521_v0 = vadd.f32 %v2520_v41, %v1976_v46  ;;  %v2008_v15 = vadd.f32 %v4756_v45, %v4971_v40 }
 0x1f6   : > { %v5035_v8 = vmax.f32 %v2902_v51, %v2910_v38  ;;  %v2911_v33 = vmax.f32 %v2529_v34, 0.0  ;;  %v2016_v38 = vadd.f32 %v4756_v45, %v5005_v22 }
 0x1f7   : > { %v5038_v53 = vmax.f32 %v2900_v9, %v2908_v52  ;;  %v2909_v49 = vmax.f32 %v2521_v0, 0.0 }
 0x1f8   : > { %v5042_v57 = vmax.f32 %v2903_v23, %v2911_v33 }
 0x1f9   : > { %v5046_v47 = vmax.f32 %v2901_v50, %v2909_v49  ;;  %v3857_v31 = vpop.f32.mrb[108].mxu1  ;;  %v2028_v3 = vpop.f32.mrb[108].mxu0  ;;  %v2021_v49 = vadd.f32 %v4756_v45, %v5022_v55 }
 0x1fa   : > { %v2542_v28 = vadd.f32 %v3857_v31, %v1997_v32  ;;  %v2533_v20 = vpop.f32.mrb[109].mxu1  ;;  %v2030_v35 = vpop.f32.mrb[109].mxu0  ;;  %v2029_v50 = vadd.f32 %v4756_v45, %v2028_v3 }
 0x1fb   : > { %v2534_v21 = vadd.f32 %v2533_v20, %v1989_v60  ;;  %v3858_v10 = vpop.f32.mrb[110].mxu1  ;;  %v2031_v62 = vpop.f32.mrb[110].mxu0 }
 0x1fc   : > { %v2914_v54 = vmax.f32 %v2542_v28, 0.0  ;;  %v2545_v48 = vadd.f32 %v3858_v10, %v2000_v44  ;;  %v2536_v59 = vpop.f32.mrb[111].mxu1  ;;  %v2033_v5 = vpop.f32.mrb[111].mxu0  ;;  %v2032_v60 = vadd.f32 %v4756_v45, %v2031_v62  ;;  %v2024_v28 = vadd.f32 %v4756_v45, %v5030_v58 }
 0x1fd   : > { %v2912_v11 = vmax.f32 %v2534_v21, 0.0  ;;  %v2537_v39 = vadd.f32 %v2536_v59, %v1992_v12 }
 0x1fe   : > { %v5055_v36 = vmax.f32 %v2906_v2, %v2914_v54  ;;  %v2915_v18 = vmax.f32 %v2545_v48, 0.0 }
 0x1ff   : > { %v5058_v61 = vmax.f32 %v2904_v17, %v2912_v11  ;;  %v2913_v46 = vmax.f32 %v2537_v39, 0.0 }
 0x200   : > { %v5062_v56 = vmax.f32 %v2907_v29, %v2915_v18 }
 0x201   : > { %v5066_v27 = vmax.f32 %v2905_v42, %v2913_v46  ;;  %v3861_v51 = vpop.f32.mrb[112].mxu1  ;;  %v2036_v4 = vpop.f32.mrb[112].mxu0 }
 0x202   : > { %v2558_v34 = vadd.f32 %v3861_v51, %v2013_v63  ;;  %v2549_v16 = vpop.f32.mrb[113].mxu1  ;;  %v2038_v41 = vpop.f32.mrb[113].mxu0  ;;  %v2037_v62 = vadd.f32 %v4756_v45, %v2036_v4 }
 0x203   : > { %v2550_v9 = vadd.f32 %v2549_v16, %v2005_v6  ;;  %v3862_v30 = vpop.f32.mrb[114].mxu1  ;;  %v2039_v52 = vpop.f32.mrb[114].mxu0 }
 0x204   : > { %v2561_v0 = vadd.f32 %v3862_v30, %v2016_v38  ;;  %v2552_v23 = vpop.f32.mrb[115].mxu1  ;;  %v2041_v33 = vpop.f32.mrb[115].mxu0  ;;  %v2040_v11 = vadd.f32 %v4756_v45, %v2039_v52  ;;  %v2918_v42 = vmax.f32 %v2558_v34, 0.0 }
 0x205   : > { %v2553_v26 = vadd.f32 %v2552_v23, %v2008_v15  ;;  %v2916_v38 = vmax.f32 %v2550_v9, 0.0 }
 0x206   : > { %v2919_v41 = vmax.f32 %v2561_v0, 0.0 }
 0x207   : > { %v2917_v23 = vmax.f32 %v2553_v26, 0.0 }
 0x209   : > { %v3865_v32 = vpop.f32.mrb[116].mxu1  ;;  %v2044_v22 = vpop.f32.mrb[116].mxu0 }
 0x20a   : > { %v5076_v31 = vadd.f32 %v3865_v32, %v2029_v50  ;;  %v2565_v44 = vpop.f32.mrb[117].mxu1  ;;  %v2046_v40 = vpop.f32.mrb[117].mxu0  ;;  %v2045_v2 = vadd.f32 %v4756_v45, %v2044_v22 }
 0x20b   : > { %v5080_v20 = vadd.f32 %v2565_v44, %v2021_v49  ;;  %v3866_v35 = vpop.f32.mrb[118].mxu1  ;;  %v2047_v12 = vpop.f32.mrb[118].mxu0 }
 0x20c   : > { %v5082_v21 = vadd.f32 %v3866_v35, %v2032_v60  ;;  %v2568_v3 = vpop.f32.mrb[119].mxu1  ;;  %v2049_v10 = vpop.f32.mrb[119].mxu0  ;;  %v2048_v59 = vadd.f32 %v4756_v45, %v2047_v12  ;;  %v2922_v32 = vmax.f32 %v5076_v31, 0.0 }
 0x20d   : > { %v5084_v55 = vadd.f32 %v2568_v3, %v2024_v28  ;;  %v2920_v0 = vmax.f32 %v5080_v20, 0.0 }
 0x20e   : > { %v2923_v26 = vmax.f32 %v5082_v21, 0.0 }
 0x20f   : > { %v2921_v20 = vmax.f32 %v5084_v55, 0.0 }
 0x211   : > { %v3869_v54 = vpop.f32.mrb[120].mxu1  ;;  %v2052_v48 = vpop.f32.mrb[120].mxu0 }
 0x212   : > { %v2590_v5 = vadd.f32 %v3869_v54, %v2045_v2  ;;  %v2581_v58 = vpop.f32.mrb[121].mxu1  ;;  %v2054_v17 = vpop.f32.mrb[121].mxu0  ;;  %v2053_v34 = vadd.f32 %v4756_v45, %v2052_v48 }
 0x213   : > { %v2582_v39 = vadd.f32 %v2581_v58, %v2037_v62  ;;  %v3870_v29 = vpop.f32.mrb[122].mxu1  ;;  %v2055_v18 = vpop.f32.mrb[122].mxu0 }
 0x214   : > { %v2926_v46 = vmax.f32 %v2590_v5, 0.0  ;;  %v2593_v63 = vadd.f32 %v3870_v29, %v2048_v59  ;;  %v2584_v6 = vpop.f32.mrb[123].mxu1  ;;  %v2057_v51 = vpop.f32.mrb[123].mxu0  ;;  %v2056_v12 = vadd.f32 %v4756_v45, %v2055_v18 }
 0x215   : > { %v2924_v16 = vmax.f32 %v2582_v39, 0.0  ;;  %v2585_v4 = vadd.f32 %v2584_v6, %v2040_v11 }
 0x216   : > { %v3038_v15 = vmax.f32 %v2918_v42, %v2926_v46  ;;  %v2927_v30 = vmax.f32 %v2593_v63, 0.0 }
 0x217   : > { %v3036_v33 = vmax.f32 %v2916_v38, %v2924_v16  ;;  %v2925_v50 = vmax.f32 %v2585_v4, 0.0 }
 0x218   : > { %v3070_v52 = vmax.f32 %v5035_v8, %v3038_v15  ;;  %v3039_v49 = vmax.f32 %v2919_v41, %v2927_v30 }
 0x219   : > { %v3068_v22 = vmax.f32 %v5038_v53, %v3036_v33  ;;  %v3037_v60 = vmax.f32 %v2917_v23, %v2925_v50  ;;  %v2060_v9 = vpop.f32.mrb[124].mxu0  ;;  %v3873_v44 = vpop.f32.mrb[124].mxu1 }
 0x21a   : > { %v2061_v40 = vadd.f32 %v4756_v45, %v2060_v9  ;;  %v2062_v28 = vpop.f32.mrb[125].mxu0  ;;  %v2597_v35 = vpop.f32.mrb[125].mxu1  ;;  %v3071_v8 = vmax.f32 %v5042_v57, %v3039_v49  ;;  %3119 = vst.msk [vmem:[%s4922_s14 + $0x28] sm:$0xff] %vm3092_vm1, %v3070_v52  ;;  %v3271_v59 = vmul.f32 %v3070_v52, %v3070_v52  ;;  %v3209_v16 = vsel %vm3092_vm1, %v3070_v52, 0.0 }
 0x21b   : > { %v3269_v31 = vmul.f32 %v3068_v22, %v3068_v22  ;;  %v2598_v53 = vadd.f32 %v2597_v35, %v2053_v34  ;;  %v2063_v3 = vpop.f32.mrb[126].mxu0  ;;  %v3874_v10 = vpop.f32.mrb[126].mxu1  ;;  %v3069_v2 = vmax.f32 %v5046_v47, %v3037_v60  ;;  %3094 = vst.msk [vmem:[%s4922_s14 + $0x20] sm:$0xff] %vm3092_vm1, %v3068_v22  ;;  %v3205_v21 = vsel %vm3092_vm1, %v3068_v22, 0.0 }
 0x21c   : > { %v2606_v62 = vadd.f32 %v3873_v44, %v2061_v40  ;;  %v2064_v54 = vadd.f32 %v4756_v45, %v2063_v3  ;;  %v2600_v57 = vpop.f32.mrb[127].mxu1  ;;  %3128 = vrot.lane.b32.xlu1 %v3071_v8, %s4266_s19  ;;  %v2065_v48 = vpop.f32.mrb[127].mxu0  ;;  %v3272_v42 = vmul.f32 %v3071_v8, %v3071_v8  ;;  %v3206_v46 = vadd.f32 %v3205_v21, %v5015_v24 }
 0x21d   : > { %v3308_v5 = vsel %vm3092_vm1, %v3269_v31, 0.0  ;;  %v2928_v58 = vmax.f32 %v2598_v53, 0.0  ;;  %v2601_v17 = vadd.f32 %v2600_v57, %v2056_v12  ;;  %3103 = vrot.lane.b32.xlu0 %v3069_v2, %s4266_s19  ;;  %v3207_v55 = vsel %vm3092_vm1, %v3069_v2, 0.0 }
 0x21e   : > { %v2930_v47 = vmax.f32 %v2606_v62, 0.0  ;;  %v2609_v11 = vadd.f32 %v3874_v10, %v2064_v54  ;;  %v3270_v39 = vmul.f32 %v3069_v2, %v3069_v2  ;;  %v3309_v38 = vadd.f32 %v3308_v5, %v5024_v14 }
 0x21f   : > { %v3040_v29 = vmax.f32 %v2920_v0, %v2928_v58  ;;  %v2929_v18 = vmax.f32 %v2601_v17, 0.0  ;;  %v3208_v15 = vadd.f32 %v3207_v55, %v3206_v46  ;;  %v3312_v14 = vsel %vm3092_vm1, %v3271_v59, 0.0 }
 0x220   : > { %v3042_v63 = vmax.f32 %v2922_v32, %v2930_v47  ;;  %v2931_v6 = vmax.f32 %v2609_v11, 0.0  ;;  %v3310_v51 = vsel %vm3092_vm1, %v3270_v39, 0.0  ;;  %v3211_v44 = vsel %vm3092_vm1, %v3071_v8, 0.0 }
 0x221   : > { %v3072_v4 = vmax.f32 %v5058_v61, %v3040_v29  ;;  %v3041_v41 = vmax.f32 %v2921_v20, %v2929_v18  ;;  %v2068_v30 = vpop.f32.mrb[128].mxu0  ;;  %v3877_v23 = vpop.f32.mrb[128].mxu1  ;;  %v3311_v49 = vadd.f32 %v3310_v51, %v3309_v38  ;;  %v3210_v52 = vadd.f32 %v3209_v16, %v3208_v15 }
 0x222   : > { %v3074_v33 = vmax.f32 %v5055_v36, %v3042_v63  ;;  %v3043_v50 = vmax.f32 %v2923_v26, %v2931_v6  ;;  %v2069_v24 = vadd.f32 %v4756_v45, %v2068_v30  ;;  %v2070_v32 = vpop.f32.mrb[129].mxu0  ;;  %v2613_v34 = vpop.f32.mrb[129].mxu1  ;;  %v3314_v36 = vsel %vm3092_vm1, %v3272_v42, 0.0  ;;  %v5146_v63 = vld [vmem:[%s5568_s2] ss:$0 sm:$0xff] }
 0x223   : > { %v3273_v22 = vmul.f32 %v3072_v4, %v3072_v4  ;;  %v2071_v60 = vpop.f32.mrb[130].mxu0  ;;  %v3878_v61 = vpop.f32.mrb[130].mxu1  ;;  %v3073_v9 = vmax.f32 %v5066_v27, %v3041_v41  ;;  %3143 = vst.msk [vmem:[%s4922_s14 + $0x30] sm:$0xff] %vm3092_vm1, %v3072_v4  ;;  %v3313_v0 = vadd.f32 %v3312_v14, %v3311_v49  ;;  %v3213_v35 = vsel %vm3092_vm1, %v3072_v4, 0.0 }
 0x224   : > { %v5124_v26 = vadd.f32 %v2613_v34, %v2069_v24  ;;  %v2616_v40 = vpop.f32.mrb[131].mxu1  ;;  %v2073_v28 = vpop.f32.mrb[131].mxu0  ;;  %3167 = vst.msk [vmem:[%s4922_s14 + $0x38] sm:$0xff] %vm3092_vm1, %v3074_v33  ;;  %v2072_v12 = vadd.f32 %v4756_v45, %v2071_v60  ;;  %v3275_v53 = vmul.f32 %v3074_v33, %v3074_v33  ;;  %v3212_v8 = vadd.f32 %v3211_v44, %v3210_v52 }
 0x225   : > { %v3316_v31 = vsel %vm3092_vm1, %v3273_v22, 0.0  ;;  %v3274_v27 = vmul.f32 %v3073_v9, %v3073_v9  ;;  %3152 = vrot.lane.b32.xlu1 %v3073_v9, %s4266_s19  ;;  %v3315_v3 = vadd.f32 %v3314_v36, %v3313_v0  ;;  %v3215_v2 = vsel %vm3092_vm1, %v3073_v9, 0.0 }
 0x226   : > { %v5132_v10 = vadd.f32 %v2616_v40, %v2072_v12  ;;  %v3075_v21 = vmax.f32 %v5062_v56, %v3043_v50  ;;  %v3214_v62 = vadd.f32 %v3213_v35, %v3212_v8  ;;  %v3217_v55 = vsel %vm3092_vm1, %v3074_v33, 0.0 }
 0x227   : > { %v3318_v20 = vsel %vm3092_vm1, %v3274_v27, 0.0  ;;  %v3317_v54 = vadd.f32 %v3316_v31, %v3315_v3  ;;  %v3320_v39 = vsel %vm3092_vm1, %v3275_v53, 0.0 }
 0x228   : > { %v3276_v59 = vmul.f32 %v3075_v21, %v3075_v21  ;;  %v3216_v5 = vadd.f32 %v3215_v2, %v3214_v62  ;;  %v3219_v38 = vsel %vm3092_vm1, %v3075_v21, 0.0 }
 0x229   : > { %v2076_v57 = vpop.f32.mrb[132].mxu0  ;;  %v3881_v48 = vpop.f32.mrb[132].mxu1  ;;  %3176 = vrot.lane.b32.xlu1 %v3075_v21, %s4266_s19  ;;  %v3319_v58 = vadd.f32 %v3318_v20, %v3317_v54 }
 0x22a   : > { %v2077_v17 = vadd.f32 %v4756_v45, %v2076_v57  ;;  %v2078_v47 = vpop.f32.mrb[133].mxu0  ;;  %v2629_v11 = vpop.f32.mrb[133].mxu1  ;;  %v3218_v42 = vadd.f32 %v3217_v55, %v3216_v5  ;;  %v3322_v16 = vsel %vm3092_vm1, %v3276_v59, 0.0 }
 0x22b   : > { %v2079_v29 = vpop.f32.mrb[134].mxu0  ;;  %v3882_v18 = vpop.f32.mrb[134].mxu1  ;;  %v3321_v46 = vadd.f32 %v3320_v39, %v3319_v58  ;;  %v2932_v58 = vmax.f32 %v5124_v26, 0.0 }
 0x22c   : > { %v5141_v56 = vadd.f32 %v3877_v23, %v2077_v17  ;;  %v2080_v6 = vadd.f32 %v5146_v63, %v2079_v29  ;;  %v2632_v45 = vpop.f32.mrb[135].mxu1  ;;  %v2081_v51 = vpop.f32.mrb[135].mxu0  ;;  %v5151_v4 = vadd.f32 %v3219_v38, %v3218_v42 }
 0x22d   : > { %v5153_v41 = vadd.f32 %v3322_v16, %v3321_v46 }
 0x22e   : > { %v5155_v15 = vadd.f32 %v3878_v61, %v2080_v6 }
 0x231   : > { %v2084_v30 = vpop.f32.mrb[136].mxu0  ;;  %v3885_v23 = vpop.f32.mrb[136].mxu1 }
 0x232   : > { %v2085_v33 = vadd.f32 %v5146_v63, %v2084_v30  ;;  %v2086_v50 = vpop.f32.mrb[137].mxu0  ;;  %v2645_v49 = vpop.f32.mrb[137].mxu1 }
 0x233   : > { %v2087_v24 = vpop.f32.mrb[138].mxu0  ;;  %v3886_v32 = vpop.f32.mrb[138].mxu1 }
 0x234   : > { %v5158_v34 = vadd.f32 %v2629_v11, %v2085_v33  ;;  %v2088_v14 = vadd.f32 %v5146_v63, %v2087_v24  ;;  %v2648_v22 = vpop.f32.mrb[139].mxu1  ;;  %v2089_v52 = vpop.f32.mrb[139].mxu0  ;;  %v2933_v11 = vmax.f32 %v5132_v10, 0.0  ;;  %v2934_v33 = vmax.f32 %v5141_v56, 0.0 }
 0x236   : > { %v5161_v60 = vadd.f32 %v2632_v45, %v2088_v14  ;;  %v2935_v14 = vmax.f32 %v5155_v15, 0.0 }
 0x239   : > { %v2092_v9 = vpop.f32.mrb[140].mxu0  ;;  %v5163_v44 = vpop.f32.mrb[140].mxu1 }
 0x23a   : > { %v2093_v61 = vadd.f32 %v5146_v63, %v2092_v9  ;;  %v2094_v36 = vpop.f32.mrb[141].mxu0  ;;  %v2661_v0 = vpop.f32.mrb[141].mxu1 }
 0x23b   : > { %v2095_v40 = vpop.f32.mrb[142].mxu0  ;;  %v5166_v28 = vpop.f32.mrb[142].mxu1 }
 0x23c   : > { %v5168_v35 = vadd.f32 %v3881_v48, %v2093_v61  ;;  %v2096_v31 = vadd.f32 %v5146_v63, %v2095_v40  ;;  %v2664_v12 = vpop.f32.mrb[143].mxu1  ;;  %v2097_v27 = vpop.f32.mrb[143].mxu0 }
 0x23e   : > { %v5171_v53 = vadd.f32 %v3882_v18, %v2096_v31 }
 0x241   : > { %v2100_v8 = vpop.f32.mrb[144].mxu0  ;;  %v5173_v3 = vpop.f32.mrb[144].mxu1 }
 0x242   : > { %v2101_v2 = vadd.f32 %v5146_v63, %v2100_v8  ;;  %v2102_v20 = vpop.f32.mrb[145].mxu0  ;;  %v5176_v21 = vpop.f32.mrb[145].mxu1 }
 0x243   : > { %v2103_v62 = vpop.f32.mrb[146].mxu0  ;;  %v5178_v54 = vpop.f32.mrb[146].mxu1 }
 0x244   : > { %v2646_v57 = vadd.f32 %v2645_v49, %v2101_v2  ;;  %v2104_v48 = vadd.f32 %v5146_v63, %v2103_v62  ;;  %v5181_v59 = vpop.f32.mrb[147].mxu1  ;;  %v2105_v5 = vpop.f32.mrb[147].mxu0  ;;  %v2936_v62 = vmax.f32 %v5158_v34, 0.0 }
 0x245   : > { %v2937_v5 = vmax.f32 %v5161_v60, 0.0 }
 0x246   : > { %v2940_v17 = vmax.f32 %v2646_v57, 0.0  ;;  %v2649_v47 = vadd.f32 %v2648_v22, %v2104_v48 }
 0x248   : > { %v5185_v55 = vmax.f32 %v2932_v58, %v2940_v17  ;;  %v2941_v39 = vmax.f32 %v2649_v47, 0.0 }
 0x249   : > { %v2108_v29 = vpop.f32.mrb[148].mxu0  ;;  %v5187_v18 = vpop.f32.mrb[148].mxu1 }
 0x24a   : > { %v5189_v42 = vmax.f32 %v2933_v11, %v2941_v39  ;;  %v2109_v46 = vadd.f32 %v5146_v63, %v2108_v29  ;;  %v2110_v6 = vpop.f32.mrb[149].mxu0  ;;  %v5192_v45 = vpop.f32.mrb[149].mxu1 }
 0x24b   : > { %v2111_v51 = vpop.f32.mrb[150].mxu0  ;;  %v5194_v26 = vpop.f32.mrb[150].mxu1 }
 0x24c   : > { %v2654_v38 = vadd.f32 %v3885_v23, %v2109_v46  ;;  %v2112_v10 = vadd.f32 %v5146_v63, %v2111_v51  ;;  %v5197_v16 = vpop.f32.mrb[151].mxu1  ;;  %v2113_v30 = vpop.f32.mrb[151].mxu0 }
 0x24d   : > { %v2938_v30 = vmax.f32 %v5168_v35, 0.0  ;;  %v2208_v35 = vadd.f32 %v5146_v63, %v4550_v19 }
 0x24e   : > { %v2942_v50 = vmax.f32 %v2654_v38, 0.0  ;;  %v2657_v49 = vadd.f32 %v3886_v32, %v2112_v10  ;;  %v3127_v24 = vpop.permute.xlu0 %3126 }
 0x24f   : > { %3138 = vst.msk [vmem:[%s4922_s14 + $0x8] sm:$0xff] %vm3113_vm2, %v3127_v24  ;;  %v2205_v24 = vadd.f32 %v5146_v63, %v4544_v13 }
 0x250   : > { %v5201_v22 = vmax.f32 %v2934_v33, %v2942_v50  ;;  %v2943_v52 = vmax.f32 %v2657_v49, 0.0 }
 0x251   : > { %v2116_v23 = vpop.f32.mrb[152].mxu0  ;;  %v5205_v9 = vpop.f32.mrb[152].mxu1 }
 0x252   : > { %v5207_v61 = vmax.f32 %v2935_v14, %v2943_v52  ;;  %v2117_v36 = vadd.f32 %v5146_v63, %v2116_v23  ;;  %v2118_v40 = vpop.f32.mrb[153].mxu0  ;;  %v5210_v56 = vpop.f32.mrb[153].mxu1  ;;  %v2197_v23 = vadd.f32 %v5146_v63, %v4530_v1 }
 0x253   : > { %v3102_v31 = vpop.permute.xlu0 %3101  ;;  %v2119_v32 = vpop.f32.mrb[154].mxu0 }
 0x254   : > { %v2662_v27 = vadd.f32 %v2661_v0, %v2117_v36  ;;  %3114 = vst.msk [vmem:[%s4922_s14] sm:$0xff] %vm3113_vm2, %v3102_v31  ;;  %v2120_v15 = vadd.f32 %v5146_v63, %v2119_v32  ;;  %v5215_v8 = vpop.f32.mrb[154].mxu1  ;;  %v2121_v2 = vpop.f32.mrb[155].mxu0 }
 0x255   : > { %v5217_v20 = vpop.f32.mrb[155].mxu1 }
 0x256   : > { %v2944_v57 = vmax.f32 %v2662_v27, 0.0  ;;  %v2665_v48 = vadd.f32 %v2664_v12, %v2120_v15 }
 0x257   : > { %v3175_v39 = vpop.permute.xlu0 %3174 }
 0x258   : > { %v5221_v58 = vmax.f32 %v2936_v62, %v2944_v57  ;;  %v2945_v17 = vmax.f32 %v2665_v48, 0.0  ;;  %3186 = vst.msk [vmem:[%s4922_s14 + $0x18] sm:$0xff] %vm3113_vm2, %v3175_v39  ;;  %v2221_v39 = vadd.f32 %v5146_v63, %v4572_v37 }
 0x259   : > { %v2124_v0 = vpop.f32.mrb[156].mxu0  ;;  %v5223_v47 = vpop.f32.mrb[156].mxu1 }
 0x25a   : > { %v5225_v11 = vmax.f32 %v2937_v5, %v2945_v17  ;;  %v2125_v29 = vadd.f32 %v5146_v63, %v2124_v0  ;;  %v2126_v46 = vpop.f32.mrb[157].mxu0  ;;  %v5230_v34 = vpop.f32.mrb[157].mxu1 }
 0x25b   : > { %v2127_v12 = vpop.f32.mrb[158].mxu0  ;;  %v5234_v51 = vpop.f32.mrb[158].mxu1 }
 0x25c   : > { %v2670_v60 = vadd.f32 %v5163_v44, %v2125_v29  ;;  %v2128_v6 = vadd.f32 %v5146_v63, %v2127_v12  ;;  %v2129_v38 = vpop.f32.mrb[159].mxu0  ;;  %v5236_v10 = vpop.f32.mrb[159].mxu1  ;;  %v2939_v44 = vmax.f32 %v5171_v53, 0.0  ;;  %v2200_v53 = vadd.f32 %v5146_v63, %v4536_v7 }
 0x25d   : > { %v3151_v50 = vpop.permute.xlu0 %3150  ;;  %v2213_v7 = vadd.f32 %v5146_v63, %v4558_v25 }
 0x25e   : > { %v2946_v33 = vmax.f32 %v2670_v60, 0.0  ;;  %v2673_v49 = vadd.f32 %v5166_v28, %v2128_v6  ;;  %3162 = vst.msk [vmem:[%s4922_s14 + $0x10] sm:$0xff] %vm3113_vm2, %v3151_v50 }
 0x260   : > { %v5245_v14 = vmax.f32 %v2938_v30, %v2946_v33  ;;  %v2947_v52 = vmax.f32 %v2673_v49, 0.0  ;;  %v5596_v30 = vld [vmem:[#allocation2_spill] sm:$0xff] }
 0x261   : > { %v2132_v36 = vpop.f32.mrb[160].mxu0  ;;  %v3909_v40 = vpop.f32.mrb[160].mxu1 }
 0x262   : > { %v5251_v31 = vmax.f32 %v2939_v44, %v2947_v52  ;;  %v2133_v28 = vadd.f32 %v5146_v63, %v2132_v36  ;;  %v2750_v32 = vadd.f32 %v3909_v40, %v2205_v24  ;;  %v2134_v27 = vpop.f32.mrb[161].mxu0  ;;  %v2741_v13 = vpop.f32.mrb[161].mxu1  ;;  %v5597_v36 = vld [vmem:[#allocation5_spill] sm:$0xff] }
 0x263   : > { %v2742_v15 = vadd.f32 %v2741_v13, %v2197_v23  ;;  %v2135_v2 = vpop.f32.mrb[162].mxu0  ;;  %v3910_v62 = vpop.f32.mrb[162].mxu1  ;;  %v2237_v40 = vadd.f32 %v5146_v63, %v5597_v36  ;;  %v5599_v13 = vld [vmem:[#allocation6_spill] sm:$0xff] }
 0x264   : > { %v5257_v1 = vadd.f32 %v5176_v21, %v2133_v28  ;;  %v2136_v57 = vadd.f32 %v5146_v63, %v2135_v2  ;;  %v2753_v48 = vadd.f32 %v3910_v62, %v2208_v35  ;;  %v2744_v19 = vpop.f32.mrb[163].mxu1  ;;  %v2137_v5 = vpop.f32.mrb[163].mxu0  ;;  %v2224_v21 = vadd.f32 %v5146_v63, %v4578_v43  ;;  %v5598_v35 = vld [vmem:[#allocation3_spill] sm:$0xff] }
 0x265   : > { %v2745_v17 = vadd.f32 %v2744_v19, %v2200_v53  ;;  %v2229_v28 = vadd.f32 %v5146_v63, %v5598_v35  ;;  %v2240_v53 = vadd.f32 %v5146_v63, %v5599_v13  ;;  %v5600_v5 = vld [vmem:[#allocation4_spill] sm:$0xff]  ;;  %v5602_v13 = vld [vmem:[#allocation7_spill] sm:$0xff] }
 0x266   : > { %v5261_v0 = vadd.f32 %v5181_v59, %v2136_v57  ;;  %v2216_v59 = vadd.f32 %v5146_v63, %v5596_v30 }
 0x269   : > { %v2140_v29 = vpop.f32.mrb[164].mxu0  ;;  %v3913_v46 = vpop.f32.mrb[164].mxu1 }
 0x26a   : > { %v2141_v12 = vadd.f32 %v5146_v63, %v2140_v29  ;;  %v5270_v60 = vadd.f32 %v3913_v46, %v2221_v39  ;;  %v2142_v6 = vpop.f32.mrb[165].mxu0  ;;  %v2757_v38 = vpop.f32.mrb[165].mxu1  ;;  %v2966_v39 = vmax.f32 %v2750_v32, 0.0 }
 0x26b   : > { %v5274_v33 = vadd.f32 %v2757_v38, %v2213_v7  ;;  %v2143_v37 = vpop.f32.mrb[166].mxu0  ;;  %v3914_v50 = vpop.f32.mrb[166].mxu1 }
 0x26c   : > { %v5277_v25 = vadd.f32 %v5173_v3, %v2141_v12  ;;  %v2144_v49 = vadd.f32 %v5146_v63, %v2143_v37  ;;  %v5280_v24 = vadd.f32 %v3914_v50, %v2224_v21  ;;  %v2760_v43 = vpop.f32.mrb[167].mxu1  ;;  %v2145_v44 = vpop.f32.mrb[167].mxu0  ;;  %v2964_v37 = vmax.f32 %v2742_v15, 0.0 }
 0x26d   : > { %v5282_v52 = vadd.f32 %v2760_v43, %v2216_v59  ;;  %v2967_v43 = vmax.f32 %v2753_v48, 0.0  ;;  %v2245_v15 = vadd.f32 %v5146_v63, %v5602_v13 }
 0x26e   : > { %v5285_v23 = vadd.f32 %v5178_v54, %v2144_v49  ;;  %v2232_v54 = vadd.f32 %v5146_v63, %v5600_v5 }
 0x271   : > { %v2148_v27 = vpop.f32.mrb[168].mxu0  ;;  %v3917_v3 = vpop.f32.mrb[168].mxu1 }
 0x272   : > { %v2149_v2 = vadd.f32 %v5146_v63, %v2148_v27  ;;  %v2782_v62 = vadd.f32 %v3917_v3, %v2237_v40  ;;  %v2150_v57 = vpop.f32.mrb[169].mxu0  ;;  %v2773_v19 = vpop.f32.mrb[169].mxu1  ;;  %v2965_v40 = vmax.f32 %v2745_v17, 0.0 }
 0x273   : > { %v2774_v7 = vadd.f32 %v2773_v19, %v2229_v28  ;;  %v2151_v29 = vpop.f32.mrb[170].mxu0  ;;  %v3918_v46 = vpop.f32.mrb[170].mxu1  ;;  %v5601_v28 = vld [vmem:[#allocation9_spill] sm:$0xff] }
 0x274   : > { %v5297_v21 = vadd.f32 %v5192_v45, %v2149_v2  ;;  %v2974_v12 = vmax.f32 %v2782_v62, 0.0  ;;  %v2152_v6 = vadd.f32 %v5146_v63, %v2151_v29  ;;  %v2785_v38 = vadd.f32 %v3918_v46, %v2240_v53  ;;  %v2776_v30 = vpop.f32.mrb[171].mxu1  ;;  %v2153_v59 = vpop.f32.mrb[171].mxu0  ;;  %v5603_v62 = vld [vmem:[#allocation10_spill] sm:$0xff] }
 0x275   : > { %v2972_v50 = vmax.f32 %v2774_v7, 0.0  ;;  %v2777_v49 = vadd.f32 %v2776_v30, %v2232_v54  ;;  %v2253_v27 = vadd.f32 %v5146_v63, %v5601_v28  ;;  %v5604_v54 = vld [vmem:[#allocation8_spill] sm:$0xff]  ;;  %v2970_v7 = vmax.f32 %v5270_v60, 0.0 }
 0x276   : > { %v5300_v44 = vmax.f32 %v2966_v39, %v2974_v12  ;;  %v5303_v32 = vadd.f32 %v5197_v16, %v2152_v6  ;;  %v2975_v36 = vmax.f32 %v2785_v38, 0.0  ;;  %v2256_v16 = vadd.f32 %v5146_v63, %v5603_v62 }
 0x277   : > { %v5305_v35 = vmax.f32 %v2964_v37, %v2972_v50  ;;  %v2973_v45 = vmax.f32 %v2777_v49, 0.0  ;;  %v2248_v39 = vadd.f32 %v5146_v63, %v5604_v54  ;;  %v2968_v49 = vmax.f32 %v5274_v33, 0.0  ;;  %v5606_v33 = vld [vmem:[#allocation11_spill] sm:$0xff] }
 0x278   : > { %v5309_v3 = vmax.f32 %v2967_v43, %v2975_v36  ;;  %v2261_v62 = vadd.f32 %v5146_v63, %v5606_v33  ;;  %v2949_v33 = vmax.f32 %v5261_v0, 0.0 }
 0x279   : > { %v5313_v53 = vmax.f32 %v2965_v40, %v2973_v45  ;;  %v2156_v48 = vpop.f32.mrb[172].mxu0  ;;  %v3921_v2 = vpop.f32.mrb[172].mxu1  ;;  %v2971_v40 = vmax.f32 %v5280_v24, 0.0 }
 0x27a   : > { %v2157_v17 = vadd.f32 %v5146_v63, %v2156_v48  ;;  %v2798_v57 = vadd.f32 %v3921_v2, %v2253_v27  ;;  %v2158_v19 = vpop.f32.mrb[173].mxu0  ;;  %v2789_v5 = vpop.f32.mrb[173].mxu1 }
 0x27b   : > { %v2790_v29 = vadd.f32 %v2789_v5, %v2245_v15  ;;  %v2159_v46 = vpop.f32.mrb[174].mxu0  ;;  %v3922_v12 = vpop.f32.mrb[174].mxu1  ;;  %v5605_v15 = vld [vmem:[#allocation13_spill] sm:$0xff] }
 0x27c   : > { %v5322_v6 = vadd.f32 %v5187_v18, %v2157_v17  ;;  %v2978_v38 = vmax.f32 %v2798_v57, 0.0  ;;  %v2160_v30 = vadd.f32 %v5146_v63, %v2159_v46  ;;  %v2801_v59 = vadd.f32 %v3922_v12, %v2256_v16  ;;  %v2792_v37 = vpop.f32.mrb[175].mxu1  ;;  %v2161_v50 = vpop.f32.mrb[175].mxu0 }
 0x27d   : > { %v2976_v43 = vmax.f32 %v2790_v29, 0.0  ;;  %v2793_v36 = vadd.f32 %v2792_v37, %v2248_v39  ;;  %v2969_v18 = vmax.f32 %v5282_v52, 0.0  ;;  %v2269_v48 = vadd.f32 %v5146_v63, %v5605_v15  ;;  %v5608_v39 = vld [vmem:[#allocation12_spill] sm:$0xff] }
 0x27e   : > { %v5327_v45 = vmax.f32 %v2970_v7, %v2978_v38  ;;  %v5330_v60 = vadd.f32 %v5194_v26, %v2160_v30  ;;  %v2979_v28 = vmax.f32 %v2801_v59, 0.0  ;;  %v5607_v26 = vld [vmem:[#allocation14_spill] sm:$0xff]  ;;  %v2264_v7 = vadd.f32 %v5146_v63, %v5608_v39 }
 0x27f   : > { %v5333_v27 = vmax.f32 %v2968_v49, %v2976_v43  ;;  %v2977_v13 = vmax.f32 %v2793_v36, 0.0  ;;  %v2272_v57 = vadd.f32 %v5146_v63, %v5607_v26  ;;  %v2948_v43 = vmax.f32 %v5257_v1, 0.0  ;;  %v5613_v1 = vld [vmem:[#allocation19_spill] sm:$0xff] }
 0x280   : > { %v5337_v2 = vmax.f32 %v2971_v40, %v2979_v28  ;;  %v5609_v28 = vld [vmem:[#allocation15_spill] sm:$0xff] }
 0x281   : > { %v5341_v24 = vmax.f32 %v2969_v18, %v2977_v13  ;;  %v2164_v16 = vpop.f32.mrb[176].mxu0  ;;  %v3925_v17 = vpop.f32.mrb[176].mxu1  ;;  %v2277_v18 = vadd.f32 %v5146_v63, %v5609_v28  ;;  %v5610_v13 = vld [vmem:[#allocation16_spill] sm:$0xff] }
 0x282   : > { %v2165_v52 = vadd.f32 %v5146_v63, %v2164_v16  ;;  %v5346_v19 = vadd.f32 %v3925_v17, %v2269_v48  ;;  %v2166_v5 = vpop.f32.mrb[177].mxu0  ;;  %v2805_v54 = vpop.f32.mrb[177].mxu1  ;;  %v2280_v15 = vadd.f32 %v5146_v63, %v5610_v13  ;;  %v5612_v17 = vld [vmem:[#allocation18_spill] sm:$0xff]  ;;  %v5618_v28 = vld [vmem:[#allocation24_spill] sm:$0xff] }
 0x283   : > { %v5350_v29 = vadd.f32 %v2805_v54, %v2261_v62  ;;  %v2167_v46 = vpop.f32.mrb[178].mxu0  ;;  %v3926_v12 = vpop.f32.mrb[178].mxu1  ;;  %v2288_v26 = vadd.f32 %v5146_v63, %v5612_v17  ;;  %v5615_v5 = vld [vmem:[#allocation21_spill] sm:$0xff]  ;;  %v5389_v13 = vadd.f32 %v5146_v63, %v5618_v28  ;;  %v2952_v28 = vmax.f32 %v5297_v21, 0.0 }
 0x284   : > { %v2710_v38 = vadd.f32 %v5210_v56, %v2165_v52  ;;  %v2168_v30 = vadd.f32 %v5146_v63, %v2167_v46  ;;  %v5354_v59 = vadd.f32 %v3926_v12, %v2272_v57  ;;  %v2808_v37 = vpop.f32.mrb[179].mxu1  ;;  %v2169_v50 = vpop.f32.mrb[179].mxu0  ;;  %v5611_v56 = vld [vmem:[#allocation17_spill] sm:$0xff]  ;;  %v2293_v57 = vadd.f32 %v5146_v63, %v5613_v1 }
 0x285   : > { %v5356_v49 = vadd.f32 %v2808_v37, %v2264_v7  ;;  %v2285_v48 = vadd.f32 %v5146_v63, %v5611_v56  ;;  %v2301_v54 = vadd.f32 %v5146_v63, %v5615_v5  ;;  %v5616_v50 = vld [vmem:[#allocation22_spill] sm:$0xff] }
 0x286   : > { %v2956_v36 = vmax.f32 %v2710_v38, 0.0  ;;  %v2713_v40 = vadd.f32 %v5217_v20, %v2168_v30  ;;  %v5614_v20 = vld [vmem:[#allocation20_spill] sm:$0xff] }
 0x287   : > { %v5373_v52 = vadd.f32 %v5146_v63, %v5614_v20 }
 0x288   : > { %v3044_v62 = vmax.f32 %v2948_v43, %v2956_v36  ;;  %v2957_v16 = vmax.f32 %v2713_v40, 0.0  ;;  %v2304_v43 = vadd.f32 %v5146_v63, %v5616_v50  ;;  %v5617_v36 = vld [vmem:[#allocation23_spill] sm:$0xff] }
 0x289   : > { %v2172_v39 = vpop.f32.mrb[180].mxu0  ;;  %v3929_v7 = vpop.f32.mrb[180].mxu1  ;;  %v5385_v40 = vadd.f32 %v5146_v63, %v5617_v36 }
 0x28a   : > { %v3076_v0 = vmax.f32 %v5185_v55, %v3044_v62  ;;  %v3045_v46 = vmax.f32 %v2949_v33, %v2957_v16  ;;  %v2173_v12 = vadd.f32 %v5146_v63, %v2172_v39  ;;  %v5379_v38 = vadd.f32 %v3929_v7, %v2285_v48  ;;  %v2174_v30 = vpop.f32.mrb[181].mxu0  ;;  %v2821_v37 = vpop.f32.mrb[181].mxu1  ;;  %v5619_v62 = vld [vmem:[#allocation25_spill] sm:$0xff] }
 0x28b   : > { %v5391_v56 = vadd.f32 %v2821_v37, %v2277_v18  ;;  %v2175_v55 = vpop.f32.mrb[182].mxu0  ;;  %v3930_v33 = vpop.f32.mrb[182].mxu1  ;;  %v5395_v48 = vadd.f32 %v5146_v63, %v5619_v62  ;;  %v2950_v39 = vmax.f32 %v5277_v25, 0.0 }
 0x28c   : > { %v3221_v16 = vsel %vm3092_vm1, %v3076_v0, 0.0  ;;  %v3277_v17 = vmul.f32 %v3076_v0, %v3076_v0  ;;  %3095 = vst.msk [vmem:[%s4922_s14 + $0x40] sm:$0xff] %vm3092_vm1, %v3076_v0  ;;  %v2718_v1 = vadd.f32 %v5205_v9, %v2173_v12  ;;  %v2824_v20 = vpop.f32.mrb[183].mxu1  ;;  %v2177_v5 = vpop.f32.mrb[183].mxu0  ;;  %v2176_v18 = vadd.f32 %v5146_v63, %v2175_v55 }
 0x28d   : > { %v5403_v7 = vadd.f32 %v3930_v33, %v2288_v26  ;;  %v5405_v30 = vadd.f32 %v2824_v20, %v2280_v15  ;;  %v3077_v36 = vmax.f32 %v5189_v42, %v3045_v46  ;;  %v3222_v0 = vadd.f32 %v3221_v16, %v5151_v4 }
 0x28e   : > { %v3324_v37 = vsel %vm3092_vm1, %v3277_v17, 0.0  ;;  %v2958_v50 = vmax.f32 %v2718_v1, 0.0  ;;  %v3129_v9 = vpop.permute.xlu1 %3128  ;;  %v2951_v12 = vmax.f32 %v5285_v23, 0.0  ;;  %v2721_v25 = vadd.f32 %v5215_v8, %v2176_v18 }
 0x28f   : > { %v3325_v26 = vadd.f32 %v3324_v37, %v5153_v41  ;;  %3139 = vst.msk [vmem:[%s4922_s14 + $0x28] sm:$0xff] %vm3113_vm2, %v3129_v9  ;;  %v3104_v15 = vpop.permute.xlu0 %3103  ;;  %v2953_v55 = vmax.f32 %v5303_v32, 0.0  ;;  %v3223_v62 = vsel %vm3092_vm1, %v3077_v36, 0.0  ;;  %v3278_v42 = vmul.f32 %v3077_v36, %v3077_v36  ;;  %3105 = vrot.lane.b32.xlu1 %v3077_v36, %s4266_s19 }
 0x290   : > { %v3046_v33 = vmax.f32 %v2950_v39, %v2958_v50  ;;  %3115 = vst.msk [vmem:[%s4922_s14 + $0x20] sm:$0xff] %vm3113_vm2, %v3104_v15  ;;  %v2982_v4 = vmax.f32 %v5346_v19, 0.0  ;;  %v2980_v23 = vmax.f32 %v5350_v29, 0.0  ;;  %v2959_v8 = vmax.f32 %v2721_v25, 0.0 }
 0x291   : > { %v3224_v21 = vadd.f32 %v3223_v62, %v3222_v0  ;;  %v2180_v41 = vpop.f32.mrb[184].mxu0  ;;  %v3933_v46 = vpop.f32.mrb[184].mxu1  ;;  %v3326_v17 = vsel %vm3092_vm1, %v3278_v42, 0.0  ;;  %v2983_v18 = vmax.f32 %v5354_v59, 0.0  ;;  %v2981_v0 = vmax.f32 %v5356_v49, 0.0 }
 0x292   : > { %v3078_v16 = vmax.f32 %v5201_v22, %v3046_v33  ;;  %v2181_v1 = vadd.f32 %v5146_v63, %v2180_v41  ;;  %v2846_v20 = vadd.f32 %v3933_v46, %v2301_v54  ;;  %v2182_v5 = vpop.f32.mrb[185].mxu0  ;;  %v2837_v39 = vpop.f32.mrb[185].mxu1  ;;  %v3047_v37 = vmax.f32 %v2951_v12, %v2959_v8 }
 0x293   : > { %v3327_v19 = vadd.f32 %v3326_v17, %v3325_v26  ;;  %v2838_v50 = vadd.f32 %v2837_v39, %v2293_v57  ;;  %v2183_v29 = vpop.f32.mrb[186].mxu0  ;;  %v3934_v36 = vpop.f32.mrb[186].mxu1  ;;  %v5620_v39 = vld [vmem:[#allocation26_spill] sm:$0xff]  ;;  %v2985_v32 = vmax.f32 %v5405_v30, 0.0 }
 0x294   : > { %v3279_v9 = vmul.f32 %v3078_v16, %v3078_v16  ;;  %3120 = vst.msk [vmem:[%s4922_s14 + $0x48] sm:$0xff] %vm3092_vm1, %v3078_v16  ;;  %v2726_v22 = vadd.f32 %v5230_v34, %v2181_v1  ;;  %v2990_v25 = vmax.f32 %v2846_v20, 0.0  ;;  %v2840_v15 = vpop.f32.mrb[187].mxu1  ;;  %v2185_v33 = vpop.f32.mrb[187].mxu0  ;;  %v2184_v62 = vadd.f32 %v5146_v63, %v2183_v29 }
 0x295   : > { %v2988_v54 = vmax.f32 %v2838_v50, 0.0  ;;  %v2849_v42 = vadd.f32 %v3934_v36, %v2304_v43  ;;  %v2841_v59 = vadd.f32 %v2840_v15, %v5373_v52  ;;  %v3225_v57 = vsel %vm3092_vm1, %v3078_v16, 0.0 }
 0x296   : > { %v2960_v12 = vmax.f32 %v2726_v22, 0.0  ;;  %v3054_v26 = vmax.f32 %v2982_v4, %v2990_v25  ;;  %v3079_v49 = vmax.f32 %v5207_v61, %v3047_v37  ;;  %v2729_v41 = vadd.f32 %v5236_v10, %v2184_v62 }
 0x297   : > { %v3052_v8 = vmax.f32 %v2980_v23, %v2988_v54  ;;  %v2991_v34 = vmax.f32 %v2849_v42, 0.0  ;;  %v2989_v46 = vmax.f32 %v2841_v59, 0.0  ;;  %v3153_v17 = vpop.permute.xlu1 %3152  ;;  %v3328_v1 = vsel %vm3092_vm1, %v3279_v9, 0.0 }
 0x298   : > { %v3048_v20 = vmax.f32 %v2952_v28, %v2960_v12  ;;  %v5438_v43 = vmax.f32 %v5300_v44, %v3054_v26  ;;  %v3280_v52 = vmul.f32 %v3079_v49, %v3079_v49  ;;  %3130 = vrot.lane.b32.xlu0 %v3079_v49, %s4266_s19  ;;  %3163 = vst.msk [vmem:[%s4922_s14 + $0x30] sm:$0xff] %vm3113_vm2, %v3153_v17  ;;  %v2961_v10 = vmax.f32 %v2729_v41, 0.0 }
 0x299   : > { %v5444_v61 = vmax.f32 %v5305_v35, %v3052_v8  ;;  %v3055_v4 = vmax.f32 %v2983_v18, %v2991_v34  ;;  %v5446_v23 = vmax.f32 %v2981_v0, %v2989_v46  ;;  %v2188_v16 = vpop.f32.mrb[188].mxu0  ;;  %v3937_v5 = vpop.f32.mrb[188].mxu1  ;;  %v2320_v28 = vadd.f32 %v5146_v63, %v5620_v39 }
 0x29a   : > { %v2954_v44 = vmax.f32 %v5322_v6, 0.0  ;;  %v3080_v37 = vmax.f32 %v5221_v58, %v3048_v20  ;;  %3121 = vst.msk [vmem:[%s4922_s14 + $0x68] sm:$0xff] %vm3092_vm1, %v5438_v43  ;;  %v3227_v35 = vsel %vm3092_vm1, %v3079_v49, 0.0  ;;  %v2190_v50 = vpop.f32.mrb[189].mxu0  ;;  %v2853_v29 = vpop.f32.mrb[189].mxu1  ;;  %v2955_v18 = vmax.f32 %v5330_v60, 0.0 }
 0x29b   : > { %3096 = vst.msk [vmem:[%s4922_s14 + $0x60] sm:$0xff] %vm3092_vm1, %v5444_v61  ;;  %v3049_v36 = vmax.f32 %v2953_v55, %v2961_v10  ;;  %v3330_v6 = vsel %vm3092_vm1, %v3280_v52, 0.0  ;;  %v3226_v0 = vadd.f32 %v3225_v57, %v3224_v21  ;;  %v2191_v58 = vpop.f32.mrb[190].mxu0  ;;  %v3938_v9 = vpop.f32.mrb[190].mxu1  ;;  %v2986_v22 = vmax.f32 %v5379_v38, 0.0 }
 0x29c   : > { %v2984_v25 = vmax.f32 %v5391_v56, 0.0  ;;  %v2987_v15 = vmax.f32 %v5403_v7, 0.0  ;;  %3144 = vst.msk [vmem:[%s4922_s14 + $0x50] sm:$0xff] %vm3092_vm1, %v3080_v37  ;;  %v3329_v60 = vadd.f32 %v3328_v1, %v3327_v19  ;;  %v3177_v33 = vpop.permute.xlu1 %3176  ;;  %v2856_v54 = vpop.f32.mrb[191].mxu1  ;;  %v2189_v62 = vadd.f32 %v5146_v63, %v2188_v16 }
 0x29d   : > { %v3228_v55 = vadd.f32 %v3227_v35, %v3226_v0  ;;  %v2862_v21 = vadd.f32 %v3937_v5, %v5395_v48  ;;  %3187 = vst.msk [vmem:[%s4922_s14 + $0x38] sm:$0xff] %vm3113_vm2, %v3177_v33  ;;  %v2193_v42 = vpop.f32.mrb[191].mxu0  ;;  %v3281_v38 = vmul.f32 %v3080_v37, %v3080_v37  ;;  %v2854_v56 = vadd.f32 %v2853_v29, %v5385_v40 }
 0x29e   : > { %v3331_v59 = vadd.f32 %v3330_v6, %v3329_v60  ;;  %v2192_v7 = vadd.f32 %v5146_v63, %v2191_v58  ;;  %v2734_v19 = vadd.f32 %v5223_v47, %v2189_v62  ;;  %v2865_v12 = vadd.f32 %v3938_v9, %v2320_v28 }
 0x29f   : > { %v2994_v57 = vmax.f32 %v2862_v21, 0.0  ;;  %v2857_v30 = vadd.f32 %v2856_v54, %v5389_v13  ;;  %v2992_v26 = vmax.f32 %v2854_v56, 0.0  ;;  %v5479_v48 = vmax.f32 %v5309_v3, %v3055_v4 }
 0x2a0   : > { %v2737_v49 = vadd.f32 %v5234_v51, %v2192_v7  ;;  %v3081_v8 = vmax.f32 %v5225_v11, %v3049_v36  ;;  %v2962_v41 = vmax.f32 %v2734_v19, 0.0  ;;  %v2995_v40 = vmax.f32 %v2865_v12, 0.0 }
 0x2a1   : > { %v3058_v34 = vmax.f32 %v2986_v22, %v2994_v57  ;;  %v2993_v46 = vmax.f32 %v2857_v30, 0.0  ;;  %v3229_v63 = vsel %vm3092_vm1, %v3080_v37, 0.0  ;;  %v3332_v47 = vsel %vm3092_vm1, %v3281_v38, 0.0  ;;  %3132 = vrot.lane.b32.xlu1 %v5479_v48, %s4266_s19 }
 0x2a2   : > { %v3056_v17 = vmax.f32 %v2984_v25, %v2992_v26  ;;  %v2963_v13 = vmax.f32 %v2737_v49, 0.0  ;;  %3154 = vrot.lane.b32.xlu0 %v3081_v8, %s4266_s19  ;;  %v3050_v51 = vmax.f32 %v2954_v44, %v2962_v41  ;;  %v3059_v3 = vmax.f32 %v2987_v15, %v2995_v40 }
 0x2a3   : > { %v5488_v11 = vmax.f32 %v5327_v45, %v3058_v34  ;;  %v3057_v1 = vmax.f32 %v2985_v32, %v2993_v46  ;;  %v3231_v4 = vsel %vm3092_vm1, %v3081_v8, 0.0  ;;  %v3282_v16 = vmul.f32 %v3081_v8, %v3081_v8 }
 0x2a4   : > { %v3088_v20 = vmax.f32 %v5333_v27, %v3056_v17  ;;  %v3051_v52 = vmax.f32 %v2955_v18, %v2963_v13  ;;  %v3082_v10 = vmax.f32 %v5245_v14, %v3050_v51  ;;  %v3230_v5 = vadd.f32 %v3229_v63, %v3228_v55 }
 0x2a5   : > { %3169 = vst.msk [vmem:[%s4922_s14 + $0x78] sm:$0xff] %vm3092_vm1, %v5488_v11  ;;  %v3333_v39 = vadd.f32 %v3332_v47, %v3331_v59  ;;  %v3334_v27 = vsel %vm3092_vm1, %v3282_v16, 0.0  ;;  %v3085_v14 = vmax.f32 %v5313_v53, %v5446_v23  ;;  %v3089_v50 = vmax.f32 %v5341_v24, %v3057_v1 }
 0x2a6   : > { %3145 = vst.msk [vmem:[%s4922_s14 + $0x70] sm:$0xff] %vm3092_vm1, %v3088_v20  ;;  %v3233_v45 = vsel %vm3092_vm1, %v3082_v10, 0.0  ;;  %v3283_v28 = vmul.f32 %v3082_v10, %v3082_v10  ;;  %3168 = vst.msk [vmem:[%s4922_s14 + $0x58] sm:$0xff] %vm3092_vm1, %v3082_v10  ;;  %v3232_v44 = vadd.f32 %v3231_v4, %v3230_v5  ;;  %v3083_v29 = vmax.f32 %v5251_v31, %v3051_v52 }
 0x2a7   : > { %v3335_v37 = vadd.f32 %v3334_v27, %v3333_v39  ;;  %v3091_v18 = vmax.f32 %v5337_v2, %v3059_v3  ;;  %3107 = vrot.lane.b32.xlu1 %v3085_v14, %s4266_s19  ;;  %v3285_v0 = vmul.f32 %v5444_v61, %v5444_v61  ;;  %v3237_v24 = vsel %vm3092_vm1, %v5444_v61, 0.0 }
 0x2a8   : > { %v3336_v35 = vsel %vm3092_vm1, %v3283_v28, 0.0  ;;  %v3234_v36 = vadd.f32 %v3233_v45, %v3232_v44  ;;  %v3235_v58 = vsel %vm3092_vm1, %v3083_v29, 0.0  ;;  %v3284_v9 = vmul.f32 %v3083_v29, %v3083_v29  ;;  %3178 = vrot.lane.b32.xlu0 %v3083_v29, %s4266_s19 }
 0x2a9   : > { %v3337_v6 = vadd.f32 %v3336_v35, %v3335_v37  ;;  %v3286_v23 = vmul.f32 %v3085_v14, %v3085_v14  ;;  %v3287_v25 = vmul.f32 %v5438_v43, %v5438_v43  ;;  %v3340_v15 = vsel %vm3092_vm1, %v3285_v0, 0.0 }
 0x2aa   : > { %v3236_v53 = vadd.f32 %v3235_v58, %v3234_v36  ;;  %v3338_v31 = vsel %vm3092_vm1, %v3284_v9, 0.0  ;;  %v3239_v60 = vsel %vm3092_vm1, %v3085_v14, 0.0  ;;  %v3241_v32 = vsel %vm3092_vm1, %v5438_v43, 0.0 }
 0x2ab   : > { %3156 = vrot.lane.b32.xlu1 %v3089_v50, %s4266_s19  ;;  %v3339_v22 = vadd.f32 %v3338_v31, %v3337_v6  ;;  %v3288_v61 = vmul.f32 %v5479_v48, %v5479_v48  ;;  %v3342_v55 = vsel %vm3092_vm1, %v3286_v23, 0.0  ;;  %v3344_v42 = vsel %vm3092_vm1, %v3287_v25, 0.0 }
 0x2ac   : > { %v3238_v2 = vadd.f32 %v3237_v24, %v3236_v53  ;;  %v3289_v38 = vmul.f32 %v3088_v20, %v3088_v20  ;;  %v3243_v59 = vsel %vm3092_vm1, %v5479_v48, 0.0  ;;  %v3245_v19 = vsel %vm3092_vm1, %v3088_v20, 0.0 }
 0x2ad   : > { %v3341_v54 = vadd.f32 %v3340_v15, %v3339_v22  ;;  %v3346_v43 = vsel %vm3092_vm1, %v3288_v61, 0.0  ;;  %v3290_v57 = vmul.f32 %v3089_v50, %v3089_v50  ;;  %v3291_v26 = vmul.f32 %v5488_v11, %v5488_v11 }
 0x2ae   : > { %v3240_v33 = vadd.f32 %v3239_v60, %v3238_v2  ;;  %v3348_v49 = vsel %vm3092_vm1, %v3289_v38, 0.0  ;;  %v3247_v8 = vsel %vm3092_vm1, %v3089_v50, 0.0  ;;  %v3249_v34 = vsel %vm3092_vm1, %v5488_v11, 0.0 }
 0x2af   : > { %v3343_v21 = vadd.f32 %v3342_v55, %v3341_v54  ;;  %3180 = vrot.lane.b32.xlu1 %v3091_v18, %s4266_s19  ;;  %v3350_v40 = vsel %vm3092_vm1, %v3290_v57, 0.0  ;;  %v3292_v46 = vmul.f32 %v3091_v18, %v3091_v18  ;;  %v3352_v17 = vsel %vm3092_vm1, %v3291_v26, 0.0 }
 0x2b0   : > { %v3242_v62 = vadd.f32 %v3241_v32, %v3240_v33  ;;  %v3251_v13 = vsel %vm3092_vm1, %v3091_v18, 0.0 }
 0x2b1   : > { %v3345_v56 = vadd.f32 %v3344_v42, %v3343_v21  ;;  %v3354_v1 = vsel %vm3092_vm1, %v3292_v46, 0.0 }
 0x2b2   : > { %v3244_v7 = vadd.f32 %v3243_v59, %v3242_v62 }
 0x2b3   : > { %v3347_v30 = vadd.f32 %v3346_v43, %v3345_v56 }
 0x2b4   : > { %v3246_v12 = vadd.f32 %v3245_v19, %v3244_v7 }
 0x2b5   : > { %v3349_v48 = vadd.f32 %v3348_v49, %v3347_v30 }
 0x2b6   : > { %v3248_v41 = vadd.f32 %v3247_v8, %v3246_v12 }
 0x2b7   : > { %v3351_v47 = vadd.f32 %v3350_v40, %v3349_v48 }
 0x2b8   : > { %v3250_v63 = vadd.f32 %v3249_v34, %v3248_v41 }
 0x2b9   : > { %v3353_v3 = vadd.f32 %v3352_v17, %v3351_v47 }
 0x2ba   : > { %v3252_v51 = vadd.f32 %v3251_v13, %v3250_v63 }
 0x2bb   : > { %v3355_v52 = vadd.f32 %v3354_v1, %v3353_v3 }
 0x2bc   : > { %v3253_v20 = vrot.slane %v3252_v51, 4 }
 0x2bd   : > { %v3356_v4 = vrot.slane %v3355_v52, 4 }
 0x2be   : > { %v3254_v10 = vadd.f32 %v3253_v20, %v3252_v51 }
 0x2bf   : > { %v3357_v16 = vadd.f32 %v3356_v4, %v3355_v52 }
 0x2c0   : > { %v3255_v11 = vrot.slane %v3254_v10, 2 }
 0x2c1   : > { %v3358_v39 = vrot.slane %v3357_v16, 2 }
 0x2c2   : > { %v3256_v5 = vadd.f32 %v3255_v11, %v3254_v10 }
 0x2c3   : > { %v3359_v28 = vadd.f32 %v3358_v39, %v3357_v16 }
 0x2c4   : > { %v3257_v45 = vrot.slane %v3256_v5, 1 }
 0x2c5   : > { %v3360_v44 = vrot.slane %v3359_v28, 1 }
 0x2c6   : > { %v3258_v27 = vadd.f32 %v3257_v45, %v3256_v5 }
 0x2c7   : > { %v3361_v37 = vadd.f32 %v3360_v44, %v3359_v28 }
 0x2c8   : > { %3260 = vst.msk [vmem:[%s216_s23] sm:$0x1] %vm3259_vm3, %v3258_v27 }
 0x2c9   : > { %3362 = vst.msk [vmem:[%s216_s23 + $0x1] sm:$0x1] %vm3259_vm3, %v3361_v37 }
 0x301   : > { %v3106_v14 = vpop.permute.xlu1 %3105 }
 0x302   : > { %3116 = vst.msk [vmem:[%s4922_s14 + $0x40] sm:$0xff] %vm3113_vm2, %v3106_v14 }
 0x30a   : > { %v3131_v35 = vpop.permute.xlu0 %3130 }
 0x30b   : > { %3140 = vst.msk [vmem:[%s4922_s14 + $0x48] sm:$0xff] %vm3113_vm2, %v3131_v35 }
 0x313   : > { %v3133_v50 = vpop.permute.xlu1 %3132 }
 0x314   : > { %v3155_v29 = vpop.permute.xlu0 %3154  ;;  %3141 = vst.msk [vmem:[%s4922_s14 + $0x68] sm:$0xff] %vm3113_vm2, %v3133_v50 }
 0x315   : > { %3164 = vst.msk [vmem:[%s4922_s14 + $0x50] sm:$0xff] %vm3113_vm2, %v3155_v29 }
 0x319   : > { %v3108_v18 = vpop.permute.xlu1 %3107 }
 0x31a   : > { %3117 = vst.msk [vmem:[%s4922_s14 + $0x60] sm:$0xff] %vm3113_vm2, %v3108_v18  ;;  %v3179_v36 = vpop.permute.xlu0 %3178 }
 0x31b   : > { %3188 = vst.msk [vmem:[%s4922_s14 + $0x58] sm:$0xff] %vm3113_vm2, %v3179_v36 }
 0x31d   : > { %v3157_v6 = vpop.permute.xlu1 %3156 }
 0x31e   : > { %3165 = vst.msk [vmem:[%s4922_s14 + $0x70] sm:$0xff] %vm3113_vm2, %v3157_v6 }
 0x321   : > { %v3181_v0 = vpop.permute.xlu1 %3180 }
 0x322   : > { %3189 = vst.msk [vmem:[%s4922_s14 + $0x78] sm:$0xff] %vm3113_vm2, %v3181_v0 }
 0x323 PF: > { %s15_s15 = sadd.s32 1, %s4263_s15  }
 0x324   : > { %p12_p5 = scmp.ge.s32.totalorder %s15_s15, 6  }
 0x326   :  { %14 = sbr.rel (!%p12_p5) target bundleno = 1 (0x1), region = 74 }

</bundles_post_ra>
